<compile_context>
chip_gen: v7x
topology: tpu7x:2x2x1
jax: 0.10.0
libtpu: 0.0.40
codegen_flags: <defaults>
</compile_context>

<pallas_src>
import functools

import jax
import jax.numpy as jnp
from jax.experimental import pallas as pl
from jax.experimental.pallas import tpu as pltpu


# ----------------------------- Pallas kernels -------------------------------

def _down_conv_kernel(a_ref, b_ref, *rest, act_slope, use_bn, eps):
    """[LeakyReLU] -> matmul (MXU, f32 acc) -> [BatchNorm], one VMEM block.

    a_ref: (tm, K) bf16 im2col patches; b_ref: (K, Cout) bf16 weights.
    Optional BN params are f32 (1, Cout) rows.  No conv bias in this net's
    down path.
    """
    if use_bn:
        g_ref, be_ref, o_ref = rest
    else:
        (o_ref,) = rest

    a = a_ref[...]
    if act_slope is not None:
        a = jnp.where(a >= 0, a, a * act_slope)
    y = jnp.dot(a, b_ref[...], preferred_element_type=jnp.float32)

    if use_bn:
        # Two-pass batch stats (mean, then centered sum of squares); rows are
        # exact (no padding) so no masking is needed.
        inv_n = 1.0 / float(y.shape[0])
        mean = jnp.sum(y, axis=0, keepdims=True) * inv_n
        d = y - mean
        var = jnp.sum(d * d, axis=0, keepdims=True) * inv_n
        scale = jax.lax.rsqrt(var + eps) * g_ref[...]
        y = d * scale + be_ref[...]

    o_ref[...] = y.astype(o_ref.dtype)


def fused_down_conv(patches, w, gamma, beta, *, act_slope, use_bn, out_dtype,
                    num_cores=1):
    M, K = patches.shape
    cout = w.shape[1]
    kernel = functools.partial(_down_conv_kernel, act_slope=act_slope,
                               use_bn=use_bn, eps=1e-5)
    # v7x: split M across both TensorCores when rows are independent (no BN).
    tiles = num_cores if (not use_bn and num_cores > 1
                          and M % (num_cores * 16) == 0) else 1
    tm = M // tiles

    in_specs = [pl.BlockSpec((tm, K), lambda i: (i, 0)),
                pl.BlockSpec((K, cout), lambda i: (0, 0))]
    operands = [patches, w]
    if use_bn:
        in_specs += [pl.BlockSpec((1, cout), lambda i: (0, 0)),
                     pl.BlockSpec((1, cout), lambda i: (0, 0))]
        operands += [gamma, beta]

    return pl.pallas_call(
        kernel,
        out_shape=jax.ShapeDtypeStruct((M, cout), out_dtype),
        grid=(tiles,),
        in_specs=in_specs,
        out_specs=pl.BlockSpec((tm, cout), lambda i: (i, 0)),
        compiler_params=pltpu.CompilerParams(
            dimension_semantics=("parallel",) if tiles > 1 else ("arbitrary",)),
    )(*operands)


def _up_conv_kernel(a_ref, b_ref, *rest, has_bias, use_bn, eps):
    """ReLU -> 4 phase matmuls (sub-pixel ConvTranspose) -> [bias] -> [BN].

    a_ref: (4, M2, K) bf16 phase patches; b_ref: (4, K, Cout) bf16 weights.
    BN stats are over all 4 phases x M2 rows (= N*H_out*W_out pixels).
    In this net has_bias (outermost) and use_bn are mutually exclusive.
    """
    idx = 0
    if has_bias:
        bias_ref = rest[idx]; idx += 1
    if use_bn:
        g_ref, be_ref = rest[idx], rest[idx + 1]; idx += 2
    o_ref = rest[idx]

    ys = []
    for p in range(4):
        a = jnp.maximum(a_ref[p], 0.0)                      # ReLU prologue
        ys.append(jnp.dot(a, b_ref[p], preferred_element_type=jnp.float32))

    if use_bn:
        m = ys[0].shape[0]
        inv_n = 1.0 / float(4 * m)
        s = ys[0].sum(axis=0, keepdims=True)
        for p in range(1, 4):
            s = s + ys[p].sum(axis=0, keepdims=True)
        mean = s * inv_n
        v = None
        for p in range(4):
            d = ys[p] - mean
            vp = (d * d).sum(axis=0, keepdims=True)
            v = vp if v is None else v + vp
        var = v * inv_n
        scale = jax.lax.rsqrt(var + eps) * g_ref[...]
        shift = be_ref[...] - mean * scale
        for p in range(4):
            o_ref[p] = (ys[p] * scale + shift).astype(o_ref.dtype)
    else:
        for p in range(4):
            y = ys[p]
            if has_bias:
                y = y + bias_ref[...]
            o_ref[p] = y.astype(o_ref.dtype)


def fused_up_conv(patches4, w4, bias, gamma, beta, *, has_bias, use_bn,
                  out_dtype):
    _, M2, K2 = patches4.shape
    cout = w4.shape[2]
    kernel = functools.partial(_up_conv_kernel, has_bias=has_bias,
                               use_bn=use_bn, eps=1e-5)
    in_specs = [pl.BlockSpec((4, M2, K2), lambda i: (0, 0, 0)),
                pl.BlockSpec((4, K2, cout), lambda i: (0, 0, 0))]
    operands = [patches4, w4]
    if has_bias:
        in_specs.append(pl.BlockSpec((1, cout), lambda i: (0, 0)))
        operands.append(bias)
    if use_bn:
        in_specs += [pl.BlockSpec((1, cout), lambda i: (0, 0)),
                     pl.BlockSpec((1, cout), lambda i: (0, 0))]
        operands += [gamma, beta]

    return pl.pallas_call(
        kernel,
        out_shape=jax.ShapeDtypeStruct((4, M2, cout), out_dtype),
        grid=(1,),
        in_specs=in_specs,
        out_specs=pl.BlockSpec((4, M2, cout), lambda i: (0, 0, 0)),
        compiler_params=pltpu.CompilerParams(
            dimension_semantics=("arbitrary",)),
    )(*operands)


def _innermost_kernel(x_ref, wd_ref, wu_ref, g_ref, be_ref, o_ref, *,
                      act_slope, eps):
    """Innermost level, fully fused (spatial 2x2 -> 1x1 -> 2x2).

    Down: LeakyReLU -> conv k4s2p1 on a 2x2 map == matmul with the 4 central
    kernel taps.  Up: ReLU -> ConvT k4s2p1(op1) on a 1x1 map == one matmul per
    output phase.  BN (of the up ConvBlock) over the 4*N output pixels.
    x_ref: (N, 4*Cin) bf16 (NHWC raster flatten of the 2x2 input),
    wd_ref: (4*Cin, Ci) bf16, wu_ref: (4, Ci, Cout) bf16.
    """
    a = x_ref[...]
    a = jnp.where(a >= 0, a, a * act_slope)
    h = jnp.dot(a, wd_ref[...], preferred_element_type=jnp.float32)  # no BN/bias
    hr = jnp.maximum(h, 0.0).astype(jnp.bfloat16)                    # ReLU

    ys = [jnp.dot(hr, wu_ref[p], preferred_element_type=jnp.float32)
          for p in range(4)]

    m = ys[0].shape[0]
    inv_n = 1.0 / float(4 * m)
    s = ys[0].sum(axis=0, keepdims=True)
    for p in range(1, 4):
        s = s + ys[p].sum(axis=0, keepdims=True)
    mean = s * inv_n
    v = None
    for p in range(4):
        d = ys[p] - mean
        vp = (d * d).sum(axis=0, keepdims=True)
        v = vp if v is None else v + vp
    var = v * inv_n
    scale = jax.lax.rsqrt(var + eps) * g_ref[...]
    shift = be_ref[...] - mean * scale
    for p in range(4):
        o_ref[p] = (ys[p] * scale + shift).astype(o_ref.dtype)


def fused_innermost(x_flat, wd, wu, gamma, beta):
    N, K = x_flat.shape
    ci = wd.shape[1]
    co = wu.shape[2]
    kernel = functools.partial(_innermost_kernel, act_slope=0.2, eps=1e-5)
    return pl.pallas_call(
        kernel,
        out_shape=jax.ShapeDtypeStruct((4, N, co), jnp.bfloat16),
        grid=(1,),
        in_specs=[pl.BlockSpec((N, K), lambda i: (0, 0)),
                  pl.BlockSpec((K, ci), lambda i: (0, 0)),
                  pl.BlockSpec((4, ci, co), lambda i: (0, 0, 0)),
                  pl.BlockSpec((1, co), lambda i: (0, 0)),
                  pl.BlockSpec((1, co), lambda i: (0, 0))],
        out_specs=pl.BlockSpec((4, N, co), lambda i: (0, 0, 0)),
        compiler_params=pltpu.CompilerParams(
            dimension_semantics=("arbitrary",)),
    )(x_flat, wd, wu, gamma, beta)


# ------------------------------ im2col glue (NHWC) ---------------------------
# TODO(synk): move these into the kernels (pl.ds strided ref reads) to cut the
# patch-matrix HBM traffic; at 32x32/nf=8 they are tiny XLA fusions.

def _im2col_down(x):
    """Conv2d(k=4,s=2,p=1) patches. x: (N,H,W,C) -> ((N*Ho*Wo, 16*C), Ho, Wo)."""
    N, H, W, C = x.shape
    Ho, Wo = H // 2, W // 2
    xp = jnp.pad(x, ((0, 0), (1, 1), (1, 1), (0, 0)))
    taps = []
    for ky in range(4):
        for kx in range(4):
            taps.append(xp[:, ky:ky + 2 * Ho:2, kx:kx + 2 * Wo:2, :])
    patches = jnp.stack(taps, axis=3)                 # (N, Ho, Wo, 16, C)
    return patches.reshape(N * Ho * Wo, 16 * C), Ho, Wo


def _im2col_up_phases(x):
    """Sub-pixel patches for ConvTranspose2d(k4,s2,p1,op1), cropped to 2Hx2W.

    Output phase (py,px): out[2r+py, 2c+px] is a stride-1 2x2 conv over the
    1-padded input. Returns (4, N*H*W, 4*C), phase order (0,0),(0,1),(1,0),(1,1).
    """
    N, H, W, C = x.shape
    xp = jnp.pad(x, ((0, 0), (1, 1), (1, 1), (0, 0)))
    phases = []
    for py in range(2):
        for px in range(2):
            taps = []
            for dy in range(2):
                for dx in range(2):
                    taps.append(xp[:, py + dy:py + dy + H, px + dx:px + dx + W, :])
            p = jnp.stack(taps, axis=3)               # (N, H, W, 4, C)
            phases.append(p.reshape(N * H * W, 4 * C))
    return jnp.stack(phases, axis=0)


def _interleave_phases(yp, N, H, W, C):
    """yp: (4, N*H*W, C) phase outputs -> (N, 2H, 2W, C)."""
    y = yp.reshape(2, 2, N, H, W, C)
    y = jnp.transpose(y, (2, 3, 0, 4, 1, 5))          # (N, H, py, W, px, C)
    return y.reshape(N, 2 * H, 2 * W, C)


# ----------------------------- Unet definition -------------------------------

def make_cfg(input_nc, output_nc, nf):
    """num_downs = 5 recursive structure (outermost .. innermost)."""
    return [
        dict(down_in=input_nc, down_out=nf, up_in=2 * nf, up_out=output_nc,
             down_act=False, down_bn=False, up_bn=False, up_bias=True,
             outermost=True, innermost=False),
        dict(down_in=nf, down_out=2 * nf, up_in=4 * nf, up_out=nf,
             down_act=True, down_bn=True, up_bn=True, up_bias=False,
             outermost=False, innermost=False),
        dict(down_in=2 * nf, down_out=4 * nf, up_in=8 * nf, up_out=2 * nf,
             down_act=True, down_bn=True, up_bn=True, up_bias=False,
             outermost=False, innermost=False),
        dict(down_in=4 * nf, down_out=8 * nf, up_in=16 * nf, up_out=4 * nf,
             down_act=True, down_bn=True, up_bn=True, up_bias=False,
             outermost=False, innermost=False),
        dict(down_in=8 * nf, down_out=8 * nf, up_in=8 * nf, up_out=8 * nf,
             down_act=True, down_bn=False, up_bn=True, up_bias=False,
             outermost=False, innermost=True),
    ]


def init_params(key, cfg):
    """Raw PyTorch-layout weights: dw (Cout,Cin,4,4), uw (Cin,Cout,4,4)."""
    params = []
    for c in cfg:
        key, k1, k2, k3 = jax.random.split(key, 4)
        p = {
            "dw": 0.05 * jax.random.normal(
                k1, (c["down_out"], c["down_in"], 4, 4), jnp.float32),
            "uw": 0.05 * jax.random.normal(
                k2, (c["up_in"], c["up_out"], 4, 4), jnp.float32),
        }
        if c["up_bias"]:
            p["ub"] = 0.05 * jax.random.normal(k3, (c["up_out"],), jnp.float32)
        if c["down_bn"]:
            p["dg"] = jnp.ones((c["down_out"],), jnp.float32)
            p["dbe"] = jnp.zeros((c["down_out"],), jnp.float32)
        if c["up_bn"]:
            p["ug"] = jnp.ones((c["up_out"],), jnp.float32)
            p["ube"] = jnp.zeros((c["up_out"],), jnp.float32)
        params.append(p)
    return params


def pack_params(params, cfg):
    """One-time packing into unpadded bf16 matmul operands (true K, true Cout)
    plus f32 (1, Cout) bias / BN rows.  Hoisted out of the forward pass."""
    packed = []
    for c, p in zip(cfg, params):
        cd, cu = c["down_out"], c["up_out"]
        q = {}

        if c["innermost"]:
            # Down on a 2x2 map: only kernel taps ky,kx in {1,2} hit real data.
            wd = jnp.transpose(p["dw"][:, :, 1:3, 1:3], (2, 3, 1, 0))
            q["dw"] = wd.reshape(4 * c["down_in"], cd).astype(jnp.bfloat16)
            # Up from a 1x1 map: phase (py,px) output = x @ w[:, :, 1+py, 1+px].
            ws = [p["uw"][:, :, 1 + py, 1 + px]
                  for py in range(2) for px in range(2)]
            q["uw"] = jnp.stack(ws, axis=0).astype(jnp.bfloat16)  # (4, Cin, Cout)
        else:
            # down conv: (Cout,Cin,4,4) -> (16*Cin, Cout), K = (ky*4+kx)*Cin+ci
            dK = 16 * c["down_in"]
            dw = jnp.transpose(p["dw"], (2, 3, 1, 0)).reshape(dK, cd)
            q["dw"] = dw.astype(jnp.bfloat16)
            # up conv: per-phase 2x2 effective kernels, ky=3-py-2dy, kx=3-px-2dx
            uK = 4 * c["up_in"]
            w = p["uw"]                                   # (Cin, Cout, 4, 4)
            phase_ws = []
            for py in range(2):
                for px in range(2):
                    wsub = w[:, :, [3 - py, 1 - py], :][:, :, :, [3 - px, 1 - px]]
                    phase_ws.append(
                        jnp.transpose(wsub, (2, 3, 0, 1)).reshape(uK, cu))
            q["uw"] = jnp.stack(phase_ws, axis=0).astype(jnp.bfloat16)

        if c["up_bias"]:
            q["ub"] = p["ub"].reshape(1, cu).astype(jnp.float32)
        if c["down_bn"]:
            q["dg"] = p["dg"].reshape(1, cd).astype(jnp.float32)
            q["dbe"] = p["dbe"].reshape(1, cd).astype(jnp.float32)
        if c["up_bn"]:
            q["ug"] = p["ug"].reshape(1, cu).astype(jnp.float32)
            q["ube"] = p["ube"].reshape(1, cu).astype(jnp.float32)
        packed.append(q)
    return packed


def unet_forward(x, packed, cfg, num_cores=1):
    """x: NHWC (N,H,W,C) bf16. Returns NHWC f32 output."""

    def block(x, level):
        c, p = cfg[level], packed[level]
        N, H, W, _ = x.shape

        if c["innermost"]:
            assert H == 2 and W == 2, "innermost level expects a 2x2 map"
            x_flat = x.reshape(N, 4 * c["down_in"])          # NHWC raster order
            y4 = fused_innermost(x_flat, p["dw"], p["uw"], p["ug"], p["ube"])
            up = _interleave_phases(y4, N, 1, 1, c["up_out"])
            return jnp.concatenate([x, up], axis=-1)

        # ---- down ConvBlock: [LeakyReLU(0.2)] -> Conv(k4,s2,p1) -> [BN] ----
        patches, Ho, Wo = _im2col_down(x)
        h = fused_down_conv(patches, p["dw"], p.get("dg"), p.get("dbe"),
                            act_slope=0.2 if c["down_act"] else None,
                            use_bn=c["down_bn"], out_dtype=jnp.bfloat16,
                            num_cores=num_cores)
        h = h.reshape(N, Ho, Wo, c["down_out"])

        # ---- submodule ----
        h = block(h, level + 1)

        # ---- up ConvBlock: ReLU -> ConvT(k4,s2,p1,op1) [+bias] -> [BN] ----
        patches4 = _im2col_up_phases(h)
        y4 = fused_up_conv(patches4, p["uw"], p.get("ub"), p.get("ug"),
                           p.get("ube"), has_bias=c["up_bias"],
                           use_bn=c["up_bn"],
                           out_dtype=jnp.float32 if c["outermost"]
                           else jnp.bfloat16)
        up = _interleave_phases(y4, N, Ho, Wo, c["up_out"])
        # PyTorch ConvT output is (2H+1, 2W+1); the subsequent center_crop keeps
        # rows/cols [0, 2H)x[0, 2W) (offset 0) -- exactly the slab computed
        # above, so the crop is fused and shapes match the skip connection.

        if c["outermost"]:
            return up
        return jnp.concatenate([x, up], axis=-1)

    return block(x, 0)


def unet_forward_nchw(x_nchw, packed, cfg, num_cores=1):
    x = jnp.transpose(x_nchw, (0, 2, 3, 1)).astype(jnp.bfloat16)  # entry only
    y = unet_forward(x, packed, cfg, num_cores=num_cores)
    return jnp.transpose(y, (0, 3, 1, 2))                         # exit only


def _num_parallel_cores():
    """2 on v7x (two TensorCores/chip), else 1.  Safe either way."""
    try:
        kind = jax.devices()[0].device_kind.lower()
    except Exception:
        return 1
    return 2 if "v7" in kind else 1


# TODO(synk): SEBlock ('seconv'), the double-conv 'dconv' path and Dropout are
# never instantiated under the default Unet config (conv_type='sconv',
# use_dropout=False), so they are not implemented.  BatchNorm running-stat
# updates are not modeled (batch statistics are used, matching the forward of
# a freshly constructed train-mode nn.Module).

# --------------------------------- main ---------------------------------------

if __name__ == "__main__":
    input_nc, output_nc, nf = 3, 2, 8       # Unet(3, 2, num_downs=5, num_filters=8)
    N, H, W = 2, 32, 32                      # 32 / 2^5 = 1 at the innermost level

    key = jax.random.PRNGKey(0)
    kx, kp = jax.random.split(key)
    x = jax.random.normal(kx, (N, input_nc, H, W), jnp.float32)

    cfg = make_cfg(input_nc, output_nc, nf)
    raw_params = init_params(kp, cfg)
    packed_params = pack_params(raw_params, cfg)   # packed once, not per-forward
    cores = _num_parallel_cores()

    fwd = jax.jit(lambda xx, pp: unet_forward_nchw(xx, pp, cfg, num_cores=cores))
    out = jax.block_until_ready(fwd(x, packed_params))

    assert out.shape == (N, output_nc, H, W), out.shape
    assert out.dtype == jnp.float32
    assert jnp.all(jnp.isfinite(out))
    print("KERNEL_OK")
</pallas_src>

<mosaic_0001>
module attributes {stable_mosaic.version = 11 : i64} {
  func.func @_down_conv_kernel(%arg0: i32, %arg1: memref<512x48xbf16, #tpu.memory_space<vmem>>, %arg2: memref<48x8xbf16, #tpu.memory_space<vmem>>, %arg3: memref<512x8xbf16, #tpu.memory_space<vmem>>) attributes {dimension_semantics = [#tpu.dimension_semantics<arbitrary>], iteration_bounds = array<i64: 1>, scalar_prefetch = 0 : i64, scratch_operands = 0 : i64, tpu.core_type = #tpu.core_type<tc>, window_params = [{transform_indices = @transform_0, window_bounds = array<i64: 512, 48>}, {pipeline_mode = #tpu.pipeline_mode<synchronous>, transform_indices = @transform_1, window_bounds = array<i64: 48, 8>}, {transform_indices = @transform_2, window_bounds = array<i64: 512, 8>}]} {
    %c0 = arith.constant 0 : index
    %c0_0 = arith.constant 0 : index
    %0 = vector.load %arg1[%c0, %c0_0] : memref<512x48xbf16, #tpu.memory_space<vmem>>, vector<512x48xbf16>
    %c0_1 = arith.constant 0 : index
    %c0_2 = arith.constant 0 : index
    %1 = vector.load %arg2[%c0_1, %c0_2] : memref<48x8xbf16, #tpu.memory_space<vmem>>, vector<48x8xbf16>
    %cst = arith.constant dense<0.000000e+00> : vector<512x8xf32>
    %2 = tpu.matmul %0, %1, %cst {dimension_numbers = #tpu.dot_dimension_numbers<[1], [0], [0], [1], [0, 0, 1, 1], [], []>} : vector<512x48xbf16>, vector<48x8xbf16>, vector<512x8xf32> -> vector<512x8xf32>
    %3 = arith.truncf %2 : vector<512x8xf32> to vector<512x8xbf16>
    %c0_3 = arith.constant 0 : index
    %c0_4 = arith.constant 0 : index
    %4 = vector.load %arg3[%c0_3, %c0_4] : memref<512x8xbf16, #tpu.memory_space<vmem>>, vector<512x8xbf16>
    tpu.vector_store %arg3[%c0_3, %c0_4], %3 {strides = array<i32>} : memref<512x8xbf16, #tpu.memory_space<vmem>>, vector<512x8xbf16>,
    return
  }
  func.func @transform_0(%arg0: i32) -> (i32, i32) {
    %c0_i32 = arith.constant 0 : i32
    %c0_i32_0 = arith.constant 0 : i32
    return %arg0, %c0_i32 : i32, i32
  }
  func.func @transform_1(%arg0: i32) -> (i32, i32) {
    %c0_i32 = arith.constant 0 : i32
    %c0_i32_0 = arith.constant 0 : i32
    %c0_i32_1 = arith.constant 0 : i32
    return %c0_i32, %c0_i32_0 : i32, i32
  }
  func.func @transform_2(%arg0: i32) -> (i32, i32) {
    %c0_i32 = arith.constant 0 : i32
    %c0_i32_0 = arith.constant 0 : i32
    return %arg0, %c0_i32 : i32, i32
  }
}

module attributes {stable_mosaic.version = 11 : i64} {
  func.func @_down_conv_kernel(%arg0: i32, %arg1: memref<128x128xbf16, #tpu.memory_space<vmem>>, %arg2: memref<128x16xbf16, #tpu.memory_space<vmem>>, %arg3: memref<1x16xf32, #tpu.memory_space<vmem>>, %arg4: memref<1x16xf32, #tpu.memory_space<vmem>>, %arg5: memref<128x16xbf16, #tpu.memory_space<vmem>>) attributes {dimension_semantics = [#tpu.dimension_semantics<arbitrary>], iteration_bounds = array<i64: 1>, scalar_prefetch = 0 : i64, scratch_operands = 0 : i64, tpu.core_type = #tpu.core_type<tc>, window_params = [{transform_indices = @transform_0, window_bounds = array<i64: 128, 128>}, {pipeline_mode = #tpu.pipeline_mode<synchronous>, transform_indices = @transform_1, window_bounds = array<i64: 128, 16>}, {pipeline_mode = #tpu.pipeline_mode<synchronous>, transform_indices = @transform_2, window_bounds = array<i64: 1, 16>}, {pipeline_mode = #tpu.pipeline_mode<synchronous>, transform_indices = @transform_3, window_bounds = array<i64: 1, 16>}, {transform_indices = @transform_4, window_bounds = array<i64: 128, 16>}]} {
    %c0 = arith.constant 0 : index
    %c0_0 = arith.constant 0 : index
    %0 = vector.load %arg1[%c0, %c0_0] : memref<128x128xbf16, #tpu.memory_space<vmem>>, vector<128x128xbf16>
    %cst = arith.constant 0.000000e+00 : bf16
    %1 = vector.broadcast %cst : bf16 to vector<128x128xbf16>
    %2 = arith.cmpf oge, %0, %1 : vector<128x128xbf16>
    %cst_1 = arith.constant 2.001950e-01 : bf16
    %3 = vector.broadcast %cst_1 : bf16 to vector<128x128xbf16>
    %4 = arith.mulf %0, %3 : vector<128x128xbf16>
    %5 = arith.select %2, %0, %4 : vector<128x128xi1>, vector<128x128xbf16>
    %c0_2 = arith.constant 0 : index
    %c0_3 = arith.constant 0 : index
    %6 = vector.load %arg2[%c0_2, %c0_3] : memref<128x16xbf16, #tpu.memory_space<vmem>>, vector<128x16xbf16>
    %cst_4 = arith.constant dense<0.000000e+00> : vector<128x16xf32>
    %7 = tpu.matmul %5, %6, %cst_4 {dimension_numbers = #tpu.dot_dimension_numbers<[1], [0], [0], [1], [0, 0, 1, 1], [], []>} : vector<128x128xbf16>, vector<128x16xbf16>, vector<128x16xf32> -> vector<128x16xf32>
    %cst_5 = arith.constant dense<0.000000e+00> : vector<16xf32>
    %8 = vector.multi_reduction <add>, %7, %cst_5 [0] : vector<128x16xf32> to vector<16xf32>
    %9 = vector.shape_cast %8 : vector<16xf32> to vector<1x16xf32>
    %cst_6 = arith.constant 7.812500e-03 : f32
    %10 = vector.broadcast %cst_6 : f32 to vector<1x16xf32>
    %11 = arith.mulf %9, %10 : vector<1x16xf32>
    %12 = vector.broadcast %11 : vector<1x16xf32> to vector<128x16xf32>
    %13 = arith.subf %7, %12 : vector<128x16xf32>
    %14 = arith.mulf %13, %13 : vector<128x16xf32>
    %cst_7 = arith.constant dense<0.000000e+00> : vector<16xf32>
    %15 = vector.multi_reduction <add>, %14, %cst_7 [0] : vector<128x16xf32> to vector<16xf32>
    %16 = vector.shape_cast %15 : vector<16xf32> to vector<1x16xf32>
    %cst_8 = arith.constant 7.812500e-03 : f32
    %17 = vector.broadcast %cst_8 : f32 to vector<1x16xf32>
    %18 = arith.mulf %16, %17 : vector<1x16xf32>
    %cst_9 = arith.constant 9.99999974E-6 : f32
    %19 = vector.broadcast %cst_9 : f32 to vector<1x16xf32>
    %20 = arith.addf %18, %19 : vector<1x16xf32>
    %21 = math.rsqrt %20 : vector<1x16xf32>
    %c0_10 = arith.constant 0 : index
    %c0_11 = arith.constant 0 : index
    %22 = vector.load %arg3[%c0_10, %c0_11] : memref<1x16xf32, #tpu.memory_space<vmem>>, vector<1x16xf32>
    %23 = arith.mulf %21, %22 : vector<1x16xf32>
    %24 = vector.broadcast %23 : vector<1x16xf32> to vector<128x16xf32>
    %25 = arith.mulf %13, %24 : vector<128x16xf32>
    %c0_12 = arith.constant 0 : index
    %c0_13 = arith.constant 0 : index
    %26 = vector.load %arg4[%c0_12, %c0_13] : memref<1x16xf32, #tpu.memory_space<vmem>>, vector<1x16xf32>
    %27 = vector.broadcast %26 : vector<1x16xf32> to vector<128x16xf32>
    %28 = arith.addf %25, %27 : vector<128x16xf32>
    %29 = arith.truncf %28 : vector<128x16xf32> to vector<128x16xbf16>
    %c0_14 = arith.constant 0 : index
    %c0_15 = arith.constant 0 : index
    %30 = vector.load %arg5[%c0_14, %c0_15] : memref<128x16xbf16, #tpu.memory_space<vmem>>, vector<128x16xbf16>
    tpu.vector_store %arg5[%c0_14, %c0_15], %29 {strides = array<i32>} : memref<128x16xbf16, #tpu.memory_space<vmem>>, vector<128x16xbf16>,
    return
  }
  func.func @transform_0(%arg0: i32) -> (i32, i32) {
    %c0_i32 = arith.constant 0 : i32
    %c0_i32_0 = arith.constant 0 : i32
    return %arg0, %c0_i32 : i32, i32
  }
  func.func @transform_1(%arg0: i32) -> (i32, i32) {
    %c0_i32 = arith.constant 0 : i32
    %c0_i32_0 = arith.constant 0 : i32
    %c0_i32_1 = arith.constant 0 : i32
    return %c0_i32, %c0_i32_0 : i32, i32
  }
  func.func @transform_2(%arg0: i32) -> (i32, i32) {
    %c0_i32 = arith.constant 0 : i32
    %c0_i32_0 = arith.constant 0 : i32
    %c0_i32_1 = arith.constant 0 : i32
    return %c0_i32, %c0_i32_0 : i32, i32
  }
  func.func @transform_3(%arg0: i32) -> (i32, i32) {
    %c0_i32 = arith.constant 0 : i32
    %c0_i32_0 = arith.constant 0 : i32
    %c0_i32_1 = arith.constant 0 : i32
    return %c0_i32, %c0_i32_0 : i32, i32
  }
  func.func @transform_4(%arg0: i32) -> (i32, i32) {
    %c0_i32 = arith.constant 0 : i32
    %c0_i32_0 = arith.constant 0 : i32
    return %arg0, %c0_i32 : i32, i32
  }
}

module attributes {stable_mosaic.version = 11 : i64} {
  func.func @_down_conv_kernel(%arg0: i32, %arg1: memref<32x256xbf16, #tpu.memory_space<vmem>>, %arg2: memref<256x32xbf16, #tpu.memory_space<vmem>>, %arg3: memref<1x32xf32, #tpu.memory_space<vmem>>, %arg4: memref<1x32xf32, #tpu.memory_space<vmem>>, %arg5: memref<32x32xbf16, #tpu.memory_space<vmem>>) attributes {dimension_semantics = [#tpu.dimension_semantics<arbitrary>], iteration_bounds = array<i64: 1>, scalar_prefetch = 0 : i64, scratch_operands = 0 : i64, tpu.core_type = #tpu.core_type<tc>, window_params = [{transform_indices = @transform_0, window_bounds = array<i64: 32, 256>}, {pipeline_mode = #tpu.pipeline_mode<synchronous>, transform_indices = @transform_1, window_bounds = array<i64: 256, 32>}, {pipeline_mode = #tpu.pipeline_mode<synchronous>, transform_indices = @transform_2, window_bounds = array<i64: 1, 32>}, {pipeline_mode = #tpu.pipeline_mode<synchronous>, transform_indices = @transform_3, window_bounds = array<i64: 1, 32>}, {transform_indices = @transform_4, window_bounds = array<i64: 32, 32>}]} {
    %c0 = arith.constant 0 : index
    %c0_0 = arith.constant 0 : index
    %0 = vector.load %arg1[%c0, %c0_0] : memref<32x256xbf16, #tpu.memory_space<vmem>>, vector<32x256xbf16>
    %cst = arith.constant 0.000000e+00 : bf16
    %1 = vector.broadcast %cst : bf16 to vector<32x256xbf16>
    %2 = arith.cmpf oge, %0, %1 : vector<32x256xbf16>
    %cst_1 = arith.constant 2.001950e-01 : bf16
    %3 = vector.broadcast %cst_1 : bf16 to vector<32x256xbf16>
    %4 = arith.mulf %0, %3 : vector<32x256xbf16>
    %5 = arith.select %2, %0, %4 : vector<32x256xi1>, vector<32x256xbf16>
    %c0_2 = arith.constant 0 : index
    %c0_3 = arith.constant 0 : index
    %6 = vector.load %arg2[%c0_2, %c0_3] : memref<256x32xbf16, #tpu.memory_space<vmem>>, vector<256x32xbf16>
    %cst_4 = arith.constant dense<0.000000e+00> : vector<32x32xf32>
    %7 = tpu.matmul %5, %6, %cst_4 {dimension_numbers = #tpu.dot_dimension_numbers<[1], [0], [0], [1], [0, 0, 1, 1], [], []>} : vector<32x256xbf16>, vector<256x32xbf16>, vector<32x32xf32> -> vector<32x32xf32>
    %cst_5 = arith.constant dense<0.000000e+00> : vector<32xf32>
    %8 = vector.multi_reduction <add>, %7, %cst_5 [0] : vector<32x32xf32> to vector<32xf32>
    %9 = vector.shape_cast %8 : vector<32xf32> to vector<1x32xf32>
    %cst_6 = arith.constant 3.125000e-02 : f32
    %10 = vector.broadcast %cst_6 : f32 to vector<1x32xf32>
    %11 = arith.mulf %9, %10 : vector<1x32xf32>
    %12 = vector.broadcast %11 : vector<1x32xf32> to vector<32x32xf32>
    %13 = arith.subf %7, %12 : vector<32x32xf32>
    %14 = arith.mulf %13, %13 : vector<32x32xf32>
    %cst_7 = arith.constant dense<0.000000e+00> : vector<32xf32>
    %15 = vector.multi_reduction <add>, %14, %cst_7 [0] : vector<32x32xf32> to vector<32xf32>
    %16 = vector.shape_cast %15 : vector<32xf32> to vector<1x32xf32>
    %cst_8 = arith.constant 3.125000e-02 : f32
    %17 = vector.broadcast %cst_8 : f32 to vector<1x32xf32>
    %18 = arith.mulf %16, %17 : vector<1x32xf32>
    %cst_9 = arith.constant 9.99999974E-6 : f32
    %19 = vector.broadcast %cst_9 : f32 to vector<1x32xf32>
    %20 = arith.addf %18, %19 : vector<1x32xf32>
    %21 = math.rsqrt %20 : vector<1x32xf32>
    %c0_10 = arith.constant 0 : index
    %c0_11 = arith.constant 0 : index
    %22 = vector.load %arg3[%c0_10, %c0_11] : memref<1x32xf32, #tpu.memory_space<vmem>>, vector<1x32xf32>
    %23 = arith.mulf %21, %22 : vector<1x32xf32>
    %24 = vector.broadcast %23 : vector<1x32xf32> to vector<32x32xf32>
    %25 = arith.mulf %13, %24 : vector<32x32xf32>
    %c0_12 = arith.constant 0 : index
    %c0_13 = arith.constant 0 : index
    %26 = vector.load %arg4[%c0_12, %c0_13] : memref<1x32xf32, #tpu.memory_space<vmem>>, vector<1x32xf32>
    %27 = vector.broadcast %26 : vector<1x32xf32> to vector<32x32xf32>
    %28 = arith.addf %25, %27 : vector<32x32xf32>
    %29 = arith.truncf %28 : vector<32x32xf32> to vector<32x32xbf16>
    %c0_14 = arith.constant 0 : index
    %c0_15 = arith.constant 0 : index
    %30 = vector.load %arg5[%c0_14, %c0_15] : memref<32x32xbf16, #tpu.memory_space<vmem>>, vector<32x32xbf16>
    tpu.vector_store %arg5[%c0_14, %c0_15], %29 {strides = array<i32>} : memref<32x32xbf16, #tpu.memory_space<vmem>>, vector<32x32xbf16>,
    return
  }
  func.func @transform_0(%arg0: i32) -> (i32, i32) {
    %c0_i32 = arith.constant 0 : i32
    %c0_i32_0 = arith.constant 0 : i32
    return %arg0, %c0_i32 : i32, i32
  }
  func.func @transform_1(%arg0: i32) -> (i32, i32) {
    %c0_i32 = arith.constant 0 : i32
    %c0_i32_0 = arith.constant 0 : i32
    %c0_i32_1 = arith.constant 0 : i32
    return %c0_i32, %c0_i32_0 : i32, i32
  }
  func.func @transform_2(%arg0: i32) -> (i32, i32) {
    %c0_i32 = arith.constant 0 : i32
    %c0_i32_0 = arith.constant 0 : i32
    %c0_i32_1 = arith.constant 0 : i32
    return %c0_i32, %c0_i32_0 : i32, i32
  }
  func.func @transform_3(%arg0: i32) -> (i32, i32) {
    %c0_i32 = arith.constant 0 : i32
    %c0_i32_0 = arith.constant 0 : i32
    %c0_i32_1 = arith.constant 0 : i32
    return %c0_i32, %c0_i32_0 : i32, i32
  }
  func.func @transform_4(%arg0: i32) -> (i32, i32) {
    %c0_i32 = arith.constant 0 : i32
    %c0_i32_0 = arith.constant 0 : i32
    return %arg0, %c0_i32 : i32, i32
  }
}

module attributes {stable_mosaic.version = 11 : i64} {
  func.func @_innermost_kernel(%arg0: i32, %arg1: memref<2x256xbf16, #tpu.memory_space<vmem>>, %arg2: memref<256x64xbf16, #tpu.memory_space<vmem>>, %arg3: memref<4x64x64xbf16, #tpu.memory_space<vmem>>, %arg4: memref<1x64xf32, #tpu.memory_space<vmem>>, %arg5: memref<1x64xf32, #tpu.memory_space<vmem>>, %arg6: memref<4x2x64xbf16, #tpu.memory_space<vmem>>) attributes {dimension_semantics = [#tpu.dimension_semantics<arbitrary>], iteration_bounds = array<i64: 1>, scalar_prefetch = 0 : i64, scratch_operands = 0 : i64, tpu.core_type = #tpu.core_type<tc>, window_params = [{pipeline_mode = #tpu.pipeline_mode<synchronous>, transform_indices = @transform_0, window_bounds = array<i64: 2, 256>}, {pipeline_mode = #tpu.pipeline_mode<synchronous>, transform_indices = @transform_1, window_bounds = array<i64: 256, 64>}, {pipeline_mode = #tpu.pipeline_mode<synchronous>, transform_indices = @transform_2, window_bounds = array<i64: 4, 64, 64>}, {pipeline_mode = #tpu.pipeline_mode<synchronous>, transform_indices = @transform_3, window_bounds = array<i64: 1, 64>}, {pipeline_mode = #tpu.pipeline_mode<synchronous>, transform_indices = @transform_4, window_bounds = array<i64: 1, 64>}, {pipeline_mode = #tpu.pipeline_mode<synchronous>, transform_indices = @transform_5, window_bounds = array<i64: 4, 2, 64>}]} {
    %c0 = arith.constant 0 : index
    %c0_0 = arith.constant 0 : index
    %0 = vector.load %arg1[%c0, %c0_0] : memref<2x256xbf16, #tpu.memory_space<vmem>>, vector<2x256xbf16>
    %cst = arith.constant 0.000000e+00 : bf16
    %1 = vector.broadcast %cst : bf16 to vector<2x256xbf16>
    %2 = arith.cmpf oge, %0, %1 : vector<2x256xbf16>
    %cst_1 = arith.constant 2.001950e-01 : bf16
    %3 = vector.broadcast %cst_1 : bf16 to vector<2x256xbf16>
    %4 = arith.mulf %0, %3 : vector<2x256xbf16>
    %5 = arith.select %2, %0, %4 : vector<2x256xi1>, vector<2x256xbf16>
    %c0_2 = arith.constant 0 : index
    %c0_3 = arith.constant 0 : index
    %6 = vector.load %arg2[%c0_2, %c0_3] : memref<256x64xbf16, #tpu.memory_space<vmem>>, vector<256x64xbf16>
    %cst_4 = arith.constant dense<0.000000e+00> : vector<2x64xf32>
    %7 = tpu.matmul %5, %6, %cst_4 {dimension_numbers = #tpu.dot_dimension_numbers<[1], [0], [0], [1], [0, 0, 1, 1], [], []>} : vector<2x256xbf16>, vector<256x64xbf16>, vector<2x64xf32> -> vector<2x64xf32>
    %cst_5 = arith.constant 0.000000e+00 : f32
    %8 = vector.broadcast %cst_5 : f32 to vector<2x64xf32>
    %9 = arith.maximumf %7, %8 : vector<2x64xf32>
    %10 = arith.truncf %9 : vector<2x64xf32> to vector<2x64xbf16>
    %c0_6 = arith.constant 0 : index
    %c0_7 = arith.constant 0 : index
    %c0_8 = arith.constant 0 : index
    %11 = vector.load %arg3[%c0_6, %c0_7, %c0_8] : memref<4x64x64xbf16, #tpu.memory_space<vmem>>, vector<1x64x64xbf16>
    %12 = vector.shape_cast %11 : vector<1x64x64xbf16> to vector<64x64xbf16>
    %cst_9 = arith.constant dense<0.000000e+00> : vector<2x64xf32>
    %13 = tpu.matmul %10, %12, %cst_9 {dimension_numbers = #tpu.dot_dimension_numbers<[1], [0], [0], [1], [0, 0, 1, 1], [], []>} : vector<2x64xbf16>, vector<64x64xbf16>, vector<2x64xf32> -> vector<2x64xf32>
    %c1 = arith.constant 1 : index
    %c0_10 = arith.constant 0 : index
    %c0_11 = arith.constant 0 : index
    %14 = vector.load %arg3[%c1, %c0_10, %c0_11] : memref<4x64x64xbf16, #tpu.memory_space<vmem>>, vector<1x64x64xbf16>
    %15 = vector.shape_cast %14 : vector<1x64x64xbf16> to vector<64x64xbf16>
    %cst_12 = arith.constant dense<0.000000e+00> : vector<2x64xf32>
    %16 = tpu.matmul %10, %15, %cst_12 {dimension_numbers = #tpu.dot_dimension_numbers<[1], [0], [0], [1], [0, 0, 1, 1], [], []>} : vector<2x64xbf16>, vector<64x64xbf16>, vector<2x64xf32> -> vector<2x64xf32>
    %c2 = arith.constant 2 : index
    %c0_13 = arith.constant 0 : index
    %c0_14 = arith.constant 0 : index
    %17 = vector.load %arg3[%c2, %c0_13, %c0_14] : memref<4x64x64xbf16, #tpu.memory_space<vmem>>, vector<1x64x64xbf16>
    %18 = vector.shape_cast %17 : vector<1x64x64xbf16> to vector<64x64xbf16>
    %cst_15 = arith.constant dense<0.000000e+00> : vector<2x64xf32>
    %19 = tpu.matmul %10, %18, %cst_15 {dimension_numbers = #tpu.dot_dimension_numbers<[1], [0], [0], [1], [0, 0, 1, 1], [], []>} : vector<2x64xbf16>, vector<64x64xbf16>, vector<2x64xf32> -> vector<2x64xf32>
    %c3 = arith.constant 3 : index
    %c0_16 = arith.constant 0 : index
    %c0_17 = arith.constant 0 : index
    %20 = vector.load %arg3[%c3, %c0_16, %c0_17] : memref<4x64x64xbf16, #tpu.memory_space<vmem>>, vector<1x64x64xbf16>
    %21 = vector.shape_cast %20 : vector<1x64x64xbf16> to vector<64x64xbf16>
    %cst_18 = arith.constant dense<0.000000e+00> : vector<2x64xf32>
    %22 = tpu.matmul %10, %21, %cst_18 {dimension_numbers = #tpu.dot_dimension_numbers<[1], [0], [0], [1], [0, 0, 1, 1], [], []>} : vector<2x64xbf16>, vector<64x64xbf16>, vector<2x64xf32> -> vector<2x64xf32>
    %cst_19 = arith.constant dense<0.000000e+00> : vector<64xf32>
    %23 = vector.multi_reduction <add>, %13, %cst_19 [0] : vector<2x64xf32> to vector<64xf32>
    %24 = vector.shape_cast %23 : vector<64xf32> to vector<1x64xf32>
    %cst_20 = arith.constant dense<0.000000e+00> : vector<64xf32>
    %25 = vector.multi_reduction <add>, %16, %cst_20 [0] : vector<2x64xf32> to vector<64xf32>
    %26 = vector.shape_cast %25 : vector<64xf32> to vector<1x64xf32>
    %27 = arith.addf %24, %26 : vector<1x64xf32>
    %cst_21 = arith.constant dense<0.000000e+00> : vector<64xf32>
    %28 = vector.multi_reduction <add>, %19, %cst_21 [0] : vector<2x64xf32> to vector<64xf32>
    %29 = vector.shape_cast %28 : vector<64xf32> to vector<1x64xf32>
    %30 = arith.addf %27, %29 : vector<1x64xf32>
    %cst_22 = arith.constant dense<0.000000e+00> : vector<64xf32>
    %31 = vector.multi_reduction <add>, %22, %cst_22 [0] : vector<2x64xf32> to vector<64xf32>
    %32 = vector.shape_cast %31 : vector<64xf32> to vector<1x64xf32>
    %33 = arith.addf %30, %32 : vector<1x64xf32>
    %cst_23 = arith.constant 1.250000e-01 : f32
    %34 = vector.broadcast %cst_23 : f32 to vector<1x64xf32>
    %35 = arith.mulf %33, %34 : vector<1x64xf32>
    %36 = vector.broadcast %35 : vector<1x64xf32> to vector<2x64xf32>
    %37 = arith.subf %13, %36 : vector<2x64xf32>
    %38 = arith.mulf %37, %37 : vector<2x64xf32>
    %cst_24 = arith.constant dense<0.000000e+00> : vector<64xf32>
    %39 = vector.multi_reduction <add>, %38, %cst_24 [0] : vector<2x64xf32> to vector<64xf32>
    %40 = vector.shape_cast %39 : vector<64xf32> to vector<1x64xf32>
    %41 = vector.broadcast %35 : vector<1x64xf32> to vector<2x64xf32>
    %42 = arith.subf %16, %41 : vector<2x64xf32>
    %43 = arith.mulf %42, %42 : vector<2x64xf32>
    %cst_25 = arith.constant dense<0.000000e+00> : vector<64xf32>
    %44 = vector.multi_reduction <add>, %43, %cst_25 [0] : vector<2x64xf32> to vector<64xf32>
    %45 = vector.shape_cast %44 : vector<64xf32> to vector<1x64xf32>
    %46 = arith.addf %40, %45 : vector<1x64xf32>
    %47 = vector.broadcast %35 : vector<1x64xf32> to vector<2x64xf32>
    %48 = arith.subf %19, %47 : vector<2x64xf32>
    %49 = arith.mulf %48, %48 : vector<2x64xf32>
    %cst_26 = arith.constant dense<0.000000e+00> : vector<64xf32>
    %50 = vector.multi_reduction <add>, %49, %cst_26 [0] : vector<2x64xf32> to vector<64xf32>
    %51 = vector.shape_cast %50 : vector<64xf32> to vector<1x64xf32>
    %52 = arith.addf %46, %51 : vector<1x64xf32>
    %53 = vector.broadcast %35 : vector<1x64xf32> to vector<2x64xf32>
    %54 = arith.subf %22, %53 : vector<2x64xf32>
    %55 = arith.mulf %54, %54 : vector<2x64xf32>
    %cst_27 = arith.constant dense<0.000000e+00> : vector<64xf32>
    %56 = vector.multi_reduction <add>, %55, %cst_27 [0] : vector<2x64xf32> to vector<64xf32>
    %57 = vector.shape_cast %56 : vector<64xf32> to vector<1x64xf32>
    %58 = arith.addf %52, %57 : vector<1x64xf32>
    %cst_28 = arith.constant 1.250000e-01 : f32
    %59 = vector.broadcast %cst_28 : f32 to vector<1x64xf32>
    %60 = arith.mulf %58, %59 : vector<1x64xf32>
    %cst_29 = arith.constant 9.99999974E-6 : f32
    %61 = vector.broadcast %cst_29 : f32 to vector<1x64xf32>
    %62 = arith.addf %60, %61 : vector<1x64xf32>
    %63 = math.rsqrt %62 : vector<1x64xf32>
    %c0_30 = arith.constant 0 : index
    %c0_31 = arith.constant 0 : index
    %64 = vector.load %arg4[%c0_30, %c0_31] : memref<1x64xf32, #tpu.memory_space<vmem>>, vector<1x64xf32>
    %65 = arith.mulf %63, %64 : vector<1x64xf32>
    %c0_32 = arith.constant 0 : index
    %c0_33 = arith.constant 0 : index
    %66 = vector.load %arg5[%c0_32, %c0_33] : memref<1x64xf32, #tpu.memory_space<vmem>>, vector<1x64xf32>
    %67 = arith.mulf %35, %65 : vector<1x64xf32>
    %68 = arith.subf %66, %67 : vector<1x64xf32>
    %69 = vector.broadcast %65 : vector<1x64xf32> to vector<2x64xf32>
    %70 = arith.mulf %13, %69 : vector<2x64xf32>
    %71 = vector.broadcast %68 : vector<1x64xf32> to vector<2x64xf32>
    %72 = arith.addf %70, %71 : vector<2x64xf32>
    %73 = arith.truncf %72 : vector<2x64xf32> to vector<2x64xbf16>
    %c0_34 = arith.constant 0 : index
    %c0_35 = arith.constant 0 : index
    %c0_36 = arith.constant 0 : index
    %74 = vector.load %arg6[%c0_34, %c0_35, %c0_36] : memref<4x2x64xbf16, #tpu.memory_space<vmem>>, vector<1x2x64xbf16>
    %75 = vector.shape_cast %74 : vector<1x2x64xbf16> to vector<2x64xbf16>
    %76 = vector.shape_cast %73 : vector<2x64xbf16> to vector<1x2x64xbf16>
    tpu.vector_store %arg6[%c0_34, %c0_35, %c0_36], %76 {strides = array<i32>} : memref<4x2x64xbf16, #tpu.memory_space<vmem>>, vector<1x2x64xbf16>,
    %77 = vector.broadcast %65 : vector<1x64xf32> to vector<2x64xf32>
    %78 = arith.mulf %16, %77 : vector<2x64xf32>
    %79 = vector.broadcast %68 : vector<1x64xf32> to vector<2x64xf32>
    %80 = arith.addf %78, %79 : vector<2x64xf32>
    %81 = arith.truncf %80 : vector<2x64xf32> to vector<2x64xbf16>
    %c1_37 = arith.constant 1 : index
    %c0_38 = arith.constant 0 : index
    %c0_39 = arith.constant 0 : index
    %82 = vector.load %arg6[%c1_37, %c0_38, %c0_39] : memref<4x2x64xbf16, #tpu.memory_space<vmem>>, vector<1x2x64xbf16>
    %83 = vector.shape_cast %82 : vector<1x2x64xbf16> to vector<2x64xbf16>
    %84 = vector.shape_cast %81 : vector<2x64xbf16> to vector<1x2x64xbf16>
    tpu.vector_store %arg6[%c1_37, %c0_38, %c0_39], %84 {strides = array<i32>} : memref<4x2x64xbf16, #tpu.memory_space<vmem>>, vector<1x2x64xbf16>,
    %85 = vector.broadcast %65 : vector<1x64xf32> to vector<2x64xf32>
    %86 = arith.mulf %19, %85 : vector<2x64xf32>
    %87 = vector.broadcast %68 : vector<1x64xf32> to vector<2x64xf32>
    %88 = arith.addf %86, %87 : vector<2x64xf32>
    %89 = arith.truncf %88 : vector<2x64xf32> to vector<2x64xbf16>
    %c2_40 = arith.constant 2 : index
    %c0_41 = arith.constant 0 : index
    %c0_42 = arith.constant 0 : index
    %90 = vector.load %arg6[%c2_40, %c0_41, %c0_42] : memref<4x2x64xbf16, #tpu.memory_space<vmem>>, vector<1x2x64xbf16>
    %91 = vector.shape_cast %90 : vector<1x2x64xbf16> to vector<2x64xbf16>
    %92 = vector.shape_cast %89 : vector<2x64xbf16> to vector<1x2x64xbf16>
    tpu.vector_store %arg6[%c2_40, %c0_41, %c0_42], %92 {strides = array<i32>} : memref<4x2x64xbf16, #tpu.memory_space<vmem>>, vector<1x2x64xbf16>,
    %93 = vector.broadcast %65 : vector<1x64xf32> to vector<2x64xf32>
    %94 = arith.mulf %22, %93 : vector<2x64xf32>
    %95 = vector.broadcast %68 : vector<1x64xf32> to vector<2x64xf32>
    %96 = arith.addf %94, %95 : vector<2x64xf32>
    %97 = arith.truncf %96 : vector<2x64xf32> to vector<2x64xbf16>
    %c3_43 = arith.constant 3 : index
    %c0_44 = arith.constant 0 : index
    %c0_45 = arith.constant 0 : index
    %98 = vector.load %arg6[%c3_43, %c0_44, %c0_45] : memref<4x2x64xbf16, #tpu.memory_space<vmem>>, vector<1x2x64xbf16>
    %99 = vector.shape_cast %98 : vector<1x2x64xbf16> to vector<2x64xbf16>
    %100 = vector.shape_cast %97 : vector<2x64xbf16> to vector<1x2x64xbf16>
    tpu.vector_store %arg6[%c3_43, %c0_44, %c0_45], %100 {strides = array<i32>} : memref<4x2x64xbf16, #tpu.memory_space<vmem>>, vector<1x2x64xbf16>,
    return
  }
  func.func @transform_0(%arg0: i32) -> (i32, i32) {
    %c0_i32 = arith.constant 0 : i32
    %c0_i32_0 = arith.constant 0 : i32
    %c0_i32_1 = arith.constant 0 : i32
    return %c0_i32, %c0_i32_0 : i32, i32
  }
  func.func @transform_1(%arg0: i32) -> (i32, i32) {
    %c0_i32 = arith.constant 0 : i32
    %c0_i32_0 = arith.constant 0 : i32
    %c0_i32_1 = arith.constant 0 : i32
    return %c0_i32, %c0_i32_0 : i32, i32
  }
  func.func @transform_2(%arg0: i32) -> (i32, i32, i32) {
    %c0_i32 = arith.constant 0 : i32
    %c0_i32_0 = arith.constant 0 : i32
    %c0_i32_1 = arith.constant 0 : i32
    %c0_i32_2 = arith.constant 0 : i32
    return %c0_i32, %c0_i32_0, %c0_i32_1 : i32, i32, i32
  }
  func.func @transform_3(%arg0: i32) -> (i32, i32) {
    %c0_i32 = arith.constant 0 : i32
    %c0_i32_0 = arith.constant 0 : i32
    %c0_i32_1 = arith.constant 0 : i32
    return %c0_i32, %c0_i32_0 : i32, i32
  }
  func.func @transform_4(%arg0: i32) -> (i32, i32) {
    %c0_i32 = arith.constant 0 : i32
    %c0_i32_0 = arith.constant 0 : i32
    %c0_i32_1 = arith.constant 0 : i32
    return %c0_i32, %c0_i32_0 : i32, i32
  }
  func.func @transform_5(%arg0: i32) -> (i32, i32, i32) {
    %c0_i32 = arith.constant 0 : i32
    %c0_i32_0 = arith.constant 0 : i32
    %c0_i32_1 = arith.constant 0 : i32
    %c0_i32_2 = arith.constant 0 : i32
    return %c0_i32, %c0_i32_0, %c0_i32_1 : i32, i32, i32
  }
}

module attributes {stable_mosaic.version = 11 : i64} {
  func.func @_down_conv_kernel(%arg0: i32, %arg1: memref<8x512xbf16, #tpu.memory_space<vmem>>, %arg2: memref<512x64xbf16, #tpu.memory_space<vmem>>, %arg3: memref<1x64xf32, #tpu.memory_space<vmem>>, %arg4: memref<1x64xf32, #tpu.memory_space<vmem>>, %arg5: memref<8x64xbf16, #tpu.memory_space<vmem>>) attributes {dimension_semantics = [#tpu.dimension_semantics<arbitrary>], iteration_bounds = array<i64: 1>, scalar_prefetch = 0 : i64, scratch_operands = 0 : i64, tpu.core_type = #tpu.core_type<tc>, window_params = [{transform_indices = @transform_0, window_bounds = array<i64: 8, 512>}, {pipeline_mode = #tpu.pipeline_mode<synchronous>, transform_indices = @transform_1, window_bounds = array<i64: 512, 64>}, {pipeline_mode = #tpu.pipeline_mode<synchronous>, transform_indices = @transform_2, window_bounds = array<i64: 1, 64>}, {pipeline_mode = #tpu.pipeline_mode<synchronous>, transform_indices = @transform_3, window_bounds = array<i64: 1, 64>}, {transform_indices = @transform_4, window_bounds = array<i64: 8, 64>}]} {
    %c0 = arith.constant 0 : index
    %c0_0 = arith.constant 0 : index
    %0 = vector.load %arg1[%c0, %c0_0] : memref<8x512xbf16, #tpu.memory_space<vmem>>, vector<8x512xbf16>
    %cst = arith.constant 0.000000e+00 : bf16
    %1 = vector.broadcast %cst : bf16 to vector<8x512xbf16>
    %2 = arith.cmpf oge, %0, %1 : vector<8x512xbf16>
    %cst_1 = arith.constant 2.001950e-01 : bf16
    %3 = vector.broadcast %cst_1 : bf16 to vector<8x512xbf16>
    %4 = arith.mulf %0, %3 : vector<8x512xbf16>
    %5 = arith.select %2, %0, %4 : vector<8x512xi1>, vector<8x512xbf16>
    %c0_2 = arith.constant 0 : index
    %c0_3 = arith.constant 0 : index
    %6 = vector.load %arg2[%c0_2, %c0_3] : memref<512x64xbf16, #tpu.memory_space<vmem>>, vector<512x64xbf16>
    %cst_4 = arith.constant dense<0.000000e+00> : vector<8x64xf32>
    %7 = tpu.matmul %5, %6, %cst_4 {dimension_numbers = #tpu.dot_dimension_numbers<[1], [0], [0], [1], [0, 0, 1, 1], [], []>} : vector<8x512xbf16>, vector<512x64xbf16>, vector<8x64xf32> -> vector<8x64xf32>
    %cst_5 = arith.constant dense<0.000000e+00> : vector<64xf32>
    %8 = vector.multi_reduction <add>, %7, %cst_5 [0] : vector<8x64xf32> to vector<64xf32>
    %9 = vector.shape_cast %8 : vector<64xf32> to vector<1x64xf32>
    %cst_6 = arith.constant 1.250000e-01 : f32
    %10 = vector.broadcast %cst_6 : f32 to vector<1x64xf32>
    %11 = arith.mulf %9, %10 : vector<1x64xf32>
    %12 = vector.broadcast %11 : vector<1x64xf32> to vector<8x64xf32>
    %13 = arith.subf %7, %12 : vector<8x64xf32>
    %14 = arith.mulf %13, %13 : vector<8x64xf32>
    %cst_7 = arith.constant dense<0.000000e+00> : vector<64xf32>
    %15 = vector.multi_reduction <add>, %14, %cst_7 [0] : vector<8x64xf32> to vector<64xf32>
    %16 = vector.shape_cast %15 : vector<64xf32> to vector<1x64xf32>
    %cst_8 = arith.constant 1.250000e-01 : f32
    %17 = vector.broadcast %cst_8 : f32 to vector<1x64xf32>
    %18 = arith.mulf %16, %17 : vector<1x64xf32>
    %cst_9 = arith.constant 9.99999974E-6 : f32
    %19 = vector.broadcast %cst_9 : f32 to vector<1x64xf32>
    %20 = arith.addf %18, %19 : vector<1x64xf32>
    %21 = math.rsqrt %20 : vector<1x64xf32>
    %c0_10 = arith.constant 0 : index
    %c0_11 = arith.constant 0 : index
    %22 = vector.load %arg3[%c0_10, %c0_11] : memref<1x64xf32, #tpu.memory_space<vmem>>, vector<1x64xf32>
    %23 = arith.mulf %21, %22 : vector<1x64xf32>
    %24 = vector.broadcast %23 : vector<1x64xf32> to vector<8x64xf32>
    %25 = arith.mulf %13, %24 : vector<8x64xf32>
    %c0_12 = arith.constant 0 : index
    %c0_13 = arith.constant 0 : index
    %26 = vector.load %arg4[%c0_12, %c0_13] : memref<1x64xf32, #tpu.memory_space<vmem>>, vector<1x64xf32>
    %27 = vector.broadcast %26 : vector<1x64xf32> to vector<8x64xf32>
    %28 = arith.addf %25, %27 : vector<8x64xf32>
    %29 = arith.truncf %28 : vector<8x64xf32> to vector<8x64xbf16>
    %c0_14 = arith.constant 0 : index
    %c0_15 = arith.constant 0 : index
    %30 = vector.load %arg5[%c0_14, %c0_15] : memref<8x64xbf16, #tpu.memory_space<vmem>>, vector<8x64xbf16>
    tpu.vector_store %arg5[%c0_14, %c0_15], %29 {strides = array<i32>} : memref<8x64xbf16, #tpu.memory_space<vmem>>, vector<8x64xbf16>,
    return
  }
  func.func @transform_0(%arg0: i32) -> (i32, i32) {
    %c0_i32 = arith.constant 0 : i32
    %c0_i32_0 = arith.constant 0 : i32
    return %arg0, %c0_i32 : i32, i32
  }
  func.func @transform_1(%arg0: i32) -> (i32, i32) {
    %c0_i32 = arith.constant 0 : i32
    %c0_i32_0 = arith.constant 0 : i32
    %c0_i32_1 = arith.constant 0 : i32
    return %c0_i32, %c0_i32_0 : i32, i32
  }
  func.func @transform_2(%arg0: i32) -> (i32, i32) {
    %c0_i32 = arith.constant 0 : i32
    %c0_i32_0 = arith.constant 0 : i32
    %c0_i32_1 = arith.constant 0 : i32
    return %c0_i32, %c0_i32_0 : i32, i32
  }
  func.func @transform_3(%arg0: i32) -> (i32, i32) {
    %c0_i32 = arith.constant 0 : i32
    %c0_i32_0 = arith.constant 0 : i32
    %c0_i32_1 = arith.constant 0 : i32
    return %c0_i32, %c0_i32_0 : i32, i32
  }
  func.func @transform_4(%arg0: i32) -> (i32, i32) {
    %c0_i32 = arith.constant 0 : i32
    %c0_i32_0 = arith.constant 0 : i32
    return %arg0, %c0_i32 : i32, i32
  }
}

module attributes {stable_mosaic.version = 11 : i64} {
  func.func @_up_conv_kernel(%arg0: i32, %arg1: memref<4x8x512xbf16, #tpu.memory_space<vmem>>, %arg2: memref<4x512x32xbf16, #tpu.memory_space<vmem>>, %arg3: memref<1x32xf32, #tpu.memory_space<vmem>>, %arg4: memref<1x32xf32, #tpu.memory_space<vmem>>, %arg5: memref<4x8x32xbf16, #tpu.memory_space<vmem>>) attributes {dimension_semantics = [#tpu.dimension_semantics<arbitrary>], iteration_bounds = array<i64: 1>, scalar_prefetch = 0 : i64, scratch_operands = 0 : i64, tpu.core_type = #tpu.core_type<tc>, window_params = [{pipeline_mode = #tpu.pipeline_mode<synchronous>, transform_indices = @transform_0, window_bounds = array<i64: 4, 8, 512>}, {pipeline_mode = #tpu.pipeline_mode<synchronous>, transform_indices = @transform_1, window_bounds = array<i64: 4, 512, 32>}, {pipeline_mode = #tpu.pipeline_mode<synchronous>, transform_indices = @transform_2, window_bounds = array<i64: 1, 32>}, {pipeline_mode = #tpu.pipeline_mode<synchronous>, transform_indices = @transform_3, window_bounds = array<i64: 1, 32>}, {pipeline_mode = #tpu.pipeline_mode<synchronous>, transform_indices = @transform_4, window_bounds = array<i64: 4, 8, 32>}]} {
    %c0 = arith.constant 0 : index
    %c0_0 = arith.constant 0 : index
    %c0_1 = arith.constant 0 : index
    %0 = vector.load %arg1[%c0, %c0_0, %c0_1] : memref<4x8x512xbf16, #tpu.memory_space<vmem>>, vector<1x8x512xbf16>
    %1 = vector.shape_cast %0 : vector<1x8x512xbf16> to vector<8x512xbf16>
    %cst = arith.constant 0.000000e+00 : bf16
    %2 = vector.broadcast %cst : bf16 to vector<8x512xbf16>
    %3 = arith.maximumf %1, %2 : vector<8x512xbf16>
    %c0_2 = arith.constant 0 : index
    %c0_3 = arith.constant 0 : index
    %c0_4 = arith.constant 0 : index
    %4 = vector.load %arg2[%c0_2, %c0_3, %c0_4] : memref<4x512x32xbf16, #tpu.memory_space<vmem>>, vector<1x512x32xbf16>
    %5 = vector.shape_cast %4 : vector<1x512x32xbf16> to vector<512x32xbf16>
    %cst_5 = arith.constant dense<0.000000e+00> : vector<8x32xf32>
    %6 = tpu.matmul %3, %5, %cst_5 {dimension_numbers = #tpu.dot_dimension_numbers<[1], [0], [0], [1], [0, 0, 1, 1], [], []>} : vector<8x512xbf16>, vector<512x32xbf16>, vector<8x32xf32> -> vector<8x32xf32>
    %c1 = arith.constant 1 : index
    %c0_6 = arith.constant 0 : index
    %c0_7 = arith.constant 0 : index
    %7 = vector.load %arg1[%c1, %c0_6, %c0_7] : memref<4x8x512xbf16, #tpu.memory_space<vmem>>, vector<1x8x512xbf16>
    %8 = vector.shape_cast %7 : vector<1x8x512xbf16> to vector<8x512xbf16>
    %cst_8 = arith.constant 0.000000e+00 : bf16
    %9 = vector.broadcast %cst_8 : bf16 to vector<8x512xbf16>
    %10 = arith.maximumf %8, %9 : vector<8x512xbf16>
    %c1_9 = arith.constant 1 : index
    %c0_10 = arith.constant 0 : index
    %c0_11 = arith.constant 0 : index
    %11 = vector.load %arg2[%c1_9, %c0_10, %c0_11] : memref<4x512x32xbf16, #tpu.memory_space<vmem>>, vector<1x512x32xbf16>
    %12 = vector.shape_cast %11 : vector<1x512x32xbf16> to vector<512x32xbf16>
    %cst_12 = arith.constant dense<0.000000e+00> : vector<8x32xf32>
    %13 = tpu.matmul %10, %12, %cst_12 {dimension_numbers = #tpu.dot_dimension_numbers<[1], [0], [0], [1], [0, 0, 1, 1], [], []>} : vector<8x512xbf16>, vector<512x32xbf16>, vector<8x32xf32> -> vector<8x32xf32>
    %c2 = arith.constant 2 : index
    %c0_13 = arith.constant 0 : index
    %c0_14 = arith.constant 0 : index
    %14 = vector.load %arg1[%c2, %c0_13, %c0_14] : memref<4x8x512xbf16, #tpu.memory_space<vmem>>, vector<1x8x512xbf16>
    %15 = vector.shape_cast %14 : vector<1x8x512xbf16> to vector<8x512xbf16>
    %cst_15 = arith.constant 0.000000e+00 : bf16
    %16 = vector.broadcast %cst_15 : bf16 to vector<8x512xbf16>
    %17 = arith.maximumf %15, %16 : vector<8x512xbf16>
    %c2_16 = arith.constant 2 : index
    %c0_17 = arith.constant 0 : index
    %c0_18 = arith.constant 0 : index
    %18 = vector.load %arg2[%c2_16, %c0_17, %c0_18] : memref<4x512x32xbf16, #tpu.memory_space<vmem>>, vector<1x512x32xbf16>
    %19 = vector.shape_cast %18 : vector<1x512x32xbf16> to vector<512x32xbf16>
    %cst_19 = arith.constant dense<0.000000e+00> : vector<8x32xf32>
    %20 = tpu.matmul %17, %19, %cst_19 {dimension_numbers = #tpu.dot_dimension_numbers<[1], [0], [0], [1], [0, 0, 1, 1], [], []>} : vector<8x512xbf16>, vector<512x32xbf16>, vector<8x32xf32> -> vector<8x32xf32>
    %c3 = arith.constant 3 : index
    %c0_20 = arith.constant 0 : index
    %c0_21 = arith.constant 0 : index
    %21 = vector.load %arg1[%c3, %c0_20, %c0_21] : memref<4x8x512xbf16, #tpu.memory_space<vmem>>, vector<1x8x512xbf16>
    %22 = vector.shape_cast %21 : vector<1x8x512xbf16> to vector<8x512xbf16>
    %cst_22 = arith.constant 0.000000e+00 : bf16
    %23 = vector.broadcast %cst_22 : bf16 to vector<8x512xbf16>
    %24 = arith.maximumf %22, %23 : vector<8x512xbf16>
    %c3_23 = arith.constant 3 : index
    %c0_24 = arith.constant 0 : index
    %c0_25 = arith.constant 0 : index
    %25 = vector.load %arg2[%c3_23, %c0_24, %c0_25] : memref<4x512x32xbf16, #tpu.memory_space<vmem>>, vector<1x512x32xbf16>
    %26 = vector.shape_cast %25 : vector<1x512x32xbf16> to vector<512x32xbf16>
    %cst_26 = arith.constant dense<0.000000e+00> : vector<8x32xf32>
    %27 = tpu.matmul %24, %26, %cst_26 {dimension_numbers = #tpu.dot_dimension_numbers<[1], [0], [0], [1], [0, 0, 1, 1], [], []>} : vector<8x512xbf16>, vector<512x32xbf16>, vector<8x32xf32> -> vector<8x32xf32>
    %cst_27 = arith.constant dense<0.000000e+00> : vector<32xf32>
    %28 = vector.multi_reduction <add>, %6, %cst_27 [0] : vector<8x32xf32> to vector<32xf32>
    %29 = vector.shape_cast %28 : vector<32xf32> to vector<1x32xf32>
    %cst_28 = arith.constant dense<0.000000e+00> : vector<32xf32>
    %30 = vector.multi_reduction <add>, %13, %cst_28 [0] : vector<8x32xf32> to vector<32xf32>
    %31 = vector.shape_cast %30 : vector<32xf32> to vector<1x32xf32>
    %32 = arith.addf %29, %31 : vector<1x32xf32>
    %cst_29 = arith.constant dense<0.000000e+00> : vector<32xf32>
    %33 = vector.multi_reduction <add>, %20, %cst_29 [0] : vector<8x32xf32> to vector<32xf32>
    %34 = vector.shape_cast %33 : vector<32xf32> to vector<1x32xf32>
    %35 = arith.addf %32, %34 : vector<1x32xf32>
    %cst_30 = arith.constant dense<0.000000e+00> : vector<32xf32>
    %36 = vector.multi_reduction <add>, %27, %cst_30 [0] : vector<8x32xf32> to vector<32xf32>
    %37 = vector.shape_cast %36 : vector<32xf32> to vector<1x32xf32>
    %38 = arith.addf %35, %37 : vector<1x32xf32>
    %cst_31 = arith.constant 3.125000e-02 : f32
    %39 = vector.broadcast %cst_31 : f32 to vector<1x32xf32>
    %40 = arith.mulf %38, %39 : vector<1x32xf32>
    %41 = vector.broadcast %40 : vector<1x32xf32> to vector<8x32xf32>
    %42 = arith.subf %6, %41 : vector<8x32xf32>
    %43 = arith.mulf %42, %42 : vector<8x32xf32>
    %cst_32 = arith.constant dense<0.000000e+00> : vector<32xf32>
    %44 = vector.multi_reduction <add>, %43, %cst_32 [0] : vector<8x32xf32> to vector<32xf32>
    %45 = vector.shape_cast %44 : vector<32xf32> to vector<1x32xf32>
    %46 = vector.broadcast %40 : vector<1x32xf32> to vector<8x32xf32>
    %47 = arith.subf %13, %46 : vector<8x32xf32>
    %48 = arith.mulf %47, %47 : vector<8x32xf32>
    %cst_33 = arith.constant dense<0.000000e+00> : vector<32xf32>
    %49 = vector.multi_reduction <add>, %48, %cst_33 [0] : vector<8x32xf32> to vector<32xf32>
    %50 = vector.shape_cast %49 : vector<32xf32> to vector<1x32xf32>
    %51 = arith.addf %45, %50 : vector<1x32xf32>
    %52 = vector.broadcast %40 : vector<1x32xf32> to vector<8x32xf32>
    %53 = arith.subf %20, %52 : vector<8x32xf32>
    %54 = arith.mulf %53, %53 : vector<8x32xf32>
    %cst_34 = arith.constant dense<0.000000e+00> : vector<32xf32>
    %55 = vector.multi_reduction <add>, %54, %cst_34 [0] : vector<8x32xf32> to vector<32xf32>
    %56 = vector.shape_cast %55 : vector<32xf32> to vector<1x32xf32>
    %57 = arith.addf %51, %56 : vector<1x32xf32>
    %58 = vector.broadcast %40 : vector<1x32xf32> to vector<8x32xf32>
    %59 = arith.subf %27, %58 : vector<8x32xf32>
    %60 = arith.mulf %59, %59 : vector<8x32xf32>
    %cst_35 = arith.constant dense<0.000000e+00> : vector<32xf32>
    %61 = vector.multi_reduction <add>, %60, %cst_35 [0] : vector<8x32xf32> to vector<32xf32>
    %62 = vector.shape_cast %61 : vector<32xf32> to vector<1x32xf32>
    %63 = arith.addf %57, %62 : vector<1x32xf32>
    %cst_36 = arith.constant 3.125000e-02 : f32
    %64 = vector.broadcast %cst_36 : f32 to vector<1x32xf32>
    %65 = arith.mulf %63, %64 : vector<1x32xf32>
    %cst_37 = arith.constant 9.99999974E-6 : f32
    %66 = vector.broadcast %cst_37 : f32 to vector<1x32xf32>
    %67 = arith.addf %65, %66 : vector<1x32xf32>
    %68 = math.rsqrt %67 : vector<1x32xf32>
    %c0_38 = arith.constant 0 : index
    %c0_39 = arith.constant 0 : index
    %69 = vector.load %arg3[%c0_38, %c0_39] : memref<1x32xf32, #tpu.memory_space<vmem>>, vector<1x32xf32>
    %70 = arith.mulf %68, %69 : vector<1x32xf32>
    %c0_40 = arith.constant 0 : index
    %c0_41 = arith.constant 0 : index
    %71 = vector.load %arg4[%c0_40, %c0_41] : memref<1x32xf32, #tpu.memory_space<vmem>>, vector<1x32xf32>
    %72 = arith.mulf %40, %70 : vector<1x32xf32>
    %73 = arith.subf %71, %72 : vector<1x32xf32>
    %74 = vector.broadcast %70 : vector<1x32xf32> to vector<8x32xf32>
    %75 = arith.mulf %6, %74 : vector<8x32xf32>
    %76 = vector.broadcast %73 : vector<1x32xf32> to vector<8x32xf32>
    %77 = arith.addf %75, %76 : vector<8x32xf32>
    %78 = arith.truncf %77 : vector<8x32xf32> to vector<8x32xbf16>
    %c0_42 = arith.constant 0 : index
    %c0_43 = arith.constant 0 : index
    %c0_44 = arith.constant 0 : index
    %79 = vector.load %arg5[%c0_42, %c0_43, %c0_44] : memref<4x8x32xbf16, #tpu.memory_space<vmem>>, vector<1x8x32xbf16>
    %80 = vector.shape_cast %79 : vector<1x8x32xbf16> to vector<8x32xbf16>
    %81 = vector.shape_cast %78 : vector<8x32xbf16> to vector<1x8x32xbf16>
    tpu.vector_store %arg5[%c0_42, %c0_43, %c0_44], %81 {strides = array<i32>} : memref<4x8x32xbf16, #tpu.memory_space<vmem>>, vector<1x8x32xbf16>,
    %82 = vector.broadcast %70 : vector<1x32xf32> to vector<8x32xf32>
    %83 = arith.mulf %13, %82 : vector<8x32xf32>
    %84 = vector.broadcast %73 : vector<1x32xf32> to vector<8x32xf32>
    %85 = arith.addf %83, %84 : vector<8x32xf32>
    %86 = arith.truncf %85 : vector<8x32xf32> to vector<8x32xbf16>
    %c1_45 = arith.constant 1 : index
    %c0_46 = arith.constant 0 : index
    %c0_47 = arith.constant 0 : index
    %87 = vector.load %arg5[%c1_45, %c0_46, %c0_47] : memref<4x8x32xbf16, #tpu.memory_space<vmem>>, vector<1x8x32xbf16>
    %88 = vector.shape_cast %87 : vector<1x8x32xbf16> to vector<8x32xbf16>
    %89 = vector.shape_cast %86 : vector<8x32xbf16> to vector<1x8x32xbf16>
    tpu.vector_store %arg5[%c1_45, %c0_46, %c0_47], %89 {strides = array<i32>} : memref<4x8x32xbf16, #tpu.memory_space<vmem>>, vector<1x8x32xbf16>,
    %90 = vector.broadcast %70 : vector<1x32xf32> to vector<8x32xf32>
    %91 = arith.mulf %20, %90 : vector<8x32xf32>
    %92 = vector.broadcast %73 : vector<1x32xf32> to vector<8x32xf32>
    %93 = arith.addf %91, %92 : vector<8x32xf32>
    %94 = arith.truncf %93 : vector<8x32xf32> to vector<8x32xbf16>
    %c2_48 = arith.constant 2 : index
    %c0_49 = arith.constant 0 : index
    %c0_50 = arith.constant 0 : index
    %95 = vector.load %arg5[%c2_48, %c0_49, %c0_50] : memref<4x8x32xbf16, #tpu.memory_space<vmem>>, vector<1x8x32xbf16>
    %96 = vector.shape_cast %95 : vector<1x8x32xbf16> to vector<8x32xbf16>
    %97 = vector.shape_cast %94 : vector<8x32xbf16> to vector<1x8x32xbf16>
    tpu.vector_store %arg5[%c2_48, %c0_49, %c0_50], %97 {strides = array<i32>} : memref<4x8x32xbf16, #tpu.memory_space<vmem>>, vector<1x8x32xbf16>,
    %98 = vector.broadcast %70 : vector<1x32xf32> to vector<8x32xf32>
    %99 = arith.mulf %27, %98 : vector<8x32xf32>
    %100 = vector.broadcast %73 : vector<1x32xf32> to vector<8x32xf32>
    %101 = arith.addf %99, %100 : vector<8x32xf32>
    %102 = arith.truncf %101 : vector<8x32xf32> to vector<8x32xbf16>
    %c3_51 = arith.constant 3 : index
    %c0_52 = arith.constant 0 : index
    %c0_53 = arith.constant 0 : index
    %103 = vector.load %arg5[%c3_51, %c0_52, %c0_53] : memref<4x8x32xbf16, #tpu.memory_space<vmem>>, vector<1x8x32xbf16>
    %104 = vector.shape_cast %103 : vector<1x8x32xbf16> to vector<8x32xbf16>
    %105 = vector.shape_cast %102 : vector<8x32xbf16> to vector<1x8x32xbf16>
    tpu.vector_store %arg5[%c3_51, %c0_52, %c0_53], %105 {strides = array<i32>} : memref<4x8x32xbf16, #tpu.memory_space<vmem>>, vector<1x8x32xbf16>,
    return
  }
  func.func @transform_0(%arg0: i32) -> (i32, i32, i32) {
    %c0_i32 = arith.constant 0 : i32
    %c0_i32_0 = arith.constant 0 : i32
    %c0_i32_1 = arith.constant 0 : i32
    %c0_i32_2 = arith.constant 0 : i32
    return %c0_i32, %c0_i32_0, %c0_i32_1 : i32, i32, i32
  }
  func.func @transform_1(%arg0: i32) -> (i32, i32, i32) {
    %c0_i32 = arith.constant 0 : i32
    %c0_i32_0 = arith.constant 0 : i32
    %c0_i32_1 = arith.constant 0 : i32
    %c0_i32_2 = arith.constant 0 : i32
    return %c0_i32, %c0_i32_0, %c0_i32_1 : i32, i32, i32
  }
  func.func @transform_2(%arg0: i32) -> (i32, i32) {
    %c0_i32 = arith.constant 0 : i32
    %c0_i32_0 = arith.constant 0 : i32
    %c0_i32_1 = arith.constant 0 : i32
    return %c0_i32, %c0_i32_0 : i32, i32
  }
  func.func @transform_3(%arg0: i32) -> (i32, i32) {
    %c0_i32 = arith.constant 0 : i32
    %c0_i32_0 = arith.constant 0 : i32
    %c0_i32_1 = arith.constant 0 : i32
    return %c0_i32, %c0_i32_0 : i32, i32
  }
  func.func @transform_4(%arg0: i32) -> (i32, i32, i32) {
    %c0_i32 = arith.constant 0 : i32
    %c0_i32_0 = arith.constant 0 : i32
    %c0_i32_1 = arith.constant 0 : i32
    %c0_i32_2 = arith.constant 0 : i32
    return %c0_i32, %c0_i32_0, %c0_i32_1 : i32, i32, i32
  }
}

module attributes {stable_mosaic.version = 11 : i64} {
  func.func @_up_conv_kernel(%arg0: i32, %arg1: memref<4x32x256xbf16, #tpu.memory_space<vmem>>, %arg2: memref<4x256x16xbf16, #tpu.memory_space<vmem>>, %arg3: memref<1x16xf32, #tpu.memory_space<vmem>>, %arg4: memref<1x16xf32, #tpu.memory_space<vmem>>, %arg5: memref<4x32x16xbf16, #tpu.memory_space<vmem>>) attributes {dimension_semantics = [#tpu.dimension_semantics<arbitrary>], iteration_bounds = array<i64: 1>, scalar_prefetch = 0 : i64, scratch_operands = 0 : i64, tpu.core_type = #tpu.core_type<tc>, window_params = [{pipeline_mode = #tpu.pipeline_mode<synchronous>, transform_indices = @transform_0, window_bounds = array<i64: 4, 32, 256>}, {pipeline_mode = #tpu.pipeline_mode<synchronous>, transform_indices = @transform_1, window_bounds = array<i64: 4, 256, 16>}, {pipeline_mode = #tpu.pipeline_mode<synchronous>, transform_indices = @transform_2, window_bounds = array<i64: 1, 16>}, {pipeline_mode = #tpu.pipeline_mode<synchronous>, transform_indices = @transform_3, window_bounds = array<i64: 1, 16>}, {pipeline_mode = #tpu.pipeline_mode<synchronous>, transform_indices = @transform_4, window_bounds = array<i64: 4, 32, 16>}]} {
    %c0 = arith.constant 0 : index
    %c0_0 = arith.constant 0 : index
    %c0_1 = arith.constant 0 : index
    %0 = vector.load %arg1[%c0, %c0_0, %c0_1] : memref<4x32x256xbf16, #tpu.memory_space<vmem>>, vector<1x32x256xbf16>
    %1 = vector.shape_cast %0 : vector<1x32x256xbf16> to vector<32x256xbf16>
    %cst = arith.constant 0.000000e+00 : bf16
    %2 = vector.broadcast %cst : bf16 to vector<32x256xbf16>
    %3 = arith.maximumf %1, %2 : vector<32x256xbf16>
    %c0_2 = arith.constant 0 : index
    %c0_3 = arith.constant 0 : index
    %c0_4 = arith.constant 0 : index
    %4 = vector.load %arg2[%c0_2, %c0_3, %c0_4] : memref<4x256x16xbf16, #tpu.memory_space<vmem>>, vector<1x256x16xbf16>
    %5 = vector.shape_cast %4 : vector<1x256x16xbf16> to vector<256x16xbf16>
    %cst_5 = arith.constant dense<0.000000e+00> : vector<32x16xf32>
    %6 = tpu.matmul %3, %5, %cst_5 {dimension_numbers = #tpu.dot_dimension_numbers<[1], [0], [0], [1], [0, 0, 1, 1], [], []>} : vector<32x256xbf16>, vector<256x16xbf16>, vector<32x16xf32> -> vector<32x16xf32>
    %c1 = arith.constant 1 : index
    %c0_6 = arith.constant 0 : index
    %c0_7 = arith.constant 0 : index
    %7 = vector.load %arg1[%c1, %c0_6, %c0_7] : memref<4x32x256xbf16, #tpu.memory_space<vmem>>, vector<1x32x256xbf16>
    %8 = vector.shape_cast %7 : vector<1x32x256xbf16> to vector<32x256xbf16>
    %cst_8 = arith.constant 0.000000e+00 : bf16
    %9 = vector.broadcast %cst_8 : bf16 to vector<32x256xbf16>
    %10 = arith.maximumf %8, %9 : vector<32x256xbf16>
    %c1_9 = arith.constant 1 : index
    %c0_10 = arith.constant 0 : index
    %c0_11 = arith.constant 0 : index
    %11 = vector.load %arg2[%c1_9, %c0_10, %c0_11] : memref<4x256x16xbf16, #tpu.memory_space<vmem>>, vector<1x256x16xbf16>
    %12 = vector.shape_cast %11 : vector<1x256x16xbf16> to vector<256x16xbf16>
    %cst_12 = arith.constant dense<0.000000e+00> : vector<32x16xf32>
    %13 = tpu.matmul %10, %12, %cst_12 {dimension_numbers = #tpu.dot_dimension_numbers<[1], [0], [0], [1], [0, 0, 1, 1], [], []>} : vector<32x256xbf16>, vector<256x16xbf16>, vector<32x16xf32> -> vector<32x16xf32>
    %c2 = arith.constant 2 : index
    %c0_13 = arith.constant 0 : index
    %c0_14 = arith.constant 0 : index
    %14 = vector.load %arg1[%c2, %c0_13, %c0_14] : memref<4x32x256xbf16, #tpu.memory_space<vmem>>, vector<1x32x256xbf16>
    %15 = vector.shape_cast %14 : vector<1x32x256xbf16> to vector<32x256xbf16>
    %cst_15 = arith.constant 0.000000e+00 : bf16
    %16 = vector.broadcast %cst_15 : bf16 to vector<32x256xbf16>
    %17 = arith.maximumf %15, %16 : vector<32x256xbf16>
    %c2_16 = arith.constant 2 : index
    %c0_17 = arith.constant 0 : index
    %c0_18 = arith.constant 0 : index
    %18 = vector.load %arg2[%c2_16, %c0_17, %c0_18] : memref<4x256x16xbf16, #tpu.memory_space<vmem>>, vector<1x256x16xbf16>
    %19 = vector.shape_cast %18 : vector<1x256x16xbf16> to vector<256x16xbf16>
    %cst_19 = arith.constant dense<0.000000e+00> : vector<32x16xf32>
    %20 = tpu.matmul %17, %19, %cst_19 {dimension_numbers = #tpu.dot_dimension_numbers<[1], [0], [0], [1], [0, 0, 1, 1], [], []>} : vector<32x256xbf16>, vector<256x16xbf16>, vector<32x16xf32> -> vector<32x16xf32>
    %c3 = arith.constant 3 : index
    %c0_20 = arith.constant 0 : index
    %c0_21 = arith.constant 0 : index
    %21 = vector.load %arg1[%c3, %c0_20, %c0_21] : memref<4x32x256xbf16, #tpu.memory_space<vmem>>, vector<1x32x256xbf16>
    %22 = vector.shape_cast %21 : vector<1x32x256xbf16> to vector<32x256xbf16>
    %cst_22 = arith.constant 0.000000e+00 : bf16
    %23 = vector.broadcast %cst_22 : bf16 to vector<32x256xbf16>
    %24 = arith.maximumf %22, %23 : vector<32x256xbf16>
    %c3_23 = arith.constant 3 : index
    %c0_24 = arith.constant 0 : index
    %c0_25 = arith.constant 0 : index
    %25 = vector.load %arg2[%c3_23, %c0_24, %c0_25] : memref<4x256x16xbf16, #tpu.memory_space<vmem>>, vector<1x256x16xbf16>
    %26 = vector.shape_cast %25 : vector<1x256x16xbf16> to vector<256x16xbf16>
    %cst_26 = arith.constant dense<0.000000e+00> : vector<32x16xf32>
    %27 = tpu.matmul %24, %26, %cst_26 {dimension_numbers = #tpu.dot_dimension_numbers<[1], [0], [0], [1], [0, 0, 1, 1], [], []>} : vector<32x256xbf16>, vector<256x16xbf16>, vector<32x16xf32> -> vector<32x16xf32>
    %cst_27 = arith.constant dense<0.000000e+00> : vector<16xf32>
    %28 = vector.multi_reduction <add>, %6, %cst_27 [0] : vector<32x16xf32> to vector<16xf32>
    %29 = vector.shape_cast %28 : vector<16xf32> to vector<1x16xf32>
    %cst_28 = arith.constant dense<0.000000e+00> : vector<16xf32>
    %30 = vector.multi_reduction <add>, %13, %cst_28 [0] : vector<32x16xf32> to vector<16xf32>
    %31 = vector.shape_cast %30 : vector<16xf32> to vector<1x16xf32>
    %32 = arith.addf %29, %31 : vector<1x16xf32>
    %cst_29 = arith.constant dense<0.000000e+00> : vector<16xf32>
    %33 = vector.multi_reduction <add>, %20, %cst_29 [0] : vector<32x16xf32> to vector<16xf32>
    %34 = vector.shape_cast %33 : vector<16xf32> to vector<1x16xf32>
    %35 = arith.addf %32, %34 : vector<1x16xf32>
    %cst_30 = arith.constant dense<0.000000e+00> : vector<16xf32>
    %36 = vector.multi_reduction <add>, %27, %cst_30 [0] : vector<32x16xf32> to vector<16xf32>
    %37 = vector.shape_cast %36 : vector<16xf32> to vector<1x16xf32>
    %38 = arith.addf %35, %37 : vector<1x16xf32>
    %cst_31 = arith.constant 7.812500e-03 : f32
    %39 = vector.broadcast %cst_31 : f32 to vector<1x16xf32>
    %40 = arith.mulf %38, %39 : vector<1x16xf32>
    %41 = vector.broadcast %40 : vector<1x16xf32> to vector<32x16xf32>
    %42 = arith.subf %6, %41 : vector<32x16xf32>
    %43 = arith.mulf %42, %42 : vector<32x16xf32>
    %cst_32 = arith.constant dense<0.000000e+00> : vector<16xf32>
    %44 = vector.multi_reduction <add>, %43, %cst_32 [0] : vector<32x16xf32> to vector<16xf32>
    %45 = vector.shape_cast %44 : vector<16xf32> to vector<1x16xf32>
    %46 = vector.broadcast %40 : vector<1x16xf32> to vector<32x16xf32>
    %47 = arith.subf %13, %46 : vector<32x16xf32>
    %48 = arith.mulf %47, %47 : vector<32x16xf32>
    %cst_33 = arith.constant dense<0.000000e+00> : vector<16xf32>
    %49 = vector.multi_reduction <add>, %48, %cst_33 [0] : vector<32x16xf32> to vector<16xf32>
    %50 = vector.shape_cast %49 : vector<16xf32> to vector<1x16xf32>
    %51 = arith.addf %45, %50 : vector<1x16xf32>
    %52 = vector.broadcast %40 : vector<1x16xf32> to vector<32x16xf32>
    %53 = arith.subf %20, %52 : vector<32x16xf32>
    %54 = arith.mulf %53, %53 : vector<32x16xf32>
    %cst_34 = arith.constant dense<0.000000e+00> : vector<16xf32>
    %55 = vector.multi_reduction <add>, %54, %cst_34 [0] : vector<32x16xf32> to vector<16xf32>
    %56 = vector.shape_cast %55 : vector<16xf32> to vector<1x16xf32>
    %57 = arith.addf %51, %56 : vector<1x16xf32>
    %58 = vector.broadcast %40 : vector<1x16xf32> to vector<32x16xf32>
    %59 = arith.subf %27, %58 : vector<32x16xf32>
    %60 = arith.mulf %59, %59 : vector<32x16xf32>
    %cst_35 = arith.constant dense<0.000000e+00> : vector<16xf32>
    %61 = vector.multi_reduction <add>, %60, %cst_35 [0] : vector<32x16xf32> to vector<16xf32>
    %62 = vector.shape_cast %61 : vector<16xf32> to vector<1x16xf32>
    %63 = arith.addf %57, %62 : vector<1x16xf32>
    %cst_36 = arith.constant 7.812500e-03 : f32
    %64 = vector.broadcast %cst_36 : f32 to vector<1x16xf32>
    %65 = arith.mulf %63, %64 : vector<1x16xf32>
    %cst_37 = arith.constant 9.99999974E-6 : f32
    %66 = vector.broadcast %cst_37 : f32 to vector<1x16xf32>
    %67 = arith.addf %65, %66 : vector<1x16xf32>
    %68 = math.rsqrt %67 : vector<1x16xf32>
    %c0_38 = arith.constant 0 : index
    %c0_39 = arith.constant 0 : index
    %69 = vector.load %arg3[%c0_38, %c0_39] : memref<1x16xf32, #tpu.memory_space<vmem>>, vector<1x16xf32>
    %70 = arith.mulf %68, %69 : vector<1x16xf32>
    %c0_40 = arith.constant 0 : index
    %c0_41 = arith.constant 0 : index
    %71 = vector.load %arg4[%c0_40, %c0_41] : memref<1x16xf32, #tpu.memory_space<vmem>>, vector<1x16xf32>
    %72 = arith.mulf %40, %70 : vector<1x16xf32>
    %73 = arith.subf %71, %72 : vector<1x16xf32>
    %74 = vector.broadcast %70 : vector<1x16xf32> to vector<32x16xf32>
    %75 = arith.mulf %6, %74 : vector<32x16xf32>
    %76 = vector.broadcast %73 : vector<1x16xf32> to vector<32x16xf32>
    %77 = arith.addf %75, %76 : vector<32x16xf32>
    %78 = arith.truncf %77 : vector<32x16xf32> to vector<32x16xbf16>
    %c0_42 = arith.constant 0 : index
    %c0_43 = arith.constant 0 : index
    %c0_44 = arith.constant 0 : index
    %79 = vector.load %arg5[%c0_42, %c0_43, %c0_44] : memref<4x32x16xbf16, #tpu.memory_space<vmem>>, vector<1x32x16xbf16>
    %80 = vector.shape_cast %79 : vector<1x32x16xbf16> to vector<32x16xbf16>
    %81 = vector.shape_cast %78 : vector<32x16xbf16> to vector<1x32x16xbf16>
    tpu.vector_store %arg5[%c0_42, %c0_43, %c0_44], %81 {strides = array<i32>} : memref<4x32x16xbf16, #tpu.memory_space<vmem>>, vector<1x32x16xbf16>,
    %82 = vector.broadcast %70 : vector<1x16xf32> to vector<32x16xf32>
    %83 = arith.mulf %13, %82 : vector<32x16xf32>
    %84 = vector.broadcast %73 : vector<1x16xf32> to vector<32x16xf32>
    %85 = arith.addf %83, %84 : vector<32x16xf32>
    %86 = arith.truncf %85 : vector<32x16xf32> to vector<32x16xbf16>
    %c1_45 = arith.constant 1 : index
    %c0_46 = arith.constant 0 : index
    %c0_47 = arith.constant 0 : index
    %87 = vector.load %arg5[%c1_45, %c0_46, %c0_47] : memref<4x32x16xbf16, #tpu.memory_space<vmem>>, vector<1x32x16xbf16>
    %88 = vector.shape_cast %87 : vector<1x32x16xbf16> to vector<32x16xbf16>
    %89 = vector.shape_cast %86 : vector<32x16xbf16> to vector<1x32x16xbf16>
    tpu.vector_store %arg5[%c1_45, %c0_46, %c0_47], %89 {strides = array<i32>} : memref<4x32x16xbf16, #tpu.memory_space<vmem>>, vector<1x32x16xbf16>,
    %90 = vector.broadcast %70 : vector<1x16xf32> to vector<32x16xf32>
    %91 = arith.mulf %20, %90 : vector<32x16xf32>
    %92 = vector.broadcast %73 : vector<1x16xf32> to vector<32x16xf32>
    %93 = arith.addf %91, %92 : vector<32x16xf32>
    %94 = arith.truncf %93 : vector<32x16xf32> to vector<32x16xbf16>
    %c2_48 = arith.constant 2 : index
    %c0_49 = arith.constant 0 : index
    %c0_50 = arith.constant 0 : index
    %95 = vector.load %arg5[%c2_48, %c0_49, %c0_50] : memref<4x32x16xbf16, #tpu.memory_space<vmem>>, vector<1x32x16xbf16>
    %96 = vector.shape_cast %95 : vector<1x32x16xbf16> to vector<32x16xbf16>
    %97 = vector.shape_cast %94 : vector<32x16xbf16> to vector<1x32x16xbf16>
    tpu.vector_store %arg5[%c2_48, %c0_49, %c0_50], %97 {strides = array<i32>} : memref<4x32x16xbf16, #tpu.memory_space<vmem>>, vector<1x32x16xbf16>,
    %98 = vector.broadcast %70 : vector<1x16xf32> to vector<32x16xf32>
    %99 = arith.mulf %27, %98 : vector<32x16xf32>
    %100 = vector.broadcast %73 : vector<1x16xf32> to vector<32x16xf32>
    %101 = arith.addf %99, %100 : vector<32x16xf32>
    %102 = arith.truncf %101 : vector<32x16xf32> to vector<32x16xbf16>
    %c3_51 = arith.constant 3 : index
    %c0_52 = arith.constant 0 : index
    %c0_53 = arith.constant 0 : index
    %103 = vector.load %arg5[%c3_51, %c0_52, %c0_53] : memref<4x32x16xbf16, #tpu.memory_space<vmem>>, vector<1x32x16xbf16>
    %104 = vector.shape_cast %103 : vector<1x32x16xbf16> to vector<32x16xbf16>
    %105 = vector.shape_cast %102 : vector<32x16xbf16> to vector<1x32x16xbf16>
    tpu.vector_store %arg5[%c3_51, %c0_52, %c0_53], %105 {strides = array<i32>} : memref<4x32x16xbf16, #tpu.memory_space<vmem>>, vector<1x32x16xbf16>,
    return
  }
  func.func @transform_0(%arg0: i32) -> (i32, i32, i32) {
    %c0_i32 = arith.constant 0 : i32
    %c0_i32_0 = arith.constant 0 : i32
    %c0_i32_1 = arith.constant 0 : i32
    %c0_i32_2 = arith.constant 0 : i32
    return %c0_i32, %c0_i32_0, %c0_i32_1 : i32, i32, i32
  }
  func.func @transform_1(%arg0: i32) -> (i32, i32, i32) {
    %c0_i32 = arith.constant 0 : i32
    %c0_i32_0 = arith.constant 0 : i32
    %c0_i32_1 = arith.constant 0 : i32
    %c0_i32_2 = arith.constant 0 : i32
    return %c0_i32, %c0_i32_0, %c0_i32_1 : i32, i32, i32
  }
  func.func @transform_2(%arg0: i32) -> (i32, i32) {
    %c0_i32 = arith.constant 0 : i32
    %c0_i32_0 = arith.constant 0 : i32
    %c0_i32_1 = arith.constant 0 : i32
    return %c0_i32, %c0_i32_0 : i32, i32
  }
  func.func @transform_3(%arg0: i32) -> (i32, i32) {
    %c0_i32 = arith.constant 0 : i32
    %c0_i32_0 = arith.constant 0 : i32
    %c0_i32_1 = arith.constant 0 : i32
    return %c0_i32, %c0_i32_0 : i32, i32
  }
  func.func @transform_4(%arg0: i32) -> (i32, i32, i32) {
    %c0_i32 = arith.constant 0 : i32
    %c0_i32_0 = arith.constant 0 : i32
    %c0_i32_1 = arith.constant 0 : i32
    %c0_i32_2 = arith.constant 0 : i32
    return %c0_i32, %c0_i32_0, %c0_i32_1 : i32, i32, i32
  }
}

module attributes {stable_mosaic.version = 11 : i64} {
  func.func @_up_conv_kernel(%arg0: i32, %arg1: memref<4x128x128xbf16, #tpu.memory_space<vmem>>, %arg2: memref<4x128x8xbf16, #tpu.memory_space<vmem>>, %arg3: memref<1x8xf32, #tpu.memory_space<vmem>>, %arg4: memref<1x8xf32, #tpu.memory_space<vmem>>, %arg5: memref<4x128x8xbf16, #tpu.memory_space<vmem>>) attributes {dimension_semantics = [#tpu.dimension_semantics<arbitrary>], iteration_bounds = array<i64: 1>, scalar_prefetch = 0 : i64, scratch_operands = 0 : i64, tpu.core_type = #tpu.core_type<tc>, window_params = [{pipeline_mode = #tpu.pipeline_mode<synchronous>, transform_indices = @transform_0, window_bounds = array<i64: 4, 128, 128>}, {pipeline_mode = #tpu.pipeline_mode<synchronous>, transform_indices = @transform_1, window_bounds = array<i64: 4, 128, 8>}, {pipeline_mode = #tpu.pipeline_mode<synchronous>, transform_indices = @transform_2, window_bounds = array<i64: 1, 8>}, {pipeline_mode = #tpu.pipeline_mode<synchronous>, transform_indices = @transform_3, window_bounds = array<i64: 1, 8>}, {pipeline_mode = #tpu.pipeline_mode<synchronous>, transform_indices = @transform_4, window_bounds = array<i64: 4, 128, 8>}]} {
    %c0 = arith.constant 0 : index
    %c0_0 = arith.constant 0 : index
    %c0_1 = arith.constant 0 : index
    %0 = vector.load %arg1[%c0, %c0_0, %c0_1] : memref<4x128x128xbf16, #tpu.memory_space<vmem>>, vector<1x128x128xbf16>
    %1 = vector.shape_cast %0 : vector<1x128x128xbf16> to vector<128x128xbf16>
    %cst = arith.constant 0.000000e+00 : bf16
    %2 = vector.broadcast %cst : bf16 to vector<128x128xbf16>
    %3 = arith.maximumf %1, %2 : vector<128x128xbf16>
    %c0_2 = arith.constant 0 : index
    %c0_3 = arith.constant 0 : index
    %c0_4 = arith.constant 0 : index
    %4 = vector.load %arg2[%c0_2, %c0_3, %c0_4] : memref<4x128x8xbf16, #tpu.memory_space<vmem>>, vector<1x128x8xbf16>
    %5 = vector.shape_cast %4 : vector<1x128x8xbf16> to vector<128x8xbf16>
    %cst_5 = arith.constant dense<0.000000e+00> : vector<128x8xf32>
    %6 = tpu.matmul %3, %5, %cst_5 {dimension_numbers = #tpu.dot_dimension_numbers<[1], [0], [0], [1], [0, 0, 1, 1], [], []>} : vector<128x128xbf16>, vector<128x8xbf16>, vector<128x8xf32> -> vector<128x8xf32>
    %c1 = arith.constant 1 : index
    %c0_6 = arith.constant 0 : index
    %c0_7 = arith.constant 0 : index
    %7 = vector.load %arg1[%c1, %c0_6, %c0_7] : memref<4x128x128xbf16, #tpu.memory_space<vmem>>, vector<1x128x128xbf16>
    %8 = vector.shape_cast %7 : vector<1x128x128xbf16> to vector<128x128xbf16>
    %cst_8 = arith.constant 0.000000e+00 : bf16
    %9 = vector.broadcast %cst_8 : bf16 to vector<128x128xbf16>
    %10 = arith.maximumf %8, %9 : vector<128x128xbf16>
    %c1_9 = arith.constant 1 : index
    %c0_10 = arith.constant 0 : index
    %c0_11 = arith.constant 0 : index
    %11 = vector.load %arg2[%c1_9, %c0_10, %c0_11] : memref<4x128x8xbf16, #tpu.memory_space<vmem>>, vector<1x128x8xbf16>
    %12 = vector.shape_cast %11 : vector<1x128x8xbf16> to vector<128x8xbf16>
    %cst_12 = arith.constant dense<0.000000e+00> : vector<128x8xf32>
    %13 = tpu.matmul %10, %12, %cst_12 {dimension_numbers = #tpu.dot_dimension_numbers<[1], [0], [0], [1], [0, 0, 1, 1], [], []>} : vector<128x128xbf16>, vector<128x8xbf16>, vector<128x8xf32> -> vector<128x8xf32>
    %c2 = arith.constant 2 : index
    %c0_13 = arith.constant 0 : index
    %c0_14 = arith.constant 0 : index
    %14 = vector.load %arg1[%c2, %c0_13, %c0_14] : memref<4x128x128xbf16, #tpu.memory_space<vmem>>, vector<1x128x128xbf16>
    %15 = vector.shape_cast %14 : vector<1x128x128xbf16> to vector<128x128xbf16>
    %cst_15 = arith.constant 0.000000e+00 : bf16
    %16 = vector.broadcast %cst_15 : bf16 to vector<128x128xbf16>
    %17 = arith.maximumf %15, %16 : vector<128x128xbf16>
    %c2_16 = arith.constant 2 : index
    %c0_17 = arith.constant 0 : index
    %c0_18 = arith.constant 0 : index
    %18 = vector.load %arg2[%c2_16, %c0_17, %c0_18] : memref<4x128x8xbf16, #tpu.memory_space<vmem>>, vector<1x128x8xbf16>
    %19 = vector.shape_cast %18 : vector<1x128x8xbf16> to vector<128x8xbf16>
    %cst_19 = arith.constant dense<0.000000e+00> : vector<128x8xf32>
    %20 = tpu.matmul %17, %19, %cst_19 {dimension_numbers = #tpu.dot_dimension_numbers<[1], [0], [0], [1], [0, 0, 1, 1], [], []>} : vector<128x128xbf16>, vector<128x8xbf16>, vector<128x8xf32> -> vector<128x8xf32>
    %c3 = arith.constant 3 : index
    %c0_20 = arith.constant 0 : index
    %c0_21 = arith.constant 0 : index
    %21 = vector.load %arg1[%c3, %c0_20, %c0_21] : memref<4x128x128xbf16, #tpu.memory_space<vmem>>, vector<1x128x128xbf16>
    %22 = vector.shape_cast %21 : vector<1x128x128xbf16> to vector<128x128xbf16>
    %cst_22 = arith.constant 0.000000e+00 : bf16
    %23 = vector.broadcast %cst_22 : bf16 to vector<128x128xbf16>
    %24 = arith.maximumf %22, %23 : vector<128x128xbf16>
    %c3_23 = arith.constant 3 : index
    %c0_24 = arith.constant 0 : index
    %c0_25 = arith.constant 0 : index
    %25 = vector.load %arg2[%c3_23, %c0_24, %c0_25] : memref<4x128x8xbf16, #tpu.memory_space<vmem>>, vector<1x128x8xbf16>
    %26 = vector.shape_cast %25 : vector<1x128x8xbf16> to vector<128x8xbf16>
    %cst_26 = arith.constant dense<0.000000e+00> : vector<128x8xf32>
    %27 = tpu.matmul %24, %26, %cst_26 {dimension_numbers = #tpu.dot_dimension_numbers<[1], [0], [0], [1], [0, 0, 1, 1], [], []>} : vector<128x128xbf16>, vector<128x8xbf16>, vector<128x8xf32> -> vector<128x8xf32>
    %cst_27 = arith.constant dense<0.000000e+00> : vector<8xf32>
    %28 = vector.multi_reduction <add>, %6, %cst_27 [0] : vector<128x8xf32> to vector<8xf32>
    %29 = vector.shape_cast %28 : vector<8xf32> to vector<1x8xf32>
    %cst_28 = arith.constant dense<0.000000e+00> : vector<8xf32>
    %30 = vector.multi_reduction <add>, %13, %cst_28 [0] : vector<128x8xf32> to vector<8xf32>
    %31 = vector.shape_cast %30 : vector<8xf32> to vector<1x8xf32>
    %32 = arith.addf %29, %31 : vector<1x8xf32>
    %cst_29 = arith.constant dense<0.000000e+00> : vector<8xf32>
    %33 = vector.multi_reduction <add>, %20, %cst_29 [0] : vector<128x8xf32> to vector<8xf32>
    %34 = vector.shape_cast %33 : vector<8xf32> to vector<1x8xf32>
    %35 = arith.addf %32, %34 : vector<1x8xf32>
    %cst_30 = arith.constant dense<0.000000e+00> : vector<8xf32>
    %36 = vector.multi_reduction <add>, %27, %cst_30 [0] : vector<128x8xf32> to vector<8xf32>
    %37 = vector.shape_cast %36 : vector<8xf32> to vector<1x8xf32>
    %38 = arith.addf %35, %37 : vector<1x8xf32>
    %cst_31 = arith.constant 0.001953125 : f32
    %39 = vector.broadcast %cst_31 : f32 to vector<1x8xf32>
    %40 = arith.mulf %38, %39 : vector<1x8xf32>
    %41 = vector.broadcast %40 : vector<1x8xf32> to vector<128x8xf32>
    %42 = arith.subf %6, %41 : vector<128x8xf32>
    %43 = arith.mulf %42, %42 : vector<128x8xf32>
    %cst_32 = arith.constant dense<0.000000e+00> : vector<8xf32>
    %44 = vector.multi_reduction <add>, %43, %cst_32 [0] : vector<128x8xf32> to vector<8xf32>
    %45 = vector.shape_cast %44 : vector<8xf32> to vector<1x8xf32>
    %46 = vector.broadcast %40 : vector<1x8xf32> to vector<128x8xf32>
    %47 = arith.subf %13, %46 : vector<128x8xf32>
    %48 = arith.mulf %47, %47 : vector<128x8xf32>
    %cst_33 = arith.constant dense<0.000000e+00> : vector<8xf32>
    %49 = vector.multi_reduction <add>, %48, %cst_33 [0] : vector<128x8xf32> to vector<8xf32>
    %50 = vector.shape_cast %49 : vector<8xf32> to vector<1x8xf32>
    %51 = arith.addf %45, %50 : vector<1x8xf32>
    %52 = vector.broadcast %40 : vector<1x8xf32> to vector<128x8xf32>
    %53 = arith.subf %20, %52 : vector<128x8xf32>
    %54 = arith.mulf %53, %53 : vector<128x8xf32>
    %cst_34 = arith.constant dense<0.000000e+00> : vector<8xf32>
    %55 = vector.multi_reduction <add>, %54, %cst_34 [0] : vector<128x8xf32> to vector<8xf32>
    %56 = vector.shape_cast %55 : vector<8xf32> to vector<1x8xf32>
    %57 = arith.addf %51, %56 : vector<1x8xf32>
    %58 = vector.broadcast %40 : vector<1x8xf32> to vector<128x8xf32>
    %59 = arith.subf %27, %58 : vector<128x8xf32>
    %60 = arith.mulf %59, %59 : vector<128x8xf32>
    %cst_35 = arith.constant dense<0.000000e+00> : vector<8xf32>
    %61 = vector.multi_reduction <add>, %60, %cst_35 [0] : vector<128x8xf32> to vector<8xf32>
    %62 = vector.shape_cast %61 : vector<8xf32> to vector<1x8xf32>
    %63 = arith.addf %57, %62 : vector<1x8xf32>
    %cst_36 = arith.constant 0.001953125 : f32
    %64 = vector.broadcast %cst_36 : f32 to vector<1x8xf32>
    %65 = arith.mulf %63, %64 : vector<1x8xf32>
    %cst_37 = arith.constant 9.99999974E-6 : f32
    %66 = vector.broadcast %cst_37 : f32 to vector<1x8xf32>
    %67 = arith.addf %65, %66 : vector<1x8xf32>
    %68 = math.rsqrt %67 : vector<1x8xf32>
    %c0_38 = arith.constant 0 : index
    %c0_39 = arith.constant 0 : index
    %69 = vector.load %arg3[%c0_38, %c0_39] : memref<1x8xf32, #tpu.memory_space<vmem>>, vector<1x8xf32>
    %70 = arith.mulf %68, %69 : vector<1x8xf32>
    %c0_40 = arith.constant 0 : index
    %c0_41 = arith.constant 0 : index
    %71 = vector.load %arg4[%c0_40, %c0_41] : memref<1x8xf32, #tpu.memory_space<vmem>>, vector<1x8xf32>
    %72 = arith.mulf %40, %70 : vector<1x8xf32>
    %73 = arith.subf %71, %72 : vector<1x8xf32>
    %74 = vector.broadcast %70 : vector<1x8xf32> to vector<128x8xf32>
    %75 = arith.mulf %6, %74 : vector<128x8xf32>
    %76 = vector.broadcast %73 : vector<1x8xf32> to vector<128x8xf32>
    %77 = arith.addf %75, %76 : vector<128x8xf32>
    %78 = arith.truncf %77 : vector<128x8xf32> to vector<128x8xbf16>
    %c0_42 = arith.constant 0 : index
    %c0_43 = arith.constant 0 : index
    %c0_44 = arith.constant 0 : index
    %79 = vector.load %arg5[%c0_42, %c0_43, %c0_44] : memref<4x128x8xbf16, #tpu.memory_space<vmem>>, vector<1x128x8xbf16>
    %80 = vector.shape_cast %79 : vector<1x128x8xbf16> to vector<128x8xbf16>
    %81 = vector.shape_cast %78 : vector<128x8xbf16> to vector<1x128x8xbf16>
    tpu.vector_store %arg5[%c0_42, %c0_43, %c0_44], %81 {strides = array<i32>} : memref<4x128x8xbf16, #tpu.memory_space<vmem>>, vector<1x128x8xbf16>,
    %82 = vector.broadcast %70 : vector<1x8xf32> to vector<128x8xf32>
    %83 = arith.mulf %13, %82 : vector<128x8xf32>
    %84 = vector.broadcast %73 : vector<1x8xf32> to vector<128x8xf32>
    %85 = arith.addf %83, %84 : vector<128x8xf32>
    %86 = arith.truncf %85 : vector<128x8xf32> to vector<128x8xbf16>
    %c1_45 = arith.constant 1 : index
    %c0_46 = arith.constant 0 : index
    %c0_47 = arith.constant 0 : index
    %87 = vector.load %arg5[%c1_45, %c0_46, %c0_47] : memref<4x128x8xbf16, #tpu.memory_space<vmem>>, vector<1x128x8xbf16>
    %88 = vector.shape_cast %87 : vector<1x128x8xbf16> to vector<128x8xbf16>
    %89 = vector.shape_cast %86 : vector<128x8xbf16> to vector<1x128x8xbf16>
    tpu.vector_store %arg5[%c1_45, %c0_46, %c0_47], %89 {strides = array<i32>} : memref<4x128x8xbf16, #tpu.memory_space<vmem>>, vector<1x128x8xbf16>,
    %90 = vector.broadcast %70 : vector<1x8xf32> to vector<128x8xf32>
    %91 = arith.mulf %20, %90 : vector<128x8xf32>
    %92 = vector.broadcast %73 : vector<1x8xf32> to vector<128x8xf32>
    %93 = arith.addf %91, %92 : vector<128x8xf32>
    %94 = arith.truncf %93 : vector<128x8xf32> to vector<128x8xbf16>
    %c2_48 = arith.constant 2 : index
    %c0_49 = arith.constant 0 : index
    %c0_50 = arith.constant 0 : index
    %95 = vector.load %arg5[%c2_48, %c0_49, %c0_50] : memref<4x128x8xbf16, #tpu.memory_space<vmem>>, vector<1x128x8xbf16>
    %96 = vector.shape_cast %95 : vector<1x128x8xbf16> to vector<128x8xbf16>
    %97 = vector.shape_cast %94 : vector<128x8xbf16> to vector<1x128x8xbf16>
    tpu.vector_store %arg5[%c2_48, %c0_49, %c0_50], %97 {strides = array<i32>} : memref<4x128x8xbf16, #tpu.memory_space<vmem>>, vector<1x128x8xbf16>,
    %98 = vector.broadcast %70 : vector<1x8xf32> to vector<128x8xf32>
    %99 = arith.mulf %27, %98 : vector<128x8xf32>
    %100 = vector.broadcast %73 : vector<1x8xf32> to vector<128x8xf32>
    %101 = arith.addf %99, %100 : vector<128x8xf32>
    %102 = arith.truncf %101 : vector<128x8xf32> to vector<128x8xbf16>
    %c3_51 = arith.constant 3 : index
    %c0_52 = arith.constant 0 : index
    %c0_53 = arith.constant 0 : index
    %103 = vector.load %arg5[%c3_51, %c0_52, %c0_53] : memref<4x128x8xbf16, #tpu.memory_space<vmem>>, vector<1x128x8xbf16>
    %104 = vector.shape_cast %103 : vector<1x128x8xbf16> to vector<128x8xbf16>
    %105 = vector.shape_cast %102 : vector<128x8xbf16> to vector<1x128x8xbf16>
    tpu.vector_store %arg5[%c3_51, %c0_52, %c0_53], %105 {strides = array<i32>} : memref<4x128x8xbf16, #tpu.memory_space<vmem>>, vector<1x128x8xbf16>,
    return
  }
  func.func @transform_0(%arg0: i32) -> (i32, i32, i32) {
    %c0_i32 = arith.constant 0 : i32
    %c0_i32_0 = arith.constant 0 : i32
    %c0_i32_1 = arith.constant 0 : i32
    %c0_i32_2 = arith.constant 0 : i32
    return %c0_i32, %c0_i32_0, %c0_i32_1 : i32, i32, i32
  }
  func.func @transform_1(%arg0: i32) -> (i32, i32, i32) {
    %c0_i32 = arith.constant 0 : i32
    %c0_i32_0 = arith.constant 0 : i32
    %c0_i32_1 = arith.constant 0 : i32
    %c0_i32_2 = arith.constant 0 : i32
    return %c0_i32, %c0_i32_0, %c0_i32_1 : i32, i32, i32
  }
  func.func @transform_2(%arg0: i32) -> (i32, i32) {
    %c0_i32 = arith.constant 0 : i32
    %c0_i32_0 = arith.constant 0 : i32
    %c0_i32_1 = arith.constant 0 : i32
    return %c0_i32, %c0_i32_0 : i32, i32
  }
  func.func @transform_3(%arg0: i32) -> (i32, i32) {
    %c0_i32 = arith.constant 0 : i32
    %c0_i32_0 = arith.constant 0 : i32
    %c0_i32_1 = arith.constant 0 : i32
    return %c0_i32, %c0_i32_0 : i32, i32
  }
  func.func @transform_4(%arg0: i32) -> (i32, i32, i32) {
    %c0_i32 = arith.constant 0 : i32
    %c0_i32_0 = arith.constant 0 : i32
    %c0_i32_1 = arith.constant 0 : i32
    %c0_i32_2 = arith.constant 0 : i32
    return %c0_i32, %c0_i32_0, %c0_i32_1 : i32, i32, i32
  }
}

module attributes {stable_mosaic.version = 11 : i64} {
  func.func @_up_conv_kernel(%arg0: i32, %arg1: memref<4x512x64xbf16, #tpu.memory_space<vmem>>, %arg2: memref<4x64x2xbf16, #tpu.memory_space<vmem>>, %arg3: memref<1x2xf32, #tpu.memory_space<vmem>>, %arg4: memref<4x512x2xf32, #tpu.memory_space<vmem>>) attributes {dimension_semantics = [#tpu.dimension_semantics<arbitrary>], iteration_bounds = array<i64: 1>, scalar_prefetch = 0 : i64, scratch_operands = 0 : i64, tpu.core_type = #tpu.core_type<tc>, window_params = [{pipeline_mode = #tpu.pipeline_mode<synchronous>, transform_indices = @transform_0, window_bounds = array<i64: 4, 512, 64>}, {pipeline_mode = #tpu.pipeline_mode<synchronous>, transform_indices = @transform_1, window_bounds = array<i64: 4, 64, 2>}, {pipeline_mode = #tpu.pipeline_mode<synchronous>, transform_indices = @transform_2, window_bounds = array<i64: 1, 2>}, {pipeline_mode = #tpu.pipeline_mode<synchronous>, transform_indices = @transform_3, window_bounds = array<i64: 4, 512, 2>}]} {
    %c0 = arith.constant 0 : index
    %c0_0 = arith.constant 0 : index
    %c0_1 = arith.constant 0 : index
    %0 = vector.load %arg1[%c0, %c0_0, %c0_1] : memref<4x512x64xbf16, #tpu.memory_space<vmem>>, vector<1x512x64xbf16>
    %1 = vector.shape_cast %0 : vector<1x512x64xbf16> to vector<512x64xbf16>
    %cst = arith.constant 0.000000e+00 : bf16
    %2 = vector.broadcast %cst : bf16 to vector<512x64xbf16>
    %3 = arith.maximumf %1, %2 : vector<512x64xbf16>
    %c0_2 = arith.constant 0 : index
    %c0_3 = arith.constant 0 : index
    %c0_4 = arith.constant 0 : index
    %4 = vector.load %arg2[%c0_2, %c0_3, %c0_4] : memref<4x64x2xbf16, #tpu.memory_space<vmem>>, vector<1x64x2xbf16>
    %5 = vector.shape_cast %4 : vector<1x64x2xbf16> to vector<64x2xbf16>
    %cst_5 = arith.constant dense<0.000000e+00> : vector<512x2xf32>
    %6 = tpu.matmul %3, %5, %cst_5 {dimension_numbers = #tpu.dot_dimension_numbers<[1], [0], [0], [1], [0, 0, 1, 1], [], []>} : vector<512x64xbf16>, vector<64x2xbf16>, vector<512x2xf32> -> vector<512x2xf32>
    %c1 = arith.constant 1 : index
    %c0_6 = arith.constant 0 : index
    %c0_7 = arith.constant 0 : index
    %7 = vector.load %arg1[%c1, %c0_6, %c0_7] : memref<4x512x64xbf16, #tpu.memory_space<vmem>>, vector<1x512x64xbf16>
    %8 = vector.shape_cast %7 : vector<1x512x64xbf16> to vector<512x64xbf16>
    %cst_8 = arith.constant 0.000000e+00 : bf16
    %9 = vector.broadcast %cst_8 : bf16 to vector<512x64xbf16>
    %10 = arith.maximumf %8, %9 : vector<512x64xbf16>
    %c1_9 = arith.constant 1 : index
    %c0_10 = arith.constant 0 : index
    %c0_11 = arith.constant 0 : index
    %11 = vector.load %arg2[%c1_9, %c0_10, %c0_11] : memref<4x64x2xbf16, #tpu.memory_space<vmem>>, vector<1x64x2xbf16>
    %12 = vector.shape_cast %11 : vector<1x64x2xbf16> to vector<64x2xbf16>
    %cst_12 = arith.constant dense<0.000000e+00> : vector<512x2xf32>
    %13 = tpu.matmul %10, %12, %cst_12 {dimension_numbers = #tpu.dot_dimension_numbers<[1], [0], [0], [1], [0, 0, 1, 1], [], []>} : vector<512x64xbf16>, vector<64x2xbf16>, vector<512x2xf32> -> vector<512x2xf32>
    %c2 = arith.constant 2 : index
    %c0_13 = arith.constant 0 : index
    %c0_14 = arith.constant 0 : index
    %14 = vector.load %arg1[%c2, %c0_13, %c0_14] : memref<4x512x64xbf16, #tpu.memory_space<vmem>>, vector<1x512x64xbf16>
    %15 = vector.shape_cast %14 : vector<1x512x64xbf16> to vector<512x64xbf16>
    %cst_15 = arith.constant 0.000000e+00 : bf16
    %16 = vector.broadcast %cst_15 : bf16 to vector<512x64xbf16>
    %17 = arith.maximumf %15, %16 : vector<512x64xbf16>
    %c2_16 = arith.constant 2 : index
    %c0_17 = arith.constant 0 : index
    %c0_18 = arith.constant 0 : index
    %18 = vector.load %arg2[%c2_16, %c0_17, %c0_18] : memref<4x64x2xbf16, #tpu.memory_space<vmem>>, vector<1x64x2xbf16>
    %19 = vector.shape_cast %18 : vector<1x64x2xbf16> to vector<64x2xbf16>
    %cst_19 = arith.constant dense<0.000000e+00> : vector<512x2xf32>
    %20 = tpu.matmul %17, %19, %cst_19 {dimension_numbers = #tpu.dot_dimension_numbers<[1], [0], [0], [1], [0, 0, 1, 1], [], []>} : vector<512x64xbf16>, vector<64x2xbf16>, vector<512x2xf32> -> vector<512x2xf32>
    %c3 = arith.constant 3 : index
    %c0_20 = arith.constant 0 : index
    %c0_21 = arith.constant 0 : index
    %21 = vector.load %arg1[%c3, %c0_20, %c0_21] : memref<4x512x64xbf16, #tpu.memory_space<vmem>>, vector<1x512x64xbf16>
    %22 = vector.shape_cast %21 : vector<1x512x64xbf16> to vector<512x64xbf16>
    %cst_22 = arith.constant 0.000000e+00 : bf16
    %23 = vector.broadcast %cst_22 : bf16 to vector<512x64xbf16>
    %24 = arith.maximumf %22, %23 : vector<512x64xbf16>
    %c3_23 = arith.constant 3 : index
    %c0_24 = arith.constant 0 : index
    %c0_25 = arith.constant 0 : index
    %25 = vector.load %arg2[%c3_23, %c0_24, %c0_25] : memref<4x64x2xbf16, #tpu.memory_space<vmem>>, vector<1x64x2xbf16>
    %26 = vector.shape_cast %25 : vector<1x64x2xbf16> to vector<64x2xbf16>
    %cst_26 = arith.constant dense<0.000000e+00> : vector<512x2xf32>
    %27 = tpu.matmul %24, %26, %cst_26 {dimension_numbers = #tpu.dot_dimension_numbers<[1], [0], [0], [1], [0, 0, 1, 1], [], []>} : vector<512x64xbf16>, vector<64x2xbf16>, vector<512x2xf32> -> vector<512x2xf32>
    %c0_27 = arith.constant 0 : index
    %c0_28 = arith.constant 0 : index
    %28 = vector.load %arg3[%c0_27, %c0_28] : memref<1x2xf32, #tpu.memory_space<vmem>>, vector<1x2xf32>
    %29 = vector.broadcast %28 : vector<1x2xf32> to vector<512x2xf32>
    %30 = arith.addf %6, %29 : vector<512x2xf32>
    %c0_29 = arith.constant 0 : index
    %c0_30 = arith.constant 0 : index
    %c0_31 = arith.constant 0 : index
    %31 = vector.load %arg4[%c0_29, %c0_30, %c0_31] : memref<4x512x2xf32, #tpu.memory_space<vmem>>, vector<1x512x2xf32>
    %32 = vector.shape_cast %31 : vector<1x512x2xf32> to vector<512x2xf32>
    %33 = vector.shape_cast %30 : vector<512x2xf32> to vector<1x512x2xf32>
    tpu.vector_store %arg4[%c0_29, %c0_30, %c0_31], %33 {strides = array<i32>} : memref<4x512x2xf32, #tpu.memory_space<vmem>>, vector<1x512x2xf32>,
    %c0_32 = arith.constant 0 : index
    %c0_33 = arith.constant 0 : index
    %34 = vector.load %arg3[%c0_32, %c0_33] : memref<1x2xf32, #tpu.memory_space<vmem>>, vector<1x2xf32>
    %35 = vector.broadcast %34 : vector<1x2xf32> to vector<512x2xf32>
    %36 = arith.addf %13, %35 : vector<512x2xf32>
    %c1_34 = arith.constant 1 : index
    %c0_35 = arith.constant 0 : index
    %c0_36 = arith.constant 0 : index
    %37 = vector.load %arg4[%c1_34, %c0_35, %c0_36] : memref<4x512x2xf32, #tpu.memory_space<vmem>>, vector<1x512x2xf32>
    %38 = vector.shape_cast %37 : vector<1x512x2xf32> to vector<512x2xf32>
    %39 = vector.shape_cast %36 : vector<512x2xf32> to vector<1x512x2xf32>
    tpu.vector_store %arg4[%c1_34, %c0_35, %c0_36], %39 {strides = array<i32>} : memref<4x512x2xf32, #tpu.memory_space<vmem>>, vector<1x512x2xf32>,
    %c0_37 = arith.constant 0 : index
    %c0_38 = arith.constant 0 : index
    %40 = vector.load %arg3[%c0_37, %c0_38] : memref<1x2xf32, #tpu.memory_space<vmem>>, vector<1x2xf32>
    %41 = vector.broadcast %40 : vector<1x2xf32> to vector<512x2xf32>
    %42 = arith.addf %20, %41 : vector<512x2xf32>
    %c2_39 = arith.constant 2 : index
    %c0_40 = arith.constant 0 : index
    %c0_41 = arith.constant 0 : index
    %43 = vector.load %arg4[%c2_39, %c0_40, %c0_41] : memref<4x512x2xf32, #tpu.memory_space<vmem>>, vector<1x512x2xf32>
    %44 = vector.shape_cast %43 : vector<1x512x2xf32> to vector<512x2xf32>
    %45 = vector.shape_cast %42 : vector<512x2xf32> to vector<1x512x2xf32>
    tpu.vector_store %arg4[%c2_39, %c0_40, %c0_41], %45 {strides = array<i32>} : memref<4x512x2xf32, #tpu.memory_space<vmem>>, vector<1x512x2xf32>,
    %c0_42 = arith.constant 0 : index
    %c0_43 = arith.constant 0 : index
    %46 = vector.load %arg3[%c0_42, %c0_43] : memref<1x2xf32, #tpu.memory_space<vmem>>, vector<1x2xf32>
    %47 = vector.broadcast %46 : vector<1x2xf32> to vector<512x2xf32>
    %48 = arith.addf %27, %47 : vector<512x2xf32>
    %c3_44 = arith.constant 3 : index
    %c0_45 = arith.constant 0 : index
    %c0_46 = arith.constant 0 : index
    %49 = vector.load %arg4[%c3_44, %c0_45, %c0_46] : memref<4x512x2xf32, #tpu.memory_space<vmem>>, vector<1x512x2xf32>
    %50 = vector.shape_cast %49 : vector<1x512x2xf32> to vector<512x2xf32>
    %51 = vector.shape_cast %48 : vector<512x2xf32> to vector<1x512x2xf32>
    tpu.vector_store %arg4[%c3_44, %c0_45, %c0_46], %51 {strides = array<i32>} : memref<4x512x2xf32, #tpu.memory_space<vmem>>, vector<1x512x2xf32>,
    return
  }
  func.func @transform_0(%arg0: i32) -> (i32, i32, i32) {
    %c0_i32 = arith.constant 0 : i32
    %c0_i32_0 = arith.constant 0 : i32
    %c0_i32_1 = arith.constant 0 : i32
    %c0_i32_2 = arith.constant 0 : i32
    return %c0_i32, %c0_i32_0, %c0_i32_1 : i32, i32, i32
  }
  func.func @transform_1(%arg0: i32) -> (i32, i32, i32) {
    %c0_i32 = arith.constant 0 : i32
    %c0_i32_0 = arith.constant 0 : i32
    %c0_i32_1 = arith.constant 0 : i32
    %c0_i32_2 = arith.constant 0 : i32
    return %c0_i32, %c0_i32_0, %c0_i32_1 : i32, i32, i32
  }
  func.func @transform_2(%arg0: i32) -> (i32, i32) {
    %c0_i32 = arith.constant 0 : i32
    %c0_i32_0 = arith.constant 0 : i32
    %c0_i32_1 = arith.constant 0 : i32
    return %c0_i32, %c0_i32_0 : i32, i32
  }
  func.func @transform_3(%arg0: i32) -> (i32, i32, i32) {
    %c0_i32 = arith.constant 0 : i32
    %c0_i32_0 = arith.constant 0 : i32
    %c0_i32_1 = arith.constant 0 : i32
    %c0_i32_2 = arith.constant 0 : i32
    return %c0_i32, %c0_i32_0, %c0_i32_1 : i32, i32, i32
  }
}

</mosaic_0001>

<bundles_post_ra>
// kernel: _lambda_.9
= control target key start
LH: loop header
LB: loop body
LE: loop exit
PB: predicated region body
PF: predicated region fallthrough
CT: control target
= control target key end

     0   :  { %vm260_vm0 = vcmask 392192   ;;  %vm902_vm1 = vcmask 60416   ;;  %s1720_s1 = inlined_call_operand.vmem [shape: bf16[48,8], index: 1, kind: input, shape index: {}]   ;;  %s1721_s0 = inlined_call_operand.vmem [shape: bf16[512,48], index: 0, kind: input, shape index: {}]   ;;  %s1722_s2 = inlined_call_operand.vmem [shape: bf16[512,8], index: 2, kind: output, shape index: {}]  }
   0x1   :  { %v1277_v0 = vld [vmem:[%s1720_s1] sm:$0xff]   ;;  %v1278_v1 = vld [vmem:[%s1720_s1 + $0x8] sm:$0xff]   ;;  %v1279_v2 = vld [vmem:[%s1720_s1 + $0x10] sm:$0xff]  }
   0x2   :  { %1201 = vmatprep.subr.bf16.mxu0 %v1277_v0  ;;  %1271 = vmatprep.subr.bf16.mxu1 %v1277_v0  ;;  %v1280_v3 = vld [vmem:[%s1721_s0] sm:$0xff]   ;;  %v1282_v5 = vld [vmem:[%s1721_s0 + $0x8] sm:$0xff]   ;;  %v1284_v7 = vld [vmem:[%s1721_s0 + $0x10] sm:$0xff]  }
   0x3   :  { %1202 = vmatpush3.bf16.msra.mxu0 %v1277_v0  ;;  %1274 = vmatpush3.bf16.msra.mxu1 %v1277_v0  ;;  %v1281_v4 = vld [vmem:[%s1721_s0 + $0x80] sm:$0xff]   ;;  %v1283_v6 = vld [vmem:[%s1721_s0 + $0x88] sm:$0xff]   ;;  %v1285_v8 = vld [vmem:[%s1721_s0 + $0x90] sm:$0xff]  }
   0x4   :  { %1203 = vmatprep.subr.bf16.mxu0 %v1278_v1  ;;  %1272 = vmatprep.subr.bf16.mxu1 %v1278_v1  ;;  %v1286_v9 = vld [vmem:[%s1721_s0 + $0x18] sm:$0xff]   ;;  %v1288_v11 = vld [vmem:[%s1721_s0 + $0x20] sm:$0xff]   ;;  %v1290_v13 = vld [vmem:[%s1721_s0 + $0x28] sm:$0xff]  }
   0x5   :  { %1207 = vmatprep.mubr.msk.bf16.mxu0 %vm260_vm0, %v1280_v3  ;;  %1239 = vmatprep.mubr.msk.bf16.mxu1 %vm260_vm0, %v1281_v4  ;;  %v1287_v10 = vld [vmem:[%s1721_s0 + $0x98] sm:$0xff]   ;;  %v1289_v12 = vld [vmem:[%s1721_s0 + $0xa0] sm:$0xff]   ;;  %v1291_v14 = vld [vmem:[%s1721_s0 + $0xa8] sm:$0xff]  }
   0x6   :  { %v1292_v15 = vld [vmem:[%s1721_s0 + $0x30] sm:$0xff]   ;;  %v1294_v17 = vld [vmem:[%s1721_s0 + $0x38] sm:$0xff]   ;;  %v1296_v19 = vld [vmem:[%s1721_s0 + $0x40] sm:$0xff]  }
   0x7   :  { %1204 = vmatpush3.bf16.msra.mxu0 %v1278_v1  ;;  %1275 = vmatpush3.bf16.msra.mxu1 %v1278_v1  ;;  %v1293_v16 = vld [vmem:[%s1721_s0 + $0xb0] sm:$0xff]   ;;  %v1295_v18 = vld [vmem:[%s1721_s0 + $0xb8] sm:$0xff]   ;;  %v1297_v20 = vld [vmem:[%s1721_s0 + $0xc0] sm:$0xff]  }
   0x8   :  { %1205 = vmatprep.subr.bf16.mxu0 %v1279_v2  ;;  %1273 = vmatprep.subr.bf16.mxu1 %v1279_v2  ;;  %v1298_v21 = vld [vmem:[%s1721_s0 + $0x48] sm:$0xff]   ;;  %v1300_v23 = vld [vmem:[%s1721_s0 + $0x50] sm:$0xff]   ;;  %v1302_v25 = vld [vmem:[%s1721_s0 + $0x58] sm:$0xff]  }
   0x9   :  { %v1299_v22 = vld [vmem:[%s1721_s0 + $0xc8] sm:$0xff]   ;;  %v1301_v24 = vld [vmem:[%s1721_s0 + $0xd0] sm:$0xff]   ;;  %v1303_v26 = vld [vmem:[%s1721_s0 + $0xd8] sm:$0xff]  }
   0xa   :  { %v1304_v27 = vld [vmem:[%s1721_s0 + $0x60] sm:$0xff]   ;;  %v1306_v29 = vld [vmem:[%s1721_s0 + $0x68] sm:$0xff]   ;;  %v1308_v31 = vld [vmem:[%s1721_s0 + $0x70] sm:$0xff]  }
   0xb   :  { %1206 = vmatpush3.bf16.msra.mxu0 %v1279_v2  ;;  %1276 = vmatpush3.bf16.msra.mxu1 %v1279_v2  ;;  %v1305_v28 = vld [vmem:[%s1721_s0 + $0xe0] sm:$0xff]   ;;  %v1307_v30 = vld [vmem:[%s1721_s0 + $0xe8] sm:$0xff]   ;;  %v1309_v32 = vld [vmem:[%s1721_s0 + $0xf0] sm:$0xff]  }
   0xc   :  { %v1310_v33 = vld [vmem:[%s1721_s0 + $0x78] sm:$0xff]  }
   0xd   :  { %v1311_v34 = vld [vmem:[%s1721_s0 + $0xf8] sm:$0xff]  }
   0xe   :  { %1208 = vmatmul.mubr.msk.bf16.vlgmr.msra.gmra.mrb[0].mxu0 %vm260_vm0, %v1282_v5  ;;  %1240 = vmatmul.mubr.msk.bf16.vlgmr.msra.gmra.mrb[0].mxu1 %vm260_vm0, %v1283_v6 }
   0xf   :  { %1211 = vmatprep.mubr.msk.bf16.mxu0 %vm260_vm0, %v1284_v7  ;;  %1243 = vmatprep.mubr.msk.bf16.mxu1 %vm260_vm0, %v1285_v8 }
  0x16   :  { %1212 = vmatmul.mubr.msk.bf16.gmra.mrb[4].mxu0 %vm260_vm0, %v1286_v9  ;;  %1244 = vmatmul.mubr.msk.bf16.gmra.mrb[4].mxu1 %vm260_vm0, %v1287_v10 }
  0x17   :  { %1215 = vmatprep.mubr.msk.bf16.mxu0 %vm260_vm0, %v1288_v11  ;;  %1247 = vmatprep.mubr.msk.bf16.mxu1 %vm260_vm0, %v1289_v12 }
  0x1e   :  { %1216 = vmatmul.mubr.msk.bf16.gmra.mrb[8].mxu0 %vm260_vm0, %v1290_v13  ;;  %1248 = vmatmul.mubr.msk.bf16.gmra.mrb[8].mxu1 %vm260_vm0, %v1291_v14 }
  0x1f   :  { %1219 = vmatprep.mubr.msk.bf16.mxu0 %vm260_vm0, %v1292_v15  ;;  %1251 = vmatprep.mubr.msk.bf16.mxu1 %vm260_vm0, %v1293_v16 }
  0x26   :  { %1220 = vmatmul.mubr.msk.bf16.gmra.mrb[12].mxu0 %vm260_vm0, %v1294_v17  ;;  %1252 = vmatmul.mubr.msk.bf16.gmra.mrb[12].mxu1 %vm260_vm0, %v1295_v18 }
  0x27   :  { %1223 = vmatprep.mubr.msk.bf16.mxu0 %vm260_vm0, %v1296_v19  ;;  %1255 = vmatprep.mubr.msk.bf16.mxu1 %vm260_vm0, %v1297_v20 }
  0x2e   :  { %1224 = vmatmul.mubr.msk.bf16.gmra.mrb[16].mxu0 %vm260_vm0, %v1298_v21  ;;  %1256 = vmatmul.mubr.msk.bf16.gmra.mrb[16].mxu1 %vm260_vm0, %v1299_v22 }
  0x2f   :  { %1227 = vmatprep.mubr.msk.bf16.mxu0 %vm260_vm0, %v1300_v23  ;;  %1259 = vmatprep.mubr.msk.bf16.mxu1 %vm260_vm0, %v1301_v24 }
  0x36   :  { %1228 = vmatmul.mubr.msk.bf16.gmra.mrb[20].mxu0 %vm260_vm0, %v1302_v25  ;;  %1260 = vmatmul.mubr.msk.bf16.gmra.mrb[20].mxu1 %vm260_vm0, %v1303_v26 }
  0x37   :  { %1231 = vmatprep.mubr.msk.bf16.mxu0 %vm260_vm0, %v1304_v27  ;;  %1263 = vmatprep.mubr.msk.bf16.mxu1 %vm260_vm0, %v1305_v28 }
  0x3e   :  { %1232 = vmatmul.mubr.msk.bf16.gmra.mrb[24].mxu0 %vm260_vm0, %v1306_v29  ;;  %1264 = vmatmul.mubr.msk.bf16.gmra.mrb[24].mxu1 %vm260_vm0, %v1307_v30 }
  0x3f   :  { %1235 = vmatprep.mubr.msk.bf16.mxu0 %vm260_vm0, %v1308_v31  ;;  %1267 = vmatprep.mubr.msk.bf16.mxu1 %vm260_vm0, %v1309_v32 }
  0x46   :  { %1236 = vmatmul.mubr.msk.bf16.gmra.mrb[28].mxu0 %vm260_vm0, %v1310_v33  ;;  %1268 = vmatmul.mubr.msk.bf16.gmra.mrb[28].mxu1 %vm260_vm0, %v1311_v34 }
  0xe1   :  { %v1209_v35 = vpop.f32.mrb[0].mxu0  ;;  %v1241_v36 = vpop.f32.mrb[0].mxu1 }
  0xe2   :  { %v1104_v37 = vpack.c.bf16 %v1209_v35, %v1209_v35  ;;  %v1136_v38 = vpack.c.bf16 %v1241_v36, %v1241_v36  ;;  %v391_v39 = vpop.f32.mrb[1].mxu0  ;;  %v519_v40 = vpop.f32.mrb[1].mxu1 }
  0xe3   :  { %v1102_v41 = vpack.c.bf16 %v391_v39, %v391_v39  ;;  %v1134_v42 = vpack.c.bf16 %v519_v40, %v519_v40  ;;  %v1210_v43 = vpop.f32.mrb[2].mxu0  ;;  %v1242_v44 = vpop.f32.mrb[2].mxu1 }
  0xe4   :  { %905 = vst.msk [vmem:[%s1722_s2 + $0x8] sm:$0xf] %vm902_vm1, %v1104_v37  ;;  %937 = vst.msk [vmem:[%s1722_s2 + $0x88] sm:$0xf] %vm902_vm1, %v1136_v38  ;;  %v1105_v45 = vpack.c.bf16 %v1210_v43, %v1210_v43  ;;  %v1137_v46 = vpack.c.bf16 %v1242_v44, %v1242_v44  ;;  %v394_v47 = vpop.f32.mrb[3].mxu0  ;;  %v522_v48 = vpop.f32.mrb[3].mxu1 }
  0xe5   :  { %903 = vst.msk [vmem:[%s1722_s2] sm:$0xf] %vm902_vm1, %v1102_v41  ;;  %935 = vst.msk [vmem:[%s1722_s2 + $0x80] sm:$0xf] %vm902_vm1, %v1134_v42  ;;  %v1103_v49 = vpack.c.bf16 %v394_v47, %v394_v47  ;;  %v1135_v50 = vpack.c.bf16 %v522_v48, %v522_v48 }
  0xe6   :  { %906 = vst.msk [vmem:[%s1722_s2 + $0xc] sm:$0xf] %vm902_vm1, %v1105_v45  ;;  %938 = vst.msk [vmem:[%s1722_s2 + $0x8c] sm:$0xf] %vm902_vm1, %v1137_v46 }
  0xe7   :  { %904 = vst.msk [vmem:[%s1722_s2 + $0x4] sm:$0xf] %vm902_vm1, %v1103_v49  ;;  %936 = vst.msk [vmem:[%s1722_s2 + $0x84] sm:$0xf] %vm902_vm1, %v1135_v50 }
  0xe9   :  { %v1213_v51 = vpop.f32.mrb[4].mxu0  ;;  %v1245_v52 = vpop.f32.mrb[4].mxu1 }
  0xea   :  { %v1108_v53 = vpack.c.bf16 %v1213_v51, %v1213_v51  ;;  %v1140_v54 = vpack.c.bf16 %v1245_v52, %v1245_v52  ;;  %v407_v55 = vpop.f32.mrb[5].mxu0  ;;  %v535_v56 = vpop.f32.mrb[5].mxu1 }
  0xeb   :  { %v1106_v57 = vpack.c.bf16 %v407_v55, %v407_v55  ;;  %v1138_v58 = vpack.c.bf16 %v535_v56, %v535_v56  ;;  %v1214_v59 = vpop.f32.mrb[6].mxu0  ;;  %v1246_v60 = vpop.f32.mrb[6].mxu1 }
  0xec   :  { %909 = vst.msk [vmem:[%s1722_s2 + $0x18] sm:$0xf] %vm902_vm1, %v1108_v53  ;;  %941 = vst.msk [vmem:[%s1722_s2 + $0x98] sm:$0xf] %vm902_vm1, %v1140_v54  ;;  %v1109_v61 = vpack.c.bf16 %v1214_v59, %v1214_v59  ;;  %v1141_v62 = vpack.c.bf16 %v1246_v60, %v1246_v60  ;;  %v410_v63 = vpop.f32.mrb[7].mxu0  ;;  %v538_v0 = vpop.f32.mrb[7].mxu1 }
  0xed   :  { %907 = vst.msk [vmem:[%s1722_s2 + $0x10] sm:$0xf] %vm902_vm1, %v1106_v57  ;;  %939 = vst.msk [vmem:[%s1722_s2 + $0x90] sm:$0xf] %vm902_vm1, %v1138_v58  ;;  %v1107_v1 = vpack.c.bf16 %v410_v63, %v410_v63  ;;  %v1139_v2 = vpack.c.bf16 %v538_v0, %v538_v0 }
  0xee   :  { %910 = vst.msk [vmem:[%s1722_s2 + $0x1c] sm:$0xf] %vm902_vm1, %v1109_v61  ;;  %942 = vst.msk [vmem:[%s1722_s2 + $0x9c] sm:$0xf] %vm902_vm1, %v1141_v62 }
  0xef   :  { %908 = vst.msk [vmem:[%s1722_s2 + $0x14] sm:$0xf] %vm902_vm1, %v1107_v1  ;;  %940 = vst.msk [vmem:[%s1722_s2 + $0x94] sm:$0xf] %vm902_vm1, %v1139_v2 }
  0xf1   :  { %v1217_v3 = vpop.f32.mrb[8].mxu0  ;;  %v1249_v4 = vpop.f32.mrb[8].mxu1 }
  0xf2   :  { %v1112_v5 = vpack.c.bf16 %v1217_v3, %v1217_v3  ;;  %v1144_v6 = vpack.c.bf16 %v1249_v4, %v1249_v4  ;;  %v423_v7 = vpop.f32.mrb[9].mxu0  ;;  %v551_v8 = vpop.f32.mrb[9].mxu1 }
  0xf3   :  { %v1110_v9 = vpack.c.bf16 %v423_v7, %v423_v7  ;;  %v1142_v10 = vpack.c.bf16 %v551_v8, %v551_v8  ;;  %v1218_v11 = vpop.f32.mrb[10].mxu0  ;;  %v1250_v12 = vpop.f32.mrb[10].mxu1 }
  0xf4   :  { %913 = vst.msk [vmem:[%s1722_s2 + $0x28] sm:$0xf] %vm902_vm1, %v1112_v5  ;;  %945 = vst.msk [vmem:[%s1722_s2 + $0xa8] sm:$0xf] %vm902_vm1, %v1144_v6  ;;  %v1113_v13 = vpack.c.bf16 %v1218_v11, %v1218_v11  ;;  %v1145_v14 = vpack.c.bf16 %v1250_v12, %v1250_v12  ;;  %v426_v15 = vpop.f32.mrb[11].mxu0  ;;  %v554_v16 = vpop.f32.mrb[11].mxu1 }
  0xf5   :  { %911 = vst.msk [vmem:[%s1722_s2 + $0x20] sm:$0xf] %vm902_vm1, %v1110_v9  ;;  %943 = vst.msk [vmem:[%s1722_s2 + $0xa0] sm:$0xf] %vm902_vm1, %v1142_v10  ;;  %v1111_v17 = vpack.c.bf16 %v426_v15, %v426_v15  ;;  %v1143_v18 = vpack.c.bf16 %v554_v16, %v554_v16 }
  0xf6   :  { %914 = vst.msk [vmem:[%s1722_s2 + $0x2c] sm:$0xf] %vm902_vm1, %v1113_v13  ;;  %946 = vst.msk [vmem:[%s1722_s2 + $0xac] sm:$0xf] %vm902_vm1, %v1145_v14 }
  0xf7   :  { %912 = vst.msk [vmem:[%s1722_s2 + $0x24] sm:$0xf] %vm902_vm1, %v1111_v17  ;;  %944 = vst.msk [vmem:[%s1722_s2 + $0xa4] sm:$0xf] %vm902_vm1, %v1143_v18 }
  0xf9   :  { %v1221_v19 = vpop.f32.mrb[12].mxu0  ;;  %v1253_v20 = vpop.f32.mrb[12].mxu1 }
  0xfa   :  { %v1116_v21 = vpack.c.bf16 %v1221_v19, %v1221_v19  ;;  %v1148_v22 = vpack.c.bf16 %v1253_v20, %v1253_v20  ;;  %v439_v23 = vpop.f32.mrb[13].mxu0  ;;  %v567_v24 = vpop.f32.mrb[13].mxu1 }
  0xfb   :  { %v1114_v25 = vpack.c.bf16 %v439_v23, %v439_v23  ;;  %v1146_v26 = vpack.c.bf16 %v567_v24, %v567_v24  ;;  %v1222_v27 = vpop.f32.mrb[14].mxu0  ;;  %v1254_v28 = vpop.f32.mrb[14].mxu1 }
  0xfc   :  { %917 = vst.msk [vmem:[%s1722_s2 + $0x38] sm:$0xf] %vm902_vm1, %v1116_v21  ;;  %949 = vst.msk [vmem:[%s1722_s2 + $0xb8] sm:$0xf] %vm902_vm1, %v1148_v22  ;;  %v1117_v29 = vpack.c.bf16 %v1222_v27, %v1222_v27  ;;  %v1149_v30 = vpack.c.bf16 %v1254_v28, %v1254_v28  ;;  %v442_v31 = vpop.f32.mrb[15].mxu0  ;;  %v570_v32 = vpop.f32.mrb[15].mxu1 }
  0xfd   :  { %915 = vst.msk [vmem:[%s1722_s2 + $0x30] sm:$0xf] %vm902_vm1, %v1114_v25  ;;  %947 = vst.msk [vmem:[%s1722_s2 + $0xb0] sm:$0xf] %vm902_vm1, %v1146_v26  ;;  %v1115_v33 = vpack.c.bf16 %v442_v31, %v442_v31  ;;  %v1147_v34 = vpack.c.bf16 %v570_v32, %v570_v32 }
  0xfe   :  { %918 = vst.msk [vmem:[%s1722_s2 + $0x3c] sm:$0xf] %vm902_vm1, %v1117_v29  ;;  %950 = vst.msk [vmem:[%s1722_s2 + $0xbc] sm:$0xf] %vm902_vm1, %v1149_v30 }
  0xff   :  { %916 = vst.msk [vmem:[%s1722_s2 + $0x34] sm:$0xf] %vm902_vm1, %v1115_v33  ;;  %948 = vst.msk [vmem:[%s1722_s2 + $0xb4] sm:$0xf] %vm902_vm1, %v1147_v34 }
 0x101   :  { %v1225_v35 = vpop.f32.mrb[16].mxu0  ;;  %v1257_v36 = vpop.f32.mrb[16].mxu1 }
 0x102   :  { %v1120_v37 = vpack.c.bf16 %v1225_v35, %v1225_v35  ;;  %v1152_v38 = vpack.c.bf16 %v1257_v36, %v1257_v36  ;;  %v455_v39 = vpop.f32.mrb[17].mxu0  ;;  %v583_v40 = vpop.f32.mrb[17].mxu1 }
 0x103   :  { %v1118_v41 = vpack.c.bf16 %v455_v39, %v455_v39  ;;  %v1150_v42 = vpack.c.bf16 %v583_v40, %v583_v40  ;;  %v1226_v43 = vpop.f32.mrb[18].mxu0  ;;  %v1258_v44 = vpop.f32.mrb[18].mxu1 }
 0x104   :  { %921 = vst.msk [vmem:[%s1722_s2 + $0x48] sm:$0xf] %vm902_vm1, %v1120_v37  ;;  %953 = vst.msk [vmem:[%s1722_s2 + $0xc8] sm:$0xf] %vm902_vm1, %v1152_v38  ;;  %v1121_v45 = vpack.c.bf16 %v1226_v43, %v1226_v43  ;;  %v1153_v46 = vpack.c.bf16 %v1258_v44, %v1258_v44  ;;  %v458_v47 = vpop.f32.mrb[19].mxu0  ;;  %v586_v48 = vpop.f32.mrb[19].mxu1 }
 0x105   :  { %919 = vst.msk [vmem:[%s1722_s2 + $0x40] sm:$0xf] %vm902_vm1, %v1118_v41  ;;  %951 = vst.msk [vmem:[%s1722_s2 + $0xc0] sm:$0xf] %vm902_vm1, %v1150_v42  ;;  %v1119_v49 = vpack.c.bf16 %v458_v47, %v458_v47  ;;  %v1151_v50 = vpack.c.bf16 %v586_v48, %v586_v48 }
 0x106   :  { %922 = vst.msk [vmem:[%s1722_s2 + $0x4c] sm:$0xf] %vm902_vm1, %v1121_v45  ;;  %954 = vst.msk [vmem:[%s1722_s2 + $0xcc] sm:$0xf] %vm902_vm1, %v1153_v46 }
 0x107   :  { %920 = vst.msk [vmem:[%s1722_s2 + $0x44] sm:$0xf] %vm902_vm1, %v1119_v49  ;;  %952 = vst.msk [vmem:[%s1722_s2 + $0xc4] sm:$0xf] %vm902_vm1, %v1151_v50 }
 0x109   :  { %v1229_v51 = vpop.f32.mrb[20].mxu0  ;;  %v1261_v52 = vpop.f32.mrb[20].mxu1 }
 0x10a   :  { %v1124_v53 = vpack.c.bf16 %v1229_v51, %v1229_v51  ;;  %v1156_v54 = vpack.c.bf16 %v1261_v52, %v1261_v52  ;;  %v471_v55 = vpop.f32.mrb[21].mxu0  ;;  %v599_v56 = vpop.f32.mrb[21].mxu1 }
 0x10b   :  { %v1122_v57 = vpack.c.bf16 %v471_v55, %v471_v55  ;;  %v1154_v58 = vpack.c.bf16 %v599_v56, %v599_v56  ;;  %v1230_v59 = vpop.f32.mrb[22].mxu0  ;;  %v1262_v60 = vpop.f32.mrb[22].mxu1 }
 0x10c   :  { %925 = vst.msk [vmem:[%s1722_s2 + $0x58] sm:$0xf] %vm902_vm1, %v1124_v53  ;;  %957 = vst.msk [vmem:[%s1722_s2 + $0xd8] sm:$0xf] %vm902_vm1, %v1156_v54  ;;  %v1125_v61 = vpack.c.bf16 %v1230_v59, %v1230_v59  ;;  %v1157_v62 = vpack.c.bf16 %v1262_v60, %v1262_v60  ;;  %v474_v63 = vpop.f32.mrb[23].mxu0  ;;  %v602_v0 = vpop.f32.mrb[23].mxu1 }
 0x10d   :  { %923 = vst.msk [vmem:[%s1722_s2 + $0x50] sm:$0xf] %vm902_vm1, %v1122_v57  ;;  %955 = vst.msk [vmem:[%s1722_s2 + $0xd0] sm:$0xf] %vm902_vm1, %v1154_v58  ;;  %v1123_v1 = vpack.c.bf16 %v474_v63, %v474_v63  ;;  %v1155_v2 = vpack.c.bf16 %v602_v0, %v602_v0 }
 0x10e   :  { %926 = vst.msk [vmem:[%s1722_s2 + $0x5c] sm:$0xf] %vm902_vm1, %v1125_v61  ;;  %958 = vst.msk [vmem:[%s1722_s2 + $0xdc] sm:$0xf] %vm902_vm1, %v1157_v62 }
 0x10f   :  { %924 = vst.msk [vmem:[%s1722_s2 + $0x54] sm:$0xf] %vm902_vm1, %v1123_v1  ;;  %956 = vst.msk [vmem:[%s1722_s2 + $0xd4] sm:$0xf] %vm902_vm1, %v1155_v2 }
 0x111   :  { %v1233_v3 = vpop.f32.mrb[24].mxu0  ;;  %v1265_v4 = vpop.f32.mrb[24].mxu1 }
 0x112   :  { %v1128_v5 = vpack.c.bf16 %v1233_v3, %v1233_v3  ;;  %v1160_v6 = vpack.c.bf16 %v1265_v4, %v1265_v4  ;;  %v487_v7 = vpop.f32.mrb[25].mxu0  ;;  %v615_v8 = vpop.f32.mrb[25].mxu1 }
 0x113   :  { %v1126_v9 = vpack.c.bf16 %v487_v7, %v487_v7  ;;  %v1158_v10 = vpack.c.bf16 %v615_v8, %v615_v8  ;;  %v1234_v11 = vpop.f32.mrb[26].mxu0  ;;  %v1266_v12 = vpop.f32.mrb[26].mxu1 }
 0x114   :  { %929 = vst.msk [vmem:[%s1722_s2 + $0x68] sm:$0xf] %vm902_vm1, %v1128_v5  ;;  %961 = vst.msk [vmem:[%s1722_s2 + $0xe8] sm:$0xf] %vm902_vm1, %v1160_v6  ;;  %v1129_v13 = vpack.c.bf16 %v1234_v11, %v1234_v11  ;;  %v1161_v14 = vpack.c.bf16 %v1266_v12, %v1266_v12  ;;  %v490_v15 = vpop.f32.mrb[27].mxu0  ;;  %v618_v16 = vpop.f32.mrb[27].mxu1 }
 0x115   :  { %927 = vst.msk [vmem:[%s1722_s2 + $0x60] sm:$0xf] %vm902_vm1, %v1126_v9  ;;  %959 = vst.msk [vmem:[%s1722_s2 + $0xe0] sm:$0xf] %vm902_vm1, %v1158_v10  ;;  %v1127_v17 = vpack.c.bf16 %v490_v15, %v490_v15  ;;  %v1159_v18 = vpack.c.bf16 %v618_v16, %v618_v16 }
 0x116   :  { %930 = vst.msk [vmem:[%s1722_s2 + $0x6c] sm:$0xf] %vm902_vm1, %v1129_v13  ;;  %962 = vst.msk [vmem:[%s1722_s2 + $0xec] sm:$0xf] %vm902_vm1, %v1161_v14 }
 0x117   :  { %928 = vst.msk [vmem:[%s1722_s2 + $0x64] sm:$0xf] %vm902_vm1, %v1127_v17  ;;  %960 = vst.msk [vmem:[%s1722_s2 + $0xe4] sm:$0xf] %vm902_vm1, %v1159_v18 }
 0x119   :  { %v1237_v19 = vpop.f32.mrb[28].mxu0  ;;  %v1269_v20 = vpop.f32.mrb[28].mxu1 }
 0x11a   :  { %v1132_v21 = vpack.c.bf16 %v1237_v19, %v1237_v19  ;;  %v1164_v22 = vpack.c.bf16 %v1269_v20, %v1269_v20  ;;  %v503_v23 = vpop.f32.mrb[29].mxu0  ;;  %v631_v24 = vpop.f32.mrb[29].mxu1 }
 0x11b   :  { %v1130_v25 = vpack.c.bf16 %v503_v23, %v503_v23  ;;  %v1162_v26 = vpack.c.bf16 %v631_v24, %v631_v24  ;;  %v1238_v27 = vpop.f32.mrb[30].mxu0  ;;  %v1270_v28 = vpop.f32.mrb[30].mxu1 }
 0x11c   :  { %933 = vst.msk [vmem:[%s1722_s2 + $0x78] sm:$0xf] %vm902_vm1, %v1132_v21  ;;  %965 = vst.msk [vmem:[%s1722_s2 + $0xf8] sm:$0xf] %vm902_vm1, %v1164_v22  ;;  %v1133_v29 = vpack.c.bf16 %v1238_v27, %v1238_v27  ;;  %v1165_v30 = vpack.c.bf16 %v1270_v28, %v1270_v28  ;;  %v506_v31 = vpop.f32.mrb[31].mxu0  ;;  %v634_v32 = vpop.f32.mrb[31].mxu1 }
 0x11d   :  { %931 = vst.msk [vmem:[%s1722_s2 + $0x70] sm:$0xf] %vm902_vm1, %v1130_v25  ;;  %963 = vst.msk [vmem:[%s1722_s2 + $0xf0] sm:$0xf] %vm902_vm1, %v1162_v26  ;;  %v1131_v33 = vpack.c.bf16 %v506_v31, %v506_v31  ;;  %v1163_v34 = vpack.c.bf16 %v634_v32, %v634_v32 }
 0x11e   :  { %934 = vst.msk [vmem:[%s1722_s2 + $0x7c] sm:$0xf] %vm902_vm1, %v1133_v29  ;;  %966 = vst.msk [vmem:[%s1722_s2 + $0xfc] sm:$0xf] %vm902_vm1, %v1165_v30 }
 0x11f   :  { %932 = vst.msk [vmem:[%s1722_s2 + $0x74] sm:$0xf] %vm902_vm1, %v1131_v33  ;;  %964 = vst.msk [vmem:[%s1722_s2 + $0xf4] sm:$0xf] %vm902_vm1, %v1163_v34 }

// kernel: _lambda_.10
= control target key start
LH: loop header
LB: loop body
LE: loop exit
PB: predicated region body
PF: predicated region fallthrough
CT: control target
= control target key end

     0   :  { %s942_s1 = inlined_call_operand.vmem [shape: bf16[128,16], index: 1, kind: input, shape index: {}]   ;;  %s943_s0 = inlined_call_operand.vmem [shape: bf16[128,128], index: 0, kind: input, shape index: {}]   ;;  %s944_s2 = inlined_call_operand.vmem [shape: f32[1,16], index: 2, kind: input, shape index: {}]   ;;  %s945_s3 = inlined_call_operand.vmem [shape: f32[1,16], index: 3, kind: input, shape index: {}]   ;;  %s946_s4 = inlined_call_operand.vmem [shape: bf16[128,16], index: 4, kind: output, shape index: {}]  }
   0x1   :  { %v646_v0 = vld [vmem:[%s942_s1] sm:$0xff]   ;;  %v647_v1 = vld [vmem:[%s942_s1 + $0x8] sm:$0xff]   ;;  %v648_v2 = vld [vmem:[%s942_s1 + $0x10] sm:$0xff]  }
   0x2   :  { %598 = vmatprep.subr.bf16.mxu0 %v646_v0  ;;  %630 = vmatprep.subr.bf16.mxu1 %v646_v0  ;;  %v649_v3 = vld [vmem:[%s942_s1 + $0x18] sm:$0xff]   ;;  %v19_v4 = vld [vmem:[%s943_s0] sm:$0xf]  ;;  %v20_v5 = vld [vmem:[%s943_s0 + $0x4] sm:$0xf] }
   0x3   :  { %599 = vmatpush3.bf16.msra.mxu0 %v646_v0  ;;  %638 = vmatpush3.bf16.msra.mxu1 %v646_v0  ;;  %vm35_vm0 = vcmp.ge.bf16.partialorder %v19_v4, 0  ;;  %vm36_vm1 = vcmp.ge.bf16.partialorder %v20_v5, 0  ;;  %v51_v6 = vmul.bf16 1045249613, %v19_v4  ;;  %v52_v7 = vmul.bf16 1045249613, %v20_v5 }
   0x4   :  { %600 = vmatprep.subr.bf16.mxu0 %v647_v1  ;;  %631 = vmatprep.subr.bf16.mxu1 %v647_v1  ;;  %v650_v10 = vld [vmem:[%s942_s1 + $0x20] sm:$0xff]   ;;  %v21_v12 = vld [vmem:[%s943_s0 + $0x8] sm:$0xf]  ;;  %v652_v19 = vld [vmem:[%s942_s1 + $0x30] sm:$0xff]  }
   0x5   :  { %v67_v8 = vsel %vm35_vm0, %v19_v4, %v51_v6  ;;  %v68_v9 = vsel %vm36_vm1, %v20_v5, %v52_v7  ;;  %v27_v13 = vld [vmem:[%s943_s0 + $0x20] sm:$0xf]  ;;  %v651_v14 = vld [vmem:[%s942_s1 + $0x28] sm:$0xff]   ;;  %v28_v15 = vld [vmem:[%s943_s0 + $0x24] sm:$0xf]  ;;  %vm37_vm4 = vcmp.ge.bf16.partialorder %v21_v12, 0 }
   0x6   :  { %v533_v11 = vcombine.low %v67_v8, %v68_v9  ;;  %vm43_vm2 = vcmp.ge.bf16.partialorder %v27_v13, 0  ;;  %v59_v16 = vmul.bf16 1045249613, %v27_v13  ;;  %vm44_vm3 = vcmp.ge.bf16.partialorder %v28_v15, 0  ;;  %v22_v20 = vld [vmem:[%s943_s0 + $0xc] sm:$0xf] }
   0x7   :  { %601 = vmatpush3.bf16.msra.mxu0 %v647_v1  ;;  %639 = vmatpush3.bf16.msra.mxu1 %v647_v1  ;;  %v60_v17 = vmul.bf16 1045249613, %v28_v15  ;;  %v23_v21 = vld [vmem:[%s943_s0 + $0x10] sm:$0xf]  ;;  %v24_v23 = vld [vmem:[%s943_s0 + $0x14] sm:$0xf] }
   0x8   :  { %602 = vmatprep.subr.bf16.mxu0 %v648_v2  ;;  %632 = vmatprep.subr.bf16.mxu1 %v648_v2  ;;  %v75_v18 = vsel %vm43_vm2, %v27_v13, %v59_v16  ;;  %v29_v25 = vld [vmem:[%s943_s0 + $0x28] sm:$0xf]  ;;  %v30_v26 = vld [vmem:[%s943_s0 + $0x2c] sm:$0xf]  ;;  %v53_v27 = vmul.bf16 1045249613, %v21_v12 }
   0x9   :  { %614 = vmatprep.mubr.bf16.mxu0 %v533_v11  ;;  %v76_v22 = vsel %vm44_vm3, %v28_v15, %v60_v17  ;;  %v31_v28 = vld [vmem:[%s943_s0 + $0x30] sm:$0xf]  ;;  %v32_v29 = vld [vmem:[%s943_s0 + $0x34] sm:$0xf]  ;;  %v653_v30 = vld [vmem:[%s942_s1 + $0x38] sm:$0xff]   ;;  %vm38_vm5 = vcmp.ge.bf16.partialorder %v22_v20, 0 }
   0xa   :  { %v537_v24 = vcombine.low %v75_v18, %v76_v22  ;;  %v54_v31 = vmul.bf16 1045249613, %v22_v20  ;;  %vm39_vm6 = vcmp.ge.bf16.partialorder %v23_v21, 0  ;;  %v55_v32 = vmul.bf16 1045249613, %v23_v21 }
   0xb   :  { %603 = vmatpush3.bf16.msra.mxu0 %v648_v2  ;;  %640 = vmatpush3.bf16.msra.mxu1 %v648_v2  ;;  %v56_v33 = vmul.bf16 1045249613, %v24_v23  ;;  %v61_v34 = vmul.bf16 1045249613, %v29_v25  ;;  %v62_v35 = vmul.bf16 1045249613, %v30_v26  ;;  %v69_v38 = vsel %vm37_vm4, %v21_v12, %v53_v27 }
   0xc   :  { %604 = vmatprep.subr.bf16.mxu0 %v649_v3  ;;  %633 = vmatprep.subr.bf16.mxu1 %v649_v3  ;;  %vm45_vm7 = vcmp.ge.bf16.partialorder %v29_v25, 0  ;;  %vm46_vm8 = vcmp.ge.bf16.partialorder %v30_v26, 0  ;;  %v63_v36 = vmul.bf16 1045249613, %v31_v28  ;;  %v64_v37 = vmul.bf16 1045249613, %v32_v29 }
   0xd   :  { %622 = vmatprep.mubr.bf16.mxu1 %v537_v24  ;;  %vm40_vm9 = vcmp.ge.bf16.partialorder %v24_v23, 0  ;;  %vm47_vm10 = vcmp.ge.bf16.partialorder %v31_v28, 0  ;;  %vm48_vm11 = vcmp.ge.bf16.partialorder %v32_v29, 0  ;;  %v70_v39 = vsel %vm38_vm5, %v22_v20, %v54_v31  ;;  %v25_v41 = vld [vmem:[%s943_s0 + $0x18] sm:$0xf] }
   0xe   :  { %v71_v40 = vsel %vm39_vm6, %v23_v21, %v55_v32  ;;  %v26_v42 = vld [vmem:[%s943_s0 + $0x1c] sm:$0xf]  ;;  %v77_v43 = vsel %vm45_vm7, %v29_v25, %v61_v34  ;;  %v78_v44 = vsel %vm46_vm8, %v30_v26, %v62_v35  ;;  %v72_v45 = vsel %vm40_vm9, %v24_v23, %v56_v33  ;;  %v33_v48 = vld [vmem:[%s943_s0 + $0x38] sm:$0xf] }
   0xf   :  { %605 = vmatpush3.bf16.msra.mxu0 %v649_v3  ;;  %641 = vmatpush3.bf16.msra.mxu1 %v649_v3  ;;  %v79_v46 = vsel %vm47_vm10, %v31_v28, %v63_v36  ;;  %v80_v47 = vsel %vm48_vm11, %v32_v29, %v64_v37  ;;  %v34_v49 = vld [vmem:[%s943_s0 + $0x3c] sm:$0xf]  ;;  %v534_v50 = vcombine.low %v69_v38, %v70_v39  ;;  %vm41_vm12 = vcmp.ge.bf16.partialorder %v25_v41, 0 }
  0x10   :  { %606 = vmatprep.subr.bf16.mxu0 %v650_v10  ;;  %634 = vmatprep.subr.bf16.mxu1 %v650_v10  ;;  %v57_v51 = vmul.bf16 1045249613, %v25_v41  ;;  %v58_v52 = vmul.bf16 1045249613, %v26_v42  ;;  %v538_v53 = vcombine.low %v77_v43, %v78_v44  ;;  %v535_v54 = vcombine.low %v71_v40, %v72_v45 }
  0x11   :  { %v539_v55 = vcombine.low %v79_v46, %v80_v47  ;;  %v65_v56 = vmul.bf16 1045249613, %v33_v48  ;;  %v66_v57 = vmul.bf16 1045249613, %v34_v49  ;;  %vm42_vm13 = vcmp.ge.bf16.partialorder %v26_v42, 0 }
  0x12   :  { %vm49_vm14 = vcmp.ge.bf16.partialorder %v33_v48, 0  ;;  %vm50_vm15 = vcmp.ge.bf16.partialorder %v34_v49, 0  ;;  %v73_v58 = vsel %vm41_vm12, %v25_v41, %v57_v51  ;;  %v74_v59 = vsel %vm42_vm13, %v26_v42, %v58_v52 }
  0x13   :  { %607 = vmatpush3.bf16.msra.mxu0 %v650_v10  ;;  %642 = vmatpush3.bf16.msra.mxu1 %v650_v10  ;;  %v81_v60 = vsel %vm49_vm14, %v33_v48, %v65_v56  ;;  %v82_v61 = vsel %vm50_vm15, %v34_v49, %v66_v57  ;;  %v536_v62 = vcombine.low %v73_v58, %v74_v59  ;;  %vm292_vm0 = vcmask 130048  }
  0x14   :  { %608 = vmatprep.subr.bf16.mxu0 %v651_v14  ;;  %635 = vmatprep.subr.bf16.mxu1 %v651_v14  ;;  %v540_v63 = vcombine.low %v81_v60, %v82_v61  ;;  %vm512_vm1 = vcmask 125952  }
  0x17   :  { %609 = vmatpush3.bf16.msra.mxu0 %v651_v14  ;;  %643 = vmatpush3.bf16.msra.mxu1 %v651_v14 }
  0x18   :  { %610 = vmatprep.subr.bf16.mxu0 %v652_v19  ;;  %636 = vmatprep.subr.bf16.mxu1 %v652_v19 }
  0x1b   :  { %611 = vmatpush3.bf16.msra.mxu0 %v652_v19  ;;  %644 = vmatpush3.bf16.msra.mxu1 %v652_v19 }
  0x1c   :  { %612 = vmatprep.subr.bf16.mxu0 %v653_v30  ;;  %637 = vmatprep.subr.bf16.mxu1 %v653_v30 }
  0x1f   :  { %613 = vmatpush3.bf16.msra.mxu0 %v653_v30  ;;  %645 = vmatpush3.bf16.msra.mxu1 %v653_v30 }
  0x22   :  { %615 = vmatmul.mubr.bf16.vlgmr.msra.gmra.mrb[0].mxu0 %v534_v50  ;;  %623 = vmatmul.mubr.bf16.vlgmr.msra.gmra.mrb[0].mxu1 %v538_v53 }
  0x23   :  { %618 = vmatprep.mubr.bf16.mxu0 %v535_v54  ;;  %626 = vmatprep.mubr.bf16.mxu1 %v539_v55 }
  0x2a   :  { %619 = vmatmul.mubr.bf16.gmra.mrb[4].mxu0 %v536_v62  ;;  %627 = vmatmul.mubr.bf16.gmra.mrb[4].mxu1 %v540_v63 }
  0xf5   :  { %v616_v0 = vpop.f32.mrb[0].mxu0  ;;  %v756_v1 = vpop.f32.mrb[0].mxu1 }
  0xf6   :  { %v229_v2 = vpop.f32.mrb[1].mxu0  ;;  %v261_v3 = vpop.f32.mrb[1].mxu1  ;;  %v296_v11 = vsel %vm292_vm0, %v616_v0, 0.0  ;;  %v312_v35 = vsel %vm292_vm0, %v756_v1, 0.0 }
  0xf7   :  { %v617_v4 = vpop.f32.mrb[2].mxu0  ;;  %v625_v5 = vpop.f32.mrb[2].mxu1  ;;  %v293_v8 = vsel %vm292_vm0, %v229_v2, 0.0  ;;  %v308_v30 = vsel %vm292_vm0, %v261_v3, 0.0 }
  0xf8   :  { %v232_v6 = vpop.f32.mrb[3].mxu0  ;;  %v264_v7 = vpop.f32.mrb[3].mxu1  ;;  %v298_v13 = vsel %vm292_vm0, %v617_v4, 0.0  ;;  %v314_v37 = vsel %vm292_vm0, %v625_v5, 0.0 }
  0xf9   :  { %v294_v9 = vsel %vm292_vm0, %v232_v6, 0.0  ;;  %v310_v33 = vsel %vm292_vm0, %v264_v7, 0.0 }
  0xfa   :  { %v295_v10 = vadd.f32 %v294_v9, %v293_v8 }
  0xfc   :  { %v297_v12 = vadd.f32 %v296_v11, %v295_v10 }
  0xfd   :  { %v620_v14 = vpop.f32.mrb[4].mxu0  ;;  %v628_v15 = vpop.f32.mrb[4].mxu1 }
  0xfe   :  { %v245_v16 = vpop.f32.mrb[5].mxu0  ;;  %v299_v17 = vadd.f32 %v298_v13, %v297_v12  ;;  %v277_v18 = vpop.f32.mrb[5].mxu1  ;;  %v304_v27 = vsel %vm292_vm0, %v620_v14, 0.0  ;;  %v320_v43 = vsel %vm292_vm0, %v628_v15, 0.0 }
  0xff   :  { %v300_v19 = vsel %vm292_vm0, %v245_v16, 0.0  ;;  %v621_v20 = vpop.f32.mrb[6].mxu0  ;;  %v629_v21 = vpop.f32.mrb[6].mxu1  ;;  %v316_v38 = vsel %vm292_vm0, %v277_v18, 0.0 }
 0x100   :  { %v301_v22 = vadd.f32 %v300_v19, %v299_v17  ;;  %v248_v23 = vpop.f32.mrb[7].mxu0  ;;  %v280_v24 = vpop.f32.mrb[7].mxu1  ;;  %v306_v29 = vsel %vm292_vm0, %v621_v20, 0.0  ;;  %v322_v45 = vsel %vm292_vm0, %v629_v21, 0.0 }
 0x101   :  { %v302_v25 = vsel %vm292_vm0, %v248_v23, 0.0  ;;  %v318_v41 = vsel %vm292_vm0, %v280_v24, 0.0 }
 0x102   :  { %v303_v26 = vadd.f32 %v302_v25, %v301_v22 }
 0x104   :  { %v305_v28 = vadd.f32 %v304_v27, %v303_v26 }
 0x106   :  { %v307_v31 = vadd.f32 %v306_v29, %v305_v28 }
 0x108   :  { %v309_v32 = vadd.f32 %v308_v30, %v307_v31 }
 0x10a   :  { %v311_v34 = vadd.f32 %v310_v33, %v309_v32 }
 0x10c   :  { %v313_v36 = vadd.f32 %v312_v35, %v311_v34 }
 0x10e   :  { %v315_v39 = vadd.f32 %v314_v37, %v313_v36 }
 0x110   :  { %v317_v40 = vadd.f32 %v316_v38, %v315_v39 }
 0x112   :  { %v319_v42 = vadd.f32 %v318_v41, %v317_v40 }
 0x114   :  { %v321_v44 = vadd.f32 %v320_v43, %v319_v42 }
 0x116   :  { %v323_v46 = vadd.f32 %v322_v45, %v321_v44 }
 0x118   :  { %v324_v47 = vrot.slane %v323_v46, 4 }
 0x11a   :  { %v325_v48 = vadd.f32 %v324_v47, %v323_v46 }
 0x11c   :  { %v326_v49 = vrot.slane %v325_v48, 2 }
 0x11e   :  { %v327_v50 = vadd.f32 %v326_v49, %v325_v48 }
 0x120   :  { %v328_v51 = vrot.slane %v327_v50, 1 }
 0x122   :  { %v329_v52 = vadd.f32 %v328_v51, %v327_v50 }
 0x124   :  { %v330_v53 = vmul.f32 0.0078125, %v329_v52 }
 0x126   :  { %v775_v54 = vsub.f32 %v229_v2, %v330_v53  ;;  %v777_v55 = vsub.f32 %v232_v6, %v330_v53  ;;  %v779_v56 = vsub.f32 %v616_v0, %v330_v53  ;;  %v781_v57 = vsub.f32 %v617_v4, %v330_v53 }
 0x127   :  { %v783_v58 = vsub.f32 %v245_v16, %v330_v53  ;;  %v785_v59 = vsub.f32 %v248_v23, %v330_v53  ;;  %v787_v60 = vsub.f32 %v620_v14, %v330_v53  ;;  %v789_v61 = vsub.f32 %v621_v20, %v330_v53 }
 0x128   :  { %v791_v62 = vsub.f32 %v261_v3, %v330_v53  ;;  %v793_v63 = vsub.f32 %v264_v7, %v330_v53  ;;  %v796_v2 = vsub.f32 %v756_v1, %v330_v53  ;;  %v798_v6 = vsub.f32 %v625_v5, %v330_v53 }
 0x129   :  { %v800_v0 = vsub.f32 %v277_v18, %v330_v53  ;;  %v802_v4 = vsub.f32 %v280_v24, %v330_v53  ;;  %v804_v8 = vsub.f32 %v628_v15, %v330_v53  ;;  %v806_v9 = vsub.f32 %v629_v21, %v330_v53 }
 0x12a   :  { %v347_v10 = vmul.f32 %v775_v54, %v775_v54  ;;  %v348_v3 = vmul.f32 %v777_v55, %v777_v55  ;;  %v349_v1 = vmul.f32 %v779_v56, %v779_v56  ;;  %v356_v5 = vmul.f32 %v793_v63, %v793_v63 }
 0x12b   :  { %v357_v7 = vmul.f32 %v796_v2, %v796_v2  ;;  %v350_v11 = vmul.f32 %v781_v57, %v781_v57  ;;  %v358_v12 = vmul.f32 %v798_v6, %v798_v6  ;;  %v359_v13 = vmul.f32 %v800_v0, %v800_v0 }
 0x12c   :  { %v360_v14 = vmul.f32 %v802_v4, %v802_v4  ;;  %v361_v15 = vmul.f32 %v804_v8, %v804_v8  ;;  %v362_v16 = vmul.f32 %v806_v9, %v806_v9  ;;  %v363_v17 = vsel %vm292_vm0, %v347_v10, 0.0 }
 0x12d   :  { %v364_v18 = vsel %vm292_vm0, %v348_v3, 0.0  ;;  %v351_v20 = vmul.f32 %v783_v58, %v783_v58  ;;  %v366_v21 = vsel %vm292_vm0, %v349_v1, 0.0  ;;  %v380_v22 = vsel %vm292_vm0, %v356_v5, 0.0 }
 0x12e   :  { %v365_v19 = vadd.f32 %v364_v18, %v363_v17  ;;  %v382_v23 = vsel %vm292_vm0, %v357_v7, 0.0  ;;  %v384_v25 = vsel %vm292_vm0, %v358_v12, 0.0  ;;  %v386_v26 = vsel %vm292_vm0, %v359_v13, 0.0 }
 0x12f   :  { %v388_v27 = vsel %vm292_vm0, %v360_v14, 0.0  ;;  %v352_v28 = vmul.f32 %v785_v59, %v785_v59  ;;  %v368_v29 = vsel %vm292_vm0, %v350_v11, 0.0  ;;  %v390_v30 = vsel %vm292_vm0, %v361_v15, 0.0  ;;  %v403_v15 = vld [vmem:[%s944_s2] sm:$0x1] }
 0x130   :  { %v367_v24 = vadd.f32 %v366_v21, %v365_v19  ;;  %v392_v31 = vsel %vm292_vm0, %v362_v16, 0.0  ;;  %v353_v33 = vmul.f32 %v787_v60, %v787_v60  ;;  %v370_v34 = vsel %vm292_vm0, %v351_v20, 0.0 }
 0x131   :  { %v354_v36 = vmul.f32 %v789_v61, %v789_v61  ;;  %v372_v37 = vsel %vm292_vm0, %v352_v28, 0.0  ;;  %v355_v39 = vmul.f32 %v791_v62, %v791_v62  ;;  %v405_v13 = vlaneseq  ;;  %v549_v28 = vld [vmem:[%s945_s3] ss:$0 sm:$0xff] }
 0x132   :  { %v369_v32 = vadd.f32 %v368_v29, %v367_v24  ;;  %v374_v40 = vsel %vm292_vm0, %v353_v33, 0.0 }
 0x133   :  { %v376_v42 = vsel %vm292_vm0, %v354_v36, 0.0  ;;  %v378_v44 = vsel %vm292_vm0, %v355_v39, 0.0  ;;  %v406_v14 = vshrl.u32 %v405_v13, 7 }
 0x134   :  { %v371_v35 = vadd.f32 %v370_v34, %v369_v32 }
 0x135   :  { %v407_v16 = vsub.s32 0, %v406_v14 }
 0x136   :  { %v373_v38 = vadd.f32 %v372_v37, %v371_v35 }
 0x138   :  { %v375_v41 = vadd.f32 %v374_v40, %v373_v38 }
 0x13a   :  { %v377_v43 = vadd.f32 %v376_v42, %v375_v41 }
 0x13c   :  { %v379_v45 = vadd.f32 %v378_v44, %v377_v43 }
 0x13e   :  { %v381_v46 = vadd.f32 %v380_v22, %v379_v45 }
 0x140   :  { %v383_v47 = vadd.f32 %v382_v23, %v381_v46 }
 0x142   :  { %v385_v48 = vadd.f32 %v384_v25, %v383_v47 }
 0x144   :  { %v387_v49 = vadd.f32 %v386_v26, %v385_v48 }
 0x146   :  { %v389_v50 = vadd.f32 %v388_v27, %v387_v49 }
 0x148   :  { %v391_v51 = vadd.f32 %v390_v30, %v389_v50 }
 0x14a   :  { %v393_v52 = vadd.f32 %v392_v31, %v391_v51 }
 0x14c   :  { %v394_v53 = vrot.slane %v393_v52, 4 }
 0x14e   :  { %v395_v10 = vadd.f32 %v394_v53, %v393_v52 }
 0x150   :  { %v396_v3 = vrot.slane %v395_v10, 2 }
 0x152   :  { %v397_v1 = vadd.f32 %v396_v3, %v395_v10 }
 0x154   :  { %v398_v5 = vrot.slane %v397_v1, 1 }
 0x156   :  { %v399_v7 = vadd.f32 %v398_v5, %v397_v1 }
 0x158   :  { %v400_v11 = vmul.f32 0.0078125, %v399_v7 }
 0x15a   :  { %v401_v12 = vadd.f32 1e-05, %v400_v11 }
 0x15c   :  { %654 = vrsqrt.f32 %v401_v12 }
 0x166   :  { %v655_v17 = vpop.eup %654 }
 0x167   :  { %v404_v18 = vmul.f32 %v655_v17, %v403_v15 }
 0x169   :  { %v408_v19 = vrot.slane %v404_v18, %v407_v16 }
 0x16b   :  { %v409_v20 = vmul.f32 %v408_v19, %v775_v54  ;;  %v410_v21 = vmul.f32 %v408_v19, %v777_v55  ;;  %v411_v22 = vmul.f32 %v408_v19, %v779_v56  ;;  %v412_v23 = vmul.f32 %v408_v19, %v781_v57 }
 0x16c   :  { %v413_v24 = vmul.f32 %v408_v19, %v783_v58  ;;  %v414_v25 = vmul.f32 %v408_v19, %v785_v59  ;;  %v415_v26 = vmul.f32 %v408_v19, %v787_v60  ;;  %v416_v27 = vmul.f32 %v408_v19, %v789_v61 }
 0x16d   :  { %v417_v54 = vmul.f32 %v408_v19, %v791_v62  ;;  %v418_v55 = vmul.f32 %v408_v19, %v793_v63  ;;  %v419_v56 = vmul.f32 %v408_v19, %v796_v2  ;;  %v420_v57 = vmul.f32 %v408_v19, %v798_v6 }
 0x16e   :  { %v421_v58 = vmul.f32 %v408_v19, %v800_v0  ;;  %v422_v59 = vmul.f32 %v408_v19, %v802_v4  ;;  %v423_v60 = vmul.f32 %v408_v19, %v804_v8  ;;  %v424_v61 = vmul.f32 %v408_v19, %v806_v9 }
 0x16f   :  { %v432_v29 = vadd.f32 %v549_v28, %v409_v20  ;;  %v433_v30 = vadd.f32 %v549_v28, %v410_v21  ;;  %v434_v31 = vadd.f32 %v549_v28, %v411_v22  ;;  %v435_v32 = vadd.f32 %v549_v28, %v412_v23 }
 0x170   :  { %v436_v33 = vadd.f32 %v549_v28, %v413_v24  ;;  %v437_v62 = vadd.f32 %v549_v28, %v414_v25  ;;  %v438_v34 = vadd.f32 %v549_v28, %v415_v26  ;;  %v439_v63 = vadd.f32 %v549_v28, %v416_v27 }
 0x171   :  { %v440_v35 = vadd.f32 %v549_v28, %v417_v54  ;;  %v441_v2 = vadd.f32 %v549_v28, %v418_v55  ;;  %v442_v36 = vadd.f32 %v549_v28, %v419_v56  ;;  %v443_v6 = vadd.f32 %v549_v28, %v420_v57 }
 0x172   :  { %v444_v37 = vadd.f32 %v549_v28, %v421_v58  ;;  %v445_v0 = vadd.f32 %v549_v28, %v422_v59  ;;  %v446_v38 = vadd.f32 %v549_v28, %v423_v60  ;;  %v447_v4 = vadd.f32 %v549_v28, %v424_v61 }
 0x173   :  { %v566_v39 = vpack.c.bf16 %v432_v29, %v432_v29  ;;  %v567_v8 = vpack.c.bf16 %v433_v30, %v433_v30  ;;  %v568_v40 = vpack.c.bf16 %v434_v31, %v434_v31  ;;  %v569_v9 = vpack.c.bf16 %v435_v32, %v435_v32 }
 0x174   :  { %v570_v41 = vpack.c.bf16 %v436_v33, %v436_v33  ;;  %v571_v42 = vpack.c.bf16 %v437_v62, %v437_v62  ;;  %v572_v43 = vpack.c.bf16 %v438_v34, %v438_v34  ;;  %v573_v44 = vpack.c.bf16 %v439_v63, %v439_v63 }
 0x175   :  { %v574_v45 = vpack.c.bf16 %v440_v35, %v440_v35  ;;  %v575_v46 = vpack.c.bf16 %v441_v2, %v441_v2  ;;  %v576_v47 = vpack.c.bf16 %v442_v36, %v442_v36  ;;  %v577_v48 = vpack.c.bf16 %v443_v6, %v443_v6  ;;  %513 = vst.msk [vmem:[%s946_s4] sm:$0xf] %vm512_vm1, %v566_v39 }
 0x176   :  { %514 = vst.msk [vmem:[%s946_s4 + $0x4] sm:$0xf] %vm512_vm1, %v567_v8  ;;  %515 = vst.msk [vmem:[%s946_s4 + $0x8] sm:$0xf] %vm512_vm1, %v568_v40  ;;  %v578_v49 = vpack.c.bf16 %v444_v37, %v444_v37  ;;  %v579_v50 = vpack.c.bf16 %v445_v0, %v445_v0  ;;  %v580_v51 = vpack.c.bf16 %v446_v38, %v446_v38 }
 0x177   :  { %516 = vst.msk [vmem:[%s946_s4 + $0xc] sm:$0xf] %vm512_vm1, %v569_v9  ;;  %v581_v52 = vpack.c.bf16 %v447_v4, %v447_v4  ;;  %517 = vst.msk [vmem:[%s946_s4 + $0x10] sm:$0xf] %vm512_vm1, %v570_v41 }
 0x178   :  { %518 = vst.msk [vmem:[%s946_s4 + $0x14] sm:$0xf] %vm512_vm1, %v571_v42  ;;  %519 = vst.msk [vmem:[%s946_s4 + $0x18] sm:$0xf] %vm512_vm1, %v572_v43 }
 0x179   :  { %520 = vst.msk [vmem:[%s946_s4 + $0x1c] sm:$0xf] %vm512_vm1, %v573_v44  ;;  %521 = vst.msk [vmem:[%s946_s4 + $0x20] sm:$0xf] %vm512_vm1, %v574_v45 }
 0x17a   :  { %522 = vst.msk [vmem:[%s946_s4 + $0x24] sm:$0xf] %vm512_vm1, %v575_v46  ;;  %523 = vst.msk [vmem:[%s946_s4 + $0x28] sm:$0xf] %vm512_vm1, %v576_v47 }
 0x17b   :  { %524 = vst.msk [vmem:[%s946_s4 + $0x2c] sm:$0xf] %vm512_vm1, %v577_v48  ;;  %525 = vst.msk [vmem:[%s946_s4 + $0x30] sm:$0xf] %vm512_vm1, %v578_v49 }
 0x17c   :  { %526 = vst.msk [vmem:[%s946_s4 + $0x34] sm:$0xf] %vm512_vm1, %v579_v50  ;;  %527 = vst.msk [vmem:[%s946_s4 + $0x38] sm:$0xf] %vm512_vm1, %v580_v51 }
 0x17d   :  { %528 = vst.msk [vmem:[%s946_s4 + $0x3c] sm:$0xf] %vm512_vm1, %v581_v52 }

// kernel: _lambda_.11
= control target key start
LH: loop header
LB: loop body
LE: loop exit
PB: predicated region body
PF: predicated region fallthrough
CT: control target
= control target key end

     0   :  { %vm232_vm4 = vcmask 261120   ;;  %vm308_vm5 = vcmask 257024   ;;  %s519_s1 = inlined_call_operand.vmem [shape: bf16[256,32], index: 1, kind: input, shape index: {}]   ;;  %s520_s0 = inlined_call_operand.vmem [shape: bf16[32,256], index: 0, kind: input, shape index: {}]   ;;  %s521_s2 = inlined_call_operand.vmem [shape: f32[1,32], index: 2, kind: input, shape index: {}]   ;;  %s522_s3 = inlined_call_operand.vmem [shape: f32[1,32], index: 3, kind: input, shape index: {}]   ;;  %s523_s4 = inlined_call_operand.vmem [shape: bf16[32,32], index: 4, kind: output, shape index: {}]  }
   0x1   :  { %v390_v0 = vld [vmem:[%s519_s1 + $0x40] sm:$0xff]   ;;  %v392_v2 = vld [vmem:[%s519_s1 + $0x48] sm:$0xff]   ;;  %v394_v4 = vld [vmem:[%s519_s1 + $0x50] sm:$0xff]  }
   0x2   :  { %v391_v1 = vld [vmem:[%s519_s1] sm:$0xff]   ;;  %346 = vmatprep.subr.bf16.mxu0 %v390_v0  ;;  %374 = vmatprep.subr.bf16.mxu1 %v390_v0  ;;  %v393_v3 = vld [vmem:[%s519_s1 + $0x8] sm:$0xff]   ;;  %v395_v5 = vld [vmem:[%s519_s1 + $0x10] sm:$0xff]  }
   0x3   :  { %347 = vmatpush3.bf16.msra.mxu0 %v391_v1  ;;  %382 = vmatpush3.bf16.msra.mxu1 %v391_v1  ;;  %v396_v6 = vld [vmem:[%s519_s1 + $0x58] sm:$0xff]   ;;  %v398_v8 = vld [vmem:[%s519_s1 + $0x60] sm:$0xff]   ;;  %v400_v10 = vld [vmem:[%s519_s1 + $0x68] sm:$0xff]  }
   0x4   :  { %348 = vmatprep.subr.bf16.mxu0 %v392_v2  ;;  %375 = vmatprep.subr.bf16.mxu1 %v392_v2  ;;  %v397_v7 = vld [vmem:[%s519_s1 + $0x18] sm:$0xff]   ;;  %v399_v9 = vld [vmem:[%s519_s1 + $0x20] sm:$0xff]   ;;  %v20_v12 = vld [vmem:[%s520_s0 + $0x8] sm:$0xff] }
   0x5   :  { %v19_v11 = vld [vmem:[%s520_s0] sm:$0xff]  ;;  %v21_v13 = vld [vmem:[%s520_s0 + $0x10] sm:$0xff]  ;;  %vm24_vm1 = vcmp.ge.bf16.partialorder %v20_v12, 0  ;;  %v28_v15 = vmul.bf16 1045249613, %v20_v12  ;;  %v22_v16 = vld [vmem:[%s520_s0 + $0x18] sm:$0xff] }
   0x6   :  { %vm23_vm0 = vcmp.ge.bf16.partialorder %v19_v11, 0  ;;  %v27_v14 = vmul.bf16 1045249613, %v19_v11  ;;  %vm25_vm2 = vcmp.ge.bf16.partialorder %v21_v13, 0  ;;  %v29_v17 = vmul.bf16 1045249613, %v21_v13 }
   0x7   :  { %349 = vmatpush3.bf16.msra.mxu0 %v393_v3  ;;  %383 = vmatpush3.bf16.msra.mxu1 %v393_v3  ;;  %v401_v18 = vld [vmem:[%s519_s1 + $0x28] sm:$0xff]   ;;  %v32_v20 = vsel %vm24_vm1, %v20_v12, %v28_v15  ;;  %vm26_vm3 = vcmp.ge.bf16.partialorder %v22_v16, 0  ;;  %v30_v21 = vmul.bf16 1045249613, %v22_v16  ;;  %v402_v22 = vld [vmem:[%s519_s1 + $0x70] sm:$0xff]   ;;  %v404_v28 = vld [vmem:[%s519_s1 + $0x78] sm:$0xff]  }
   0x8   :  { %350 = vmatprep.subr.bf16.mxu0 %v394_v4  ;;  %376 = vmatprep.subr.bf16.mxu1 %v394_v4  ;;  %v31_v19 = vsel %vm23_vm0, %v19_v11, %v27_v14  ;;  %v33_v24 = vsel %vm25_vm2, %v21_v13, %v29_v17  ;;  %v403_v27 = vld [vmem:[%s519_s1 + $0x30] sm:$0xff]   ;;  %v405_v29 = vld [vmem:[%s519_s1 + $0x38] sm:$0xff]   ;;  %v273_v17 = vlaneseq }
   0x9   :  { %v318_v23 = vcombine.high %v31_v19, %v32_v20  ;;  %v34_v25 = vsel %vm26_vm3, %v22_v16, %v30_v21  ;;  %v317_v30 = vcombine.low %v31_v19, %v32_v20  ;;  %v271_v19 = vld [vmem:[%s521_s2] sm:$0x1] }
   0xa   :  { %v320_v26 = vcombine.high %v33_v24, %v34_v25  ;;  %v319_v31 = vcombine.low %v33_v24, %v34_v25  ;;  %v337_v24 = vld [vmem:[%s522_s3] ss:$0 sm:$0xff] }
   0xb   :  { %351 = vmatpush3.bf16.msra.mxu0 %v395_v5  ;;  %384 = vmatpush3.bf16.msra.mxu1 %v395_v5 }
   0xc   :  { %352 = vmatprep.subr.bf16.mxu0 %v396_v6  ;;  %377 = vmatprep.subr.bf16.mxu1 %v396_v6 }
   0xd   :  { %215 = vmatprep.mubr.bf16.mxu0 %v318_v23  ;;  %223 = vmatprep.mubr.bf16.mxu1 %v320_v26 }
   0xf   :  { %353 = vmatpush3.bf16.msra.mxu0 %v397_v7  ;;  %385 = vmatpush3.bf16.msra.mxu1 %v397_v7 }
  0x10   :  { %354 = vmatprep.subr.bf16.mxu0 %v398_v8  ;;  %378 = vmatprep.subr.bf16.mxu1 %v398_v8 }
  0x13   :  { %355 = vmatpush3.bf16.msra.mxu0 %v399_v9  ;;  %386 = vmatpush3.bf16.msra.mxu1 %v399_v9 }
  0x14   :  { %356 = vmatprep.subr.bf16.mxu0 %v400_v10  ;;  %379 = vmatprep.subr.bf16.mxu1 %v400_v10 }
  0x17   :  { %357 = vmatpush3.bf16.msra.mxu0 %v401_v18  ;;  %387 = vmatpush3.bf16.msra.mxu1 %v401_v18  ;;  %v274_v18 = vshrl.u32 %v273_v17, 7 }
  0x18   :  { %358 = vmatprep.subr.bf16.mxu0 %v402_v22  ;;  %380 = vmatprep.subr.bf16.mxu1 %v402_v22 }
  0x19   :  { %v275_v20 = vsub.s32 0, %v274_v18 }
  0x1b   :  { %359 = vmatpush3.bf16.msra.mxu0 %v403_v27  ;;  %388 = vmatpush3.bf16.msra.mxu1 %v403_v27 }
  0x1c   :  { %360 = vmatprep.subr.bf16.mxu0 %v404_v28  ;;  %381 = vmatprep.subr.bf16.mxu1 %v404_v28 }
  0x1f   :  { %361 = vmatpush3.bf16.msra.mxu0 %v405_v29  ;;  %389 = vmatpush3.bf16.msra.mxu1 %v405_v29 }
  0x22   :  { %216 = vmatmul.mubr.bf16.vlgmr.msra.gmra.mrb[0].mxu0 %v317_v30  ;;  %224 = vmatmul.mubr.bf16.vlgmr.msra.gmra.mrb[0].mxu1 %v319_v31 }
  0xf5   :  { %v362_v32 = vpop.f32.mrb[0].mxu0  ;;  %v368_v33 = vpop.f32.mrb[0].mxu1 }
  0xf6   :  { %v363_v34 = vpop.f32.mrb[1].mxu0  ;;  %v369_v35 = vpop.f32.mrb[1].mxu1 }
  0xf7   :  { %v364_v36 = vadd.f32 %v363_v34, %v362_v32  ;;  %v365_v37 = vpop.f32.mrb[2].mxu0  ;;  %v370_v38 = vadd.f32 %v369_v35, %v368_v33  ;;  %v371_v39 = vpop.f32.mrb[2].mxu1 }
  0xf8   :  { %v366_v40 = vpop.f32.mrb[3].mxu0  ;;  %v372_v41 = vpop.f32.mrb[3].mxu1 }
  0xf9   :  { %v367_v42 = vadd.f32 %v366_v40, %v365_v37  ;;  %v373_v43 = vadd.f32 %v372_v41, %v371_v39  ;;  %v233_v44 = vsel %vm232_vm4, %v364_v36, 0.0  ;;  %v236_v45 = vsel %vm232_vm4, %v370_v38, 0.0 }
  0xfb   :  { %v234_v46 = vsel %vm232_vm4, %v367_v42, 0.0  ;;  %v238_v49 = vsel %vm232_vm4, %v373_v43, 0.0 }
  0xfc   :  { %v235_v47 = vadd.f32 %v234_v46, %v233_v44 }
  0xfe   :  { %v237_v48 = vadd.f32 %v236_v45, %v235_v47 }
 0x100   :  { %v239_v50 = vadd.f32 %v238_v49, %v237_v48 }
 0x102   :  { %v240_v51 = vrot.slane %v239_v50, 4 }
 0x104   :  { %v241_v52 = vadd.f32 %v240_v51, %v239_v50 }
 0x106   :  { %v242_v53 = vrot.slane %v241_v52, 2 }
 0x108   :  { %v243_v54 = vadd.f32 %v242_v53, %v241_v52 }
 0x10a   :  { %v244_v55 = vrot.slane %v243_v54, 1 }
 0x10c   :  { %v245_v56 = vadd.f32 %v244_v55, %v243_v54 }
 0x10e   :  { %v246_v57 = vmul.f32 0.03125, %v245_v56 }
 0x110   :  { %v247_v58 = vsub.f32 %v364_v36, %v246_v57  ;;  %v248_v59 = vsub.f32 %v367_v42, %v246_v57  ;;  %v249_v60 = vsub.f32 %v370_v38, %v246_v57  ;;  %v250_v61 = vsub.f32 %v373_v43, %v246_v57 }
 0x112   :  { %v251_v62 = vmul.f32 %v247_v58, %v247_v58  ;;  %v252_v63 = vmul.f32 %v248_v59, %v248_v59  ;;  %v253_v0 = vmul.f32 %v249_v60, %v249_v60  ;;  %v254_v1 = vmul.f32 %v250_v61, %v250_v61 }
 0x114   :  { %v255_v2 = vsel %vm232_vm4, %v251_v62, 0.0  ;;  %v256_v3 = vsel %vm232_vm4, %v252_v63, 0.0  ;;  %v258_v5 = vsel %vm232_vm4, %v253_v0, 0.0  ;;  %v260_v7 = vsel %vm232_vm4, %v254_v1, 0.0 }
 0x115   :  { %v257_v4 = vadd.f32 %v256_v3, %v255_v2 }
 0x117   :  { %v259_v6 = vadd.f32 %v258_v5, %v257_v4 }
 0x119   :  { %v261_v8 = vadd.f32 %v260_v7, %v259_v6 }
 0x11b   :  { %v262_v9 = vrot.slane %v261_v8, 4 }
 0x11d   :  { %v263_v10 = vadd.f32 %v262_v9, %v261_v8 }
 0x11f   :  { %v264_v11 = vrot.slane %v263_v10, 2 }
 0x121   :  { %v265_v12 = vadd.f32 %v264_v11, %v263_v10 }
 0x123   :  { %v266_v13 = vrot.slane %v265_v12, 1 }
 0x125   :  { %v267_v14 = vadd.f32 %v266_v13, %v265_v12 }
 0x127   :  { %v268_v15 = vmul.f32 0.03125, %v267_v14 }
 0x129   :  { %v269_v16 = vadd.f32 1e-05, %v268_v15 }
 0x12b   :  { %406 = vrsqrt.f32 %v269_v16 }
 0x135   :  { %v407_v21 = vpop.eup %406 }
 0x136   :  { %v272_v22 = vmul.f32 %v407_v21, %v271_v19 }
 0x138   :  { %v276_v23 = vrot.slane %v272_v22, %v275_v20 }
 0x13a   :  { %v277_v25 = vmul.f32 %v276_v23, %v247_v58  ;;  %v278_v26 = vmul.f32 %v276_v23, %v248_v59  ;;  %v279_v27 = vmul.f32 %v276_v23, %v249_v60  ;;  %v280_v28 = vmul.f32 %v276_v23, %v250_v61 }
 0x13c   :  { %v288_v29 = vadd.f32 %v337_v24, %v277_v25  ;;  %v289_v30 = vadd.f32 %v337_v24, %v278_v26  ;;  %v290_v31 = vadd.f32 %v337_v24, %v279_v27  ;;  %v291_v32 = vadd.f32 %v337_v24, %v280_v28 }
 0x13e   :  { %v342_v33 = vpack.c.bf16 %v288_v29, %v288_v29  ;;  %v343_v34 = vpack.c.bf16 %v289_v30, %v289_v30  ;;  %v344_v35 = vpack.c.bf16 %v290_v31, %v290_v31  ;;  %v345_v36 = vpack.c.bf16 %v291_v32, %v291_v32 }
 0x140   :  { %309 = vst.msk [vmem:[%s523_s4] sm:$0xf] %vm308_vm5, %v342_v33  ;;  %310 = vst.msk [vmem:[%s523_s4 + $0x4] sm:$0xf] %vm308_vm5, %v343_v34 }
 0x141   :  { %311 = vst.msk [vmem:[%s523_s4 + $0x8] sm:$0xf] %vm308_vm5, %v344_v35  ;;  %312 = vst.msk [vmem:[%s523_s4 + $0xc] sm:$0xf] %vm308_vm5, %v345_v36 }

// kernel: _lambda_.13
= control target key start
LH: loop header
LB: loop body
LE: loop exit
PB: predicated region body
PF: predicated region fallthrough
CT: control target
= control target key end

     0   :  { %v820_v1 = vmov 0.0   ;;  %v821_v8 = vmov 1966171168   ;;  %v62_v10 = vlaneseq  ;;  %vm822_vm1 = vmmov 0   ;;  %s1030_s1 = inlined_call_operand.vmem [shape: bf16[256,64], index: 1, kind: input, shape index: {}]   ;;  %s1031_s0 = inlined_call_operand.vmem [shape: bf16[2,256], index: 0, kind: input, shape index: {}]   ;;  %s1032_s2 = inlined_call_operand.vmem [shape: bf16[4,64,64], index: 2, kind: input, shape index: {}]   ;;  %s1033_s3 = inlined_call_operand.vmem [shape: f32[1,64], index: 3, kind: input, shape index: {}]   ;;  %s1034_s4 = inlined_call_operand.vmem [shape: f32[1,64], index: 4, kind: input, shape index: {}]   ;;  %s1035_s5 = inlined_call_operand.vmem [shape: bf16[4,2,64], index: 5, kind: output, shape index: {}]  }
   0x1   :  { %v786_v0 = vld [vmem:[%s1030_s1 + $0x40] sm:$0xff]   ;;  %735 = vmatprep.subr.bf16.mxu1 %v820_v1  ;;  %v788_v3 = vld [vmem:[%s1030_s1 + $0x48] sm:$0xff]   ;;  %v790_v5 = vld [vmem:[%s1030_s1 + $0x50] sm:$0xff]   ;;  %v60_v9 = vunpack.c.l.s4 %v821_v8  ;;  %743 = vmatprep.mubr.msk.bf16.mxu1 %vm822_vm1, %v820_v1  ;;  %vm253_vm2 = vcmask 523264   ;;  %vm516_vm3 = vcmask 517120   ;;  %vm609_vm4 = vcmask 516096  }
   0x2   :  { %v787_v2 = vld [vmem:[%s1030_s1] sm:$0xff]   ;;  %693 = vmatprep.subr.bf16.mxu0 %v786_v0  ;;  %v789_v4 = vld [vmem:[%s1030_s1 + $0x8] sm:$0xff]   ;;  %v791_v6 = vld [vmem:[%s1030_s1 + $0x10] sm:$0xff]   ;;  %v881_v14 = vshrl.u32 %v62_v10, 7 }
   0x3   :  { %694 = vmatpush3.bf16.msra.mxu0 %v787_v2  ;;  %v792_v7 = vld [vmem:[%s1030_s1 + $0x58] sm:$0xff]   ;;  %v794_v12 = vld [vmem:[%s1030_s1 + $0x60] sm:$0xff]   ;;  %v61_v13 = vunpack.c.0.s8 %v60_v9  ;;  %v796_v16 = vld [vmem:[%s1030_s1 + $0x68] sm:$0xff]  }
   0x4   :  { %695 = vmatprep.subr.bf16.mxu0 %v788_v3  ;;  %v793_v11 = vld [vmem:[%s1030_s1 + $0x18] sm:$0xff]   ;;  %v795_v15 = vld [vmem:[%s1030_s1 + $0x20] sm:$0xff]   ;;  %v797_v21 = vld [vmem:[%s1030_s1 + $0x28] sm:$0xff]  }
   0x5   :  { %v22_v17 = vld [vmem:[%s1031_s0] sm:$0x3]  ;;  %v64_v18 = vsub.s32 %v61_v13, %v881_v14  ;;  %v804_v23 = vld [vmem:[%s1032_s2 + $0x8] sm:$0xff]   ;;  %v798_v24 = vld [vmem:[%s1030_s1 + $0x70] sm:$0xff]  }
   0x6   :  { %vm23_vm0 = vcmp.ge.bf16.partialorder %v22_v17, 0  ;;  %v24_v19 = vmul.bf16 1045249613, %v22_v17  ;;  %v802_v20 = vld [vmem:[%s1032_s2] sm:$0xff]   ;;  %v799_v26 = vld [vmem:[%s1030_s1 + $0x30] sm:$0xff]   ;;  %v800_v27 = vld [vmem:[%s1030_s1 + $0x78] sm:$0xff]  }
   0x7   :  { %696 = vmatpush3.bf16.msra.mxu0 %v789_v4  ;;  %736 = vmatpush3.bf16.msra.mxu1 %v802_v20  ;;  %v801_v30 = vld [vmem:[%s1030_s1 + $0x38] sm:$0xff]   ;;  %v803_v32 = vld [vmem:[%s1032_s2 + $0x40] sm:$0xff]   ;;  %v805_v33 = vld [vmem:[%s1032_s2 + $0x48] sm:$0xff]  }
   0x8   :  { %697 = vmatprep.subr.bf16.mxu0 %v790_v5  ;;  %v25_v22 = vsel %vm23_vm0, %v22_v17, %v24_v19  ;;  %737 = vmatprep.subr.bf16.mxu1 %v820_v1  ;;  %v806_v34 = vld [vmem:[%s1032_s2 + $0x10] sm:$0xff]   ;;  %v808_v36 = vld [vmem:[%s1032_s2 + $0x18] sm:$0xff]   ;;  %v810_v44 = vld [vmem:[%s1032_s2 + $0x20] sm:$0xff]  }
   0x9   :  { %v65_v25 = vrot.slane %v25_v22, %v64_v18  ;;  %v807_v35 = vld [vmem:[%s1032_s2 + $0x50] sm:$0xff]   ;;  %v809_v37 = vld [vmem:[%s1032_s2 + $0x58] sm:$0xff]   ;;  %v811_v46 = vld [vmem:[%s1032_s2 + $0x28] sm:$0xff]  }
   0xa   :  { %v812_v47 = vld [vmem:[%s1032_s2 + $0x30] sm:$0xff]   ;;  %v813_v48 = vld [vmem:[%s1032_s2 + $0x38] sm:$0xff]   ;;  %v814_v49 = vld [vmem:[%s1032_s2 + $0x60] sm:$0xff]  }
   0xb   :  { %698 = vmatpush3.bf16.msra.mxu0 %v791_v6  ;;  %v66_v28 = vcombine.high %v65_v25, %v65_v25  ;;  %738 = vmatpush3.bf16.msra.mxu1 %v804_v23  ;;  %v73_v31 = vrot.slane %v65_v25, %v64_v18  ;;  %v815_v50 = vld [vmem:[%s1032_s2 + $0x68] sm:$0xff]   ;;  %v816_v51 = vld [vmem:[%s1032_s2 + $0x70] sm:$0xff]   ;;  %v817_v52 = vld [vmem:[%s1032_s2 + $0x78] sm:$0xff]  }
   0xc   :  { %699 = vmatprep.subr.bf16.mxu0 %v792_v7  ;;  %739 = vmatprep.subr.bf16.mxu1 %v820_v1 }
   0xd   :  { %v80_v29 = vrot.slane %v66_v28, %v64_v18 }
   0xf   :  { %700 = vmatpush3.bf16.msra.mxu0 %v793_v11  ;;  %211 = vmatprep.mubr.bf16.mxu0 %v80_v29 }
  0x10   :  { %701 = vmatprep.subr.bf16.mxu0 %v794_v12  ;;  %740 = vmatpush3.bf16.msra.mxu1 %v806_v34 }
  0x11   :  { %741 = vmatprep.subr.bf16.mxu1 %v820_v1 }
  0x13   :  { %702 = vmatpush3.bf16.msra.mxu0 %v795_v15 }
  0x14   :  { %703 = vmatprep.subr.bf16.mxu0 %v796_v16  ;;  %742 = vmatpush3.bf16.msra.mxu1 %v808_v36 }
  0x15   :  { %747 = vmatprep.subr.bf16.mxu1 %v820_v1 }
  0x17   :  { %704 = vmatpush3.bf16.msra.mxu0 %v797_v21 }
  0x18   :  { %705 = vmatprep.subr.bf16.mxu0 %v798_v24 }
  0x1b   :  { %706 = vmatpush3.bf16.msra.mxu0 %v799_v26 }
  0x1c   :  { %707 = vmatprep.subr.bf16.mxu0 %v800_v27 }
  0x1f   :  { %708 = vmatpush3.bf16.msra.mxu0 %v801_v30 }
  0x20   :  { %759 = vmatprep.subr.bf16.mxu0 %v820_v1 }
  0x22   :  { %212 = vmatmul.mubr.bf16.vlgmr.msra.gmra.mrb[0].mxu0 %v73_v31 }
  0x23   :  { %760 = vmatpush3.bf16.msra.mxu0 %v803_v32  ;;  %767 = vmatprep.mubr.msk.bf16.mxu0 %vm822_vm1, %v820_v1 }
  0x24   :  { %761 = vmatprep.subr.bf16.mxu0 %v820_v1 }
  0x27   :  { %762 = vmatpush3.bf16.msra.mxu0 %v805_v33 }
  0x28   :  { %763 = vmatprep.subr.bf16.mxu0 %v820_v1 }
  0x2b   :  { %764 = vmatpush3.bf16.msra.mxu0 %v807_v35 }
  0x2c   :  { %765 = vmatprep.subr.bf16.mxu0 %v820_v1 }
  0x2f   :  { %766 = vmatpush3.bf16.msra.mxu0 %v809_v37 }
  0xf5   :  { %v709_v38 = vpop.f32.mrb[0].mxu0 }
  0xf6   :  { %v710_v39 = vpop.f32.mrb[1].mxu0 }
  0xf7   :  { %v711_v40 = vadd.f32 %v710_v39, %v709_v38  ;;  %v712_v41 = vpop.f32.mrb[2].mxu0 }
  0xf8   :  { %v713_v42 = vpop.f32.mrb[3].mxu0 }
  0xf9   :  { %v219_v43 = vmax.f32 %v711_v40, 0.0 }
  0xfb   :  { %v220_v45 = vpack.c.bf16 %v219_v43, %v219_v43 }
  0xfd   :  { %744 = vmatmul.mubr.msk.bf16.vlgmr.msra.gmra.mrb[0].mxu1 %vm253_vm2, %v220_v45  ;;  %768 = vmatmul.mubr.msk.bf16.vlgmr.msra.gmra.mrb[4].mxu0 %vm253_vm2, %v220_v45 }
  0xfe   :  { %748 = vmatpush3.bf16.msra.mxu1 %v810_v44  ;;  %755 = vmatprep.mubr.msk.bf16.mxu1 %vm822_vm1, %v820_v1 }
  0xff   :  { %749 = vmatprep.subr.bf16.mxu1 %v820_v1 }
 0x102   :  { %750 = vmatpush3.bf16.msra.mxu1 %v811_v46 }
 0x103   :  { %751 = vmatprep.subr.bf16.mxu1 %v820_v1 }
 0x106   :  { %752 = vmatpush3.bf16.msra.mxu1 %v812_v47 }
 0x107   :  { %753 = vmatprep.subr.bf16.mxu1 %v820_v1 }
 0x10a   :  { %754 = vmatpush3.bf16.msra.mxu1 %v813_v48 }
 0x10b   :  { %771 = vmatprep.subr.bf16.mxu1 %v820_v1 }
 0x10d   :  { %756 = vmatmul.mubr.msk.bf16.vlgmr.msra.gmra.mrb[4].mxu1 %vm253_vm2, %v220_v45 }
 0x10e   :  { %772 = vmatpush3.bf16.msra.mxu1 %v814_v49  ;;  %779 = vmatprep.mubr.msk.bf16.mxu1 %vm822_vm1, %v820_v1 }
 0x10f   :  { %773 = vmatprep.subr.bf16.mxu1 %v820_v1 }
 0x112   :  { %774 = vmatpush3.bf16.msra.mxu1 %v815_v50 }
 0x113   :  { %775 = vmatprep.subr.bf16.mxu1 %v820_v1 }
 0x116   :  { %776 = vmatpush3.bf16.msra.mxu1 %v816_v51 }
 0x117   :  { %777 = vmatprep.subr.bf16.mxu1 %v820_v1 }
 0x11a   :  { %778 = vmatpush3.bf16.msra.mxu1 %v817_v52 }
 0x11d   :  { %780 = vmatmul.mubr.msk.bf16.vlgmr.msra.gmra.mrb[8].mxu1 %vm253_vm2, %v220_v45 }
 0x1d0   :  { %v983_v53 = vpop.f32.mrb[0].mxu1  ;;  %v985_v54 = vpop.f32.mrb[4].mxu0 }
 0x1d1   :  { %v745_v55 = vpop.f32.mrb[1].mxu1  ;;  %v769_v56 = vpop.f32.mrb[5].mxu0  ;;  %v517_v61 = vsel %vm516_vm3, %v983_v53, 0.0  ;;  %v532_v62 = vsel %vm516_vm3, %v985_v54, 0.0 }
 0x1d2   :  { %v294_v57 = vpop.f32.mrb[2].mxu1  ;;  %v440_v58 = vpop.f32.mrb[6].mxu0  ;;  %v518_v63 = vrot.slane %v517_v61, 4  ;;  %v533_v0 = vrot.slane %v532_v62, 4 }
 0x1d3   :  { %v746_v59 = vpop.f32.mrb[3].mxu1  ;;  %v770_v60 = vpop.f32.mrb[7].mxu0 }
 0x1d4   :  { %v519_v1 = vadd.f32 %v518_v63, %v517_v61  ;;  %v534_v2 = vadd.f32 %v533_v0, %v532_v62 }
 0x1d6   :  { %v520_v3 = vrot.slane %v519_v1, 2  ;;  %v535_v7 = vrot.slane %v534_v2, 2 }
 0x1d8   :  { %v521_v11 = vadd.f32 %v520_v3, %v519_v1  ;;  %v536_v13 = vadd.f32 %v535_v7, %v534_v2 }
 0x1da   :  { %v522_v16 = vrot.slane %v521_v11, 1  ;;  %v537_v18 = vrot.slane %v536_v13, 1 }
 0x1dc   :  { %v523_v20 = vadd.f32 %v522_v16, %v521_v11  ;;  %v538_v22 = vadd.f32 %v537_v18, %v536_v13 }
 0x1e0   :  { %v991_v4 = vpop.f32.mrb[4].mxu1 }
 0x1e1   :  { %v524_v5 = vsel %vm516_vm3, %v991_v4, 0.0  ;;  %v757_v6 = vpop.f32.mrb[5].mxu1 }
 0x1e2   :  { %v525_v8 = vrot.slane %v524_v5, 4  ;;  %v367_v9 = vpop.f32.mrb[6].mxu1 }
 0x1e3   :  { %v758_v10 = vpop.f32.mrb[7].mxu1 }
 0x1e4   :  { %v526_v12 = vadd.f32 %v525_v8, %v524_v5 }
 0x1e6   :  { %v527_v15 = vrot.slane %v526_v12, 2 }
 0x1e8   :  { %v528_v17 = vadd.f32 %v527_v15, %v526_v12 }
 0x1ea   :  { %v529_v19 = vrot.slane %v528_v17, 1 }
 0x1ec   :  { %v530_v21 = vadd.f32 %v529_v19, %v528_v17  ;;  %v591_v19 = vld [vmem:[%s1033_s3] sm:$0x1] }
 0x1ee   :  { %v531_v23 = vadd.f32 %v530_v21, %v523_v20  ;;  %v598_v20 = vsub.s32 0, %v881_v14 }
 0x1f0   :  { %v995_v24 = vpop.f32.mrb[8].mxu1  ;;  %v539_v25 = vadd.f32 %v538_v22, %v531_v23  ;;  %v593_v23 = vld [vmem:[%s1034_s4] sm:$0x1] }
 0x1f1   :  { %v540_v26 = vsel %vm516_vm3, %v995_v24, 0.0  ;;  %v781_v27 = vpop.f32.mrb[9].mxu1 }
 0x1f2   :  { %v541_v28 = vrot.slane %v540_v26, 4  ;;  %v513_v29 = vpop.f32.mrb[10].mxu1 }
 0x1f3   :  { %v782_v30 = vpop.f32.mrb[11].mxu1 }
 0x1f4   :  { %v542_v31 = vadd.f32 %v541_v28, %v540_v26 }
 0x1f6   :  { %v543_v32 = vrot.slane %v542_v31, 2 }
 0x1f8   :  { %v544_v33 = vadd.f32 %v543_v32, %v542_v31 }
 0x1fa   :  { %v545_v34 = vrot.slane %v544_v33, 1 }
 0x1fc   :  { %v546_v35 = vadd.f32 %v545_v34, %v544_v33 }
 0x1fe   :  { %v547_v36 = vadd.f32 %v546_v35, %v539_v25 }
 0x200   :  { %v548_v37 = vmul.f32 0.125, %v547_v36 }
 0x202   :  { %v549_v38 = vsub.f32 %v983_v53, %v548_v37  ;;  %v558_v39 = vsub.f32 %v991_v4, %v548_v37  ;;  %v568_v40 = vsub.f32 %v985_v54, %v548_v37  ;;  %v578_v41 = vsub.f32 %v995_v24, %v548_v37 }
 0x204   :  { %v550_v42 = vmul.f32 %v549_v38, %v549_v38  ;;  %v559_v43 = vmul.f32 %v558_v39, %v558_v39  ;;  %v569_v44 = vmul.f32 %v568_v40, %v568_v40  ;;  %v579_v45 = vmul.f32 %v578_v41, %v578_v41 }
 0x206   :  { %v551_v46 = vsel %vm516_vm3, %v550_v42, 0.0  ;;  %v560_v47 = vsel %vm516_vm3, %v559_v43, 0.0  ;;  %v570_v48 = vsel %vm516_vm3, %v569_v44, 0.0  ;;  %v580_v49 = vsel %vm516_vm3, %v579_v45, 0.0 }
 0x207   :  { %v552_v50 = vrot.slane %v551_v46, 4  ;;  %v561_v51 = vrot.slane %v560_v47, 4  ;;  %v571_v52 = vrot.slane %v570_v48, 4  ;;  %v581_v55 = vrot.slane %v580_v49, 4 }
 0x209   :  { %v553_v56 = vadd.f32 %v552_v50, %v551_v46  ;;  %v562_v57 = vadd.f32 %v561_v51, %v560_v47  ;;  %v572_v58 = vadd.f32 %v571_v52, %v570_v48  ;;  %v582_v59 = vadd.f32 %v581_v55, %v580_v49 }
 0x20b   :  { %v554_v60 = vrot.slane %v553_v56, 2  ;;  %v563_v61 = vrot.slane %v562_v57, 2  ;;  %v573_v62 = vrot.slane %v572_v58, 2  ;;  %v583_v63 = vrot.slane %v582_v59, 2 }
 0x20d   :  { %v555_v0 = vadd.f32 %v554_v60, %v553_v56  ;;  %v564_v1 = vadd.f32 %v563_v61, %v562_v57  ;;  %v574_v2 = vadd.f32 %v573_v62, %v572_v58  ;;  %v584_v3 = vadd.f32 %v583_v63, %v582_v59 }
 0x20f   :  { %v556_v5 = vrot.slane %v555_v0, 1  ;;  %v565_v6 = vrot.slane %v564_v1, 1  ;;  %v575_v7 = vrot.slane %v574_v2, 1  ;;  %v585_v10 = vrot.slane %v584_v3, 1 }
 0x211   :  { %v557_v8 = vadd.f32 %v556_v5, %v555_v0  ;;  %v566_v9 = vadd.f32 %v565_v6, %v564_v1  ;;  %v576_v12 = vadd.f32 %v575_v7, %v574_v2  ;;  %v586_v15 = vadd.f32 %v585_v10, %v584_v3 }
 0x213   :  { %v567_v11 = vadd.f32 %v566_v9, %v557_v8 }
 0x215   :  { %v577_v13 = vadd.f32 %v576_v12, %v567_v11 }
 0x217   :  { %v587_v16 = vadd.f32 %v586_v15, %v577_v13 }
 0x219   :  { %v588_v17 = vmul.f32 0.125, %v587_v16 }
 0x21b   :  { %v589_v18 = vadd.f32 1e-05, %v588_v17 }
 0x21d   :  { %818 = vrsqrt.f32 %v589_v18 }
 0x227   :  { %v819_v21 = vpop.eup %818 }
 0x228   :  { %v592_v22 = vmul.f32 %v819_v21, %v591_v19 }
 0x22a   :  { %v594_v25 = vmul.f32 %v592_v22, %v548_v37  ;;  %v599_v26 = vrot.slane %v592_v22, %v598_v20 }
 0x22c   :  { %v595_v27 = vsub.f32 %v593_v23, %v594_v25  ;;  %v600_v28 = vmul.f32 %v599_v26, %v983_v53  ;;  %v611_v29 = vmul.f32 %v599_v26, %v991_v4  ;;  %v616_v30 = vmul.f32 %v599_v26, %v985_v54 }
 0x22d   :  { %v621_v31 = vmul.f32 %v599_v26, %v995_v24 }
 0x22e   :  { %v605_v32 = vrot.slane %v595_v27, %v598_v20 }
 0x230   :  { %v607_v33 = vadd.f32 %v605_v32, %v600_v28  ;;  %v612_v14 = vadd.f32 %v611_v29, %v605_v32  ;;  %v617_v34 = vadd.f32 %v616_v30, %v605_v32  ;;  %v622_v35 = vadd.f32 %v621_v31, %v605_v32 }
 0x232   :  { %v608_v36 = vpack.c.bf16 %v607_v33, %v607_v33  ;;  %v613_v38 = vpack.c.bf16 %v612_v14, %v612_v14  ;;  %v618_v39 = vpack.c.bf16 %v617_v34, %v617_v34  ;;  %v623_v37 = vpack.c.bf16 %v622_v35, %v622_v35 }
 0x234   :  { %610 = vst.msk [vmem:[%s1035_s5] sm:$0x1] %vm609_vm4, %v608_v36  ;;  %690 = vst.msk [vmem:[%s1035_s5 + $0x1] sm:$0x1] %vm609_vm4, %v613_v38 }
 0x235   :  { %691 = vst.msk [vmem:[%s1035_s5 + $0x2] sm:$0x1] %vm609_vm4, %v618_v39  ;;  %692 = vst.msk [vmem:[%s1035_s5 + $0x3] sm:$0x1] %vm609_vm4, %v623_v37 }

// kernel: _lambda_.12
= control target key start
LH: loop header
LB: loop body
LE: loop exit
PB: predicated region body
PF: predicated region fallthrough
CT: control target
= control target key end

     0   :  { %vm377_vm2 = vcmask 523264   ;;  %vm414_vm3 = vcmask 519168   ;;  %s671_s1 = inlined_call_operand.vmem [shape: bf16[512,64], index: 1, kind: input, shape index: {}]   ;;  %s672_s0 = inlined_call_operand.vmem [shape: bf16[8,512], index: 0, kind: input, shape index: {}]   ;;  %s673_s2 = inlined_call_operand.vmem [shape: f32[1,64], index: 2, kind: input, shape index: {}]   ;;  %s674_s3 = inlined_call_operand.vmem [shape: f32[1,64], index: 3, kind: input, shape index: {}]   ;;  %s675_s4 = inlined_call_operand.vmem [shape: bf16[8,64], index: 4, kind: output, shape index: {}]  }
   0x1   :  { %v501_v0 = vld [vmem:[%s671_s1 + $0x40] sm:$0xff]   ;;  %v505_v4 = vld [vmem:[%s671_s1 + $0x48] sm:$0xff]   ;;  %v509_v8 = vld [vmem:[%s671_s1 + $0x50] sm:$0xff]  }
   0x2   :  { %v502_v1 = vld [vmem:[%s671_s1 + $0xc0] sm:$0xff]   ;;  %457 = vmatprep.subr.bf16.mxu0 %v501_v0  ;;  %v506_v5 = vld [vmem:[%s671_s1 + $0xc8] sm:$0xff]   ;;  %v510_v9 = vld [vmem:[%s671_s1 + $0xd0] sm:$0xff]  }
   0x3   :  { %v503_v2 = vld [vmem:[%s671_s1] sm:$0xff]   ;;  %479 = vmatprep.subr.bf16.mxu1 %v502_v1  ;;  %v507_v6 = vld [vmem:[%s671_s1 + $0x8] sm:$0xff]   ;;  %v511_v10 = vld [vmem:[%s671_s1 + $0x10] sm:$0xff]  }
   0x4   :  { %v504_v3 = vld [vmem:[%s671_s1 + $0x80] sm:$0xff]   ;;  %458 = vmatpush3.bf16.msra.mxu0 %v503_v2  ;;  %v508_v7 = vld [vmem:[%s671_s1 + $0x88] sm:$0xff]   ;;  %v512_v11 = vld [vmem:[%s671_s1 + $0x90] sm:$0xff]  }
   0x5   :  { %480 = vmatpush3.bf16.msra.mxu1 %v504_v3  ;;  %459 = vmatprep.subr.bf16.mxu0 %v505_v4  ;;  %v513_v12 = vld [vmem:[%s671_s1 + $0x58] sm:$0xff]   ;;  %v517_v16 = vld [vmem:[%s671_s1 + $0x60] sm:$0xff]   ;;  %v521_v20 = vld [vmem:[%s671_s1 + $0x68] sm:$0xff]  }
   0x6   :  { %481 = vmatprep.subr.bf16.mxu1 %v506_v5  ;;  %v514_v13 = vld [vmem:[%s671_s1 + $0xd8] sm:$0xff]   ;;  %v518_v17 = vld [vmem:[%s671_s1 + $0xe0] sm:$0xff]   ;;  %v522_v21 = vld [vmem:[%s671_s1 + $0xe8] sm:$0xff]  }
   0x7   :  { %v515_v14 = vld [vmem:[%s671_s1 + $0x18] sm:$0xff]   ;;  %v519_v18 = vld [vmem:[%s671_s1 + $0x20] sm:$0xff]   ;;  %v523_v22 = vld [vmem:[%s671_s1 + $0x28] sm:$0xff]  }
   0x8   :  { %460 = vmatpush3.bf16.msra.mxu0 %v507_v6  ;;  %v516_v15 = vld [vmem:[%s671_s1 + $0x98] sm:$0xff]   ;;  %v520_v19 = vld [vmem:[%s671_s1 + $0xa0] sm:$0xff]   ;;  %v524_v23 = vld [vmem:[%s671_s1 + $0xa8] sm:$0xff]  }
   0x9   :  { %482 = vmatpush3.bf16.msra.mxu1 %v508_v7  ;;  %461 = vmatprep.subr.bf16.mxu0 %v509_v8  ;;  %v525_v24 = vld [vmem:[%s671_s1 + $0x70] sm:$0xff]   ;;  %v529_v28 = vld [vmem:[%s671_s1 + $0x78] sm:$0xff]   ;;  %v19_v32 = vld [vmem:[%s672_s0] sm:$0xff]  ;;  %v400_v8 = vlaneseq }
   0xa   :  { %483 = vmatprep.subr.bf16.mxu1 %v510_v9  ;;  %v526_v25 = vld [vmem:[%s671_s1 + $0xf0] sm:$0xff]   ;;  %v530_v29 = vld [vmem:[%s671_s1 + $0xf8] sm:$0xff]   ;;  %v20_v33 = vld [vmem:[%s672_s0 + $0x8] sm:$0xff]  ;;  %vm21_vm0 = vcmp.ge.bf16.partialorder %v19_v32, 0  ;;  %v23_v34 = vmul.bf16 1045249613, %v19_v32 }
   0xb   :  { %v527_v26 = vld [vmem:[%s671_s1 + $0x30] sm:$0xff]   ;;  %v531_v30 = vld [vmem:[%s671_s1 + $0x38] sm:$0xff]   ;;  %vm22_vm1 = vcmp.ge.bf16.partialorder %v20_v33, 0  ;;  %v24_v35 = vmul.bf16 1045249613, %v20_v33  ;;  %v401_v9 = vshrl.u32 %v400_v8, 7 }
   0xc   :  { %462 = vmatpush3.bf16.msra.mxu0 %v511_v10  ;;  %v528_v27 = vld [vmem:[%s671_s1 + $0xb0] sm:$0xff]   ;;  %v532_v31 = vld [vmem:[%s671_s1 + $0xb8] sm:$0xff]   ;;  %v25_v36 = vsel %vm21_vm0, %v19_v32, %v23_v34  ;;  %v398_v10 = vld [vmem:[%s673_s2] sm:$0x1] }
   0xd   :  { %484 = vmatpush3.bf16.msra.mxu1 %v512_v11  ;;  %463 = vmatprep.subr.bf16.mxu0 %v513_v12  ;;  %v26_v37 = vsel %vm22_vm1, %v20_v33, %v24_v35  ;;  %v420_v38 = vcombine.low %v25_v36, %v25_v36  ;;  %v421_v39 = vcombine.high %v25_v36, %v25_v36  ;;  %v402_v11 = vsub.s32 0, %v401_v9 }
   0xe   :  { %485 = vmatprep.subr.bf16.mxu1 %v514_v13  ;;  %v422_v40 = vcombine.low %v26_v37, %v26_v37  ;;  %v423_v41 = vcombine.high %v26_v37, %v26_v37 }
   0xf   :  { %329 = vmatprep.mubr.bf16.mxu0 %v421_v39 }
  0x10   :  { %464 = vmatpush3.bf16.msra.mxu0 %v515_v14  ;;  %369 = vmatprep.mubr.bf16.mxu1 %v423_v41 }
  0x11   :  { %486 = vmatpush3.bf16.msra.mxu1 %v516_v15  ;;  %465 = vmatprep.subr.bf16.mxu0 %v517_v16  ;;  %v456_v15 = vld [vmem:[%s674_s3] ss:$0 sm:$0xff] }
  0x12   :  { %487 = vmatprep.subr.bf16.mxu1 %v518_v17 }
  0x14   :  { %466 = vmatpush3.bf16.msra.mxu0 %v519_v18 }
  0x15   :  { %488 = vmatpush3.bf16.msra.mxu1 %v520_v19  ;;  %467 = vmatprep.subr.bf16.mxu0 %v521_v20 }
  0x16   :  { %489 = vmatprep.subr.bf16.mxu1 %v522_v21 }
  0x18   :  { %468 = vmatpush3.bf16.msra.mxu0 %v523_v22 }
  0x19   :  { %490 = vmatpush3.bf16.msra.mxu1 %v524_v23  ;;  %469 = vmatprep.subr.bf16.mxu0 %v525_v24 }
  0x1a   :  { %491 = vmatprep.subr.bf16.mxu1 %v526_v25 }
  0x1c   :  { %470 = vmatpush3.bf16.msra.mxu0 %v527_v26 }
  0x1d   :  { %492 = vmatpush3.bf16.msra.mxu1 %v528_v27  ;;  %471 = vmatprep.subr.bf16.mxu0 %v529_v28 }
  0x1e   :  { %493 = vmatprep.subr.bf16.mxu1 %v530_v29 }
  0x20   :  { %472 = vmatpush3.bf16.msra.mxu0 %v531_v30 }
  0x21   :  { %494 = vmatpush3.bf16.msra.mxu1 %v532_v31 }
  0x23   :  { %330 = vmatmul.mubr.bf16.vlgmr.msra.gmra.mrb[0].mxu0 %v420_v38 }
  0x24   :  { %370 = vmatmul.mubr.bf16.vlgmr.msra.gmra.mrb[0].mxu1 %v422_v40 }
  0xf6   :  { %v473_v42 = vpop.f32.mrb[0].mxu0 }
  0xf7   :  { %v495_v43 = vpop.f32.mrb[0].mxu1  ;;  %v474_v44 = vpop.f32.mrb[1].mxu0 }
  0xf8   :  { %v496_v45 = vpop.f32.mrb[1].mxu1  ;;  %v475_v46 = vadd.f32 %v474_v44, %v473_v42  ;;  %v476_v48 = vpop.f32.mrb[2].mxu0 }
  0xf9   :  { %v497_v47 = vadd.f32 %v496_v45, %v495_v43  ;;  %v498_v49 = vpop.f32.mrb[2].mxu1  ;;  %v477_v50 = vpop.f32.mrb[3].mxu0 }
  0xfa   :  { %v499_v51 = vpop.f32.mrb[3].mxu1 }
  0xfb   :  { %v372_v52 = vadd.f32 %v497_v47, %v475_v46 }
  0xfd   :  { %v378_v53 = vsel %vm377_vm2, %v372_v52, 0.0 }
  0xfe   :  { %v379_v54 = vrot.slane %v378_v53, 4 }
 0x100   :  { %v380_v55 = vadd.f32 %v379_v54, %v378_v53 }
 0x102   :  { %v381_v56 = vrot.slane %v380_v55, 2 }
 0x104   :  { %v382_v57 = vadd.f32 %v381_v56, %v380_v55 }
 0x106   :  { %v383_v58 = vrot.slane %v382_v57, 1 }
 0x108   :  { %v384_v59 = vadd.f32 %v383_v58, %v382_v57 }
 0x10a   :  { %v385_v60 = vmul.f32 0.125, %v384_v59 }
 0x10c   :  { %v386_v61 = vsub.f32 %v372_v52, %v385_v60 }
 0x10e   :  { %v387_v62 = vmul.f32 %v386_v61, %v386_v61 }
 0x110   :  { %v388_v63 = vsel %vm377_vm2, %v387_v62, 0.0 }
 0x111   :  { %v389_v0 = vrot.slane %v388_v63, 4 }
 0x113   :  { %v390_v1 = vadd.f32 %v389_v0, %v388_v63 }
 0x115   :  { %v391_v2 = vrot.slane %v390_v1, 2 }
 0x117   :  { %v392_v3 = vadd.f32 %v391_v2, %v390_v1 }
 0x119   :  { %v393_v4 = vrot.slane %v392_v3, 1 }
 0x11b   :  { %v394_v5 = vadd.f32 %v393_v4, %v392_v3 }
 0x11d   :  { %v395_v6 = vmul.f32 0.125, %v394_v5 }
 0x11f   :  { %v396_v7 = vadd.f32 1e-05, %v395_v6 }
 0x121   :  { %533 = vrsqrt.f32 %v396_v7 }
 0x12b   :  { %v534_v12 = vpop.eup %533 }
 0x12c   :  { %v399_v13 = vmul.f32 %v534_v12, %v398_v10 }
 0x12e   :  { %v403_v14 = vrot.slane %v399_v13, %v402_v11 }
 0x130   :  { %v404_v16 = vmul.f32 %v403_v14, %v386_v61 }
 0x132   :  { %v412_v17 = vadd.f32 %v456_v15, %v404_v16 }
 0x134   :  { %v413_v18 = vpack.c.bf16 %v412_v17, %v412_v17 }
 0x136   :  { %415 = vst.msk [vmem:[%s675_s4] sm:$0xf] %vm414_vm3, %v413_v18 }

// kernel: _lambda_.14
= control target key start
LH: loop header
LB: loop body
LE: loop exit
PB: predicated region body
PF: predicated region fallthrough
CT: control target
= control target key end

     0   :  { %v2206_v34 = vmov 0   ;;  %vm1440_vm0 = vcmask 261120   ;;  %vm1533_vm1 = vcmask 257024   ;;  %s2694_s1 = inlined_call_operand.vmem [shape: bf16[4,512,32], index: 1, kind: input, shape index: {}]   ;;  %s2695_s0 = inlined_call_operand.vmem [shape: bf16[4,8,512], index: 0, kind: input, shape index: {}]   ;;  %s2696_s2 = inlined_call_operand.vmem [shape: f32[1,32], index: 2, kind: input, shape index: {}]   ;;  %s2697_s3 = inlined_call_operand.vmem [shape: f32[1,32], index: 3, kind: input, shape index: {}]   ;;  %s2698_s4 = inlined_call_operand.vmem [shape: bf16[4,8,32], index: 4, kind: output, shape index: {}]  }
   0x1   :  { %v2076_v0 = vld [vmem:[%s2694_s1 + $0x40] sm:$0xff]   ;;  %v2080_v4 = vld [vmem:[%s2694_s1 + $0x48] sm:$0xff]   ;;  %v2084_v8 = vld [vmem:[%s2694_s1 + $0x50] sm:$0xff]  }
   0x2   :  { %v2077_v1 = vld [vmem:[%s2694_s1 + $0xc0] sm:$0xff]   ;;  %1899 = vmatprep.subr.bf16.mxu0 %v2076_v0  ;;  %v2081_v5 = vld [vmem:[%s2694_s1 + $0xc8] sm:$0xff]   ;;  %v2085_v9 = vld [vmem:[%s2694_s1 + $0xd0] sm:$0xff]  }
   0x3   :  { %v2078_v2 = vld [vmem:[%s2694_s1] sm:$0xff]   ;;  %1921 = vmatprep.subr.bf16.mxu1 %v2077_v1  ;;  %v2082_v6 = vld [vmem:[%s2694_s1 + $0x8] sm:$0xff]   ;;  %v2086_v10 = vld [vmem:[%s2694_s1 + $0x10] sm:$0xff]  }
   0x4   :  { %v2079_v3 = vld [vmem:[%s2694_s1 + $0x80] sm:$0xff]   ;;  %1900 = vmatpush3.bf16.msra.mxu0 %v2078_v2  ;;  %v2083_v7 = vld [vmem:[%s2694_s1 + $0x88] sm:$0xff]   ;;  %v2087_v11 = vld [vmem:[%s2694_s1 + $0x90] sm:$0xff]  }
   0x5   :  { %1922 = vmatpush3.bf16.msra.mxu1 %v2079_v3  ;;  %1901 = vmatprep.subr.bf16.mxu0 %v2080_v4  ;;  %v2088_v12 = vld [vmem:[%s2694_s1 + $0x58] sm:$0xff]   ;;  %v2092_v16 = vld [vmem:[%s2694_s1 + $0x60] sm:$0xff]   ;;  %v2096_v20 = vld [vmem:[%s2694_s1 + $0x68] sm:$0xff]  }
   0x6   :  { %1923 = vmatprep.subr.bf16.mxu1 %v2081_v5  ;;  %v2089_v13 = vld [vmem:[%s2694_s1 + $0xd8] sm:$0xff]   ;;  %v2093_v17 = vld [vmem:[%s2694_s1 + $0xe0] sm:$0xff]   ;;  %v2097_v21 = vld [vmem:[%s2694_s1 + $0xe8] sm:$0xff]  }
   0x7   :  { %v2090_v14 = vld [vmem:[%s2694_s1 + $0x18] sm:$0xff]   ;;  %v2094_v18 = vld [vmem:[%s2694_s1 + $0x20] sm:$0xff]   ;;  %v2098_v22 = vld [vmem:[%s2694_s1 + $0x28] sm:$0xff]  }
   0x8   :  { %1902 = vmatpush3.bf16.msra.mxu0 %v2082_v6  ;;  %v2091_v15 = vld [vmem:[%s2694_s1 + $0x98] sm:$0xff]   ;;  %v2095_v19 = vld [vmem:[%s2694_s1 + $0xa0] sm:$0xff]   ;;  %v2099_v23 = vld [vmem:[%s2694_s1 + $0xa8] sm:$0xff]  }
   0x9   :  { %1924 = vmatpush3.bf16.msra.mxu1 %v2083_v7  ;;  %1903 = vmatprep.subr.bf16.mxu0 %v2084_v8  ;;  %v2100_v24 = vld [vmem:[%s2694_s1 + $0x70] sm:$0xff]   ;;  %v2104_v28 = vld [vmem:[%s2694_s1 + $0x78] sm:$0xff]   ;;  %v18_v32 = vld [vmem:[%s2695_s0] sm:$0xff] }
   0xa   :  { %1925 = vmatprep.subr.bf16.mxu1 %v2085_v9  ;;  %v2101_v25 = vld [vmem:[%s2694_s1 + $0xf0] sm:$0xff]   ;;  %v2105_v29 = vld [vmem:[%s2694_s1 + $0xf8] sm:$0xff]   ;;  %v19_v33 = vld [vmem:[%s2695_s0 + $0x8] sm:$0xff]  ;;  %v20_v35 = vmax.bf16 %v2206_v34, %v18_v32 }
   0xb   :  { %v2102_v26 = vld [vmem:[%s2694_s1 + $0x30] sm:$0xff]   ;;  %v2106_v30 = vld [vmem:[%s2694_s1 + $0x38] sm:$0xff]   ;;  %v21_v36 = vmax.bf16 %v2206_v34, %v19_v33  ;;  %v2108_v37 = vld [vmem:[%s2694_s1 + $0x140] sm:$0xff]  }
   0xc   :  { %1904 = vmatpush3.bf16.msra.mxu0 %v2086_v10  ;;  %v2103_v27 = vld [vmem:[%s2694_s1 + $0xb0] sm:$0xff]   ;;  %v2107_v31 = vld [vmem:[%s2694_s1 + $0xb8] sm:$0xff]   ;;  %v2109_v38 = vld [vmem:[%s2694_s1 + $0x1c0] sm:$0xff]   ;;  %v1555_v39 = vcombine.high %v20_v35, %v20_v35  ;;  %v1554_v41 = vcombine.low %v20_v35, %v20_v35 }
   0xd   :  { %1926 = vmatpush3.bf16.msra.mxu1 %v2087_v11  ;;  %1905 = vmatprep.subr.bf16.mxu0 %v2088_v12  ;;  %v1557_v40 = vcombine.high %v21_v36, %v21_v36  ;;  %v1556_v42 = vcombine.low %v21_v36, %v21_v36  ;;  %v2110_v43 = vld [vmem:[%s2694_s1 + $0x100] sm:$0xff]   ;;  %v2112_v45 = vld [vmem:[%s2694_s1 + $0x148] sm:$0xff]   ;;  %v2116_v49 = vld [vmem:[%s2694_s1 + $0x150] sm:$0xff]  }
   0xe   :  { %1927 = vmatprep.subr.bf16.mxu1 %v2089_v13  ;;  %v2111_v44 = vld [vmem:[%s2694_s1 + $0x180] sm:$0xff]   ;;  %324 = vmatprep.mubr.bf16.mxu0 %v1555_v39  ;;  %v2113_v46 = vld [vmem:[%s2694_s1 + $0x1c8] sm:$0xff]   ;;  %v2117_v50 = vld [vmem:[%s2694_s1 + $0x1d0] sm:$0xff]  }
   0xf   :  { %364 = vmatprep.mubr.bf16.mxu1 %v1557_v40  ;;  %v2114_v47 = vld [vmem:[%s2694_s1 + $0x108] sm:$0xff]   ;;  %v2118_v51 = vld [vmem:[%s2694_s1 + $0x110] sm:$0xff]   ;;  %v2120_v53 = vld [vmem:[%s2694_s1 + $0x158] sm:$0xff]  }
  0x10   :  { %1906 = vmatpush3.bf16.msra.mxu0 %v2090_v14  ;;  %v2115_v48 = vld [vmem:[%s2694_s1 + $0x188] sm:$0xff]   ;;  %v2119_v52 = vld [vmem:[%s2694_s1 + $0x190] sm:$0xff]   ;;  %v2121_v54 = vld [vmem:[%s2694_s1 + $0x1d8] sm:$0xff]  }
  0x11   :  { %1928 = vmatpush3.bf16.msra.mxu1 %v2091_v15  ;;  %1907 = vmatprep.subr.bf16.mxu0 %v2092_v16  ;;  %v2122_v55 = vld [vmem:[%s2694_s1 + $0x118] sm:$0xff]   ;;  %v2124_v57 = vld [vmem:[%s2694_s1 + $0x160] sm:$0xff]   ;;  %v2128_v61 = vld [vmem:[%s2694_s1 + $0x168] sm:$0xff]  }
  0x12   :  { %1929 = vmatprep.subr.bf16.mxu1 %v2093_v17  ;;  %v2123_v56 = vld [vmem:[%s2694_s1 + $0x198] sm:$0xff]   ;;  %v2125_v58 = vld [vmem:[%s2694_s1 + $0x1e0] sm:$0xff]   ;;  %v2129_v62 = vld [vmem:[%s2694_s1 + $0x1e8] sm:$0xff]  }
  0x13   :  { %v2126_v59 = vld [vmem:[%s2694_s1 + $0x120] sm:$0xff]   ;;  %v2130_v63 = vld [vmem:[%s2694_s1 + $0x128] sm:$0xff]   ;;  %v2132_v1 = vld [vmem:[%s2694_s1 + $0x170] sm:$0xff]  }
  0x14   :  { %1908 = vmatpush3.bf16.msra.mxu0 %v2094_v18  ;;  %v2127_v60 = vld [vmem:[%s2694_s1 + $0x1a0] sm:$0xff]   ;;  %v2131_v0 = vld [vmem:[%s2694_s1 + $0x1a8] sm:$0xff]   ;;  %v2133_v2 = vld [vmem:[%s2694_s1 + $0x1f0] sm:$0xff]  }
  0x15   :  { %1930 = vmatpush3.bf16.msra.mxu1 %v2095_v19  ;;  %1909 = vmatprep.subr.bf16.mxu0 %v2096_v20  ;;  %v2134_v3 = vld [vmem:[%s2694_s1 + $0x130] sm:$0xff]   ;;  %v2136_v5 = vld [vmem:[%s2694_s1 + $0x178] sm:$0xff]   ;;  %v2140_v13 = vld [vmem:[%s2694_s1 + $0x240] sm:$0xff]  }
  0x16   :  { %1931 = vmatprep.subr.bf16.mxu1 %v2097_v21  ;;  %v2135_v4 = vld [vmem:[%s2694_s1 + $0x1b0] sm:$0xff]   ;;  %v2137_v6 = vld [vmem:[%s2694_s1 + $0x1f8] sm:$0xff]   ;;  %v2141_v16 = vld [vmem:[%s2694_s1 + $0x2c0] sm:$0xff]  }
  0x17   :  { %v2138_v7 = vld [vmem:[%s2694_s1 + $0x138] sm:$0xff]   ;;  %v1590_v9 = vld [vmem:[%s2695_s0 + $0x10] sm:$0xff]  ;;  %v2142_v19 = vld [vmem:[%s2694_s1 + $0x200] sm:$0xff]  }
  0x18   :  { %1910 = vmatpush3.bf16.msra.mxu0 %v2098_v22  ;;  %v2139_v8 = vld [vmem:[%s2694_s1 + $0x1b8] sm:$0xff]   ;;  %v375_v10 = vmax.bf16 %v2206_v34, %v1590_v9  ;;  %v2143_v20 = vld [vmem:[%s2694_s1 + $0x280] sm:$0xff]   ;;  %v2144_v21 = vld [vmem:[%s2694_s1 + $0x248] sm:$0xff]  }
  0x19   :  { %1932 = vmatpush3.bf16.msra.mxu1 %v2099_v23  ;;  %1911 = vmatprep.subr.bf16.mxu0 %v2100_v24  ;;  %v1591_v11 = vld [vmem:[%s2695_s0 + $0x18] sm:$0xff]  ;;  %v2145_v22 = vld [vmem:[%s2694_s1 + $0x2c8] sm:$0xff]   ;;  %v2156_v33 = vld [vmem:[%s2694_s1 + $0x260] sm:$0xff]  }
  0x1a   :  { %1933 = vmatprep.subr.bf16.mxu1 %v2101_v25  ;;  %v376_v12 = vmax.bf16 %v2206_v34, %v1591_v11  ;;  %v1657_v14 = vcombine.high %v375_v10, %v375_v10  ;;  %v1656_v15 = vcombine.low %v375_v10, %v375_v10  ;;  %v2146_v23 = vld [vmem:[%s2694_s1 + $0x208] sm:$0xff]   ;;  %v2148_v25 = vld [vmem:[%s2694_s1 + $0x250] sm:$0xff]   ;;  %v2155_v32 = vld [vmem:[%s2694_s1 + $0x298] sm:$0xff]  }
  0x1b   :  { %v2147_v24 = vld [vmem:[%s2694_s1 + $0x288] sm:$0xff]   ;;  %v2157_v35 = vld [vmem:[%s2694_s1 + $0x2e0] sm:$0xff]   ;;  %v2187_v9 = vld [vmem:[%s2694_s1 + $0x398] sm:$0xff]  }
  0x1c   :  { %1912 = vmatpush3.bf16.msra.mxu0 %v2102_v26  ;;  %v1659_v17 = vcombine.high %v376_v12, %v376_v12  ;;  %v1658_v18 = vcombine.low %v376_v12, %v376_v12  ;;  %v2149_v26 = vld [vmem:[%s2694_s1 + $0x2d0] sm:$0xff]   ;;  %v2158_v36 = vld [vmem:[%s2694_s1 + $0x220] sm:$0xff]   ;;  %v2161_v39 = vld [vmem:[%s2694_s1 + $0x2e8] sm:$0xff]  }
  0x1d   :  { %1934 = vmatpush3.bf16.msra.mxu1 %v2103_v27  ;;  %1913 = vmatprep.subr.bf16.mxu0 %v2104_v28  ;;  %v2150_v27 = vld [vmem:[%s2694_s1 + $0x210] sm:$0xff]   ;;  %v2162_v40 = vld [vmem:[%s2694_s1 + $0x228] sm:$0xff]   ;;  %v2188_v10 = vld [vmem:[%s2694_s1 + $0x360] sm:$0xff]  }
  0x1e   :  { %1935 = vmatprep.subr.bf16.mxu1 %v2105_v29  ;;  %v2151_v28 = vld [vmem:[%s2694_s1 + $0x290] sm:$0xff]   ;;  %v2152_v29 = vld [vmem:[%s2694_s1 + $0x258] sm:$0xff]   ;;  %v2189_v11 = vld [vmem:[%s2694_s1 + $0x3e0] sm:$0xff]  }
  0x1f   :  { %v2190_v12 = vld [vmem:[%s2694_s1 + $0x320] sm:$0xff]  }
  0x20   :  { %1914 = vmatpush3.bf16.msra.mxu0 %v2106_v30  ;;  %v2153_v30 = vld [vmem:[%s2694_s1 + $0x2d8] sm:$0xff]  }
  0x21   :  { %1936 = vmatpush3.bf16.msra.mxu1 %v2107_v31  ;;  %1943 = vmatprep.subr.bf16.mxu0 %v2108_v37  ;;  %v2154_v31 = vld [vmem:[%s2694_s1 + $0x218] sm:$0xff]   ;;  %v2159_v37 = vld [vmem:[%s2694_s1 + $0x2a0] sm:$0xff]  }
  0x22   :  { %1965 = vmatprep.subr.bf16.mxu1 %v2109_v38  ;;  %v2160_v38 = vld [vmem:[%s2694_s1 + $0x268] sm:$0xff]  }
  0x23   :  { %325 = vmatmul.mubr.bf16.vlgmr.msra.gmra.mrb[0].mxu0 %v1554_v41  ;;  %v2163_v41 = vld [vmem:[%s2694_s1 + $0x2a8] sm:$0xff]  }
  0x24   :  { %365 = vmatmul.mubr.bf16.vlgmr.msra.gmra.mrb[0].mxu1 %v1556_v42  ;;  %1944 = vmatpush3.bf16.msra.mxu0 %v2110_v43  ;;  %v2164_v42 = vld [vmem:[%s2694_s1 + $0x270] sm:$0xff]  }
  0x25   :  { %1966 = vmatpush3.bf16.msra.mxu1 %v2111_v44  ;;  %1945 = vmatprep.subr.bf16.mxu0 %v2112_v45  ;;  %v2165_v43 = vld [vmem:[%s2694_s1 + $0x2f0] sm:$0xff]  }
  0x26   :  { %1967 = vmatprep.subr.bf16.mxu1 %v2113_v46  ;;  %680 = vmatprep.mubr.bf16.mxu0 %v1657_v14  ;;  %v2166_v44 = vld [vmem:[%s2694_s1 + $0x230] sm:$0xff]   ;;  %v2168_v46 = vld [vmem:[%s2694_s1 + $0x278] sm:$0xff]   ;;  %v2192_v14 = vld [vmem:[%s2694_s1 + $0x368] sm:$0xff]  }
  0x27   :  { %720 = vmatprep.mubr.bf16.mxu1 %v1659_v17  ;;  %v2167_v45 = vld [vmem:[%s2694_s1 + $0x2b0] sm:$0xff]   ;;  %v2195_v17 = vld [vmem:[%s2694_s1 + $0x3a8] sm:$0xff]  }
  0x28   :  { %1946 = vmatpush3.bf16.msra.mxu0 %v2114_v47  ;;  %v2169_v47 = vld [vmem:[%s2694_s1 + $0x2f8] sm:$0xff]  }
  0x29   :  { %1968 = vmatpush3.bf16.msra.mxu1 %v2115_v48  ;;  %1947 = vmatprep.subr.bf16.mxu0 %v2116_v49  ;;  %v2170_v48 = vld [vmem:[%s2694_s1 + $0x238] sm:$0xff]  }
  0x2a   :  { %1969 = vmatprep.subr.bf16.mxu1 %v2117_v50  ;;  %v2171_v49 = vld [vmem:[%s2694_s1 + $0x2b8] sm:$0xff]   ;;  %v1692_v50 = vld [vmem:[%s2695_s0 + $0x20] sm:$0xff] }
  0x2c   :  { %1948 = vmatpush3.bf16.msra.mxu0 %v2118_v51  ;;  %v1693_v51 = vld [vmem:[%s2695_s0 + $0x28] sm:$0xff] }
  0x2d   :  { %1970 = vmatpush3.bf16.msra.mxu1 %v2119_v52  ;;  %1949 = vmatprep.subr.bf16.mxu0 %v2120_v53  ;;  %v731_v52 = vmax.bf16 %v2206_v34, %v1692_v50  ;;  %v732_v53 = vmax.bf16 %v2206_v34, %v1693_v51 }
  0x2e   :  { %1971 = vmatprep.subr.bf16.mxu1 %v2121_v54  ;;  %v2172_v54 = vld [vmem:[%s2694_s1 + $0x340] sm:$0xff]  }
  0x30   :  { %1950 = vmatpush3.bf16.msra.mxu0 %v2122_v55  ;;  %v2173_v55 = vld [vmem:[%s2694_s1 + $0x3c0] sm:$0xff]  }
  0x31   :  { %1972 = vmatpush3.bf16.msra.mxu1 %v2123_v56  ;;  %1951 = vmatprep.subr.bf16.mxu0 %v2124_v57  ;;  %v1759_v56 = vcombine.high %v731_v52, %v731_v52  ;;  %v1761_v57 = vcombine.high %v732_v53, %v732_v53 }
  0x32   :  { %1973 = vmatprep.subr.bf16.mxu1 %v2125_v58  ;;  %v1758_v58 = vcombine.low %v731_v52, %v731_v52 }
  0x34   :  { %1952 = vmatpush3.bf16.msra.mxu0 %v2126_v59  ;;  %v1760_v59 = vcombine.low %v732_v53, %v732_v53 }
  0x35   :  { %1974 = vmatpush3.bf16.msra.mxu1 %v2127_v60  ;;  %1953 = vmatprep.subr.bf16.mxu0 %v2128_v61  ;;  %v2174_v60 = vld [vmem:[%s2694_s1 + $0x300] sm:$0xff]  }
  0x36   :  { %1975 = vmatprep.subr.bf16.mxu1 %v2129_v62  ;;  %v2175_v61 = vld [vmem:[%s2694_s1 + $0x380] sm:$0xff]   ;;  %v2176_v62 = vld [vmem:[%s2694_s1 + $0x348] sm:$0xff]  }
  0x38   :  { %1954 = vmatpush3.bf16.msra.mxu0 %v2130_v63  ;;  %v2177_v63 = vld [vmem:[%s2694_s1 + $0x3c8] sm:$0xff]  }
  0x39   :  { %1976 = vmatpush3.bf16.msra.mxu1 %v2131_v0  ;;  %1955 = vmatprep.subr.bf16.mxu0 %v2132_v1  ;;  %v2178_v0 = vld [vmem:[%s2694_s1 + $0x308] sm:$0xff]  }
  0x3a   :  { %1977 = vmatprep.subr.bf16.mxu1 %v2133_v2  ;;  %v2179_v1 = vld [vmem:[%s2694_s1 + $0x388] sm:$0xff]   ;;  %v2180_v2 = vld [vmem:[%s2694_s1 + $0x350] sm:$0xff]  }
  0x3c   :  { %1956 = vmatpush3.bf16.msra.mxu0 %v2134_v3  ;;  %v2181_v3 = vld [vmem:[%s2694_s1 + $0x3d0] sm:$0xff]  }
  0x3d   :  { %1978 = vmatpush3.bf16.msra.mxu1 %v2135_v4  ;;  %1957 = vmatprep.subr.bf16.mxu0 %v2136_v5  ;;  %v2182_v4 = vld [vmem:[%s2694_s1 + $0x310] sm:$0xff]  }
  0x3e   :  { %1979 = vmatprep.subr.bf16.mxu1 %v2137_v6  ;;  %v2183_v5 = vld [vmem:[%s2694_s1 + $0x390] sm:$0xff]   ;;  %v2184_v6 = vld [vmem:[%s2694_s1 + $0x358] sm:$0xff]  }
  0x40   :  { %1958 = vmatpush3.bf16.msra.mxu0 %v2138_v7  ;;  %v2185_v7 = vld [vmem:[%s2694_s1 + $0x3d8] sm:$0xff]  }
  0x41   :  { %1980 = vmatpush3.bf16.msra.mxu1 %v2139_v8  ;;  %1987 = vmatprep.subr.bf16.mxu0 %v2140_v13  ;;  %v2186_v8 = vld [vmem:[%s2694_s1 + $0x318] sm:$0xff]   ;;  %v2191_v13 = vld [vmem:[%s2694_s1 + $0x3a0] sm:$0xff]  }
  0x42   :  { %2009 = vmatprep.subr.bf16.mxu1 %v2141_v16  ;;  %v2194_v16 = vld [vmem:[%s2694_s1 + $0x328] sm:$0xff]  }
  0x43   :  { %681 = vmatmul.mubr.bf16.vlgmr.msra.gmra.mrb[4].mxu0 %v1656_v15  ;;  %v2193_v15 = vld [vmem:[%s2694_s1 + $0x3e8] sm:$0xff]  }
  0x44   :  { %721 = vmatmul.mubr.bf16.vlgmr.msra.gmra.mrb[4].mxu1 %v1658_v18  ;;  %1988 = vmatpush3.bf16.msra.mxu0 %v2142_v19  ;;  %v2196_v18 = vld [vmem:[%s2694_s1 + $0x370] sm:$0xff]  }
  0x45   :  { %2010 = vmatpush3.bf16.msra.mxu1 %v2143_v20  ;;  %1989 = vmatprep.subr.bf16.mxu0 %v2144_v21  ;;  %v2197_v19 = vld [vmem:[%s2694_s1 + $0x3f0] sm:$0xff]  }
  0x46   :  { %2011 = vmatprep.subr.bf16.mxu1 %v2145_v22  ;;  %1036 = vmatprep.mubr.bf16.mxu0 %v1759_v56  ;;  %v2198_v20 = vld [vmem:[%s2694_s1 + $0x330] sm:$0xff]   ;;  %v2200_v22 = vld [vmem:[%s2694_s1 + $0x378] sm:$0xff]  }
  0x47   :  { %1076 = vmatprep.mubr.bf16.mxu1 %v1761_v57  ;;  %v2199_v21 = vld [vmem:[%s2694_s1 + $0x3b0] sm:$0xff]  }
  0x48   :  { %1990 = vmatpush3.bf16.msra.mxu0 %v2146_v23  ;;  %v2201_v23 = vld [vmem:[%s2694_s1 + $0x3f8] sm:$0xff]  }
  0x49   :  { %2012 = vmatpush3.bf16.msra.mxu1 %v2147_v24  ;;  %1991 = vmatprep.subr.bf16.mxu0 %v2148_v25  ;;  %v2202_v24 = vld [vmem:[%s2694_s1 + $0x338] sm:$0xff]  }
  0x4a   :  { %2013 = vmatprep.subr.bf16.mxu1 %v2149_v26  ;;  %v2203_v25 = vld [vmem:[%s2694_s1 + $0x3b8] sm:$0xff]   ;;  %v1794_v26 = vld [vmem:[%s2695_s0 + $0x30] sm:$0xff] }
  0x4c   :  { %1992 = vmatpush3.bf16.msra.mxu0 %v2150_v27  ;;  %v1795_v27 = vld [vmem:[%s2695_s0 + $0x38] sm:$0xff] }
  0x4d   :  { %2014 = vmatpush3.bf16.msra.mxu1 %v2151_v28  ;;  %1993 = vmatprep.subr.bf16.mxu0 %v2152_v29  ;;  %v1087_v28 = vmax.bf16 %v2206_v34, %v1794_v26  ;;  %v1088_v29 = vmax.bf16 %v2206_v34, %v1795_v27 }
  0x4e   :  { %2015 = vmatprep.subr.bf16.mxu1 %v2153_v30 }
  0x4f   :  { %v1861_v30 = vcombine.high %v1087_v28, %v1087_v28 }
  0x50   :  { %1994 = vmatpush3.bf16.msra.mxu0 %v2154_v31  ;;  %v1863_v31 = vcombine.high %v1088_v29, %v1088_v29 }
  0x51   :  { %2016 = vmatpush3.bf16.msra.mxu1 %v2155_v32  ;;  %1995 = vmatprep.subr.bf16.mxu0 %v2156_v33  ;;  %v1860_v32 = vcombine.low %v1087_v28, %v1087_v28  ;;  %v1862_v33 = vcombine.low %v1088_v29, %v1088_v29 }
  0x52   :  { %2017 = vmatprep.subr.bf16.mxu1 %v2157_v35 }
  0x54   :  { %1996 = vmatpush3.bf16.msra.mxu0 %v2158_v36 }
  0x55   :  { %2018 = vmatpush3.bf16.msra.mxu1 %v2159_v37  ;;  %1997 = vmatprep.subr.bf16.mxu0 %v2160_v38 }
  0x56   :  { %2019 = vmatprep.subr.bf16.mxu1 %v2161_v39 }
  0x58   :  { %1998 = vmatpush3.bf16.msra.mxu0 %v2162_v40 }
  0x59   :  { %2020 = vmatpush3.bf16.msra.mxu1 %v2163_v41  ;;  %1999 = vmatprep.subr.bf16.mxu0 %v2164_v42 }
  0x5a   :  { %2021 = vmatprep.subr.bf16.mxu1 %v2165_v43 }
  0x5c   :  { %2000 = vmatpush3.bf16.msra.mxu0 %v2166_v44 }
  0x5d   :  { %2022 = vmatpush3.bf16.msra.mxu1 %v2167_v45  ;;  %2001 = vmatprep.subr.bf16.mxu0 %v2168_v46 }
  0x5e   :  { %2023 = vmatprep.subr.bf16.mxu1 %v2169_v47 }
  0x60   :  { %2002 = vmatpush3.bf16.msra.mxu0 %v2170_v48 }
  0x61   :  { %2024 = vmatpush3.bf16.msra.mxu1 %v2171_v49  ;;  %2031 = vmatprep.subr.bf16.mxu0 %v2172_v54 }
  0x62   :  { %2053 = vmatprep.subr.bf16.mxu1 %v2173_v55 }
  0x63   :  { %1037 = vmatmul.mubr.bf16.vlgmr.msra.gmra.mrb[8].mxu0 %v1758_v58 }
  0x64   :  { %1077 = vmatmul.mubr.bf16.vlgmr.msra.gmra.mrb[8].mxu1 %v1760_v59  ;;  %2032 = vmatpush3.bf16.msra.mxu0 %v2174_v60 }
  0x65   :  { %2054 = vmatpush3.bf16.msra.mxu1 %v2175_v61  ;;  %2033 = vmatprep.subr.bf16.mxu0 %v2176_v62 }
  0x66   :  { %2055 = vmatprep.subr.bf16.mxu1 %v2177_v63  ;;  %1392 = vmatprep.mubr.bf16.mxu0 %v1861_v30 }
  0x67   :  { %1432 = vmatprep.mubr.bf16.mxu1 %v1863_v31 }
  0x68   :  { %2034 = vmatpush3.bf16.msra.mxu0 %v2178_v0 }
  0x69   :  { %2056 = vmatpush3.bf16.msra.mxu1 %v2179_v1  ;;  %2035 = vmatprep.subr.bf16.mxu0 %v2180_v2 }
  0x6a   :  { %2057 = vmatprep.subr.bf16.mxu1 %v2181_v3 }
  0x6c   :  { %2036 = vmatpush3.bf16.msra.mxu0 %v2182_v4 }
  0x6d   :  { %2058 = vmatpush3.bf16.msra.mxu1 %v2183_v5  ;;  %2037 = vmatprep.subr.bf16.mxu0 %v2184_v6 }
  0x6e   :  { %2059 = vmatprep.subr.bf16.mxu1 %v2185_v7 }
  0x70   :  { %2038 = vmatpush3.bf16.msra.mxu0 %v2186_v8 }
  0x71   :  { %2060 = vmatpush3.bf16.msra.mxu1 %v2187_v9  ;;  %2039 = vmatprep.subr.bf16.mxu0 %v2188_v10 }
  0x72   :  { %2061 = vmatprep.subr.bf16.mxu1 %v2189_v11 }
  0x74   :  { %2040 = vmatpush3.bf16.msra.mxu0 %v2190_v12 }
  0x75   :  { %2062 = vmatpush3.bf16.msra.mxu1 %v2191_v13  ;;  %2041 = vmatprep.subr.bf16.mxu0 %v2192_v14 }
  0x76   :  { %2063 = vmatprep.subr.bf16.mxu1 %v2193_v15 }
  0x78   :  { %2042 = vmatpush3.bf16.msra.mxu0 %v2194_v16 }
  0x79   :  { %2064 = vmatpush3.bf16.msra.mxu1 %v2195_v17  ;;  %2043 = vmatprep.subr.bf16.mxu0 %v2196_v18 }
  0x7a   :  { %2065 = vmatprep.subr.bf16.mxu1 %v2197_v19 }
  0x7c   :  { %2044 = vmatpush3.bf16.msra.mxu0 %v2198_v20 }
  0x7d   :  { %2066 = vmatpush3.bf16.msra.mxu1 %v2199_v21  ;;  %2045 = vmatprep.subr.bf16.mxu0 %v2200_v22 }
  0x7e   :  { %2067 = vmatprep.subr.bf16.mxu1 %v2201_v23 }
  0x80   :  { %2046 = vmatpush3.bf16.msra.mxu0 %v2202_v24 }
  0x81   :  { %2068 = vmatpush3.bf16.msra.mxu1 %v2203_v25 }
  0x83   :  { %1393 = vmatmul.mubr.bf16.vlgmr.msra.gmra.mrb[12].mxu0 %v1860_v32 }
  0x84   :  { %1433 = vmatmul.mubr.bf16.vlgmr.msra.gmra.mrb[12].mxu1 %v1862_v33 }
  0xf6   :  { %v1915_v35 = vpop.f32.mrb[0].mxu0 }
  0xf7   :  { %v1937_v36 = vpop.f32.mrb[0].mxu1  ;;  %v1916_v37 = vpop.f32.mrb[1].mxu0 }
  0xf8   :  { %v1938_v38 = vpop.f32.mrb[1].mxu1  ;;  %v1917_v39 = vadd.f32 %v1916_v37, %v1915_v35  ;;  %v1918_v41 = vpop.f32.mrb[2].mxu0 }
  0xf9   :  { %v1939_v40 = vadd.f32 %v1938_v38, %v1937_v36  ;;  %v1940_v42 = vpop.f32.mrb[2].mxu1  ;;  %v1919_v43 = vpop.f32.mrb[3].mxu0 }
  0xfa   :  { %v1941_v34 = vpop.f32.mrb[3].mxu1 }
  0xfb   :  { %v2648_v44 = vadd.f32 %v1939_v40, %v1917_v39 }
  0xfd   :  { %v1441_v4 = vsel %vm1440_vm0, %v2648_v44, 0.0 }
  0xfe   :  { %v1442_v7 = vrot.slane %v1441_v4, 4 }
 0x100   :  { %v1443_v10 = vadd.f32 %v1442_v7, %v1441_v4 }
 0x102   :  { %v1444_v15 = vrot.slane %v1443_v10, 2 }
 0x104   :  { %v1445_v27 = vadd.f32 %v1444_v15, %v1443_v10 }
 0x106   :  { %v1446_v32 = vrot.slane %v1445_v27, 1 }
 0x108   :  { %v1447_v38 = vadd.f32 %v1446_v32, %v1445_v27  ;;  %v1520_v27 = vlaneseq }
 0x116   :  { %v1959_v45 = vpop.f32.mrb[4].mxu0 }
 0x117   :  { %v1981_v46 = vpop.f32.mrb[4].mxu1  ;;  %v1960_v47 = vpop.f32.mrb[5].mxu0 }
 0x118   :  { %v1961_v48 = vadd.f32 %v1960_v47, %v1959_v45  ;;  %v1982_v49 = vpop.f32.mrb[5].mxu1  ;;  %v1962_v50 = vpop.f32.mrb[6].mxu0 }
 0x119   :  { %v1983_v51 = vadd.f32 %v1982_v49, %v1981_v46  ;;  %v1984_v52 = vpop.f32.mrb[6].mxu1  ;;  %v1963_v53 = vpop.f32.mrb[7].mxu0 }
 0x11a   :  { %v1985_v54 = vpop.f32.mrb[7].mxu1 }
 0x11b   :  { %v2650_v55 = vadd.f32 %v1983_v51, %v1961_v48 }
 0x11d   :  { %v1448_v3 = vsel %vm1440_vm0, %v2650_v55, 0.0 }
 0x11e   :  { %v1449_v6 = vrot.slane %v1448_v3, 4 }
 0x120   :  { %v1450_v9 = vadd.f32 %v1449_v6, %v1448_v3 }
 0x122   :  { %v1451_v12 = vrot.slane %v1450_v9, 2 }
 0x124   :  { %v1452_v23 = vadd.f32 %v1451_v12, %v1450_v9 }
 0x126   :  { %v1453_v30 = vrot.slane %v1452_v23, 1 }
 0x128   :  { %v1454_v36 = vadd.f32 %v1453_v30, %v1452_v23 }
 0x12a   :  { %v1455_v41 = vadd.f32 %v1454_v36, %v1447_v38 }
 0x136   :  { %v2003_v56 = vpop.f32.mrb[8].mxu0 }
 0x137   :  { %v2025_v57 = vpop.f32.mrb[8].mxu1  ;;  %v2004_v58 = vpop.f32.mrb[9].mxu0 }
 0x138   :  { %v2026_v59 = vpop.f32.mrb[9].mxu1  ;;  %v2005_v60 = vadd.f32 %v2004_v58, %v2003_v56  ;;  %v2006_v62 = vpop.f32.mrb[10].mxu0 }
 0x139   :  { %v2027_v61 = vadd.f32 %v2026_v59, %v2025_v57  ;;  %v2028_v63 = vpop.f32.mrb[10].mxu1  ;;  %v2007_v0 = vpop.f32.mrb[11].mxu0 }
 0x13a   :  { %v2029_v1 = vpop.f32.mrb[11].mxu1 }
 0x13b   :  { %v2652_v2 = vadd.f32 %v2027_v61, %v2005_v60 }
 0x13d   :  { %v1456_v5 = vsel %vm1440_vm0, %v2652_v2, 0.0 }
 0x13e   :  { %v1457_v8 = vrot.slane %v1456_v5, 4 }
 0x140   :  { %v1458_v11 = vadd.f32 %v1457_v8, %v1456_v5 }
 0x142   :  { %v1459_v16 = vrot.slane %v1458_v11, 2 }
 0x144   :  { %v1460_v28 = vadd.f32 %v1459_v16, %v1458_v11 }
 0x146   :  { %v1461_v33 = vrot.slane %v1460_v28, 1 }
 0x148   :  { %v1462_v39 = vadd.f32 %v1461_v33, %v1460_v28  ;;  %v1521_v28 = vshrl.u32 %v1520_v27, 7  ;;  %v1517_v33 = vld [vmem:[%s2697_s3] sm:$0x1] }
 0x14a   :  { %v1463_v43 = vadd.f32 %v1462_v39, %v1455_v41  ;;  %v1522_v30 = vsub.s32 0, %v1521_v28 }
 0x156   :  { %v2047_v13 = vpop.f32.mrb[12].mxu0 }
 0x157   :  { %v2069_v14 = vpop.f32.mrb[12].mxu1  ;;  %v2048_v17 = vpop.f32.mrb[13].mxu0 }
 0x158   :  { %v2070_v18 = vpop.f32.mrb[13].mxu1  ;;  %v2049_v19 = vadd.f32 %v2048_v17, %v2047_v13  ;;  %v2050_v21 = vpop.f32.mrb[14].mxu0 }
 0x159   :  { %v2071_v20 = vadd.f32 %v2070_v18, %v2069_v14  ;;  %v2072_v22 = vpop.f32.mrb[14].mxu1  ;;  %v2051_v24 = vpop.f32.mrb[15].mxu0 }
 0x15a   :  { %v2073_v25 = vpop.f32.mrb[15].mxu1 }
 0x15b   :  { %v2660_v26 = vadd.f32 %v2071_v20, %v2049_v19 }
 0x15d   :  { %v1464_v29 = vsel %vm1440_vm0, %v2660_v26, 0.0 }
 0x15e   :  { %v1465_v31 = vrot.slane %v1464_v29, 4 }
 0x160   :  { %v1466_v35 = vadd.f32 %v1465_v31, %v1464_v29  ;;  %v1515_v29 = vld [vmem:[%s2696_s2] sm:$0x1] }
 0x162   :  { %v1467_v37 = vrot.slane %v1466_v35, 2 }
 0x164   :  { %v1468_v40 = vadd.f32 %v1467_v37, %v1466_v35 }
 0x166   :  { %v1469_v42 = vrot.slane %v1468_v40, 1 }
 0x168   :  { %v1470_v34 = vadd.f32 %v1469_v42, %v1468_v40 }
 0x16a   :  { %v1471_v45 = vadd.f32 %v1470_v34, %v1463_v43 }
 0x16c   :  { %v1472_v46 = vmul.f32 0.03125, %v1471_v45 }
 0x16e   :  { %v1473_v47 = vsub.f32 %v2648_v44, %v1472_v46  ;;  %v1482_v48 = vsub.f32 %v2650_v55, %v1472_v46  ;;  %v1492_v49 = vsub.f32 %v2652_v2, %v1472_v46  ;;  %v1502_v50 = vsub.f32 %v2660_v26, %v1472_v46 }
 0x170   :  { %v1474_v51 = vmul.f32 %v1473_v47, %v1473_v47  ;;  %v1483_v52 = vmul.f32 %v1482_v48, %v1482_v48  ;;  %v1493_v53 = vmul.f32 %v1492_v49, %v1492_v49  ;;  %v1503_v54 = vmul.f32 %v1502_v50, %v1502_v50 }
 0x172   :  { %v1475_v56 = vsel %vm1440_vm0, %v1474_v51, 0.0  ;;  %v1484_v57 = vsel %vm1440_vm0, %v1483_v52, 0.0  ;;  %v1494_v58 = vsel %vm1440_vm0, %v1493_v53, 0.0  ;;  %v1504_v59 = vsel %vm1440_vm0, %v1503_v54, 0.0 }
 0x173   :  { %v1476_v60 = vrot.slane %v1475_v56, 4  ;;  %v1485_v61 = vrot.slane %v1484_v57, 4  ;;  %v1495_v62 = vrot.slane %v1494_v58, 4  ;;  %v1505_v63 = vrot.slane %v1504_v59, 4 }
 0x175   :  { %v1477_v0 = vadd.f32 %v1476_v60, %v1475_v56  ;;  %v1486_v1 = vadd.f32 %v1485_v61, %v1484_v57  ;;  %v1496_v3 = vadd.f32 %v1495_v62, %v1494_v58  ;;  %v1506_v4 = vadd.f32 %v1505_v63, %v1504_v59 }
 0x177   :  { %v1478_v5 = vrot.slane %v1477_v0, 2  ;;  %v1487_v6 = vrot.slane %v1486_v1, 2  ;;  %v1497_v7 = vrot.slane %v1496_v3, 2  ;;  %v1507_v8 = vrot.slane %v1506_v4, 2 }
 0x179   :  { %v1479_v9 = vadd.f32 %v1478_v5, %v1477_v0  ;;  %v1488_v10 = vadd.f32 %v1487_v6, %v1486_v1  ;;  %v1498_v11 = vadd.f32 %v1497_v7, %v1496_v3  ;;  %v1508_v12 = vadd.f32 %v1507_v8, %v1506_v4 }
 0x17b   :  { %v1480_v13 = vrot.slane %v1479_v9, 1  ;;  %v1489_v14 = vrot.slane %v1488_v10, 1  ;;  %v1499_v15 = vrot.slane %v1498_v11, 1  ;;  %v1509_v18 = vrot.slane %v1508_v12, 1 }
 0x17d   :  { %v1481_v16 = vadd.f32 %v1480_v13, %v1479_v9  ;;  %v1490_v17 = vadd.f32 %v1489_v14, %v1488_v10  ;;  %v1500_v20 = vadd.f32 %v1499_v15, %v1498_v11  ;;  %v1510_v22 = vadd.f32 %v1509_v18, %v1508_v12 }
 0x17f   :  { %v1491_v19 = vadd.f32 %v1490_v17, %v1481_v16 }
 0x181   :  { %v1501_v21 = vadd.f32 %v1500_v20, %v1491_v19 }
 0x183   :  { %v1511_v23 = vadd.f32 %v1510_v22, %v1501_v21 }
 0x185   :  { %v1512_v24 = vmul.f32 0.03125, %v1511_v23 }
 0x187   :  { %v1513_v25 = vadd.f32 1e-05, %v1512_v24 }
 0x189   :  { %2204 = vrsqrt.f32 %v1513_v25 }
 0x193   :  { %v2205_v31 = vpop.eup %2204 }
 0x194   :  { %v1516_v32 = vmul.f32 %v2205_v31, %v1515_v29 }
 0x196   :  { %v1518_v35 = vmul.f32 %v1516_v32, %v1472_v46  ;;  %v1523_v36 = vrot.slane %v1516_v32, %v1522_v30 }
 0x198   :  { %v1519_v37 = vsub.f32 %v1517_v33, %v1518_v35  ;;  %v1540_v38 = vmul.f32 %v1523_v36, %v2652_v2  ;;  %v1545_v39 = vmul.f32 %v1523_v36, %v2660_v26  ;;  %v1524_v40 = vmul.f32 %v1523_v36, %v2648_v44 }
 0x199   :  { %v1535_v42 = vmul.f32 %v1523_v36, %v2650_v55 }
 0x19a   :  { %v1529_v41 = vrot.slane %v1519_v37, %v1522_v30 }
 0x19c   :  { %v1531_v43 = vadd.f32 %v1529_v41, %v1524_v40  ;;  %v1536_v34 = vadd.f32 %v1535_v42, %v1529_v41  ;;  %v1541_v45 = vadd.f32 %v1540_v38, %v1529_v41  ;;  %v1546_v47 = vadd.f32 %v1545_v39, %v1529_v41 }
 0x19e   :  { %v1532_v48 = vpack.c.bf16 %v1531_v43, %v1531_v43  ;;  %v1537_v49 = vpack.c.bf16 %v1536_v34, %v1536_v34  ;;  %v1542_v50 = vpack.c.bf16 %v1541_v45, %v1541_v45  ;;  %v1547_v46 = vpack.c.bf16 %v1546_v47, %v1546_v47 }
 0x1a0   :  { %1534 = vst.msk [vmem:[%s2698_s4] sm:$0xf] %vm1533_vm1, %v1532_v48  ;;  %1896 = vst.msk [vmem:[%s2698_s4 + $0x4] sm:$0xf] %vm1533_vm1, %v1537_v49 }
 0x1a1   :  { %1897 = vst.msk [vmem:[%s2698_s4 + $0x8] sm:$0xf] %vm1533_vm1, %v1542_v50  ;;  %1898 = vst.msk [vmem:[%s2698_s4 + $0xc] sm:$0xf] %vm1533_vm1, %v1547_v46 }

// kernel: _lambda_.15
= control target key start
LH: loop header
LB: loop body
LE: loop exit
PB: predicated region body
PF: predicated region fallthrough
CT: control target
= control target key end

     0   :  { %v1537_v35 = vmov 0   ;;  %vm844_vm0 = vcmask 130048   ;;  %vm1030_vm1 = vcmask 125952   ;;  %s2020_s1 = inlined_call_operand.vmem [shape: bf16[4,256,16], index: 1, kind: input, shape index: {}]   ;;  %s2021_s0 = inlined_call_operand.vmem [shape: bf16[4,32,256], index: 0, kind: input, shape index: {}]   ;;  %s2022_s2 = inlined_call_operand.vmem [shape: f32[1,16], index: 2, kind: input, shape index: {}]   ;;  %s2023_s3 = inlined_call_operand.vmem [shape: f32[1,16], index: 3, kind: input, shape index: {}]   ;;  %s2024_s4 = inlined_call_operand.vmem [shape: bf16[4,32,16], index: 4, kind: output, shape index: {}]  }
   0x1   :  { %v1471_v0 = vld [vmem:[%s2020_s1 + $0x40] sm:$0xff]   ;;  %v1475_v4 = vld [vmem:[%s2020_s1 + $0x48] sm:$0xff]   ;;  %v1479_v8 = vld [vmem:[%s2020_s1 + $0x50] sm:$0xff]  }
   0x2   :  { %v1472_v1 = vld [vmem:[%s2020_s1 + $0xc0] sm:$0xff]   ;;  %1358 = vmatprep.subr.bf16.mxu0 %v1471_v0  ;;  %v1476_v5 = vld [vmem:[%s2020_s1 + $0xc8] sm:$0xff]   ;;  %v1480_v9 = vld [vmem:[%s2020_s1 + $0xd0] sm:$0xff]  }
   0x3   :  { %v1473_v2 = vld [vmem:[%s2020_s1] sm:$0xff]   ;;  %1386 = vmatprep.subr.bf16.mxu1 %v1472_v1  ;;  %v1477_v6 = vld [vmem:[%s2020_s1 + $0x8] sm:$0xff]   ;;  %v1481_v10 = vld [vmem:[%s2020_s1 + $0x10] sm:$0xff]  }
   0x4   :  { %v1474_v3 = vld [vmem:[%s2020_s1 + $0x80] sm:$0xff]   ;;  %1359 = vmatpush3.bf16.msra.mxu0 %v1473_v2  ;;  %v1478_v7 = vld [vmem:[%s2020_s1 + $0x88] sm:$0xff]   ;;  %v1482_v11 = vld [vmem:[%s2020_s1 + $0x90] sm:$0xff]  }
   0x5   :  { %1387 = vmatpush3.bf16.msra.mxu1 %v1474_v3  ;;  %1360 = vmatprep.subr.bf16.mxu0 %v1475_v4  ;;  %v1483_v12 = vld [vmem:[%s2020_s1 + $0x58] sm:$0xff]   ;;  %v1487_v16 = vld [vmem:[%s2020_s1 + $0x60] sm:$0xff]   ;;  %v1491_v20 = vld [vmem:[%s2020_s1 + $0x68] sm:$0xff]  }
   0x6   :  { %1388 = vmatprep.subr.bf16.mxu1 %v1476_v5  ;;  %v1484_v13 = vld [vmem:[%s2020_s1 + $0xd8] sm:$0xff]   ;;  %v1488_v17 = vld [vmem:[%s2020_s1 + $0xe0] sm:$0xff]   ;;  %v1492_v21 = vld [vmem:[%s2020_s1 + $0xe8] sm:$0xff]  }
   0x7   :  { %v1485_v14 = vld [vmem:[%s2020_s1 + $0x18] sm:$0xff]   ;;  %v1489_v18 = vld [vmem:[%s2020_s1 + $0x20] sm:$0xff]   ;;  %v1493_v22 = vld [vmem:[%s2020_s1 + $0x28] sm:$0xff]  }
   0x8   :  { %1361 = vmatpush3.bf16.msra.mxu0 %v1477_v6  ;;  %v1486_v15 = vld [vmem:[%s2020_s1 + $0x98] sm:$0xff]   ;;  %v1490_v19 = vld [vmem:[%s2020_s1 + $0xa0] sm:$0xff]   ;;  %v1494_v23 = vld [vmem:[%s2020_s1 + $0xa8] sm:$0xff]  }
   0x9   :  { %1389 = vmatpush3.bf16.msra.mxu1 %v1478_v7  ;;  %1362 = vmatprep.subr.bf16.mxu0 %v1479_v8  ;;  %v1495_v24 = vld [vmem:[%s2020_s1 + $0x70] sm:$0xff]   ;;  %v1499_v28 = vld [vmem:[%s2020_s1 + $0x78] sm:$0xff]   ;;  %v18_v32 = vld [vmem:[%s2021_s0] sm:$0xff] }
   0xa   :  { %1390 = vmatprep.subr.bf16.mxu1 %v1480_v9  ;;  %v1496_v25 = vld [vmem:[%s2020_s1 + $0xf0] sm:$0xff]   ;;  %v1500_v29 = vld [vmem:[%s2020_s1 + $0xf8] sm:$0xff]   ;;  %v19_v33 = vld [vmem:[%s2021_s0 + $0x8] sm:$0xff]  ;;  %v22_v36 = vmax.bf16 %v1537_v35, %v18_v32 }
   0xb   :  { %v1497_v26 = vld [vmem:[%s2020_s1 + $0x30] sm:$0xff]   ;;  %v1501_v30 = vld [vmem:[%s2020_s1 + $0x38] sm:$0xff]   ;;  %v1146_v34 = vld [vmem:[%s2021_s0 + $0x20] sm:$0xff]  ;;  %v23_v37 = vmax.bf16 %v1537_v35, %v19_v33 }
   0xc   :  { %1363 = vmatpush3.bf16.msra.mxu0 %v1481_v10  ;;  %v1498_v27 = vld [vmem:[%s2020_s1 + $0xb0] sm:$0xff]   ;;  %v1502_v31 = vld [vmem:[%s2020_s1 + $0xb8] sm:$0xff]   ;;  %v1147_v38 = vld [vmem:[%s2021_s0 + $0x28] sm:$0xff]  ;;  %v228_v39 = vmax.bf16 %v1537_v35, %v1146_v34 }
   0xd   :  { %1391 = vmatpush3.bf16.msra.mxu1 %v1482_v11  ;;  %1364 = vmatprep.subr.bf16.mxu0 %v1483_v12  ;;  %v229_v40 = vmax.bf16 %v1537_v35, %v1147_v38  ;;  %v1503_v41 = vld [vmem:[%s2020_s1 + $0x140] sm:$0xff]   ;;  %v1127_v42 = vcombine.high %v22_v36, %v23_v37  ;;  %v1126_v43 = vcombine.low %v22_v36, %v23_v37  ;;  %v1507_v49 = vld [vmem:[%s2020_s1 + $0x148] sm:$0xff]   ;;  %v20_v53 = vld [vmem:[%s2021_s0 + $0x10] sm:$0xff] }
   0xe   :  { %1392 = vmatprep.subr.bf16.mxu1 %v1484_v13  ;;  %v1504_v44 = vld [vmem:[%s2020_s1 + $0x1c0] sm:$0xff]   ;;  %v1508_v50 = vld [vmem:[%s2020_s1 + $0x1c8] sm:$0xff]   ;;  %v21_v54 = vld [vmem:[%s2021_s0 + $0x18] sm:$0xff]  ;;  %v24_v55 = vmax.bf16 %v1537_v35, %v20_v53 }
   0xf   :  { %v1183_v45 = vcombine.high %v228_v39, %v229_v40  ;;  %v1182_v46 = vcombine.low %v228_v39, %v229_v40  ;;  %v1505_v47 = vld [vmem:[%s2020_s1 + $0x100] sm:$0xff]   ;;  %206 = vmatprep.mubr.bf16.mxu0 %v1127_v42  ;;  %v1509_v51 = vld [vmem:[%s2020_s1 + $0x108] sm:$0xff]   ;;  %v25_v56 = vmax.bf16 %v1537_v35, %v21_v54  ;;  %v1148_v57 = vld [vmem:[%s2021_s0 + $0x30] sm:$0xff] }
  0x10   :  { %1365 = vmatpush3.bf16.msra.mxu0 %v1485_v14  ;;  %v1506_v48 = vld [vmem:[%s2020_s1 + $0x180] sm:$0xff]   ;;  %v1510_v52 = vld [vmem:[%s2020_s1 + $0x188] sm:$0xff]   ;;  %v1149_v58 = vld [vmem:[%s2021_s0 + $0x38] sm:$0xff]  ;;  %v230_v59 = vmax.bf16 %v1537_v35, %v1148_v57 }
  0x11   :  { %1393 = vmatpush3.bf16.msra.mxu1 %v1486_v15  ;;  %1366 = vmatprep.subr.bf16.mxu0 %v1487_v16  ;;  %v231_v60 = vmax.bf16 %v1537_v35, %v1149_v58  ;;  %v1511_v61 = vld [vmem:[%s2020_s1 + $0x150] sm:$0xff]   ;;  %v1129_v62 = vcombine.high %v24_v55, %v25_v56  ;;  %v1128_v63 = vcombine.low %v24_v55, %v25_v56  ;;  %v1515_v5 = vld [vmem:[%s2020_s1 + $0x158] sm:$0xff]   ;;  %v1519_v9 = vld [vmem:[%s2020_s1 + $0x160] sm:$0xff]  }
  0x12   :  { %1394 = vmatprep.subr.bf16.mxu1 %v1488_v17  ;;  %413 = vmatprep.mubr.bf16.mxu1 %v1183_v45  ;;  %v1512_v0 = vld [vmem:[%s2020_s1 + $0x1d0] sm:$0xff]   ;;  %v1516_v6 = vld [vmem:[%s2020_s1 + $0x1d8] sm:$0xff]   ;;  %v1520_v10 = vld [vmem:[%s2020_s1 + $0x1e0] sm:$0xff]  }
  0x13   :  { %v1185_v1 = vcombine.high %v230_v59, %v231_v60  ;;  %v1184_v2 = vcombine.low %v230_v59, %v231_v60  ;;  %v1513_v3 = vld [vmem:[%s2020_s1 + $0x110] sm:$0xff]   ;;  %v1517_v7 = vld [vmem:[%s2020_s1 + $0x118] sm:$0xff]   ;;  %v1521_v11 = vld [vmem:[%s2020_s1 + $0x120] sm:$0xff]  }
  0x14   :  { %1367 = vmatpush3.bf16.msra.mxu0 %v1489_v18  ;;  %v1514_v4 = vld [vmem:[%s2020_s1 + $0x190] sm:$0xff]   ;;  %v1518_v8 = vld [vmem:[%s2020_s1 + $0x198] sm:$0xff]   ;;  %v1522_v12 = vld [vmem:[%s2020_s1 + $0x1a0] sm:$0xff]  }
  0x15   :  { %1395 = vmatpush3.bf16.msra.mxu1 %v1490_v19  ;;  %1368 = vmatprep.subr.bf16.mxu0 %v1491_v20  ;;  %v1523_v13 = vld [vmem:[%s2020_s1 + $0x168] sm:$0xff]   ;;  %v1527_v17 = vld [vmem:[%s2020_s1 + $0x170] sm:$0xff]   ;;  %v1205_v34 = vld [vmem:[%s2021_s0 + $0x58] sm:$0xff] }
  0x16   :  { %1396 = vmatprep.subr.bf16.mxu1 %v1492_v21  ;;  %v1524_v14 = vld [vmem:[%s2020_s1 + $0x1e8] sm:$0xff]   ;;  %v1528_v18 = vld [vmem:[%s2020_s1 + $0x1f0] sm:$0xff]   ;;  %v1531_v21 = vld [vmem:[%s2020_s1 + $0x178] sm:$0xff]   ;;  %v438_v38 = vmax.bf16 %v1537_v35, %v1205_v34 }
  0x17   :  { %v1525_v15 = vld [vmem:[%s2020_s1 + $0x128] sm:$0xff]   ;;  %v1529_v19 = vld [vmem:[%s2020_s1 + $0x130] sm:$0xff]   ;;  %v1261_v39 = vld [vmem:[%s2021_s0 + $0x78] sm:$0xff] }
  0x18   :  { %1369 = vmatpush3.bf16.msra.mxu0 %v1493_v22  ;;  %v1526_v16 = vld [vmem:[%s2020_s1 + $0x1a8] sm:$0xff]   ;;  %v1530_v20 = vld [vmem:[%s2020_s1 + $0x1b0] sm:$0xff]   ;;  %v1532_v22 = vld [vmem:[%s2020_s1 + $0x1f8] sm:$0xff]  }
  0x19   :  { %1397 = vmatpush3.bf16.msra.mxu1 %v1494_v23  ;;  %1370 = vmatprep.subr.bf16.mxu0 %v1495_v24  ;;  %v1533_v23 = vld [vmem:[%s2020_s1 + $0x138] sm:$0xff]   ;;  %v1204_v33 = vld [vmem:[%s2021_s0 + $0x50] sm:$0xff] }
  0x1a   :  { %1398 = vmatprep.subr.bf16.mxu1 %v1496_v25  ;;  %v1534_v24 = vld [vmem:[%s2020_s1 + $0x1b8] sm:$0xff]   ;;  %v1202_v25 = vld [vmem:[%s2021_s0 + $0x40] sm:$0xff]  ;;  %v1260_v36 = vld [vmem:[%s2021_s0 + $0x70] sm:$0xff]  ;;  %v437_v37 = vmax.bf16 %v1537_v35, %v1204_v33 }
  0x1b   :  { %v644_v40 = vmax.bf16 %v1537_v35, %v1260_v36 }
  0x1c   :  { %1371 = vmatpush3.bf16.msra.mxu0 %v1497_v26  ;;  %v1203_v26 = vld [vmem:[%s2021_s0 + $0x48] sm:$0xff]  ;;  %v1241_v45 = vcombine.high %v437_v37, %v438_v38 }
  0x1d   :  { %1399 = vmatpush3.bf16.msra.mxu1 %v1498_v27  ;;  %1372 = vmatprep.subr.bf16.mxu0 %v1499_v28  ;;  %v435_v27 = vmax.bf16 %v1537_v35, %v1202_v25  ;;  %v1258_v28 = vld [vmem:[%s2021_s0 + $0x60] sm:$0xff] }
  0x1e   :  { %1400 = vmatprep.subr.bf16.mxu1 %v1500_v29  ;;  %v1259_v29 = vld [vmem:[%s2021_s0 + $0x68] sm:$0xff] }
  0x1f   :  { %v643_v32 = vmax.bf16 %v1537_v35, %v1259_v29 }
  0x20   :  { %1373 = vmatpush3.bf16.msra.mxu0 %v1501_v30  ;;  %v436_v30 = vmax.bf16 %v1537_v35, %v1203_v26 }
  0x21   :  { %1401 = vmatpush3.bf16.msra.mxu1 %v1502_v31  ;;  %1414 = vmatprep.subr.bf16.mxu0 %v1503_v41  ;;  %v642_v31 = vmax.bf16 %v1537_v35, %v1258_v28 }
  0x22   :  { %1442 = vmatprep.subr.bf16.mxu1 %v1504_v44  ;;  %v1238_v41 = vcombine.low %v435_v27, %v436_v30  ;;  %v1239_v42 = vcombine.high %v435_v27, %v436_v30 }
  0x23   :  { %207 = vmatmul.mubr.bf16.vlgmr.msra.gmra.mrb[0].mxu0 %v1126_v43  ;;  %v1294_v43 = vcombine.low %v642_v31, %v643_v32  ;;  %v1295_v44 = vcombine.high %v642_v31, %v643_v32 }
  0x24   :  { %414 = vmatmul.mubr.bf16.vlgmr.msra.gmra.mrb[0].mxu1 %v1182_v46  ;;  %1415 = vmatpush3.bf16.msra.mxu0 %v1505_v47  ;;  %v645_v46 = vmax.bf16 %v1537_v35, %v1261_v39 }
  0x25   :  { %1443 = vmatpush3.bf16.msra.mxu1 %v1506_v48  ;;  %1416 = vmatprep.subr.bf16.mxu0 %v1507_v49  ;;  %v1240_v48 = vcombine.low %v437_v37, %v438_v38 }
  0x26   :  { %1444 = vmatprep.subr.bf16.mxu1 %v1508_v50  ;;  %214 = vmatprep.mubr.bf16.mxu0 %v1129_v62  ;;  %v1297_v47 = vcombine.high %v644_v40, %v645_v46  ;;  %v1296_v49 = vcombine.low %v644_v40, %v645_v46 }
  0x27   :  { %421 = vmatprep.mubr.bf16.mxu1 %v1185_v1 }
  0x28   :  { %1417 = vmatpush3.bf16.msra.mxu0 %v1509_v51 }
  0x29   :  { %1445 = vmatpush3.bf16.msra.mxu1 %v1510_v52  ;;  %1418 = vmatprep.subr.bf16.mxu0 %v1511_v61 }
  0x2a   :  { %1446 = vmatprep.subr.bf16.mxu1 %v1512_v0 }
  0x2b   :  { %215 = vmatmul.mubr.bf16.gmra.mrb[4].mxu0 %v1128_v63 }
  0x2c   :  { %422 = vmatmul.mubr.bf16.gmra.mrb[4].mxu1 %v1184_v2  ;;  %1419 = vmatpush3.bf16.msra.mxu0 %v1513_v3 }
  0x2d   :  { %1447 = vmatpush3.bf16.msra.mxu1 %v1514_v4  ;;  %1420 = vmatprep.subr.bf16.mxu0 %v1515_v5 }
  0x2e   :  { %1448 = vmatprep.subr.bf16.mxu1 %v1516_v6  ;;  %620 = vmatprep.mubr.bf16.mxu0 %v1239_v42 }
  0x2f   :  { %827 = vmatprep.mubr.bf16.mxu1 %v1295_v44 }
  0x30   :  { %1421 = vmatpush3.bf16.msra.mxu0 %v1517_v7 }
  0x31   :  { %1449 = vmatpush3.bf16.msra.mxu1 %v1518_v8  ;;  %1422 = vmatprep.subr.bf16.mxu0 %v1519_v9 }
  0x32   :  { %1450 = vmatprep.subr.bf16.mxu1 %v1520_v10 }
  0x34   :  { %1423 = vmatpush3.bf16.msra.mxu0 %v1521_v11 }
  0x35   :  { %1451 = vmatpush3.bf16.msra.mxu1 %v1522_v12  ;;  %1424 = vmatprep.subr.bf16.mxu0 %v1523_v13 }
  0x36   :  { %1452 = vmatprep.subr.bf16.mxu1 %v1524_v14 }
  0x38   :  { %1425 = vmatpush3.bf16.msra.mxu0 %v1525_v15 }
  0x39   :  { %1453 = vmatpush3.bf16.msra.mxu1 %v1526_v16  ;;  %1426 = vmatprep.subr.bf16.mxu0 %v1527_v17 }
  0x3a   :  { %1454 = vmatprep.subr.bf16.mxu1 %v1528_v18 }
  0x3c   :  { %1427 = vmatpush3.bf16.msra.mxu0 %v1529_v19 }
  0x3d   :  { %1455 = vmatpush3.bf16.msra.mxu1 %v1530_v20  ;;  %1428 = vmatprep.subr.bf16.mxu0 %v1531_v21 }
  0x3e   :  { %1456 = vmatprep.subr.bf16.mxu1 %v1532_v22 }
  0x40   :  { %1429 = vmatpush3.bf16.msra.mxu0 %v1533_v23 }
  0x41   :  { %1457 = vmatpush3.bf16.msra.mxu1 %v1534_v24 }
  0x43   :  { %621 = vmatmul.mubr.bf16.vlgmr.msra.gmra.mrb[8].mxu0 %v1238_v41 }
  0x44   :  { %828 = vmatmul.mubr.bf16.vlgmr.msra.gmra.mrb[8].mxu1 %v1294_v43  ;;  %628 = vmatprep.mubr.bf16.mxu0 %v1241_v45 }
  0x45   :  { %835 = vmatprep.mubr.bf16.mxu1 %v1297_v47 }
  0x4b   :  { %629 = vmatmul.mubr.bf16.gmra.mrb[12].mxu0 %v1240_v48 }
  0x4c   :  { %836 = vmatmul.mubr.bf16.gmra.mrb[12].mxu1 %v1296_v49 }
  0xf6   :  { %v1374_v50 = vpop.f32.mrb[0].mxu0 }
  0xf7   :  { %v1402_v51 = vpop.f32.mrb[0].mxu1  ;;  %v1375_v52 = vpop.f32.mrb[1].mxu0 }
  0xf8   :  { %v1819_v53 = vadd.f32 %v1375_v52, %v1374_v50  ;;  %v1403_v54 = vpop.f32.mrb[1].mxu1  ;;  %v1377_v55 = vpop.f32.mrb[2].mxu0 }
  0xf9   :  { %v1821_v56 = vadd.f32 %v1403_v54, %v1402_v51  ;;  %v1405_v35 = vpop.f32.mrb[2].mxu1  ;;  %v1378_v57 = vpop.f32.mrb[3].mxu0 }
  0xfa   :  { %v1823_v58 = vadd.f32 %v1378_v57, %v1377_v55  ;;  %v1406_v59 = vpop.f32.mrb[3].mxu1  ;;  %v845_v12 = vsel %vm844_vm0, %v1819_v53, 0.0 }
  0xfb   :  { %v1825_v60 = vadd.f32 %v1406_v59, %v1405_v35  ;;  %v858_v9 = vsel %vm844_vm0, %v1821_v56, 0.0 }
  0xfc   :  { %v846_v10 = vsel %vm844_vm0, %v1823_v58, 0.0 }
  0xfd   :  { %v859_v11 = vsel %vm844_vm0, %v1825_v60, 0.0  ;;  %v847_v15 = vadd.f32 %v846_v10, %v845_v12 }
  0xfe   :  { %v1380_v61 = vpop.f32.mrb[4].mxu0  ;;  %v860_v16 = vadd.f32 %v859_v11, %v858_v9 }
  0xff   :  { %v1408_v62 = vpop.f32.mrb[4].mxu1  ;;  %v1381_v63 = vpop.f32.mrb[5].mxu0 }
 0x100   :  { %v1827_v0 = vadd.f32 %v1381_v63, %v1380_v61  ;;  %v1409_v1 = vpop.f32.mrb[5].mxu1  ;;  %v1383_v2 = vpop.f32.mrb[6].mxu0 }
 0x101   :  { %v1829_v3 = vadd.f32 %v1409_v1, %v1408_v62  ;;  %v1411_v4 = vpop.f32.mrb[6].mxu1  ;;  %v1384_v5 = vpop.f32.mrb[7].mxu0 }
 0x102   :  { %v1831_v6 = vadd.f32 %v1384_v5, %v1383_v2  ;;  %v1412_v7 = vpop.f32.mrb[7].mxu1  ;;  %v848_v13 = vsel %vm844_vm0, %v1827_v0, 0.0 }
 0x103   :  { %v1833_v8 = vadd.f32 %v1412_v7, %v1411_v4  ;;  %v861_v14 = vsel %vm844_vm0, %v1829_v3, 0.0  ;;  %v849_v17 = vadd.f32 %v848_v13, %v847_v15 }
 0x104   :  { %v862_v18 = vadd.f32 %v861_v14, %v860_v16  ;;  %v850_v19 = vsel %vm844_vm0, %v1831_v6, 0.0 }
 0x105   :  { %v863_v20 = vsel %vm844_vm0, %v1833_v8, 0.0  ;;  %v851_v21 = vadd.f32 %v850_v19, %v849_v17 }
 0x106   :  { %v864_v22 = vadd.f32 %v863_v20, %v862_v18 }
 0x107   :  { %v852_v31 = vrot.slane %v851_v21, 4 }
 0x108   :  { %v865_v32 = vrot.slane %v864_v22, 4 }
 0x109   :  { %v853_v38 = vadd.f32 %v852_v31, %v851_v21 }
 0x10a   :  { %v866_v39 = vadd.f32 %v865_v32, %v864_v22 }
 0x10b   :  { %v854_v52 = vrot.slane %v853_v38, 2 }
 0x10c   :  { %v867_v54 = vrot.slane %v866_v39, 2 }
 0x10d   :  { %v855_v9 = vadd.f32 %v854_v52, %v853_v38 }
 0x10e   :  { %v868_v10 = vadd.f32 %v867_v54, %v866_v39 }
 0x10f   :  { %v856_v15 = vrot.slane %v855_v9, 1 }
 0x110   :  { %v869_v16 = vrot.slane %v868_v10, 1 }
 0x111   :  { %v857_v21 = vadd.f32 %v856_v15, %v855_v9 }
 0x112   :  { %v870_v22 = vadd.f32 %v869_v16, %v868_v10 }
 0x116   :  { %v1430_v23 = vpop.f32.mrb[8].mxu0 }
 0x117   :  { %v1458_v24 = vpop.f32.mrb[8].mxu1  ;;  %v1431_v25 = vpop.f32.mrb[9].mxu0 }
 0x118   :  { %v1459_v26 = vpop.f32.mrb[9].mxu1  ;;  %v1851_v27 = vadd.f32 %v1431_v25, %v1430_v23  ;;  %v1433_v29 = vpop.f32.mrb[10].mxu0 }
 0x119   :  { %v1853_v28 = vadd.f32 %v1459_v26, %v1458_v24  ;;  %v1461_v30 = vpop.f32.mrb[10].mxu1  ;;  %v1434_v33 = vpop.f32.mrb[11].mxu0 }
 0x11a   :  { %v1462_v34 = vpop.f32.mrb[11].mxu1  ;;  %v1855_v36 = vadd.f32 %v1434_v33, %v1433_v29  ;;  %v872_v47 = vsel %vm844_vm0, %v1851_v27, 0.0  ;;  %v871_v29 = vadd.f32 %v870_v22, %v857_v21 }
 0x11b   :  { %v1857_v37 = vadd.f32 %v1462_v34, %v1461_v30  ;;  %v886_v40 = vsel %vm844_vm0, %v1853_v28, 0.0 }
 0x11c   :  { %v873_v41 = vsel %vm844_vm0, %v1855_v36, 0.0 }
 0x11d   :  { %v887_v42 = vsel %vm844_vm0, %v1857_v37, 0.0  ;;  %v874_v55 = vadd.f32 %v873_v41, %v872_v47 }
 0x11e   :  { %v1436_v43 = vpop.f32.mrb[12].mxu0  ;;  %v888_v35 = vadd.f32 %v887_v42, %v886_v40 }
 0x11f   :  { %v1464_v44 = vpop.f32.mrb[12].mxu1  ;;  %v1437_v45 = vpop.f32.mrb[13].mxu0 }
 0x120   :  { %v1465_v46 = vpop.f32.mrb[13].mxu1  ;;  %v1867_v48 = vadd.f32 %v1437_v45, %v1436_v43  ;;  %v1439_v50 = vpop.f32.mrb[14].mxu0 }
 0x121   :  { %v1869_v49 = vadd.f32 %v1465_v46, %v1464_v44  ;;  %v1467_v51 = vpop.f32.mrb[14].mxu1  ;;  %v1440_v57 = vpop.f32.mrb[15].mxu0 }
 0x122   :  { %v1468_v59 = vpop.f32.mrb[15].mxu1  ;;  %v875_v61 = vsel %vm844_vm0, %v1867_v48, 0.0  ;;  %v1875_v63 = vadd.f32 %v1440_v57, %v1439_v50 }
 0x123   :  { %v889_v62 = vsel %vm844_vm0, %v1869_v49, 0.0  ;;  %v1877_v1 = vadd.f32 %v1468_v59, %v1467_v51  ;;  %v876_v2 = vadd.f32 %v875_v61, %v874_v55 }
 0x124   :  { %v890_v4 = vadd.f32 %v889_v62, %v888_v35  ;;  %v877_v5 = vsel %vm844_vm0, %v1875_v63, 0.0 }
 0x125   :  { %v891_v7 = vsel %vm844_vm0, %v1877_v1, 0.0  ;;  %v878_v11 = vadd.f32 %v877_v5, %v876_v2 }
 0x126   :  { %v892_v12 = vadd.f32 %v891_v7, %v890_v4 }
 0x127   :  { %v879_v13 = vrot.slane %v878_v11, 4 }
 0x128   :  { %v893_v14 = vrot.slane %v892_v12, 4 }
 0x129   :  { %v880_v17 = vadd.f32 %v879_v13, %v878_v11 }
 0x12a   :  { %v894_v18 = vadd.f32 %v893_v14, %v892_v12 }
 0x12b   :  { %v881_v19 = vrot.slane %v880_v17, 2 }
 0x12c   :  { %v895_v20 = vrot.slane %v894_v18, 2 }
 0x12d   :  { %v882_v23 = vadd.f32 %v881_v19, %v880_v17 }
 0x12e   :  { %v896_v24 = vadd.f32 %v895_v20, %v894_v18 }
 0x12f   :  { %v883_v25 = vrot.slane %v882_v23, 1 }
 0x130   :  { %v897_v26 = vrot.slane %v896_v24, 1 }
 0x131   :  { %v884_v30 = vadd.f32 %v883_v25, %v882_v23 }
 0x132   :  { %v898_v32 = vadd.f32 %v897_v26, %v896_v24 }
 0x133   :  { %v885_v31 = vadd.f32 %v884_v30, %v871_v29 }
 0x135   :  { %v899_v33 = vadd.f32 %v898_v32, %v885_v31 }
 0x137   :  { %v1883_v34 = vmul.f32 0.0078125, %v899_v33 }
 0x139   :  { %v901_v38 = vsub.f32 %v1819_v53, %v1883_v34  ;;  %v902_v39 = vsub.f32 %v1823_v58, %v1883_v34  ;;  %v903_v40 = vsub.f32 %v1827_v0, %v1883_v34  ;;  %v904_v41 = vsub.f32 %v1831_v6, %v1883_v34 }
 0x13a   :  { %v922_v42 = vsub.f32 %v1821_v56, %v1883_v34  ;;  %v923_v43 = vsub.f32 %v1825_v60, %v1883_v34  ;;  %v924_v44 = vsub.f32 %v1829_v3, %v1883_v34  ;;  %v925_v45 = vsub.f32 %v1833_v8, %v1883_v34 }
 0x13b   :  { %v905_v46 = vmul.f32 %v901_v38, %v901_v38  ;;  %v906_v47 = vmul.f32 %v902_v39, %v902_v39  ;;  %v907_v50 = vmul.f32 %v903_v40, %v903_v40  ;;  %v908_v51 = vmul.f32 %v904_v41, %v904_v41 }
 0x13c   :  { %v926_v52 = vmul.f32 %v922_v42, %v922_v42  ;;  %v927_v54 = vmul.f32 %v923_v43, %v923_v43  ;;  %v928_v55 = vmul.f32 %v924_v44, %v924_v44  ;;  %v929_v35 = vmul.f32 %v925_v45, %v925_v45 }
 0x13d   :  { %v909_v57 = vsel %vm844_vm0, %v905_v46, 0.0  ;;  %v910_v59 = vsel %vm844_vm0, %v906_v47, 0.0  ;;  %v912_v61 = vsel %vm844_vm0, %v907_v50, 0.0  ;;  %v914_v62 = vsel %vm844_vm0, %v908_v51, 0.0 }
 0x13e   :  { %v911_v2 = vadd.f32 %v910_v59, %v909_v57  ;;  %v930_v4 = vsel %vm844_vm0, %v926_v52, 0.0  ;;  %v931_v5 = vsel %vm844_vm0, %v927_v54, 0.0  ;;  %v933_v7 = vsel %vm844_vm0, %v928_v55, 0.0 }
 0x13f   :  { %v932_v9 = vadd.f32 %v931_v5, %v930_v4  ;;  %v935_v10 = vsel %vm844_vm0, %v929_v35, 0.0  ;;  %v944_v11 = vsub.f32 %v1851_v27, %v1883_v34  ;;  %v945_v12 = vsub.f32 %v1855_v36, %v1883_v34 }
 0x140   :  { %v913_v13 = vadd.f32 %v912_v61, %v911_v2  ;;  %v946_v14 = vsub.f32 %v1867_v48, %v1883_v34  ;;  %v947_v15 = vsub.f32 %v1875_v63, %v1883_v34  ;;  %v966_v16 = vsub.f32 %v1853_v28, %v1883_v34 }
 0x141   :  { %v934_v17 = vadd.f32 %v933_v7, %v932_v9  ;;  %v948_v18 = vmul.f32 %v944_v11, %v944_v11  ;;  %v949_v19 = vmul.f32 %v945_v12, %v945_v12  ;;  %v967_v20 = vsub.f32 %v1857_v37, %v1883_v34 }
 0x142   :  { %v915_v21 = vadd.f32 %v914_v62, %v913_v13  ;;  %v950_v22 = vmul.f32 %v946_v14, %v946_v14  ;;  %v951_v23 = vmul.f32 %v947_v15, %v947_v15  ;;  %v968_v24 = vsub.f32 %v1869_v49, %v1883_v34 }
 0x143   :  { %v936_v25 = vadd.f32 %v935_v10, %v934_v17  ;;  %v952_v26 = vsel %vm844_vm0, %v948_v18, 0.0  ;;  %v953_v29 = vsel %vm844_vm0, %v949_v19, 0.0  ;;  %v969_v30 = vsub.f32 %v1877_v1, %v1883_v34 }
 0x144   :  { %v916_v31 = vrot.slane %v915_v21, 4  ;;  %v954_v32 = vadd.f32 %v953_v29, %v952_v26  ;;  %v955_v33 = vsel %vm844_vm0, %v950_v22, 0.0  ;;  %v970_v39 = vmul.f32 %v966_v16, %v966_v16 }
 0x145   :  { %v937_v38 = vrot.slane %v936_v25, 4  ;;  %v971_v40 = vmul.f32 %v967_v20, %v967_v20  ;;  %v972_v41 = vmul.f32 %v968_v24, %v968_v24  ;;  %v957_v44 = vsel %vm844_vm0, %v951_v23, 0.0 }
 0x146   :  { %v917_v42 = vadd.f32 %v916_v31, %v915_v21  ;;  %v956_v43 = vadd.f32 %v955_v33, %v954_v32  ;;  %v973_v46 = vmul.f32 %v969_v30, %v969_v30  ;;  %v974_v47 = vsel %vm844_vm0, %v970_v39, 0.0  ;;  %v991_v31 = vld [vmem:[%s2022_s2] sm:$0x1] }
 0x147   :  { %v938_v45 = vadd.f32 %v937_v38, %v936_v25  ;;  %v975_v50 = vsel %vm844_vm0, %v971_v40, 0.0  ;;  %v977_v35 = vsel %vm844_vm0, %v972_v41, 0.0  ;;  %v996_v29 = vlaneseq  ;;  %v993_v39 = vld [vmem:[%s2023_s3] sm:$0x1] }
 0x148   :  { %v918_v51 = vrot.slane %v917_v42, 2  ;;  %v958_v52 = vadd.f32 %v957_v44, %v956_v43  ;;  %v976_v54 = vadd.f32 %v975_v50, %v974_v47  ;;  %v979_v2 = vsel %vm844_vm0, %v973_v46, 0.0 }
 0x149   :  { %v939_v55 = vrot.slane %v938_v45, 2  ;;  %v997_v30 = vshrl.u32 %v996_v29, 7 }
 0x14a   :  { %v919_v57 = vadd.f32 %v918_v51, %v917_v42  ;;  %v959_v59 = vrot.slane %v958_v52, 4  ;;  %v978_v61 = vadd.f32 %v977_v35, %v976_v54 }
 0x14b   :  { %v940_v62 = vadd.f32 %v939_v55, %v938_v45  ;;  %v998_v32 = vsub.s32 0, %v997_v30 }
 0x14c   :  { %v920_v4 = vrot.slane %v919_v57, 1  ;;  %v960_v5 = vadd.f32 %v959_v59, %v958_v52  ;;  %v980_v7 = vadd.f32 %v979_v2, %v978_v61 }
 0x14d   :  { %v941_v9 = vrot.slane %v940_v62, 1 }
 0x14e   :  { %v921_v10 = vadd.f32 %v920_v4, %v919_v57  ;;  %v961_v11 = vrot.slane %v960_v5, 2  ;;  %v981_v12 = vrot.slane %v980_v7, 4 }
 0x14f   :  { %v942_v13 = vadd.f32 %v941_v9, %v940_v62 }
 0x150   :  { %v962_v14 = vadd.f32 %v961_v11, %v960_v5  ;;  %v982_v15 = vadd.f32 %v981_v12, %v980_v7 }
 0x151   :  { %v943_v16 = vadd.f32 %v942_v13, %v921_v10 }
 0x152   :  { %v963_v17 = vrot.slane %v962_v14, 1  ;;  %v983_v18 = vrot.slane %v982_v15, 2 }
 0x154   :  { %v964_v19 = vadd.f32 %v963_v17, %v962_v14  ;;  %v984_v20 = vadd.f32 %v983_v18, %v982_v15 }
 0x156   :  { %v965_v21 = vadd.f32 %v964_v19, %v943_v16  ;;  %v985_v22 = vrot.slane %v984_v20, 1 }
 0x158   :  { %v986_v23 = vadd.f32 %v985_v22, %v984_v20 }
 0x15a   :  { %v987_v24 = vadd.f32 %v986_v23, %v965_v21 }
 0x15c   :  { %v988_v25 = vmul.f32 0.0078125, %v987_v24 }
 0x15e   :  { %v989_v26 = vadd.f32 1e-05, %v988_v25 }
 0x160   :  { %1535 = vrsqrt.f32 %v989_v26 }
 0x16a   :  { %v1536_v33 = vpop.eup %1535 }
 0x16b   :  { %v992_v38 = vmul.f32 %v1536_v33, %v991_v31 }
 0x16d   :  { %v994_v40 = vmul.f32 %v992_v38, %v1883_v34  ;;  %v999_v41 = vrot.slane %v992_v38, %v998_v32 }
 0x16f   :  { %v995_v42 = vsub.f32 %v993_v39, %v994_v40  ;;  %v1000_v43 = vmul.f32 %v1819_v53, %v999_v41  ;;  %v1001_v44 = vmul.f32 %v1823_v58, %v999_v41  ;;  %v1002_v45 = vmul.f32 %v1827_v0, %v999_v41 }
 0x170   :  { %v1003_v46 = vmul.f32 %v1831_v6, %v999_v41  ;;  %v1035_v47 = vmul.f32 %v1821_v56, %v999_v41  ;;  %v1036_v50 = vmul.f32 %v1825_v60, %v999_v41  ;;  %v1037_v51 = vmul.f32 %v1829_v3, %v999_v41 }
 0x171   :  { %v1008_v52 = vrot.slane %v995_v42, %v998_v32  ;;  %v1038_v34 = vmul.f32 %v1833_v8, %v999_v41  ;;  %v1064_v54 = vmul.f32 %v1851_v27, %v999_v41  ;;  %v1065_v55 = vmul.f32 %v1855_v36, %v999_v41 }
 0x172   :  { %v1066_v53 = vmul.f32 %v1867_v48, %v999_v41  ;;  %v1067_v58 = vmul.f32 %v1875_v63, %v999_v41  ;;  %v1093_v0 = vmul.f32 %v1853_v28, %v999_v41  ;;  %v1094_v6 = vmul.f32 %v1857_v37, %v999_v41 }
 0x173   :  { %v1010_v56 = vadd.f32 %v1008_v52, %v1000_v43  ;;  %v1011_v35 = vadd.f32 %v1008_v52, %v1001_v44  ;;  %v1012_v60 = vadd.f32 %v1008_v52, %v1002_v45  ;;  %v1013_v57 = vadd.f32 %v1008_v52, %v1003_v46 }
 0x174   :  { %v1039_v3 = vadd.f32 %v1035_v47, %v1008_v52  ;;  %v1040_v59 = vadd.f32 %v1036_v50, %v1008_v52  ;;  %v1041_v61 = vadd.f32 %v1037_v51, %v1008_v52  ;;  %v1042_v8 = vadd.f32 %v1038_v34, %v1008_v52 }
 0x175   :  { %v1342_v62 = vpack.c.bf16 %v1010_v56, %v1010_v56  ;;  %v1343_v27 = vpack.c.bf16 %v1011_v35, %v1011_v35  ;;  %v1344_v2 = vpack.c.bf16 %v1012_v60, %v1012_v60  ;;  %v1345_v36 = vpack.c.bf16 %v1013_v57, %v1013_v57 }
 0x176   :  { %v1346_v4 = vpack.c.bf16 %v1039_v3, %v1039_v3  ;;  %v1347_v48 = vpack.c.bf16 %v1040_v59, %v1040_v59  ;;  %v1348_v5 = vpack.c.bf16 %v1041_v61, %v1041_v61  ;;  %v1349_v63 = vpack.c.bf16 %v1042_v8, %v1042_v8 }
 0x177   :  { %1031 = vst.msk [vmem:[%s2024_s4] sm:$0xf] %vm1030_vm1, %v1342_v62  ;;  %1032 = vst.msk [vmem:[%s2024_s4 + $0x4] sm:$0xf] %vm1030_vm1, %v1343_v27  ;;  %v1068_v28 = vadd.f32 %v1064_v54, %v1008_v52  ;;  %v1069_v37 = vadd.f32 %v1065_v55, %v1008_v52  ;;  %v1070_v7 = vadd.f32 %v1066_v53, %v1008_v52 }
 0x178   :  { %1033 = vst.msk [vmem:[%s2024_s4 + $0x8] sm:$0xf] %vm1030_vm1, %v1344_v2  ;;  %1034 = vst.msk [vmem:[%s2024_s4 + $0xc] sm:$0xf] %vm1030_vm1, %v1345_v36  ;;  %v1071_v9 = vadd.f32 %v1067_v58, %v1008_v52  ;;  %v1095_v10 = vmul.f32 %v1869_v49, %v999_v41  ;;  %v1096_v11 = vmul.f32 %v1877_v1, %v999_v41 }
 0x179   :  { %1322 = vst.msk [vmem:[%s2024_s4 + $0x10] sm:$0xf] %vm1030_vm1, %v1346_v4  ;;  %1323 = vst.msk [vmem:[%s2024_s4 + $0x14] sm:$0xf] %vm1030_vm1, %v1347_v48  ;;  %v1097_v12 = vadd.f32 %v1093_v0, %v1008_v52  ;;  %v1098_v13 = vadd.f32 %v1094_v6, %v1008_v52  ;;  %v1350_v14 = vpack.c.bf16 %v1068_v28, %v1068_v28 }
 0x17a   :  { %1324 = vst.msk [vmem:[%s2024_s4 + $0x18] sm:$0xf] %vm1030_vm1, %v1348_v5  ;;  %1325 = vst.msk [vmem:[%s2024_s4 + $0x1c] sm:$0xf] %vm1030_vm1, %v1349_v63  ;;  %v1351_v15 = vpack.c.bf16 %v1069_v37, %v1069_v37  ;;  %v1352_v16 = vpack.c.bf16 %v1070_v7, %v1070_v7  ;;  %v1353_v17 = vpack.c.bf16 %v1071_v9, %v1071_v9 }
 0x17b   :  { %v1099_v18 = vadd.f32 %v1095_v10, %v1008_v52  ;;  %v1100_v19 = vadd.f32 %v1096_v11, %v1008_v52  ;;  %v1354_v20 = vpack.c.bf16 %v1097_v12, %v1097_v12  ;;  %v1355_v21 = vpack.c.bf16 %v1098_v13, %v1098_v13  ;;  %1330 = vst.msk [vmem:[%s2024_s4 + $0x20] sm:$0xf] %vm1030_vm1, %v1350_v14 }
 0x17c   :  { %1331 = vst.msk [vmem:[%s2024_s4 + $0x24] sm:$0xf] %vm1030_vm1, %v1351_v15  ;;  %1332 = vst.msk [vmem:[%s2024_s4 + $0x28] sm:$0xf] %vm1030_vm1, %v1352_v16 }
 0x17d   :  { %1333 = vst.msk [vmem:[%s2024_s4 + $0x2c] sm:$0xf] %vm1030_vm1, %v1353_v17  ;;  %v1356_v49 = vpack.c.bf16 %v1099_v18, %v1099_v18  ;;  %v1357_v1 = vpack.c.bf16 %v1100_v19, %v1100_v19  ;;  %1338 = vst.msk [vmem:[%s2024_s4 + $0x30] sm:$0xf] %vm1030_vm1, %v1354_v20 }
 0x17e   :  { %1339 = vst.msk [vmem:[%s2024_s4 + $0x34] sm:$0xf] %vm1030_vm1, %v1355_v21 }
 0x17f   :  { %1340 = vst.msk [vmem:[%s2024_s4 + $0x38] sm:$0xf] %vm1030_vm1, %v1356_v49  ;;  %1341 = vst.msk [vmem:[%s2024_s4 + $0x3c] sm:$0xf] %vm1030_vm1, %v1357_v1 }

// kernel: _lambda_.16
= control target key start
LH: loop header
LB: loop body
LE: loop exit
PB: predicated region body
PF: predicated region fallthrough
CT: control target
= control target key end

     0   :  { %v2457_v15 = vmov 0   ;;  %vm988_vm0 = vcmask 64512   ;;  %vm1534_vm1 = vcmask 60416   ;;  %s3783_s1 = inlined_call_operand.vmem [shape: bf16[4,128,8], index: 1, kind: input, shape index: {}]   ;;  %s3784_s0 = inlined_call_operand.vmem [shape: bf16[4,128,128], index: 0, kind: input, shape index: {}]   ;;  %s3785_s2 = inlined_call_operand.vmem [shape: f32[1,8], index: 2, kind: input, shape index: {}]   ;;  %s3786_s3 = inlined_call_operand.vmem [shape: f32[1,8], index: 3, kind: input, shape index: {}]   ;;  %s3787_s4 = inlined_call_operand.vmem [shape: bf16[4,128,8], index: 4, kind: output, shape index: {}]  }
   0x1   :  { %v2423_v0 = vld [vmem:[%s3783_s1] sm:$0xff]   ;;  %v2425_v2 = vld [vmem:[%s3783_s1 + $0x8] sm:$0xff]   ;;  %v2427_v4 = vld [vmem:[%s3783_s1 + $0x10] sm:$0xff]  }
   0x2   :  { %v2424_v1 = vld [vmem:[%s3783_s1 + $0x40] sm:$0xff]   ;;  %2294 = vmatprep.subr.bf16.mxu0 %v2423_v0  ;;  %v2426_v3 = vld [vmem:[%s3783_s1 + $0x48] sm:$0xff]   ;;  %v2428_v5 = vld [vmem:[%s3783_s1 + $0x50] sm:$0xff]  }
   0x3   :  { %2326 = vmatprep.subr.bf16.mxu1 %v2424_v1  ;;  %2295 = vmatpush3.bf16.msra.mxu0 %v2423_v0  ;;  %v2429_v6 = vld [vmem:[%s3783_s1 + $0x18] sm:$0xff]   ;;  %v2431_v8 = vld [vmem:[%s3783_s1 + $0x20] sm:$0xff]   ;;  %v2433_v10 = vld [vmem:[%s3783_s1 + $0x28] sm:$0xff]  }
   0x4   :  { %2327 = vmatpush3.bf16.msra.mxu1 %v2424_v1  ;;  %2296 = vmatprep.subr.bf16.mxu0 %v2425_v2  ;;  %v2430_v7 = vld [vmem:[%s3783_s1 + $0x58] sm:$0xff]   ;;  %v2432_v9 = vld [vmem:[%s3783_s1 + $0x60] sm:$0xff]   ;;  %v2434_v14 = vld [vmem:[%s3783_s1 + $0x68] sm:$0xff]  }
   0x5   :  { %2328 = vmatprep.subr.bf16.mxu1 %v2426_v3  ;;  %v18_v11 = vld [vmem:[%s3784_s0] sm:$0xf]  ;;  %v19_v12 = vld [vmem:[%s3784_s0 + $0x4] sm:$0xf]  ;;  %v2435_v22 = vld [vmem:[%s3783_s1 + $0x30] sm:$0xff]  }
   0x6   :  { %v1910_v13 = vld [vmem:[%s3784_s0 + $0x40] sm:$0xf]  ;;  %v34_v16 = vmax.bf16 %v2457_v15, %v18_v11  ;;  %v35_v17 = vmax.bf16 %v2457_v15, %v19_v12  ;;  %v1911_v18 = vld [vmem:[%s3784_s0 + $0x44] sm:$0xf]  ;;  %v2436_v24 = vld [vmem:[%s3783_s1 + $0x70] sm:$0xff]  }
   0x7   :  { %2297 = vmatpush3.bf16.msra.mxu0 %v2425_v2  ;;  %v276_v19 = vmax.bf16 %v2457_v15, %v1910_v13  ;;  %v277_v20 = vmax.bf16 %v2457_v15, %v1911_v18  ;;  %v2437_v25 = vld [vmem:[%s3783_s1 + $0x38] sm:$0xff]   ;;  %v20_v27 = vld [vmem:[%s3784_s0 + $0x8] sm:$0xf]  ;;  %v21_v28 = vld [vmem:[%s3784_s0 + $0xc] sm:$0xf] }
   0x8   :  { %2329 = vmatpush3.bf16.msra.mxu1 %v2426_v3  ;;  %2298 = vmatprep.subr.bf16.mxu0 %v2427_v4  ;;  %v1894_v21 = vcombine.low %v34_v16, %v35_v17  ;;  %v2438_v26 = vld [vmem:[%s3783_s1 + $0x78] sm:$0xff]   ;;  %v1912_v29 = vld [vmem:[%s3784_s0 + $0x48] sm:$0xf]  ;;  %v1913_v30 = vld [vmem:[%s3784_s0 + $0x4c] sm:$0xf]  ;;  %v36_v33 = vmax.bf16 %v2457_v15, %v20_v27  ;;  %v37_v34 = vmax.bf16 %v2457_v15, %v21_v28 }
   0x9   :  { %2330 = vmatprep.subr.bf16.mxu1 %v2428_v5  ;;  %v1942_v23 = vcombine.low %v276_v19, %v277_v20  ;;  %v22_v31 = vld [vmem:[%s3784_s0 + $0x10] sm:$0xf]  ;;  %v23_v32 = vld [vmem:[%s3784_s0 + $0x14] sm:$0xf]  ;;  %v278_v36 = vmax.bf16 %v2457_v15, %v1912_v29  ;;  %v279_v37 = vmax.bf16 %v2457_v15, %v1913_v30  ;;  %v2439_v39 = vld [vmem:[%s3783_s1 + $0x80] sm:$0xff]  }
   0xa   :  { %2310 = vmatprep.mubr.bf16.mxu0 %v1894_v21  ;;  %v1914_v35 = vld [vmem:[%s3784_s0 + $0x50] sm:$0xf]  ;;  %v1915_v38 = vld [vmem:[%s3784_s0 + $0x54] sm:$0xf]  ;;  %v2440_v40 = vld [vmem:[%s3783_s1 + $0xc0] sm:$0xff]   ;;  %v38_v41 = vmax.bf16 %v2457_v15, %v22_v31  ;;  %v39_v42 = vmax.bf16 %v2457_v15, %v23_v32  ;;  %v1895_v43 = vcombine.low %v36_v33, %v37_v34 }
   0xb   :  { %2299 = vmatpush3.bf16.msra.mxu0 %v2427_v4  ;;  %2342 = vmatprep.mubr.bf16.mxu1 %v1942_v23  ;;  %v2441_v44 = vld [vmem:[%s3783_s1 + $0x88] sm:$0xff]   ;;  %v280_v45 = vmax.bf16 %v2457_v15, %v1914_v35  ;;  %v281_v46 = vmax.bf16 %v2457_v15, %v1915_v38  ;;  %v24_v47 = vld [vmem:[%s3784_s0 + $0x18] sm:$0xf]  ;;  %v1943_v48 = vcombine.low %v278_v36, %v279_v37  ;;  %v25_v50 = vld [vmem:[%s3784_s0 + $0x1c] sm:$0xf] }
   0xc   :  { %2331 = vmatpush3.bf16.msra.mxu1 %v2428_v5  ;;  %2300 = vmatprep.subr.bf16.mxu0 %v2429_v6  ;;  %v2442_v49 = vld [vmem:[%s3783_s1 + $0xc8] sm:$0xff]   ;;  %v1916_v51 = vld [vmem:[%s3784_s0 + $0x58] sm:$0xf]  ;;  %v1917_v52 = vld [vmem:[%s3784_s0 + $0x5c] sm:$0xf]  ;;  %v1896_v54 = vcombine.low %v38_v41, %v39_v42  ;;  %v40_v57 = vmax.bf16 %v2457_v15, %v24_v47  ;;  %v41_v58 = vmax.bf16 %v2457_v15, %v25_v50 }
   0xd   :  { %2332 = vmatprep.subr.bf16.mxu1 %v2430_v7  ;;  %v26_v53 = vld [vmem:[%s3784_s0 + $0x20] sm:$0xf]  ;;  %v27_v55 = vld [vmem:[%s3784_s0 + $0x24] sm:$0xf]  ;;  %v1944_v56 = vcombine.low %v280_v45, %v281_v46  ;;  %v282_v60 = vmax.bf16 %v2457_v15, %v1916_v51  ;;  %v283_v61 = vmax.bf16 %v2457_v15, %v1917_v52  ;;  %v2443_v63 = vld [vmem:[%s3783_s1 + $0x90] sm:$0xff]  }
   0xe   :  { %v1918_v59 = vld [vmem:[%s3784_s0 + $0x60] sm:$0xf]  ;;  %v1919_v62 = vld [vmem:[%s3784_s0 + $0x64] sm:$0xf]  ;;  %v2444_v0 = vld [vmem:[%s3783_s1 + $0xd0] sm:$0xff]   ;;  %v42_v1 = vmax.bf16 %v2457_v15, %v26_v53  ;;  %v43_v2 = vmax.bf16 %v2457_v15, %v27_v55  ;;  %v1897_v3 = vcombine.low %v40_v57, %v41_v58 }
   0xf   :  { %2301 = vmatpush3.bf16.msra.mxu0 %v2429_v6  ;;  %v2445_v4 = vld [vmem:[%s3783_s1 + $0x98] sm:$0xff]   ;;  %v284_v5 = vmax.bf16 %v2457_v15, %v1918_v59  ;;  %v285_v6 = vmax.bf16 %v2457_v15, %v1919_v62  ;;  %v1921_v11 = vld [vmem:[%s3784_s0 + $0x6c] sm:$0xf]  ;;  %v30_v18 = vld [vmem:[%s3784_s0 + $0x30] sm:$0xf] }
  0x10   :  { %2333 = vmatpush3.bf16.msra.mxu1 %v2430_v7  ;;  %2302 = vmatprep.subr.bf16.mxu0 %v2431_v8  ;;  %v28_v7 = vld [vmem:[%s3784_s0 + $0x28] sm:$0xf]  ;;  %v2446_v12 = vld [vmem:[%s3783_s1 + $0xd8] sm:$0xff]   ;;  %v1898_v13 = vcombine.low %v42_v1, %v43_v2  ;;  %v31_v19 = vld [vmem:[%s3784_s0 + $0x34] sm:$0xf]  ;;  %v287_v21 = vmax.bf16 %v2457_v15, %v1921_v11 }
  0x11   :  { %2334 = vmatprep.subr.bf16.mxu1 %v2432_v9  ;;  %v44_v16 = vmax.bf16 %v2457_v15, %v28_v7  ;;  %v1923_v23 = vld [vmem:[%s3784_s0 + $0x74] sm:$0xf]  ;;  %v47_v27 = vmax.bf16 %v2457_v15, %v31_v19  ;;  %v32_v32 = vld [vmem:[%s3784_s0 + $0x38] sm:$0xf]  ;;  %v33_v33 = vld [vmem:[%s3784_s0 + $0x3c] sm:$0xf] }
  0x12   :  { %v289_v30 = vmax.bf16 %v2457_v15, %v1923_v23  ;;  %v2449_v34 = vld [vmem:[%s3783_s1 + $0xa8] sm:$0xff]   ;;  %v1924_v35 = vld [vmem:[%s3784_s0 + $0x78] sm:$0xf]  ;;  %v1925_v36 = vld [vmem:[%s3784_s0 + $0x7c] sm:$0xf]  ;;  %v49_v41 = vmax.bf16 %v2457_v15, %v33_v33 }
  0x13   :  { %2303 = vmatpush3.bf16.msra.mxu0 %v2431_v8  ;;  %v29_v8 = vld [vmem:[%s3784_s0 + $0x2c] sm:$0xf]  ;;  %v1958_v42 = vld [vmem:[%s3784_s0 + $0x80] sm:$0xf]  ;;  %v291_v45 = vmax.bf16 %v2457_v15, %v1925_v36  ;;  %v2451_v46 = vld [vmem:[%s3783_s1 + $0xb0] sm:$0xff]  }
  0x14   :  { %2335 = vmatpush3.bf16.msra.mxu1 %v2432_v9  ;;  %2304 = vmatprep.subr.bf16.mxu0 %v2433_v10  ;;  %v1945_v9 = vcombine.low %v282_v60, %v283_v61  ;;  %v45_v17 = vmax.bf16 %v2457_v15, %v29_v8  ;;  %v2450_v37 = vld [vmem:[%s3783_s1 + $0xe8] sm:$0xff]   ;;  %v2006_v47 = vld [vmem:[%s3784_s0 + $0xc0] sm:$0xf]  ;;  %v1973_v50 = vld [vmem:[%s3784_s0 + $0xbc] sm:$0xf]  ;;  %v519_v53 = vmax.bf16 %v2457_v15, %v1958_v42 }
  0x15   :  { %2336 = vmatprep.subr.bf16.mxu1 %v2434_v14  ;;  %v2020_v51 = vld [vmem:[%s3784_s0 + $0xf8] sm:$0xf]  ;;  %v2452_v52 = vld [vmem:[%s3783_s1 + $0xf0] sm:$0xff]   ;;  %v2021_v55 = vld [vmem:[%s3784_s0 + $0xfc] sm:$0xf]  ;;  %v762_v57 = vmax.bf16 %v2457_v15, %v2006_v47  ;;  %v2745_v1 = vmax.bf16 %v2457_v15, %v1973_v50 }
  0x16   :  { %v1899_v28 = vcombine.low %v44_v16, %v45_v17  ;;  %v1960_v59 = vld [vmem:[%s3784_s0 + $0x88] sm:$0xf]  ;;  %v2453_v61 = vld [vmem:[%s3783_s1 + $0xb8] sm:$0xff]   ;;  %v1961_v62 = vld [vmem:[%s3784_s0 + $0x8c] sm:$0xf]  ;;  %v2748_v2 = vmax.bf16 %v2457_v15, %v2020_v51 }
  0x17   :  { %2305 = vmatpush3.bf16.msra.mxu0 %v2433_v10  ;;  %v1920_v10 = vld [vmem:[%s3784_s0 + $0x68] sm:$0xf]  ;;  %v2454_v7 = vld [vmem:[%s3783_s1 + $0xf8] sm:$0xff]   ;;  %v2011_v11 = vld [vmem:[%s3784_s0 + $0xd4] sm:$0xf] }
  0x18   :  { %2337 = vmatpush3.bf16.msra.mxu1 %v2434_v14  ;;  %2306 = vmatprep.subr.bf16.mxu0 %v2435_v22  ;;  %v1946_v14 = vcombine.low %v284_v5, %v285_v6  ;;  %v286_v20 = vmax.bf16 %v2457_v15, %v1920_v10  ;;  %v1963_v5 = vld [vmem:[%s3784_s0 + $0x94] sm:$0xf]  ;;  %v2760_v6 = vmax.bf16 %v2457_v15, %v2021_v55  ;;  %v2010_v10 = vld [vmem:[%s3784_s0 + $0xd0] sm:$0xf]  ;;  %v2014_v33 = vld [vmem:[%s3784_s0 + $0xe0] sm:$0xf] }
  0x19   :  { %2338 = vmatprep.subr.bf16.mxu1 %v2436_v24  ;;  %v1969_v47 = vld [vmem:[%s3784_s0 + $0xac] sm:$0xf]  ;;  %v1970_v51 = vld [vmem:[%s3784_s0 + $0xb0] sm:$0xf] }
  0x1a   :  { %v1947_v31 = vcombine.low %v286_v20, %v287_v21  ;;  %v2045_v17 = vcombine.low %v2748_v2, %v2760_v6  ;;  %v524_v20 = vmax.bf16 %v2457_v15, %v1963_v5  ;;  %v766_v21 = vmax.bf16 %v2457_v15, %v2010_v10  ;;  %v2017_v50 = vld [vmem:[%s3784_s0 + $0xec] sm:$0xf] }
  0x1b   :  { %2307 = vmatpush3.bf16.msra.mxu0 %v2435_v22  ;;  %v1922_v22 = vld [vmem:[%s3784_s0 + $0x70] sm:$0xf] }
  0x1c   :  { %2339 = vmatpush3.bf16.msra.mxu1 %v2436_v24  ;;  %2308 = vmatprep.subr.bf16.mxu0 %v2437_v25  ;;  %v2447_v24 = vld [vmem:[%s3783_s1 + $0xa0] sm:$0xff]   ;;  %v288_v29 = vmax.bf16 %v2457_v15, %v1922_v22  ;;  %v767_v22 = vmax.bf16 %v2457_v15, %v2011_v11 }
  0x1d   :  { %2340 = vmatprep.subr.bf16.mxu1 %v2438_v26 }
  0x1f   :  { %2309 = vmatpush3.bf16.msra.mxu0 %v2437_v25  ;;  %v2448_v25 = vld [vmem:[%s3783_s1 + $0xe0] sm:$0xff]  }
  0x20   :  { %2341 = vmatpush3.bf16.msra.mxu1 %v2438_v26  ;;  %2358 = vmatprep.subr.bf16.mxu0 %v2439_v39  ;;  %v46_v26 = vmax.bf16 %v2457_v15, %v30_v18 }
  0x21   :  { %2390 = vmatprep.subr.bf16.mxu1 %v2440_v40 }
  0x22   :  { %2311 = vmatmul.mubr.bf16.vlgmr.msra.gmra.mrb[0].mxu0 %v1895_v43  ;;  %v1900_v38 = vcombine.low %v46_v26, %v47_v27  ;;  %v1959_v43 = vld [vmem:[%s3784_s0 + $0x84] sm:$0xf]  ;;  %v1964_v26 = vld [vmem:[%s3784_s0 + $0x98] sm:$0xf]  ;;  %v1965_v27 = vld [vmem:[%s3784_s0 + $0x9c] sm:$0xf] }
  0x23   :  { %2343 = vmatmul.mubr.bf16.vlgmr.msra.gmra.mrb[0].mxu1 %v1943_v48  ;;  %2359 = vmatpush3.bf16.msra.mxu0 %v2439_v39  ;;  %v1948_v39 = vcombine.low %v288_v29, %v289_v30  ;;  %v2007_v48 = vld [vmem:[%s3784_s0 + $0xc4] sm:$0xf]  ;;  %v2040_v29 = vcombine.low %v766_v21, %v767_v22  ;;  %v2013_v30 = vld [vmem:[%s3784_s0 + $0xdc] sm:$0xf]  ;;  %v526_v36 = vmax.bf16 %v2457_v15, %v1965_v27 }
  0x24   :  { %2391 = vmatpush3.bf16.msra.mxu1 %v2440_v40  ;;  %2360 = vmatprep.subr.bf16.mxu0 %v2441_v44  ;;  %v48_v40 = vmax.bf16 %v2457_v15, %v32_v32  ;;  %v763_v58 = vmax.bf16 %v2457_v15, %v2007_v48  ;;  %v1967_v32 = vld [vmem:[%s3784_s0 + $0xa4] sm:$0xf]  ;;  %v2016_v48 = vld [vmem:[%s3784_s0 + $0xe8] sm:$0xf] }
  0x25   :  { %2392 = vmatprep.subr.bf16.mxu1 %v2442_v49  ;;  %2314 = vmatprep.mubr.bf16.mxu0 %v1896_v54  ;;  %v520_v54 = vmax.bf16 %v2457_v15, %v1959_v43 }
  0x26   :  { %2346 = vmatprep.mubr.bf16.mxu1 %v1944_v56  ;;  %v1901_v56 = vcombine.low %v48_v40, %v49_v41  ;;  %v528_v40 = vmax.bf16 %v2457_v15, %v1967_v32  ;;  %v770_v41 = vmax.bf16 %v2457_v15, %v2014_v33 }
  0x27   :  { %2361 = vmatpush3.bf16.msra.mxu0 %v2441_v44  ;;  %v290_v44 = vmax.bf16 %v2457_v15, %v1924_v35  ;;  %v1990_v8 = vcombine.low %v519_v53, %v520_v54  ;;  %v525_v35 = vmax.bf16 %v2457_v15, %v1964_v26  ;;  %v2018_v53 = vld [vmem:[%s3784_s0 + $0xf0] sm:$0xf]  ;;  %v2019_v54 = vld [vmem:[%s3784_s0 + $0xf4] sm:$0xf] }
  0x28   :  { %2393 = vmatpush3.bf16.msra.mxu1 %v2442_v49  ;;  %2362 = vmatprep.subr.bf16.mxu0 %v2443_v63  ;;  %v1972_v49 = vld [vmem:[%s3784_s0 + $0xb8] sm:$0xf] }
  0x29   :  { %2394 = vmatprep.subr.bf16.mxu1 %v2444_v0  ;;  %v1949_v60 = vcombine.low %v290_v44, %v291_v45  ;;  %v1993_v43 = vcombine.low %v525_v35, %v526_v36 }
  0x2a   :  { %2315 = vmatmul.mubr.bf16.gmra.mrb[4].mxu0 %v1897_v3  ;;  %v2009_v3 = vld [vmem:[%s3784_s0 + $0xcc] sm:$0xf] }
  0x2b   :  { %2347 = vmatmul.mubr.bf16.gmra.mrb[4].mxu1 %v1945_v9  ;;  %2363 = vmatpush3.bf16.msra.mxu0 %v2443_v63  ;;  %v2008_v63 = vld [vmem:[%s3784_s0 + $0xc8] sm:$0xf]  ;;  %v521_v9 = vmax.bf16 %v2457_v15, %v1960_v59  ;;  %v765_v18 = vmax.bf16 %v2457_v15, %v2009_v3  ;;  %v531_v59 = vmax.bf16 %v2457_v15, %v1970_v51 }
  0x2c   :  { %2395 = vmatpush3.bf16.msra.mxu1 %v2444_v0  ;;  %2364 = vmatprep.subr.bf16.mxu0 %v2445_v4  ;;  %v2742_v0 = vmax.bf16 %v2457_v15, %v1972_v49  ;;  %v764_v16 = vmax.bf16 %v2457_v15, %v2008_v63 }
  0x2d   :  { %2396 = vmatprep.subr.bf16.mxu1 %v2446_v12  ;;  %2318 = vmatprep.mubr.bf16.mxu0 %v1898_v13  ;;  %v2038_v13 = vcombine.low %v762_v57, %v763_v58  ;;  %v772_v57 = vmax.bf16 %v2457_v15, %v2016_v48  ;;  %v773_v58 = vmax.bf16 %v2457_v15, %v2017_v50 }
  0x2e   :  { %2350 = vmatprep.mubr.bf16.mxu1 %v1946_v14  ;;  %v522_v14 = vmax.bf16 %v2457_v15, %v1961_v62  ;;  %v775_v62 = vmax.bf16 %v2457_v15, %v2019_v54 }
  0x2f   :  { %2365 = vmatpush3.bf16.msra.mxu0 %v2445_v4  ;;  %v1962_v4 = vld [vmem:[%s3784_s0 + $0x90] sm:$0xf]  ;;  %v2043_v3 = vcombine.low %v772_v57, %v773_v58 }
  0x30   :  { %2397 = vmatpush3.bf16.msra.mxu1 %v2446_v12  ;;  %2366 = vmatprep.subr.bf16.mxu0 %v2447_v24  ;;  %v1997_v12 = vcombine.low %v2742_v0, %v2745_v1  ;;  %v523_v19 = vmax.bf16 %v2457_v15, %v1962_v4  ;;  %v1991_v23 = vcombine.low %v521_v9, %v522_v14 }
  0x31   :  { %2398 = vmatprep.subr.bf16.mxu1 %v2448_v25 }
  0x32   :  { %2319 = vmatmul.mubr.bf16.gmra.mrb[8].mxu0 %v1899_v28  ;;  %v2012_v28 = vld [vmem:[%s3784_s0 + $0xd8] sm:$0xf] }
  0x33   :  { %2351 = vmatmul.mubr.bf16.gmra.mrb[8].mxu1 %v1947_v31  ;;  %2367 = vmatpush3.bf16.msra.mxu0 %v2447_v24  ;;  %v2039_v24 = vcombine.low %v764_v16, %v765_v18  ;;  %v1966_v31 = vld [vmem:[%s3784_s0 + $0xa0] sm:$0xf] }
  0x34   :  { %2399 = vmatpush3.bf16.msra.mxu1 %v2448_v25  ;;  %2368 = vmatprep.subr.bf16.mxu0 %v2449_v34  ;;  %v1992_v25 = vcombine.low %v523_v19, %v524_v20 }
  0x35   :  { %2400 = vmatprep.subr.bf16.mxu1 %v2450_v37  ;;  %2322 = vmatprep.mubr.bf16.mxu0 %v1900_v38  ;;  %v769_v38 = vmax.bf16 %v2457_v15, %v2013_v30 }
  0x36   :  { %2354 = vmatprep.mubr.bf16.mxu1 %v1948_v39  ;;  %v527_v39 = vmax.bf16 %v2457_v15, %v1966_v31 }
  0x37   :  { %2369 = vmatpush3.bf16.msra.mxu0 %v2449_v34  ;;  %v2015_v34 = vld [vmem:[%s3784_s0 + $0xe4] sm:$0xf] }
  0x38   :  { %2401 = vmatpush3.bf16.msra.mxu1 %v2450_v37  ;;  %2370 = vmatprep.subr.bf16.mxu0 %v2451_v46  ;;  %v768_v37 = vmax.bf16 %v2457_v15, %v2012_v28  ;;  %v771_v42 = vmax.bf16 %v2457_v15, %v2015_v34  ;;  %v1994_v45 = vcombine.low %v527_v39, %v528_v40 }
  0x39   :  { %2402 = vmatprep.subr.bf16.mxu1 %v2452_v52 }
  0x3a   :  { %2323 = vmatmul.mubr.bf16.gmra.mrb[12].mxu0 %v1901_v56  ;;  %v2041_v44 = vcombine.low %v768_v37, %v769_v38  ;;  %v2042_v49 = vcombine.low %v770_v41, %v771_v42  ;;  %v530_v56 = vmax.bf16 %v2457_v15, %v1969_v47 }
  0x3b   :  { %2355 = vmatmul.mubr.bf16.gmra.mrb[12].mxu1 %v1949_v60  ;;  %2371 = vmatpush3.bf16.msra.mxu0 %v2451_v46  ;;  %v1968_v46 = vld [vmem:[%s3784_s0 + $0xa8] sm:$0xf] }
  0x3c   :  { %2403 = vmatpush3.bf16.msra.mxu1 %v2452_v52  ;;  %2372 = vmatprep.subr.bf16.mxu0 %v2453_v61  ;;  %v1971_v52 = vld [vmem:[%s3784_s0 + $0xb4] sm:$0xf]  ;;  %v529_v55 = vmax.bf16 %v2457_v15, %v1968_v46 }
  0x3d   :  { %2404 = vmatprep.subr.bf16.mxu1 %v2454_v7  ;;  %2374 = vmatprep.mubr.bf16.mxu0 %v1990_v8  ;;  %v532_v60 = vmax.bf16 %v2457_v15, %v1971_v52 }
  0x3e   :  { %2406 = vmatprep.mubr.bf16.mxu1 %v2038_v13  ;;  %v1995_v63 = vcombine.low %v529_v55, %v530_v56 }
  0x3f   :  { %2373 = vmatpush3.bf16.msra.mxu0 %v2453_v61  ;;  %v774_v61 = vmax.bf16 %v2457_v15, %v2018_v53  ;;  %v1996_v4 = vcombine.low %v531_v59, %v532_v60 }
  0x40   :  { %2405 = vmatpush3.bf16.msra.mxu1 %v2454_v7 }
  0x41   :  { %v2044_v5 = vcombine.low %v774_v61, %v775_v62 }
  0x42   :  { %2375 = vmatmul.mubr.bf16.vlgmr.msra.gmra.mrb[16].mxu0 %v1991_v23 }
  0x43   :  { %2407 = vmatmul.mubr.bf16.vlgmr.msra.gmra.mrb[16].mxu1 %v2039_v24  ;;  %2378 = vmatprep.mubr.bf16.mxu0 %v1992_v25 }
  0x44   :  { %2410 = vmatprep.mubr.bf16.mxu1 %v2040_v29 }
  0x4a   :  { %2379 = vmatmul.mubr.bf16.gmra.mrb[20].mxu0 %v1993_v43 }
  0x4b   :  { %2411 = vmatmul.mubr.bf16.gmra.mrb[20].mxu1 %v2041_v44  ;;  %2382 = vmatprep.mubr.bf16.mxu0 %v1994_v45 }
  0x4c   :  { %2414 = vmatprep.mubr.bf16.mxu1 %v2042_v49 }
  0x52   :  { %2383 = vmatmul.mubr.bf16.gmra.mrb[24].mxu0 %v1995_v63 }
  0x53   :  { %2415 = vmatmul.mubr.bf16.gmra.mrb[24].mxu1 %v2043_v3  ;;  %2386 = vmatprep.mubr.bf16.mxu0 %v1996_v4 }
  0x54   :  { %2418 = vmatprep.mubr.bf16.mxu1 %v2044_v5 }
  0x5a   :  { %2387 = vmatmul.mubr.bf16.gmra.mrb[28].mxu0 %v1997_v12 }
  0x5b   :  { %2419 = vmatmul.mubr.bf16.gmra.mrb[28].mxu1 %v2045_v17 }
  0xf5   :  { %v2853_v7 = vpop.f32.mrb[0].mxu0 }
  0xf6   :  { %v2855_v15 = vpop.f32.mrb[0].mxu1  ;;  %v2857_v8 = vpop.f32.mrb[1].mxu0  ;;  %v992_v16 = vsel %vm988_vm0, %v2853_v7, 0.0 }
  0xf7   :  { %3845 = vst [vmem:[#allocation2_spill] sm:$0xff] %v2855_v15  ;;  %v2859_v9 = vpop.f32.mrb[1].mxu1  ;;  %v2861_v10 = vpop.f32.mrb[2].mxu0  ;;  %v989_v2 = vsel %vm988_vm0, %v2857_v8, 0.0  ;;  %v1029_v18 = vsel %vm988_vm0, %v2855_v15, 0.0 }
  0xf8   :  { %3846 = vst [vmem:[#allocation3_spill] sm:$0xff] %v2859_v9  ;;  %v1026_v11 = vsel %vm988_vm0, %v2859_v9, 0.0  ;;  %v2865_v0 = vpop.f32.mrb[2].mxu1  ;;  %v2867_v1 = vpop.f32.mrb[3].mxu0  ;;  %v994_v20 = vsel %vm988_vm0, %v2861_v10, 0.0 }
  0xf9   :  { %v990_v6 = vsel %vm988_vm0, %v2867_v1, 0.0  ;;  %v2873_v12 = vpop.f32.mrb[3].mxu1  ;;  %v1031_v23 = vsel %vm988_vm0, %v2865_v0, 0.0 }
  0xfa   :  { %3847 = vst [vmem:[#allocation4_spill] sm:$0xff] %v2873_v12  ;;  %v991_v13 = vadd.f32 %v990_v6, %v989_v2  ;;  %v1027_v14 = vsel %vm988_vm0, %v2873_v12, 0.0 }
  0xfb   :  { %v1028_v17 = vadd.f32 %v1027_v14, %v1026_v11 }
  0xfc   :  { %v993_v19 = vadd.f32 %v992_v16, %v991_v13 }
  0xfd   :  { %v1030_v21 = vadd.f32 %v1029_v18, %v1028_v17  ;;  %v2883_v22 = vpop.f32.mrb[4].mxu0 }
  0xfe   :  { %v2887_v24 = vpop.f32.mrb[4].mxu1  ;;  %v2889_v25 = vpop.f32.mrb[5].mxu0  ;;  %v995_v26 = vadd.f32 %v994_v20, %v993_v19  ;;  %v1000_v40 = vsel %vm988_vm0, %v2883_v22, 0.0 }
  0xff   :  { %v996_v27 = vsel %vm988_vm0, %v2889_v25, 0.0  ;;  %v2893_v28 = vpop.f32.mrb[5].mxu1  ;;  %v1032_v29 = vadd.f32 %v1031_v23, %v1030_v21  ;;  %v2895_v30 = vpop.f32.mrb[6].mxu0  ;;  %v1037_v42 = vsel %vm988_vm0, %v2887_v24, 0.0 }
 0x100   :  { %v997_v31 = vadd.f32 %v996_v27, %v995_v26  ;;  %v1033_v32 = vsel %vm988_vm0, %v2893_v28, 0.0  ;;  %v2899_v33 = vpop.f32.mrb[6].mxu1  ;;  %v2901_v34 = vpop.f32.mrb[7].mxu0  ;;  %v1002_v44 = vsel %vm988_vm0, %v2895_v30, 0.0 }
 0x101   :  { %v1034_v35 = vadd.f32 %v1033_v32, %v1032_v29  ;;  %v998_v36 = vsel %vm988_vm0, %v2901_v34, 0.0  ;;  %v2905_v37 = vpop.f32.mrb[7].mxu1  ;;  %v1039_v47 = vsel %vm988_vm0, %v2899_v33, 0.0 }
 0x102   :  { %v999_v38 = vadd.f32 %v998_v36, %v997_v31  ;;  %v1035_v39 = vsel %vm988_vm0, %v2905_v37, 0.0 }
 0x103   :  { %v1036_v41 = vadd.f32 %v1035_v39, %v1034_v35 }
 0x104   :  { %v1001_v43 = vadd.f32 %v1000_v40, %v999_v38 }
 0x105   :  { %v1038_v45 = vadd.f32 %v1037_v42, %v1036_v41  ;;  %v2915_v46 = vpop.f32.mrb[8].mxu0 }
 0x106   :  { %v2919_v48 = vpop.f32.mrb[8].mxu1  ;;  %v2921_v49 = vpop.f32.mrb[9].mxu0  ;;  %v1003_v50 = vadd.f32 %v1002_v44, %v1001_v43  ;;  %v1008_v3 = vsel %vm988_vm0, %v2915_v46, 0.0 }
 0x107   :  { %v1004_v51 = vsel %vm988_vm0, %v2921_v49, 0.0  ;;  %v2925_v52 = vpop.f32.mrb[9].mxu1  ;;  %v1040_v53 = vadd.f32 %v1039_v47, %v1038_v45  ;;  %v2927_v54 = vpop.f32.mrb[10].mxu0  ;;  %v1045_v5 = vsel %vm988_vm0, %v2919_v48, 0.0 }
 0x108   :  { %3848 = vst [vmem:[#allocation5_spill] sm:$0xff] %v2927_v54  ;;  %v1005_v55 = vadd.f32 %v1004_v51, %v1003_v50  ;;  %v1041_v56 = vsel %vm988_vm0, %v2925_v52, 0.0  ;;  %v2931_v57 = vpop.f32.mrb[10].mxu1  ;;  %v2933_v58 = vpop.f32.mrb[11].mxu0  ;;  %v1010_v2 = vsel %vm988_vm0, %v2927_v54, 0.0 }
 0x109   :  { %v1042_v59 = vadd.f32 %v1041_v56, %v1040_v53  ;;  %v1006_v60 = vsel %vm988_vm0, %v2933_v58, 0.0  ;;  %v2937_v61 = vpop.f32.mrb[11].mxu1  ;;  %v1047_v14 = vsel %vm988_vm0, %v2931_v57, 0.0 }
 0x10a   :  { %v1007_v62 = vadd.f32 %v1006_v60, %v1005_v55  ;;  %v1043_v63 = vsel %vm988_vm0, %v2937_v61, 0.0 }
 0x10b   :  { %v1044_v4 = vadd.f32 %v1043_v63, %v1042_v59 }
 0x10c   :  { %v1009_v11 = vadd.f32 %v1008_v3, %v1007_v62 }
 0x10d   :  { %v1046_v6 = vadd.f32 %v1045_v5, %v1044_v4  ;;  %v2947_v13 = vpop.f32.mrb[12].mxu0 }
 0x10e   :  { %3849 = vst [vmem:[#allocation6_spill] sm:$0xff] %v2947_v13  ;;  %v2951_v16 = vpop.f32.mrb[12].mxu1  ;;  %v2953_v17 = vpop.f32.mrb[13].mxu0  ;;  %v1011_v18 = vadd.f32 %v1010_v2, %v1009_v11  ;;  %v1016_v40 = vsel %vm988_vm0, %v2947_v13, 0.0 }
 0x10f   :  { %3850 = vst [vmem:[#allocation7_spill] sm:$0xff] %v2953_v17  ;;  %v1012_v19 = vsel %vm988_vm0, %v2953_v17, 0.0  ;;  %v2957_v20 = vpop.f32.mrb[13].mxu1  ;;  %v1048_v21 = vadd.f32 %v1047_v14, %v1046_v6  ;;  %v2959_v23 = vpop.f32.mrb[14].mxu0  ;;  %v1053_v42 = vsel %vm988_vm0, %v2951_v16, 0.0 }
 0x110   :  { %3851 = vst [vmem:[#allocation8_spill] sm:$0xff] %v2959_v23  ;;  %v1013_v26 = vadd.f32 %v1012_v19, %v1011_v18  ;;  %v1049_v27 = vsel %vm988_vm0, %v2957_v20, 0.0  ;;  %v2963_v29 = vpop.f32.mrb[14].mxu1  ;;  %v2965_v31 = vpop.f32.mrb[15].mxu0  ;;  %v1018_v44 = vsel %vm988_vm0, %v2959_v23, 0.0 }
 0x111   :  { %3852 = vst [vmem:[#allocation9_spill] sm:$0xff] %v2965_v31  ;;  %v1050_v32 = vadd.f32 %v1049_v27, %v1048_v21  ;;  %v1014_v35 = vsel %vm988_vm0, %v2965_v31, 0.0  ;;  %v2969_v36 = vpop.f32.mrb[15].mxu1  ;;  %v1055_v50 = vsel %vm988_vm0, %v2963_v29, 0.0 }
 0x112   :  { %v1015_v38 = vadd.f32 %v1014_v35, %v1013_v26  ;;  %v1051_v39 = vsel %vm988_vm0, %v2969_v36, 0.0 }
 0x113   :  { %v1052_v41 = vadd.f32 %v1051_v39, %v1050_v32 }
 0x114   :  { %v1017_v43 = vadd.f32 %v1016_v40, %v1015_v38 }
 0x115   :  { %v1054_v45 = vadd.f32 %v1053_v42, %v1052_v41  ;;  %v2979_v47 = vpop.f32.mrb[16].mxu0 }
 0x116   :  { %3853 = vst [vmem:[#allocation10_spill] sm:$0xff] %v2979_v47  ;;  %v1019_v51 = vadd.f32 %v1018_v44, %v1017_v43  ;;  %v2983_v53 = vpop.f32.mrb[16].mxu1  ;;  %v2985_v55 = vpop.f32.mrb[17].mxu0  ;;  %v1067_v26 = vsel %vm988_vm0, %v2979_v47, 0.0 }
 0x117   :  { %3854 = vst [vmem:[#allocation11_spill] sm:$0xff] %v2983_v53  ;;  %v1056_v56 = vadd.f32 %v1055_v50, %v1054_v45  ;;  %v2987_v59 = vpop.f32.mrb[17].mxu1  ;;  %v2989_v60 = vpop.f32.mrb[18].mxu0  ;;  %v1064_v11 = vsel %vm988_vm0, %v2985_v55, 0.0  ;;  %v1105_v35 = vsel %vm988_vm0, %v2983_v53, 0.0 }
 0x118   :  { %3855 = vst [vmem:[#allocation12_spill] sm:$0xff] %v2987_v59  ;;  %v1020_v62 = vrot.slane %v1019_v51, 4  ;;  %v1102_v63 = vsel %vm988_vm0, %v2987_v59, 0.0  ;;  %v2993_v3 = vpop.f32.mrb[18].mxu1  ;;  %v2995_v4 = vpop.f32.mrb[19].mxu0  ;;  %v1069_v40 = vsel %vm988_vm0, %v2989_v60, 0.0 }
 0x119   :  { %3856 = vst [vmem:[#allocation13_spill] sm:$0xff] %v2993_v3  ;;  %3857 = vst [vmem:[#allocation14_spill] sm:$0xff] %v2995_v4  ;;  %v1057_v5 = vrot.slane %v1056_v56, 4  ;;  %v1065_v2 = vsel %vm988_vm0, %v2995_v4, 0.0  ;;  %v3001_v6 = vpop.f32.mrb[19].mxu1  ;;  %v1107_v44 = vsel %vm988_vm0, %v2993_v3, 0.0 }
 0x11a   :  { %3858 = vst [vmem:[#allocation15_spill] sm:$0xff] %v3001_v6  ;;  %v1021_v14 = vadd.f32 %v1020_v62, %v1019_v51  ;;  %v1066_v18 = vadd.f32 %v1065_v2, %v1064_v11  ;;  %v1103_v19 = vsel %vm988_vm0, %v3001_v6, 0.0 }
 0x11b   :  { %v1058_v21 = vadd.f32 %v1057_v5, %v1056_v56  ;;  %v1104_v27 = vadd.f32 %v1103_v19, %v1102_v63 }
 0x11c   :  { %v1022_v32 = vrot.slane %v1021_v14, 2  ;;  %v1068_v38 = vadd.f32 %v1067_v26, %v1066_v18 }
 0x11d   :  { %v1059_v39 = vrot.slane %v1058_v21, 2  ;;  %v1106_v41 = vadd.f32 %v1105_v35, %v1104_v27  ;;  %v3011_v42 = vpop.f32.mrb[20].mxu0 }
 0x11e   :  { %v1023_v43 = vadd.f32 %v1022_v32, %v1021_v14  ;;  %v3015_v45 = vpop.f32.mrb[20].mxu1  ;;  %v3017_v50 = vpop.f32.mrb[21].mxu0  ;;  %v1070_v51 = vadd.f32 %v1069_v40, %v1068_v38 }
 0x11f   :  { %3859 = vst [vmem:[#allocation16_spill] sm:$0xff] %v3015_v45  ;;  %v1060_v56 = vadd.f32 %v1059_v39, %v1058_v21  ;;  %v1071_v62 = vsel %vm988_vm0, %v3017_v50, 0.0  ;;  %v3021_v63 = vpop.f32.mrb[21].mxu1  ;;  %v1108_v5 = vadd.f32 %v1107_v44, %v1106_v41  ;;  %v3023_v11 = vpop.f32.mrb[22].mxu0  ;;  %v1075_v44 = vsel %vm988_vm0, %v3011_v42, 0.0 }
 0x120   :  { %3860 = vst [vmem:[#allocation17_spill] sm:$0xff] %v3021_v63  ;;  %3861 = vst [vmem:[#allocation18_spill] sm:$0xff] %v3023_v11  ;;  %v1024_v2 = vrot.slane %v1023_v43, 1  ;;  %v1072_v18 = vadd.f32 %v1071_v62, %v1070_v51  ;;  %v1109_v14 = vsel %vm988_vm0, %v3021_v63, 0.0  ;;  %v3027_v19 = vpop.f32.mrb[22].mxu1  ;;  %v3029_v26 = vpop.f32.mrb[23].mxu0 }
 0x121   :  { %3862 = vst [vmem:[#allocation19_spill] sm:$0xff] %v3027_v19  ;;  %v1061_v27 = vrot.slane %v1060_v56, 1  ;;  %v1110_v32 = vadd.f32 %v1109_v14, %v1108_v5  ;;  %v1073_v21 = vsel %vm988_vm0, %v3029_v26, 0.0  ;;  %v3033_v35 = vpop.f32.mrb[23].mxu1  ;;  %v1113_v62 = vsel %vm988_vm0, %v3015_v45, 0.0 }
 0x122   :  { %3863 = vst [vmem:[#allocation20_spill] sm:$0xff] %v3033_v35  ;;  %v1025_v38 = vadd.f32 %v1024_v2, %v1023_v43  ;;  %v1074_v39 = vadd.f32 %v1073_v21, %v1072_v18  ;;  %v1111_v40 = vsel %vm988_vm0, %v3033_v35, 0.0  ;;  %v1077_v14 = vsel %vm988_vm0, %v3023_v11, 0.0 }
 0x123   :  { %v1062_v41 = vadd.f32 %v1061_v27, %v1060_v56  ;;  %v1112_v51 = vadd.f32 %v1111_v40, %v1110_v32  ;;  %v1115_v2 = vsel %vm988_vm0, %v3027_v19, 0.0 }
 0x124   :  { %v1076_v63 = vadd.f32 %v1075_v44, %v1074_v39 }
 0x125   :  { %v3041_v5 = vadd.f32 %v1062_v41, %v1025_v38  ;;  %v1114_v3 = vadd.f32 %v1113_v62, %v1112_v51  ;;  %v3045_v43 = vpop.f32.mrb[24].mxu0 }
 0x126   :  { %3864 = vst [vmem:[#allocation21_spill] sm:$0xff] %v3045_v43  ;;  %v3049_v56 = vpop.f32.mrb[24].mxu1  ;;  %v3051_v18 = vpop.f32.mrb[25].mxu0  ;;  %v1078_v27 = vadd.f32 %v1077_v14, %v1076_v63 }
 0x127   :  { %3865 = vst [vmem:[#allocation22_spill] sm:$0xff] %v3049_v56  ;;  %3866 = vst [vmem:[#allocation23_spill] sm:$0xff] %v3051_v18  ;;  %v1079_v32 = vsel %vm988_vm0, %v3051_v18, 0.0  ;;  %v3055_v21 = vpop.f32.mrb[25].mxu1  ;;  %v1116_v38 = vadd.f32 %v1115_v2, %v1114_v3  ;;  %v3057_v39 = vpop.f32.mrb[26].mxu0  ;;  %v1083_v2 = vsel %vm988_vm0, %v3045_v43, 0.0 }
 0x128   :  { %3867 = vst [vmem:[#allocation24_spill] sm:$0xff] %v3055_v21  ;;  %3868 = vst [vmem:[#allocation25_spill] sm:$0xff] %v3057_v39  ;;  %v1080_v40 = vadd.f32 %v1079_v32, %v1078_v27  ;;  %v1117_v41 = vsel %vm988_vm0, %v3055_v21, 0.0  ;;  %v3061_v44 = vpop.f32.mrb[26].mxu1  ;;  %v3063_v51 = vpop.f32.mrb[27].mxu0  ;;  %v1121_v32 = vsel %vm988_vm0, %v3049_v56, 0.0 }
 0x129   :  { %3869 = vst [vmem:[#allocation26_spill] sm:$0xff] %v3061_v44  ;;  %3870 = vst [vmem:[#allocation27_spill] sm:$0xff] %v3063_v51  ;;  %v1118_v62 = vadd.f32 %v1117_v41, %v1116_v38  ;;  %v1081_v63 = vsel %vm988_vm0, %v3063_v51, 0.0  ;;  %v3067_v14 = vpop.f32.mrb[27].mxu1  ;;  %v1085_v38 = vsel %vm988_vm0, %v3057_v39, 0.0 }
 0x12a   :  { %3871 = vst [vmem:[#allocation28_spill] sm:$0xff] %v3067_v14  ;;  %v1082_v19 = vadd.f32 %v1081_v63, %v1080_v40  ;;  %v1119_v3 = vsel %vm988_vm0, %v3067_v14, 0.0  ;;  %v1123_v40 = vsel %vm988_vm0, %v3061_v44, 0.0 }
 0x12b   :  { %v1120_v27 = vadd.f32 %v1119_v3, %v1118_v62 }
 0x12c   :  { %v1084_v21 = vadd.f32 %v1083_v2, %v1082_v19 }
 0x12d   :  { %v1122_v41 = vadd.f32 %v1121_v32, %v1120_v27  ;;  %v3077_v45 = vpop.f32.mrb[28].mxu0 }
 0x12e   :  { %3872 = vst [vmem:[#allocation29_spill] sm:$0xff] %v3077_v45  ;;  %v3081_v63 = vpop.f32.mrb[28].mxu1  ;;  %v3083_v14 = vpop.f32.mrb[29].mxu0  ;;  %v1086_v35 = vadd.f32 %v1085_v38, %v1084_v21 }
 0x12f   :  { %3873 = vst [vmem:[#allocation30_spill] sm:$0xff] %v3081_v63  ;;  %3874 = vst [vmem:[#allocation31_spill] sm:$0xff] %v3083_v14  ;;  %v1087_v62 = vsel %vm988_vm0, %v3083_v14, 0.0  ;;  %v3087_v3 = vpop.f32.mrb[29].mxu1  ;;  %v1124_v19 = vadd.f32 %v1123_v40, %v1122_v41  ;;  %v3089_v2 = vpop.f32.mrb[30].mxu0 }
 0x130   :  { %3875 = vst [vmem:[#allocation32_spill] sm:$0xff] %v3087_v3  ;;  %3876 = vst [vmem:[#allocation33_spill] sm:$0xff] %v3089_v2  ;;  %v1088_v56 = vadd.f32 %v1087_v62, %v1086_v35  ;;  %v1125_v27 = vsel %vm988_vm0, %v3087_v3, 0.0  ;;  %v3093_v32 = vpop.f32.mrb[30].mxu1  ;;  %v3095_v44 = vpop.f32.mrb[31].mxu0  ;;  %v1091_v35 = vsel %vm988_vm0, %v3077_v45, 0.0 }
 0x131   :  { %3877 = vst [vmem:[#allocation34_spill] sm:$0xff] %v3093_v32  ;;  %3878 = vst [vmem:[#allocation35_spill] sm:$0xff] %v3095_v44  ;;  %v1126_v53 = vadd.f32 %v1125_v27, %v1124_v19  ;;  %v1089_v21 = vsel %vm988_vm0, %v3095_v44, 0.0  ;;  %v3099_v38 = vpop.f32.mrb[31].mxu1  ;;  %v1129_v62 = vsel %vm988_vm0, %v3081_v63, 0.0  ;;  %v1093_v19 = vsel %vm988_vm0, %v3089_v2, 0.0 }
 0x132   :  { %3879 = vst [vmem:[#allocation36_spill] sm:$0xff] %v3099_v38  ;;  %v1090_v6 = vadd.f32 %v1089_v21, %v1088_v56  ;;  %v1127_v41 = vsel %vm988_vm0, %v3099_v38, 0.0  ;;  %v1131_v44 = vsel %vm988_vm0, %v3093_v32, 0.0 }
 0x133   :  { %v1128_v40 = vadd.f32 %v1127_v41, %v1126_v53 }
 0x134   :  { %v1092_v3 = vadd.f32 %v1091_v35, %v1090_v6 }
 0x135   :  { %v1130_v27 = vadd.f32 %v1129_v62, %v1128_v40 }
 0x136   :  { %v1094_v59 = vadd.f32 %v1093_v19, %v1092_v3 }
 0x137   :  { %v1132_v56 = vadd.f32 %v1131_v44, %v1130_v27 }
 0x138   :  { %v1095_v21 = vrot.slane %v1094_v59, 4 }
 0x139   :  { %v1133_v14 = vrot.slane %v1132_v56, 4 }
 0x13a   :  { %v1096_v38 = vadd.f32 %v1095_v21, %v1094_v59 }
 0x13b   :  { %v1134_v39 = vadd.f32 %v1133_v14, %v1132_v56 }
 0x13c   :  { %v1097_v43 = vrot.slane %v1096_v38, 2 }
 0x13d   :  { %v1135_v45 = vrot.slane %v1134_v39, 2 }
 0x13e   :  { %v1098_v53 = vadd.f32 %v1097_v43, %v1096_v38 }
 0x13f   :  { %v1136_v41 = vadd.f32 %v1135_v45, %v1134_v39 }
 0x140   :  { %v1099_v51 = vrot.slane %v1098_v53, 1 }
 0x141   :  { %v1137_v63 = vrot.slane %v1136_v41, 1 }
 0x142   :  { %v1100_v6 = vadd.f32 %v1099_v51, %v1098_v53 }
 0x143   :  { %v1138_v2 = vadd.f32 %v1137_v63, %v1136_v41 }
 0x144   :  { %v1101_v35 = vadd.f32 %v1100_v6, %v3041_v5 }
 0x146   :  { %v1139_v40 = vadd.f32 %v1138_v2, %v1101_v35 }
 0x148   :  { %v3112_v62 = vmul.f32 0.001953125, %v1139_v40 }
 0x14a   :  { %v1141_v44 = vsub.f32 %v2857_v8, %v3112_v62  ;;  %v1142_v59 = vsub.f32 %v2867_v1, %v3112_v62  ;;  %v1143_v14 = vsub.f32 %v2853_v7, %v3112_v62  ;;  %v1144_v45 = vsub.f32 %v2861_v10, %v3112_v62 }
 0x14b   :  { %v1145_v5 = vsub.f32 %v2889_v25, %v3112_v62  ;;  %v1146_v63 = vsub.f32 %v2901_v34, %v3112_v62  ;;  %v1147_v27 = vsub.f32 %v2883_v22, %v3112_v62  ;;  %v1148_v41 = vsub.f32 %v2895_v30, %v3112_v62 }
 0x14c   :  { %v1157_v43 = vmul.f32 %v1141_v44, %v1141_v44  ;;  %v1158_v39 = vmul.f32 %v1142_v59, %v1142_v59  ;;  %v1159_v51 = vmul.f32 %v1143_v14, %v1143_v14  ;;  %v1160_v3 = vmul.f32 %v1144_v45, %v1144_v45 }
 0x14d   :  { %v1161_v56 = vmul.f32 %v1145_v5, %v1145_v5  ;;  %v1162_v6 = vmul.f32 %v1146_v63, %v1146_v63  ;;  %v1149_v40 = vsub.f32 %v2921_v49, %v3112_v62  ;;  %v1210_v59 = vsub.f32 %v2859_v9, %v3112_v62 }
 0x14e   :  { %v1173_v2 = vsel %vm988_vm0, %v1157_v43, 0.0  ;;  %v1174_v38 = vsel %vm988_vm0, %v1158_v39, 0.0  ;;  %v1176_v21 = vsel %vm988_vm0, %v1159_v51, 0.0  ;;  %v1178_v35 = vsel %vm988_vm0, %v1160_v3, 0.0 }
 0x14f   :  { %v1175_v19 = vadd.f32 %v1174_v38, %v1173_v2  ;;  %v1150_v14 = vsub.f32 %v2933_v58, %v3112_v62  ;;  %v1163_v45 = vmul.f32 %v1147_v27, %v1147_v27  ;;  %v1180_v43 = vsel %vm988_vm0, %v1161_v56, 0.0 }
 0x150   :  { %v1211_v39 = vsub.f32 %v2873_v12, %v3112_v62  ;;  %v1151_v5 = vsub.f32 %v2915_v46, %v3112_v62  ;;  %v1152_v51 = vsub.f32 %v2927_v54, %v3112_v62  ;;  %v1153_v63 = vsub.f32 %v2953_v17, %v3112_v62 }
 0x151   :  { %v1177_v53 = vadd.f32 %v1176_v21, %v1175_v19  ;;  %v1154_v2 = vsub.f32 %v2965_v31, %v3112_v62  ;;  %v1164_v38 = vmul.f32 %v1148_v41, %v1148_v41  ;;  %v1182_v19 = vsel %vm988_vm0, %v1162_v6, 0.0 }
 0x152   :  { %v1212_v27 = vsub.f32 %v2855_v15, %v3112_v62  ;;  %v1155_v56 = vsub.f32 %v2947_v13, %v3112_v62  ;;  %v1156_v21 = vsub.f32 %v2959_v23, %v3112_v62  ;;  %v1165_v12 = vmul.f32 %v1149_v40, %v1149_v40 }
 0x153   :  { %v1179_v44 = vadd.f32 %v1178_v35, %v1177_v53  ;;  %v1226_v35 = vmul.f32 %v1210_v59, %v1210_v59  ;;  %v1227_v41 = vmul.f32 %v1211_v39, %v1211_v39  ;;  %v1166_v9 = vmul.f32 %v1150_v14, %v1150_v14 }
 0x154   :  { %v1167_v6 = vmul.f32 %v1151_v5, %v1151_v5  ;;  %v1168_v31 = vmul.f32 %v1152_v51, %v1152_v51  ;;  %v1169_v15 = vmul.f32 %v1153_v63, %v1153_v63  ;;  %v1186_v54 = vsel %vm988_vm0, %v1164_v38, 0.0 }
 0x155   :  { %v1181_v3 = vadd.f32 %v1180_v43, %v1179_v44  ;;  %v1184_v44 = vsel %vm988_vm0, %v1163_v45, 0.0  ;;  %v1213_v43 = vsub.f32 %v2865_v0, %v3112_v62  ;;  %v1214_v13 = vsub.f32 %v2893_v28, %v3112_v62 }
 0x156   :  { %v1228_v23 = vmul.f32 %v1212_v27, %v1212_v27  ;;  %v1171_v59 = vmul.f32 %v1155_v56, %v1155_v56  ;;  %v1242_v45 = vsel %vm988_vm0, %v1226_v35, 0.0  ;;  %v1215_v14 = vsub.f32 %v2905_v37, %v3112_v62 }
 0x157   :  { %v1183_v53 = vadd.f32 %v1182_v19, %v1181_v3  ;;  %v1170_v3 = vmul.f32 %v1154_v2, %v1154_v2  ;;  %v1188_v19 = vsel %vm988_vm0, %v1165_v12, 0.0  ;;  %v1229_v39 = vmul.f32 %v1213_v43, %v1213_v43 }
 0x158   :  { %v1243_v5 = vsel %vm988_vm0, %v1227_v41, 0.0  ;;  %v1172_v51 = vmul.f32 %v1156_v21, %v1156_v21  ;;  %v1190_v38 = vsel %vm988_vm0, %v1166_v9, 0.0  ;;  %v1192_v27 = vsel %vm988_vm0, %v1167_v6, 0.0 }
 0x159   :  { %v1185_v17 = vadd.f32 %v1184_v44, %v1183_v53  ;;  %v1244_v53 = vadd.f32 %v1243_v5, %v1242_v45  ;;  %v1245_v2 = vsel %vm988_vm0, %v1228_v23, 0.0  ;;  %v1194_v56 = vsel %vm988_vm0, %v1168_v31, 0.0 }
 0x15a   :  { %v1196_v35 = vsel %vm988_vm0, %v1169_v15, 0.0  ;;  %v1198_v21 = vsel %vm988_vm0, %v1170_v3, 0.0  ;;  %v1217_v9 = vsub.f32 %v2899_v33, %v3112_v62  ;;  %v1231_v43 = vmul.f32 %v1215_v14, %v1215_v14 }
 0x15b   :  { %v1187_v40 = vadd.f32 %v1186_v54, %v1185_v17  ;;  %v1216_v54 = vsub.f32 %v2887_v24, %v3112_v62  ;;  %v1230_v17 = vmul.f32 %v1214_v13, %v1214_v13  ;;  %v1246_v44 = vadd.f32 %v1245_v2, %v1244_v53 }
 0x15c   :  { %v1247_v41 = vsel %vm988_vm0, %v1229_v39, 0.0  ;;  %v1202_v13 = vsel %vm988_vm0, %v1172_v51, 0.0  ;;  %v1218_v31 = vsub.f32 %v2925_v52, %v3112_v62  ;;  %v1219_v15 = vsub.f32 %v2937_v61, %v3112_v62 }
 0x15d   :  { %v1189_v63 = vadd.f32 %v1188_v19, %v1187_v40  ;;  %v1200_v40 = vsel %vm988_vm0, %v1171_v59, 0.0  ;;  %v1248_v23 = vadd.f32 %v1247_v41, %v1246_v44  ;;  %v1232_v45 = vmul.f32 %v1216_v54, %v1216_v54 }
 0x15e   :  { %v1249_v3 = vsel %vm988_vm0, %v1230_v17, 0.0  ;;  %v1220_v14 = vsub.f32 %v2919_v48, %v3112_v62  ;;  %v1280_v59 = vsub.f32 %v2985_v55, %v3112_v62  ;;  %v1221_v5 = vsub.f32 %v2931_v57, %v3112_v62 }
 0x15f   :  { %v1191_v12 = vadd.f32 %v1190_v38, %v1189_v63  ;;  %v1250_v39 = vadd.f32 %v1249_v3, %v1248_v23  ;;  %v1233_v51 = vmul.f32 %v1217_v9, %v1217_v9  ;;  %v1251_v63 = vsel %vm988_vm0, %v1231_v43, 0.0 }
 0x160   :  { %v1281_v38 = vsub.f32 %v2995_v4, %v3112_v62  ;;  %v1223_v54 = vsub.f32 %v2969_v36, %v3112_v62  ;;  %v1224_v2 = vsub.f32 %v2951_v16, %v3112_v62  ;;  %v1282_v44 = vsub.f32 %v2979_v47, %v3112_v62 }
 0x161   :  { %v1193_v6 = vadd.f32 %v1192_v27, %v1191_v12  ;;  %v1222_v27 = vsub.f32 %v2957_v20, %v3112_v62  ;;  %v1252_v17 = vadd.f32 %v1251_v63, %v1250_v39  ;;  %v1234_v12 = vmul.f32 %v1218_v31, %v1218_v31 }
 0x162   :  { %v1296_v41 = vmul.f32 %v1280_v59, %v1280_v59  ;;  %v1255_v23 = vsel %vm988_vm0, %v1233_v51, 0.0  ;;  %v1283_v3 = vsub.f32 %v2989_v60, %v3112_v62  ;;  %v1236_v31 = vmul.f32 %v1220_v14, %v1220_v14 }
 0x163   :  { %v1195_v19 = vadd.f32 %v1194_v56, %v1193_v6  ;;  %v1253_v56 = vsel %vm988_vm0, %v1232_v45, 0.0  ;;  %v1235_v6 = vmul.f32 %v1219_v15, %v1219_v15  ;;  %v1237_v63 = vmul.f32 %v1221_v5, %v1221_v5 }
 0x164   :  { %v1254_v43 = vadd.f32 %v1253_v56, %v1252_v17  ;;  %v1238_v4 = vmul.f32 %v1222_v27, %v1222_v27  ;;  %v1257_v47 = vsel %vm988_vm0, %v1234_v12, 0.0  ;;  %v1239_v59 = vmul.f32 %v1223_v54, %v1223_v54 }
 0x165   :  { %v1197_v53 = vadd.f32 %v1196_v35, %v1195_v19  ;;  %v1225_v35 = vsub.f32 %v2963_v29, %v3112_v62  ;;  %v1297_v19 = vmul.f32 %v1281_v38, %v1281_v38  ;;  %v1312_v51 = vsel %vm988_vm0, %v1296_v41, 0.0 }
 0x166   :  { %v1256_v45 = vadd.f32 %v1255_v23, %v1254_v43  ;;  %v1259_v56 = vsel %vm988_vm0, %v1235_v6, 0.0  ;;  %v1299_v14 = vmul.f32 %v1283_v3, %v1283_v3  ;;  %v1240_v38 = vmul.f32 %v1224_v2, %v1224_v2 }
 0x167   :  { %v1199_v9 = vadd.f32 %v1198_v21, %v1197_v53  ;;  %v1284_v21 = vsub.f32 %v3017_v50, %v3112_v62  ;;  %v1298_v53 = vmul.f32 %v1282_v44, %v1282_v44  ;;  %v1313_v5 = vsel %vm988_vm0, %v1297_v19, 0.0 }
 0x168   :  { %v1258_v15 = vadd.f32 %v1257_v47, %v1256_v45  ;;  %v1241_v27 = vmul.f32 %v1225_v35, %v1225_v35  ;;  %v1261_v43 = vsel %vm988_vm0, %v1236_v31, 0.0  ;;  %v1263_v6 = vsel %vm988_vm0, %v1237_v63, 0.0 }
 0x169   :  { %v1201_v39 = vadd.f32 %v1200_v40, %v1199_v9  ;;  %v1285_v40 = vsub.f32 %v3029_v26, %v3112_v62  ;;  %v1314_v9 = vadd.f32 %v1313_v5, %v1312_v51  ;;  %v1300_v47 = vmul.f32 %v1284_v21, %v1284_v21 }
 0x16a   :  { %v1260_v12 = vadd.f32 %v1259_v56, %v1258_v15  ;;  %v1315_v54 = vsel %vm988_vm0, %v1298_v53, 0.0  ;;  %v1265_v3 = vsel %vm988_vm0, %v1238_v4, 0.0  ;;  %v1287_v2 = vsub.f32 %v3023_v11, %v3112_v62 }
 0x16b   :  { %v1203_v17 = vadd.f32 %v1202_v13, %v1201_v39  ;;  %v1286_v13 = vsub.f32 %v3011_v42, %v3112_v62  ;;  %v1316_v23 = vadd.f32 %v1315_v54, %v1314_v9  ;;  %v1301_v35 = vmul.f32 %v1285_v40, %v1285_v40  ;;  %v3880_v40 = vld [vmem:[#allocation27_spill] sm:$0xff] }
 0x16c   :  { %v1262_v41 = vadd.f32 %v1261_v43, %v1260_v12  ;;  %v1317_v19 = vsel %vm988_vm0, %v1299_v14, 0.0  ;;  %v1267_v31 = vsel %vm988_vm0, %v1239_v59, 0.0  ;;  %v1269_v45 = vsel %vm988_vm0, %v1240_v38, 0.0  ;;  %v3881_v12 = vld [vmem:[#allocation21_spill] sm:$0xff] }
 0x16d   :  { %v1204_v44 = vrot.slane %v1203_v17, 4  ;;  %v1318_v21 = vadd.f32 %v1317_v19, %v1316_v23  ;;  %v1271_v53 = vsel %vm988_vm0, %v1241_v27, 0.0  ;;  %v1288_v63 = vsub.f32 %v3051_v18, %v3112_v62  ;;  %v3882_v38 = vld [vmem:[#allocation25_spill] sm:$0xff] }
 0x16e   :  { %v1264_v39 = vadd.f32 %v1263_v6, %v1262_v41  ;;  %v1302_v15 = vmul.f32 %v1286_v13, %v1286_v13  ;;  %v1319_v4 = vsel %vm988_vm0, %v1300_v47, 0.0  ;;  %v1289_v5 = vsub.f32 %v3880_v40, %v3112_v62  ;;  %v3883_v13 = vld [vmem:[#allocation31_spill] sm:$0xff] }
 0x16f   :  { %v1205_v51 = vadd.f32 %v1204_v44, %v1203_v17  ;;  %v1320_v14 = vadd.f32 %v1319_v4, %v1318_v21  ;;  %v1290_v59 = vsub.f32 %v3881_v12, %v3112_v62  ;;  %v1291_v9 = vsub.f32 %v3882_v38, %v3112_v62  ;;  %v3884_v17 = vld [vmem:[#allocation12_spill] sm:$0xff]  ;;  %v3885_v6 = vld [vmem:[#allocation35_spill] sm:$0xff] }
 0x170   :  { %v1266_v56 = vadd.f32 %v1265_v3, %v1264_v39  ;;  %v1303_v43 = vmul.f32 %v1287_v2, %v1287_v2  ;;  %v1321_v27 = vsel %vm988_vm0, %v1301_v35, 0.0  ;;  %v1292_v41 = vsub.f32 %v3883_v13, %v3112_v62  ;;  %v3886_v39 = vld [vmem:[#allocation15_spill] sm:$0xff]  ;;  %v3887_v35 = vld [vmem:[#allocation29_spill] sm:$0xff] }
 0x171   :  { %v1322_v47 = vadd.f32 %v1321_v27, %v1320_v14  ;;  %v1350_v44 = vsub.f32 %v3884_v17, %v3112_v62  ;;  %v1293_v23 = vsub.f32 %v3885_v6, %v3112_v62  ;;  %v1304_v3 = vmul.f32 %v1288_v63, %v1288_v63  ;;  %v3888_v14 = vld [vmem:[#allocation33_spill] sm:$0xff]  ;;  %v3889_v6 = vld [vmem:[#allocation11_spill] sm:$0xff] }
 0x172   :  { %v1268_v54 = vadd.f32 %v1267_v31, %v1266_v56  ;;  %v1323_v19 = vsel %vm988_vm0, %v1302_v15, 0.0  ;;  %v1351_v21 = vsub.f32 %v3886_v39, %v3112_v62  ;;  %v1206_v2 = vrot.slane %v1205_v51, 2 }
 0x173   :  { %v1294_v31 = vsub.f32 %v3887_v35, %v3112_v62  ;;  %v1324_v56 = vadd.f32 %v1323_v19, %v1322_v47  ;;  %v1295_v27 = vsub.f32 %v3888_v14, %v3112_v62  ;;  %v1305_v13 = vmul.f32 %v1289_v5, %v1289_v5 }
 0x174   :  { %v1270_v4 = vadd.f32 %v1269_v45, %v1268_v54  ;;  %v1325_v17 = vsel %vm988_vm0, %v1303_v43, 0.0  ;;  %v1352_v63 = vsub.f32 %v3889_v6, %v3112_v62  ;;  %v1306_v15 = vmul.f32 %v1290_v59, %v1290_v59  ;;  %v3890_v54 = vld [vmem:[#allocation13_spill] sm:$0xff] }
 0x175   :  { %v1326_v12 = vadd.f32 %v1325_v17, %v1324_v56  ;;  %v1366_v40 = vmul.f32 %v1350_v44, %v1350_v44  ;;  %v1307_v39 = vmul.f32 %v1291_v9, %v1291_v9  ;;  %v1327_v45 = vsel %vm988_vm0, %v1304_v3, 0.0  ;;  %v3891_v6 = vld [vmem:[#allocation17_spill] sm:$0xff] }
 0x176   :  { %v1272_v38 = vadd.f32 %v1271_v53, %v1270_v4  ;;  %v1353_v35 = vsub.f32 %v3890_v54, %v3112_v62  ;;  %v1367_v47 = vmul.f32 %v1351_v21, %v1351_v21  ;;  %v1207_v19 = vadd.f32 %v1206_v2, %v1205_v51  ;;  %v3892_v21 = vld [vmem:[#allocation20_spill] sm:$0xff] }
 0x177   :  { %v1308_v14 = vmul.f32 %v1292_v41, %v1292_v41  ;;  %v1328_v5 = vadd.f32 %v1327_v45, %v1326_v12  ;;  %v1309_v11 = vmul.f32 %v1293_v23, %v1293_v23  ;;  %v1329_v43 = vsel %vm988_vm0, %v1305_v13, 0.0 }
 0x178   :  { %v1273_v18 = vrot.slane %v1272_v38, 4  ;;  %v1354_v53 = vsub.f32 %v3891_v6, %v3112_v62  ;;  %v1368_v59 = vmul.f32 %v1352_v63, %v1352_v63  ;;  %v1310_v44 = vmul.f32 %v1294_v31, %v1294_v31 }
 0x179   :  { %v1330_v9 = vadd.f32 %v1329_v43, %v1328_v5  ;;  %v1382_v3 = vsel %vm988_vm0, %v1366_v40, 0.0  ;;  %v1331_v4 = vsel %vm988_vm0, %v1306_v15, 0.0  ;;  %v1355_v51 = vsub.f32 %v3892_v21, %v3112_v62 }
 0x17a   :  { %v1274_v17 = vadd.f32 %v1273_v18, %v1272_v38  ;;  %v1369_v2 = vmul.f32 %v1353_v35, %v1353_v35  ;;  %v1383_v12 = vsel %vm988_vm0, %v1367_v47, 0.0  ;;  %v1208_v41 = vrot.slane %v1207_v19, 1  ;;  %v3893_v18 = vld [vmem:[#allocation16_spill] sm:$0xff]  ;;  %v3894_v47 = vld [vmem:[#allocation19_spill] sm:$0xff] }
 0x17b   :  { %v1332_v13 = vadd.f32 %v1331_v4, %v1330_v9  ;;  %v1384_v56 = vadd.f32 %v1383_v12, %v1382_v3  ;;  %v1333_v45 = vsel %vm988_vm0, %v1307_v39, 0.0  ;;  %v1356_v38 = vsub.f32 %v3893_v18, %v3112_v62 }
 0x17c   :  { %v1275_v23 = vrot.slane %v1274_v17, 2  ;;  %v1370_v31 = vmul.f32 %v1354_v53, %v1354_v53  ;;  %v1385_v40 = vsel %vm988_vm0, %v1368_v59, 0.0  ;;  %v1311_v15 = vmul.f32 %v1295_v27, %v1295_v27  ;;  %v3895_v59 = vld [vmem:[#allocation24_spill] sm:$0xff] }
 0x17d   :  { %v1334_v5 = vadd.f32 %v1333_v45, %v1332_v13  ;;  %v1386_v43 = vadd.f32 %v1385_v40, %v1384_v56  ;;  %v1335_v35 = vsel %vm988_vm0, %v1308_v14, 0.0  ;;  %v1357_v21 = vsub.f32 %v3894_v47, %v3112_v62 }
 0x17e   :  { %v1276_v63 = vadd.f32 %v1275_v23, %v1274_v17  ;;  %v1371_v6 = vmul.f32 %v1355_v51, %v1355_v51  ;;  %v1387_v9 = vsel %vm988_vm0, %v1369_v2, 0.0  ;;  %v1209_v3 = vadd.f32 %v1208_v41, %v1207_v19  ;;  %v3896_v51 = vld [vmem:[#allocation28_spill] sm:$0xff] }
 0x17f   :  { %v1336_v4 = vadd.f32 %v1335_v35, %v1334_v5  ;;  %v1388_v12 = vadd.f32 %v1387_v9, %v1386_v43  ;;  %v1337_v53 = vsel %vm988_vm0, %v1309_v11, 0.0  ;;  %v1358_v17 = vsub.f32 %v3895_v59, %v3112_v62 }
 0x180   :  { %v1277_v39 = vrot.slane %v1276_v63, 1  ;;  %v1372_v27 = vmul.f32 %v1356_v38, %v1356_v38  ;;  %v1389_v23 = vsel %vm988_vm0, %v1370_v31, 0.0  ;;  %v1339_v45 = vsel %vm988_vm0, %v1310_v44, 0.0  ;;  %v3897_v38 = vld [vmem:[#allocation22_spill] sm:$0xff] }
 0x181   :  { %v1338_v14 = vadd.f32 %v1337_v53, %v1336_v4  ;;  %v1390_v56 = vadd.f32 %v1389_v23, %v1388_v12  ;;  %v1359_v2 = vsub.f32 %v3896_v51, %v3112_v62  ;;  %v1373_v19 = vmul.f32 %v1357_v21, %v1357_v21  ;;  %v3898_v44 = vld [vmem:[#allocation26_spill] sm:$0xff]  ;;  %v3899_v53 = vld [vmem:[#allocation32_spill] sm:$0xff] }
 0x182   :  { %v1278_v13 = vadd.f32 %v1277_v39, %v1276_v63  ;;  %v1391_v41 = vsel %vm988_vm0, %v1371_v6, 0.0  ;;  %v1341_v43 = vsel %vm988_vm0, %v1311_v15, 0.0  ;;  %v1360_v35 = vsub.f32 %v3897_v38, %v3112_v62 }
 0x183   :  { %v1340_v5 = vadd.f32 %v1339_v45, %v1338_v14  ;;  %v1392_v11 = vadd.f32 %v1391_v41, %v1390_v56  ;;  %v1374_v31 = vmul.f32 %v1358_v17, %v1358_v17  ;;  %v1393_v63 = vsel %vm988_vm0, %v1372_v27, 0.0  ;;  %v3900_v27 = vld [vmem:[#allocation36_spill] sm:$0xff] }
 0x184   :  { %v1279_v40 = vadd.f32 %v1278_v13, %v1209_v3  ;;  %v1361_v4 = vsub.f32 %v3898_v44, %v3112_v62  ;;  %v1375_v12 = vmul.f32 %v1359_v2, %v1359_v2  ;;  %v1395_v21 = vsel %vm988_vm0, %v1373_v19, 0.0  ;;  %v3901_v19 = vld [vmem:[#allocation30_spill] sm:$0xff] }
 0x185   :  { %v1342_v9 = vadd.f32 %v1341_v43, %v1340_v5  ;;  %v1394_v39 = vadd.f32 %v1393_v63, %v1392_v11  ;;  %v1362_v23 = vsub.f32 %v3899_v53, %v3112_v62  ;;  %v1376_v15 = vmul.f32 %v1360_v35, %v1360_v35 }
 0x186   :  { %v1397_v13 = vsel %vm988_vm0, %v1374_v31, 0.0  ;;  %v1363_v56 = vsub.f32 %v3900_v27, %v3112_v62  ;;  %v1377_v45 = vmul.f32 %v1361_v4, %v1361_v4  ;;  %v1399_v41 = vsel %vm988_vm0, %v1375_v12, 0.0 }
 0x187   :  { %v1343_v6 = vrot.slane %v1342_v9, 4  ;;  %v1396_v3 = vadd.f32 %v1395_v21, %v1394_v39  ;;  %v1364_v11 = vsub.f32 %v3901_v19, %v3112_v62  ;;  %v1378_v43 = vmul.f32 %v1362_v23, %v1362_v23 }
 0x188   :  { %v1401_v63 = vsel %vm988_vm0, %v1376_v15, 0.0  ;;  %v1365_v31 = vsub.f32 %v3093_v32, %v3112_v62  ;;  %v1403_v21 = vsel %vm988_vm0, %v1377_v45, 0.0 }
 0x189   :  { %v1344_v14 = vadd.f32 %v1343_v6, %v1342_v9  ;;  %v1398_v17 = vadd.f32 %v1397_v13, %v1396_v3  ;;  %v1379_v9 = vmul.f32 %v1363_v56, %v1363_v56  ;;  %v1380_v3 = vmul.f32 %v1364_v11, %v1364_v11 }
 0x18a   :  { %v1405_v12 = vsel %vm988_vm0, %v1378_v43, 0.0 }
 0x18b   :  { %v1345_v5 = vrot.slane %v1344_v14, 2  ;;  %v1400_v2 = vadd.f32 %v1399_v41, %v1398_v17  ;;  %v1381_v41 = vmul.f32 %v1365_v31, %v1365_v31  ;;  %v1407_v23 = vsel %vm988_vm0, %v1379_v9, 0.0 }
 0x18c   :  { %v1428_v31 = vlaneseq }
 0x18d   :  { %v1346_v39 = vadd.f32 %v1345_v5, %v1344_v14  ;;  %v1402_v35 = vadd.f32 %v1401_v63, %v1400_v2  ;;  %v1409_v14 = vsel %vm988_vm0, %v1380_v3, 0.0  ;;  %v1411_v2 = vsel %vm988_vm0, %v1381_v41, 0.0 }
 0x18e   :  { %v1429_v9 = vshrl.u32 %v1428_v31, 7 }
 0x18f   :  { %v1347_v6 = vrot.slane %v1346_v39, 1  ;;  %v1404_v4 = vadd.f32 %v1403_v21, %v1402_v35 }
 0x191   :  { %v1348_v13 = vadd.f32 %v1347_v6, %v1346_v39  ;;  %v1406_v17 = vadd.f32 %v1405_v12, %v1404_v4  ;;  %v1430_v4 = vsub.s32 0, %v1429_v9 }
 0x193   :  { %v1349_v19 = vadd.f32 %v1348_v13, %v1279_v40  ;;  %v1408_v15 = vadd.f32 %v1407_v23, %v1406_v17  ;;  %v1423_v40 = vld [vmem:[%s3785_s2] sm:$0x1] }
 0x194   :  { %v1425_v13 = vld [vmem:[%s3786_s3] sm:$0x1] }
 0x195   :  { %v1410_v5 = vadd.f32 %v1409_v14, %v1408_v15 }
 0x197   :  { %v1412_v56 = vadd.f32 %v1411_v2, %v1410_v5 }
 0x199   :  { %v1413_v63 = vrot.slane %v1412_v56, 4 }
 0x19b   :  { %v1414_v45 = vadd.f32 %v1413_v63, %v1412_v56 }
 0x19d   :  { %v1415_v32 = vrot.slane %v1414_v45, 2 }
 0x19f   :  { %v1416_v35 = vadd.f32 %v1415_v32, %v1414_v45 }
 0x1a1   :  { %v1417_v11 = vrot.slane %v1416_v35, 1 }
 0x1a3   :  { %v1418_v21 = vadd.f32 %v1417_v11, %v1416_v35 }
 0x1a5   :  { %v1419_v43 = vadd.f32 %v1418_v21, %v1349_v19 }
 0x1a7   :  { %v1420_v39 = vmul.f32 0.001953125, %v1419_v43  ;;  %v3908_v43 = vld [vmem:[#allocation4_spill] sm:$0xff] }
 0x1a9   :  { %v1421_v6 = vadd.f32 1e-05, %v1420_v39 }
 0x1ab   :  { %2455 = vrsqrt.f32 %v1421_v6  ;;  %v3909_v6 = vld [vmem:[#allocation2_spill] sm:$0xff] }
 0x1b5   :  { %v2456_v3 = vpop.eup %2455 }
 0x1b6   :  { %v1424_v12 = vmul.f32 %v2456_v3, %v1423_v40 }
 0x1b8   :  { %v1426_v32 = vmul.f32 %v1424_v12, %v3112_v62  ;;  %v3313_v17 = vrot.slane %v1424_v12, %v1430_v4 }
 0x1ba   :  { %v1427_v19 = vsub.f32 %v1425_v13, %v1426_v32  ;;  %v1432_v41 = vmul.f32 %v3313_v17, %v2857_v8  ;;  %v1433_v23 = vmul.f32 %v3313_v17, %v2867_v1  ;;  %v1434_v15 = vmul.f32 %v2853_v7, %v3313_v17 }
 0x1bb   :  { %v1435_v14 = vmul.f32 %v2861_v10, %v3313_v17  ;;  %v1436_v5 = vmul.f32 %v3313_v17, %v2889_v25  ;;  %v1437_v62 = vmul.f32 %v3313_v17, %v2901_v34  ;;  %v1438_v2 = vmul.f32 %v2883_v22, %v3313_v17  ;;  %v3902_v25 = vld [vmem:[#allocation5_spill] sm:$0xff]  ;;  %v3903_v34 = vld [vmem:[#allocation7_spill] sm:$0xff] }
 0x1bc   :  { %v1439_v8 = vmul.f32 %v2895_v30, %v3313_v17  ;;  %v1440_v1 = vmul.f32 %v3313_v17, %v2921_v49  ;;  %v1441_v7 = vmul.f32 %v3313_v17, %v2933_v58  ;;  %v1442_v10 = vmul.f32 %v2915_v46, %v3313_v17  ;;  %v3904_v22 = vld [vmem:[#allocation9_spill] sm:$0xff]  ;;  %v3905_v30 = vld [vmem:[#allocation6_spill] sm:$0xff]  ;;  %v3906_v49 = vld [vmem:[#allocation8_spill] sm:$0xff] }
 0x1bd   :  { %v1443_v56 = vmul.f32 %v3902_v25, %v3313_v17  ;;  %v1444_v63 = vmul.f32 %v3313_v17, %v3903_v34  ;;  %v1445_v45 = vmul.f32 %v3313_v17, %v3904_v22  ;;  %v1446_v35 = vmul.f32 %v3905_v30, %v3313_v17  ;;  %v3907_v58 = vld [vmem:[#allocation3_spill] sm:$0xff] }
 0x1be   :  { %v1447_v11 = vmul.f32 %v3906_v49, %v3313_v17  ;;  %v3347_v21 = vrot.slane %v1427_v19, %v1430_v4  ;;  %v3351_v46 = vmul.f32 %v3313_v17, %v3907_v58  ;;  %v3355_v39 = vmul.f32 %v3313_v17, %v3908_v43 }
 0x1bf   :  { %v3359_v31 = vmul.f32 %v3909_v6, %v3313_v17  ;;  %v3363_v9 = vmul.f32 %v2865_v0, %v3313_v17  ;;  %v3367_v40 = vmul.f32 %v3313_v17, %v2893_v28  ;;  %v3371_v4 = vmul.f32 %v3313_v17, %v2905_v37 }
 0x1c0   :  { %v1454_v3 = vadd.f32 %v3347_v21, %v1432_v41  ;;  %v1455_v12 = vadd.f32 %v3347_v21, %v1433_v23  ;;  %v1456_v13 = vadd.f32 %v3347_v21, %v1434_v15  ;;  %v1457_v32 = vadd.f32 %v3347_v21, %v1435_v14 }
 0x1c1   :  { %v1458_v19 = vadd.f32 %v3347_v21, %v1436_v5  ;;  %v1459_v0 = vadd.f32 %v3347_v21, %v1437_v62  ;;  %v1460_v25 = vadd.f32 %v3347_v21, %v1438_v2  ;;  %v1461_v28 = vadd.f32 %v3347_v21, %v1439_v8 }
 0x1c2   :  { %v1462_v34 = vadd.f32 %v3347_v21, %v1440_v1  ;;  %v1463_v37 = vadd.f32 %v3347_v21, %v1441_v7  ;;  %v1464_v41 = vadd.f32 %v3347_v21, %v1442_v10  ;;  %v1465_v23 = vadd.f32 %v3347_v21, %v1443_v56 }
 0x1c3   :  { %v1466_v15 = vadd.f32 %v3347_v21, %v1444_v63  ;;  %v1467_v14 = vadd.f32 %v3347_v21, %v1445_v45  ;;  %v1468_v5 = vadd.f32 %v3347_v21, %v1446_v35  ;;  %v1469_v62 = vadd.f32 %v3347_v21, %v1447_v11 }
 0x1c4   :  { %v2166_v22 = vpack.c.bf16 %v1454_v3, %v1454_v3  ;;  %v2167_v2 = vpack.c.bf16 %v1455_v12, %v1455_v12  ;;  %v2168_v30 = vpack.c.bf16 %v1456_v13, %v1456_v13  ;;  %v2169_v8 = vpack.c.bf16 %v1457_v32, %v1457_v32 }
 0x1c5   :  { %v2170_v49 = vpack.c.bf16 %v1458_v19, %v1458_v19  ;;  %v2171_v1 = vpack.c.bf16 %v1459_v0, %v1459_v0  ;;  %v2172_v58 = vpack.c.bf16 %v1460_v25, %v1460_v25  ;;  %v2173_v7 = vpack.c.bf16 %v1461_v28, %v1461_v28 }
 0x1c6   :  { %v2174_v43 = vpack.c.bf16 %v1462_v34, %v1462_v34  ;;  %v2175_v10 = vpack.c.bf16 %v1463_v37, %v1463_v37  ;;  %v2176_v6 = vpack.c.bf16 %v1464_v41, %v1464_v41  ;;  %v2177_v56 = vpack.c.bf16 %v1465_v23, %v1465_v23  ;;  %1535 = vst.msk [vmem:[%s3787_s4] sm:$0xf] %vm1534_vm1, %v2166_v22 }
 0x1c7   :  { %1536 = vst.msk [vmem:[%s3787_s4 + $0x4] sm:$0xf] %vm1534_vm1, %v2167_v2  ;;  %1537 = vst.msk [vmem:[%s3787_s4 + $0x8] sm:$0xf] %vm1534_vm1, %v2168_v30  ;;  %v2178_v63 = vpack.c.bf16 %v1466_v15, %v1466_v15  ;;  %v2179_v45 = vpack.c.bf16 %v1467_v14, %v1467_v14  ;;  %v2180_v35 = vpack.c.bf16 %v1468_v5, %v1468_v5 }
 0x1c8   :  { %1538 = vst.msk [vmem:[%s3787_s4 + $0xc] sm:$0xf] %vm1534_vm1, %v2169_v8  ;;  %v2181_v11 = vpack.c.bf16 %v1469_v62, %v1469_v62  ;;  %1539 = vst.msk [vmem:[%s3787_s4 + $0x10] sm:$0xf] %vm1534_vm1, %v2170_v49  ;;  %v1557_v3 = vmul.f32 %v2887_v24, %v3313_v17  ;;  %v1558_v12 = vmul.f32 %v2899_v33, %v3313_v17 }
 0x1c9   :  { %1540 = vst.msk [vmem:[%s3787_s4 + $0x14] sm:$0xf] %vm1534_vm1, %v2171_v1  ;;  %1541 = vst.msk [vmem:[%s3787_s4 + $0x18] sm:$0xf] %vm1534_vm1, %v2172_v58  ;;  %v1559_v13 = vmul.f32 %v3313_v17, %v2925_v52  ;;  %v1560_v32 = vmul.f32 %v3313_v17, %v2937_v61  ;;  %v1561_v24 = vmul.f32 %v2919_v48, %v3313_v17 }
 0x1ca   :  { %1542 = vst.msk [vmem:[%s3787_s4 + $0x1c] sm:$0xf] %vm1534_vm1, %v2173_v7  ;;  %1543 = vst.msk [vmem:[%s3787_s4 + $0x20] sm:$0xf] %vm1534_vm1, %v2174_v43  ;;  %v1562_v33 = vmul.f32 %v2931_v57, %v3313_v17  ;;  %v1563_v52 = vmul.f32 %v3313_v17, %v2957_v20  ;;  %v1564_v61 = vmul.f32 %v3313_v17, %v2969_v36 }
 0x1cb   :  { %1544 = vst.msk [vmem:[%s3787_s4 + $0x24] sm:$0xf] %vm1534_vm1, %v2175_v10  ;;  %1545 = vst.msk [vmem:[%s3787_s4 + $0x28] sm:$0xf] %vm1534_vm1, %v2176_v6  ;;  %v1565_v19 = vmul.f32 %v2951_v16, %v3313_v17  ;;  %v1566_v0 = vmul.f32 %v2963_v29, %v3313_v17  ;;  %v1567_v25 = vadd.f32 %v3351_v46, %v3347_v21 }
 0x1cc   :  { %1546 = vst.msk [vmem:[%s3787_s4 + $0x2c] sm:$0xf] %vm1534_vm1, %v2177_v56  ;;  %1547 = vst.msk [vmem:[%s3787_s4 + $0x30] sm:$0xf] %vm1534_vm1, %v2178_v63  ;;  %v1568_v48 = vadd.f32 %v3355_v39, %v3347_v21  ;;  %v1569_v57 = vadd.f32 %v3359_v31, %v3347_v21  ;;  %v1570_v20 = vadd.f32 %v3363_v9, %v3347_v21  ;;  %v3910_v56 = vld [vmem:[#allocation14_spill] sm:$0xff] }
 0x1cd   :  { %1548 = vst.msk [vmem:[%s3787_s4 + $0x34] sm:$0xf] %vm1534_vm1, %v2179_v45  ;;  %1549 = vst.msk [vmem:[%s3787_s4 + $0x38] sm:$0xf] %vm1534_vm1, %v2180_v35  ;;  %v1571_v36 = vadd.f32 %v3367_v40, %v3347_v21  ;;  %v1572_v16 = vadd.f32 %v3371_v4, %v3347_v21  ;;  %v1573_v29 = vadd.f32 %v1557_v3, %v3347_v21 }
 0x1ce   :  { %1550 = vst.msk [vmem:[%s3787_s4 + $0x3c] sm:$0xf] %vm1534_vm1, %v2181_v11  ;;  %v1574_v28 = vadd.f32 %v1558_v12, %v3347_v21  ;;  %v1575_v46 = vadd.f32 %v1559_v13, %v3347_v21  ;;  %v1576_v39 = vadd.f32 %v1560_v32, %v3347_v21  ;;  %v1577_v34 = vadd.f32 %v1561_v24, %v3347_v21 }
 0x1cf   :  { %v1578_v31 = vadd.f32 %v1562_v33, %v3347_v21  ;;  %v1579_v9 = vadd.f32 %v1563_v52, %v3347_v21  ;;  %v1580_v37 = vadd.f32 %v1564_v61, %v3347_v21  ;;  %v1581_v40 = vadd.f32 %v1565_v19, %v3347_v21  ;;  %v3915_v33 = vld [vmem:[#allocation21_spill] sm:$0xff] }
 0x1d0   :  { %v1582_v4 = vadd.f32 %v1566_v0, %v3347_v21  ;;  %v2182_v41 = vpack.c.bf16 %v1567_v25, %v1567_v25  ;;  %v2183_v23 = vpack.c.bf16 %v1568_v48, %v1568_v48  ;;  %v2184_v15 = vpack.c.bf16 %v1569_v57, %v1569_v57  ;;  %v3916_v61 = vld [vmem:[#allocation25_spill] sm:$0xff]  ;;  %v3917_v0 = vld [vmem:[#allocation31_spill] sm:$0xff] }
 0x1d1   :  { %v2185_v14 = vpack.c.bf16 %v1570_v20, %v1570_v20  ;;  %v2186_v5 = vpack.c.bf16 %v1571_v36, %v1571_v36  ;;  %v2187_v62 = vpack.c.bf16 %v1572_v16, %v1572_v16  ;;  %v2188_v22 = vpack.c.bf16 %v1573_v29, %v1573_v29  ;;  %v3918_v48 = vld [vmem:[#allocation35_spill] sm:$0xff]  ;;  %v3919_v57 = vld [vmem:[#allocation29_spill] sm:$0xff] }
 0x1d2   :  { %v2189_v2 = vpack.c.bf16 %v1574_v28, %v1574_v28  ;;  %v2190_v30 = vpack.c.bf16 %v1575_v46, %v1575_v46  ;;  %v2191_v8 = vpack.c.bf16 %v1576_v39, %v1576_v39  ;;  %2086 = vst.msk [vmem:[%s3787_s4 + $0x40] sm:$0xf] %vm1534_vm1, %v2182_v41  ;;  %2087 = vst.msk [vmem:[%s3787_s4 + $0x44] sm:$0xf] %vm1534_vm1, %v2183_v23  ;;  %v3920_v36 = vld [vmem:[#allocation33_spill] sm:$0xff] }
 0x1d3   :  { %v2192_v49 = vpack.c.bf16 %v1577_v34, %v1577_v34  ;;  %v2193_v1 = vpack.c.bf16 %v1578_v31, %v1578_v31  ;;  %v2194_v58 = vpack.c.bf16 %v1579_v9, %v1579_v9  ;;  %v2195_v7 = vpack.c.bf16 %v1580_v37, %v1580_v37  ;;  %2088 = vst.msk [vmem:[%s3787_s4 + $0x48] sm:$0xf] %vm1534_vm1, %v2184_v15 }
 0x1d4   :  { %2089 = vst.msk [vmem:[%s3787_s4 + $0x4c] sm:$0xf] %vm1534_vm1, %v2185_v14  ;;  %2090 = vst.msk [vmem:[%s3787_s4 + $0x50] sm:$0xf] %vm1534_vm1, %v2186_v5  ;;  %v2196_v43 = vpack.c.bf16 %v1581_v40, %v1581_v40  ;;  %v2197_v10 = vpack.c.bf16 %v1582_v4, %v1582_v4  ;;  %v1664_v6 = vmul.f32 %v3313_v17, %v2985_v55  ;;  %v3911_v55 = vld [vmem:[#allocation10_spill] sm:$0xff] }
 0x1d5   :  { %2091 = vst.msk [vmem:[%s3787_s4 + $0x54] sm:$0xf] %vm1534_vm1, %v2187_v62  ;;  %2092 = vst.msk [vmem:[%s3787_s4 + $0x58] sm:$0xf] %vm1534_vm1, %v2188_v22  ;;  %v1665_v63 = vmul.f32 %v3313_v17, %v3910_v56  ;;  %v1666_v45 = vmul.f32 %v3911_v55, %v3313_v17  ;;  %v1667_v35 = vmul.f32 %v2989_v60, %v3313_v17  ;;  %v3912_v60 = vld [vmem:[#allocation18_spill] sm:$0xff] }
 0x1d6   :  { %2093 = vst.msk [vmem:[%s3787_s4 + $0x5c] sm:$0xf] %vm1534_vm1, %v2189_v2  ;;  %2094 = vst.msk [vmem:[%s3787_s4 + $0x60] sm:$0xf] %vm1534_vm1, %v2190_v30  ;;  %v1668_v11 = vmul.f32 %v3313_v17, %v3017_v50  ;;  %v1669_v3 = vmul.f32 %v3313_v17, %v3029_v26  ;;  %v1670_v12 = vmul.f32 %v3011_v42, %v3313_v17  ;;  %v3913_v50 = vld [vmem:[#allocation23_spill] sm:$0xff] }
 0x1d7   :  { %2095 = vst.msk [vmem:[%s3787_s4 + $0x64] sm:$0xf] %vm1534_vm1, %v2191_v8  ;;  %2096 = vst.msk [vmem:[%s3787_s4 + $0x68] sm:$0xf] %vm1534_vm1, %v2192_v49  ;;  %v1671_v13 = vmul.f32 %v3912_v60, %v3313_v17  ;;  %v1672_v32 = vmul.f32 %v3313_v17, %v3913_v50  ;;  %v3914_v26 = vld [vmem:[#allocation27_spill] sm:$0xff]  ;;  %v1674_v52 = vmul.f32 %v3915_v33, %v3313_v17  ;;  %v3925_v33 = vld [vmem:[#allocation20_spill] sm:$0xff] }
 0x1d8   :  { %2097 = vst.msk [vmem:[%s3787_s4 + $0x6c] sm:$0xf] %vm1534_vm1, %v2193_v1  ;;  %2098 = vst.msk [vmem:[%s3787_s4 + $0x70] sm:$0xf] %vm1534_vm1, %v2194_v58  ;;  %v1673_v24 = vmul.f32 %v3313_v17, %v3914_v26  ;;  %v1675_v19 = vmul.f32 %v3916_v61, %v3313_v17  ;;  %v1676_v25 = vmul.f32 %v3313_v17, %v3917_v0  ;;  %v3924_v26 = vld [vmem:[#allocation17_spill] sm:$0xff] }
 0x1d9   :  { %2099 = vst.msk [vmem:[%s3787_s4 + $0x74] sm:$0xf] %vm1534_vm1, %v2195_v7  ;;  %2100 = vst.msk [vmem:[%s3787_s4 + $0x78] sm:$0xf] %vm1534_vm1, %v2196_v43  ;;  %v1677_v42 = vmul.f32 %v3313_v17, %v3918_v48  ;;  %v1678_v20 = vmul.f32 %v3919_v57, %v3313_v17  ;;  %v1679_v16 = vmul.f32 %v3920_v36, %v3313_v17 }
 0x1da   :  { %2101 = vst.msk [vmem:[%s3787_s4 + $0x7c] sm:$0xf] %vm1534_vm1, %v2197_v10  ;;  %v1680_v29 = vadd.f32 %v1664_v6, %v3347_v21  ;;  %v1681_v28 = vadd.f32 %v1665_v63, %v3347_v21  ;;  %v1682_v46 = vadd.f32 %v1666_v45, %v3347_v21  ;;  %v1683_v39 = vadd.f32 %v1667_v35, %v3347_v21 }
 0x1db   :  { %v1684_v34 = vadd.f32 %v1668_v11, %v3347_v21  ;;  %v1685_v31 = vadd.f32 %v1669_v3, %v3347_v21  ;;  %v1686_v9 = vadd.f32 %v1670_v12, %v3347_v21  ;;  %v1687_v37 = vadd.f32 %v1671_v13, %v3347_v21  ;;  %v3921_v11 = vld [vmem:[#allocation12_spill] sm:$0xff]  ;;  %v3922_v12 = vld [vmem:[#allocation15_spill] sm:$0xff] }
 0x1dc   :  { %v1688_v40 = vadd.f32 %v1672_v32, %v3347_v21  ;;  %v1689_v4 = vadd.f32 %v1673_v24, %v3347_v21  ;;  %v1690_v41 = vadd.f32 %v1674_v52, %v3347_v21  ;;  %v1691_v23 = vadd.f32 %v1675_v19, %v3347_v21  ;;  %v3923_v13 = vld [vmem:[#allocation11_spill] sm:$0xff] }
 0x1dd   :  { %v1692_v15 = vadd.f32 %v1676_v25, %v3347_v21  ;;  %v1693_v14 = vadd.f32 %v1677_v42, %v3347_v21  ;;  %v1694_v5 = vadd.f32 %v1678_v20, %v3347_v21  ;;  %v1695_v62 = vadd.f32 %v1679_v16, %v3347_v21 }
 0x1de   :  { %v2198_v22 = vpack.c.bf16 %v1680_v29, %v1680_v29  ;;  %v2199_v2 = vpack.c.bf16 %v1681_v28, %v1681_v28  ;;  %v2200_v30 = vpack.c.bf16 %v1682_v46, %v1682_v46  ;;  %v2201_v8 = vpack.c.bf16 %v1683_v39, %v1683_v39 }
 0x1df   :  { %v2202_v49 = vpack.c.bf16 %v1684_v34, %v1684_v34  ;;  %v2203_v1 = vpack.c.bf16 %v1685_v31, %v1685_v31  ;;  %v2204_v58 = vpack.c.bf16 %v1686_v9, %v1686_v9  ;;  %v2205_v7 = vpack.c.bf16 %v1687_v37, %v1687_v37 }
 0x1e0   :  { %v2206_v43 = vpack.c.bf16 %v1688_v40, %v1688_v40  ;;  %v2207_v10 = vpack.c.bf16 %v1689_v4, %v1689_v4  ;;  %2118 = vst.msk [vmem:[%s3787_s4 + $0x80] sm:$0xf] %vm1534_vm1, %v2198_v22  ;;  %2119 = vst.msk [vmem:[%s3787_s4 + $0x84] sm:$0xf] %vm1534_vm1, %v2199_v2  ;;  %v2208_v6 = vpack.c.bf16 %v1690_v41, %v1690_v41 }
 0x1e1   :  { %v2209_v56 = vpack.c.bf16 %v1691_v23, %v1691_v23  ;;  %v2210_v63 = vpack.c.bf16 %v1692_v15, %v1692_v15  ;;  %v2211_v55 = vpack.c.bf16 %v1693_v14, %v1693_v14  ;;  %2120 = vst.msk [vmem:[%s3787_s4 + $0x88] sm:$0xf] %vm1534_vm1, %v2200_v30  ;;  %2121 = vst.msk [vmem:[%s3787_s4 + $0x8c] sm:$0xf] %vm1534_vm1, %v2201_v8 }
 0x1e2   :  { %2122 = vst.msk [vmem:[%s3787_s4 + $0x90] sm:$0xf] %vm1534_vm1, %v2202_v49  ;;  %2123 = vst.msk [vmem:[%s3787_s4 + $0x94] sm:$0xf] %vm1534_vm1, %v2203_v1  ;;  %v2212_v45 = vpack.c.bf16 %v1694_v5, %v1694_v5  ;;  %v2213_v35 = vpack.c.bf16 %v1695_v62, %v1695_v62  ;;  %v1777_v3 = vmul.f32 %v3313_v17, %v3921_v11 }
 0x1e3   :  { %2124 = vst.msk [vmem:[%s3787_s4 + $0x98] sm:$0xf] %vm1534_vm1, %v2204_v58  ;;  %2125 = vst.msk [vmem:[%s3787_s4 + $0x9c] sm:$0xf] %vm1534_vm1, %v2205_v7  ;;  %v1778_v60 = vmul.f32 %v3313_v17, %v3922_v12  ;;  %v1779_v50 = vmul.f32 %v3923_v13, %v3313_v17  ;;  %v1780_v32 = vmul.f32 %v3890_v54, %v3313_v17 }
 0x1e4   :  { %2126 = vst.msk [vmem:[%s3787_s4 + $0xa0] sm:$0xf] %vm1534_vm1, %v2206_v43  ;;  %2127 = vst.msk [vmem:[%s3787_s4 + $0xa4] sm:$0xf] %vm1534_vm1, %v2207_v10  ;;  %v1781_v24 = vmul.f32 %v3313_v17, %v3924_v26  ;;  %v1782_v52 = vmul.f32 %v3313_v17, %v3925_v33  ;;  %v1783_v61 = vmul.f32 %v3893_v18, %v3313_v17 }
 0x1e5   :  { %2128 = vst.msk [vmem:[%s3787_s4 + $0xa8] sm:$0xf] %vm1534_vm1, %v2208_v6  ;;  %2129 = vst.msk [vmem:[%s3787_s4 + $0xac] sm:$0xf] %vm1534_vm1, %v2209_v56  ;;  %v1784_v54 = vmul.f32 %v3894_v47, %v3313_v17  ;;  %v1785_v19 = vmul.f32 %v3313_v17, %v3895_v59  ;;  %v1786_v0 = vmul.f32 %v3313_v17, %v3896_v51  ;;  %v3926_v47 = vld [vmem:[#allocation30_spill] sm:$0xff] }
 0x1e6   :  { %2130 = vst.msk [vmem:[%s3787_s4 + $0xb0] sm:$0xf] %vm1534_vm1, %v2210_v63  ;;  %2131 = vst.msk [vmem:[%s3787_s4 + $0xb4] sm:$0xf] %vm1534_vm1, %v2211_v55  ;;  %v1787_v25 = vmul.f32 %v3897_v38, %v3313_v17  ;;  %v1788_v48 = vmul.f32 %v3898_v44, %v3313_v17  ;;  %v1789_v42 = vmul.f32 %v3313_v17, %v3899_v53  ;;  %v3927_v59 = vld [vmem:[#allocation34_spill] sm:$0xff] }
 0x1e7   :  { %2132 = vst.msk [vmem:[%s3787_s4 + $0xb8] sm:$0xf] %vm1534_vm1, %v2212_v45  ;;  %2133 = vst.msk [vmem:[%s3787_s4 + $0xbc] sm:$0xf] %vm1534_vm1, %v2213_v35  ;;  %v1790_v18 = vmul.f32 %v3313_v17, %v3900_v27  ;;  %v1791_v57 = vmul.f32 %v3926_v47, %v3313_v17  ;;  %v1792_v20 = vmul.f32 %v3927_v59, %v3313_v17 }
 0x1e8   :  { %v1793_v51 = vadd.f32 %v1777_v3, %v3347_v21  ;;  %v1794_v36 = vadd.f32 %v1778_v60, %v3347_v21  ;;  %v1795_v38 = vadd.f32 %v1779_v50, %v3347_v21  ;;  %v1796_v44 = vadd.f32 %v1780_v32, %v3347_v21 }
 0x1e9   :  { %v1797_v16 = vadd.f32 %v1781_v24, %v3347_v21  ;;  %v1798_v53 = vadd.f32 %v1782_v52, %v3347_v21  ;;  %v1799_v27 = vadd.f32 %v1783_v61, %v3347_v21  ;;  %v1800_v29 = vadd.f32 %v1784_v54, %v3347_v21 }
 0x1ea   :  { %v1801_v28 = vadd.f32 %v1785_v19, %v3347_v21  ;;  %v1802_v17 = vadd.f32 %v1786_v0, %v3347_v21  ;;  %v1803_v46 = vadd.f32 %v1787_v25, %v3347_v21  ;;  %v1804_v39 = vadd.f32 %v1788_v48, %v3347_v21 }
 0x1eb   :  { %v1805_v34 = vadd.f32 %v1789_v42, %v3347_v21  ;;  %v1806_v31 = vadd.f32 %v1790_v18, %v3347_v21  ;;  %v1807_v9 = vadd.f32 %v1791_v57, %v3347_v21  ;;  %v1808_v37 = vadd.f32 %v1792_v20, %v3347_v21 }
 0x1ec   :  { %v2214_v40 = vpack.c.bf16 %v1793_v51, %v1793_v51  ;;  %v2215_v4 = vpack.c.bf16 %v1794_v36, %v1794_v36  ;;  %v2216_v41 = vpack.c.bf16 %v1795_v38, %v1795_v38  ;;  %v2217_v23 = vpack.c.bf16 %v1796_v44, %v1796_v44 }
 0x1ed   :  { %v2218_v15 = vpack.c.bf16 %v1797_v16, %v1797_v16  ;;  %v2219_v14 = vpack.c.bf16 %v1798_v53, %v1798_v53  ;;  %v2220_v5 = vpack.c.bf16 %v1799_v27, %v1799_v27  ;;  %v2221_v62 = vpack.c.bf16 %v1800_v29, %v1800_v29 }
 0x1ee   :  { %v2222_v22 = vpack.c.bf16 %v1801_v28, %v1801_v28  ;;  %v2223_v2 = vpack.c.bf16 %v1802_v17, %v1802_v17  ;;  %2150 = vst.msk [vmem:[%s3787_s4 + $0xc0] sm:$0xf] %vm1534_vm1, %v2214_v40  ;;  %2151 = vst.msk [vmem:[%s3787_s4 + $0xc4] sm:$0xf] %vm1534_vm1, %v2215_v4  ;;  %v2224_v21 = vpack.c.bf16 %v1803_v46, %v1803_v46 }
 0x1ef   :  { %v2225_v30 = vpack.c.bf16 %v1804_v39, %v1804_v39  ;;  %v2226_v8 = vpack.c.bf16 %v1805_v34, %v1805_v34  ;;  %v2227_v49 = vpack.c.bf16 %v1806_v31, %v1806_v31  ;;  %2152 = vst.msk [vmem:[%s3787_s4 + $0xc8] sm:$0xf] %vm1534_vm1, %v2216_v41  ;;  %2153 = vst.msk [vmem:[%s3787_s4 + $0xcc] sm:$0xf] %vm1534_vm1, %v2217_v23 }
 0x1f0   :  { %2154 = vst.msk [vmem:[%s3787_s4 + $0xd0] sm:$0xf] %vm1534_vm1, %v2218_v15  ;;  %2155 = vst.msk [vmem:[%s3787_s4 + $0xd4] sm:$0xf] %vm1534_vm1, %v2219_v14  ;;  %v2228_v1 = vpack.c.bf16 %v1807_v9, %v1807_v9  ;;  %v2229_v58 = vpack.c.bf16 %v1808_v37, %v1808_v37 }
 0x1f1   :  { %2156 = vst.msk [vmem:[%s3787_s4 + $0xd8] sm:$0xf] %vm1534_vm1, %v2220_v5  ;;  %2157 = vst.msk [vmem:[%s3787_s4 + $0xdc] sm:$0xf] %vm1534_vm1, %v2221_v62 }
 0x1f2   :  { %2158 = vst.msk [vmem:[%s3787_s4 + $0xe0] sm:$0xf] %vm1534_vm1, %v2222_v22  ;;  %2159 = vst.msk [vmem:[%s3787_s4 + $0xe4] sm:$0xf] %vm1534_vm1, %v2223_v2 }
 0x1f3   :  { %2160 = vst.msk [vmem:[%s3787_s4 + $0xe8] sm:$0xf] %vm1534_vm1, %v2224_v21  ;;  %2161 = vst.msk [vmem:[%s3787_s4 + $0xec] sm:$0xf] %vm1534_vm1, %v2225_v30 }
 0x1f4   :  { %2162 = vst.msk [vmem:[%s3787_s4 + $0xf0] sm:$0xf] %vm1534_vm1, %v2226_v8  ;;  %2163 = vst.msk [vmem:[%s3787_s4 + $0xf4] sm:$0xf] %vm1534_vm1, %v2227_v49 }
 0x1f5   :  { %2164 = vst.msk [vmem:[%s3787_s4 + $0xf8] sm:$0xf] %vm1534_vm1, %v2228_v1  ;;  %2165 = vst.msk [vmem:[%s3787_s4 + $0xfc] sm:$0xf] %vm1534_vm1, %v2229_v58 }

// kernel: _lambda_.17
= control target key start
LH: loop header
LB: loop body
LE: loop exit
PB: predicated region body
PF: predicated region fallthrough
CT: control target
= control target key end

     0   :  { %vm756_vm0 = vcmask 523264   ;;  %v4268_v11 = vmov 0   ;;  %vm1142_vm1 = vcmask 15360   ;;  %s6779_s1 = inlined_call_operand.vmem [shape: bf16[4,64,2], index: 1, kind: input, shape index: {}]   ;;  %s6780_s0 = inlined_call_operand.vmem [shape: bf16[4,512,64], index: 0, kind: input, shape index: {}]   ;;  %s6781_s2 = inlined_call_operand.vmem [shape: f32[1,2], index: 2, kind: input, shape index: {}]   ;;  %s6782_s3 = inlined_call_operand.vmem [shape: f32[4,512,2], index: 3, kind: output, shape index: {}]  }
   0x1   :  { %v4251_v0 = vld [vmem:[%s6779_s1] sm:$0xff]   ;;  %v4253_v2 = vld [vmem:[%s6779_s1 + $0x8] sm:$0xff]   ;;  %v4255_v4 = vld [vmem:[%s6779_s1 + $0x10] sm:$0xff]  }
   0x2   :  { %v4252_v1 = vld [vmem:[%s6779_s1 + $0x20] sm:$0xff]   ;;  %3962 = vmatprep.subr.bf16.mxu0 %v4251_v0  ;;  %v4254_v3 = vld [vmem:[%s6779_s1 + $0x28] sm:$0xff]   ;;  %v4256_v5 = vld [vmem:[%s6779_s1 + $0x30] sm:$0xff]  }
   0x3   :  { %4034 = vmatprep.subr.bf16.mxu1 %v4252_v1  ;;  %3963 = vmatpush3.bf16.msra.mxu0 %v4251_v0  ;;  %v4257_v6 = vld [vmem:[%s6779_s1 + $0x18] sm:$0xff]   ;;  %v15_v8 = vld [vmem:[%s6780_s0] sm:$0xf]  ;;  %v16_v9 = vld [vmem:[%s6780_s0 + $0x4] sm:$0xf] }
   0x4   :  { %4035 = vmatpush3.bf16.msra.mxu1 %v4252_v1  ;;  %3964 = vmatprep.subr.bf16.mxu0 %v4253_v2  ;;  %v4258_v7 = vld [vmem:[%s6779_s1 + $0x38] sm:$0xff]   ;;  %v3134_v10 = vld [vmem:[%s6780_s0 + $0x100] sm:$0xf]  ;;  %v79_v12 = vmax.bf16 %v4268_v11, %v15_v8  ;;  %v80_v13 = vmax.bf16 %v4268_v11, %v16_v9  ;;  %v3135_v14 = vld [vmem:[%s6780_s0 + $0x104] sm:$0xf] }
   0x5   :  { %4036 = vmatprep.subr.bf16.mxu1 %v4254_v3  ;;  %v216_v15 = vmax.bf16 %v4268_v11, %v3134_v10  ;;  %v17_v16 = vld [vmem:[%s6780_s0 + $0x8] sm:$0xf]  ;;  %v18_v17 = vld [vmem:[%s6780_s0 + $0xc] sm:$0xf]  ;;  %v217_v18 = vmax.bf16 %v4268_v11, %v3135_v14  ;;  %v4259_v26 = vld [vmem:[%s6779_s1 + $0x40] sm:$0xff]  }
   0x6   :  { %v81_v19 = vmax.bf16 %v4268_v11, %v17_v16  ;;  %v82_v20 = vmax.bf16 %v4268_v11, %v18_v17  ;;  %v3136_v21 = vld [vmem:[%s6780_s0 + $0x108] sm:$0xf]  ;;  %v3137_v22 = vld [vmem:[%s6780_s0 + $0x10c] sm:$0xf]  ;;  %v3351_v23 = vcombine.low %v79_v12, %v80_v13  ;;  %v4260_v28 = vld [vmem:[%s6779_s1 + $0x60] sm:$0xff]  }
   0x7   :  { %3965 = vmatpush3.bf16.msra.mxu0 %v4253_v2  ;;  %v218_v24 = vmax.bf16 %v4268_v11, %v3136_v21  ;;  %v219_v25 = vmax.bf16 %v4268_v11, %v3137_v22  ;;  %v3420_v27 = vcombine.low %v216_v15, %v217_v18  ;;  %v19_v29 = vld [vmem:[%s6780_s0 + $0x10] sm:$0xf]  ;;  %v20_v30 = vld [vmem:[%s6780_s0 + $0x14] sm:$0xf]  ;;  %v21_v39 = vld [vmem:[%s6780_s0 + $0x18] sm:$0xf] }
   0x8   :  { %4037 = vmatpush3.bf16.msra.mxu1 %v4254_v3  ;;  %3966 = vmatprep.subr.bf16.mxu0 %v4255_v4  ;;  %v83_v31 = vmax.bf16 %v4268_v11, %v19_v29  ;;  %v3138_v32 = vld [vmem:[%s6780_s0 + $0x110] sm:$0xf]  ;;  %v3139_v33 = vld [vmem:[%s6780_s0 + $0x114] sm:$0xf]  ;;  %v3352_v34 = vcombine.low %v81_v19, %v82_v20  ;;  %v84_v35 = vmax.bf16 %v4268_v11, %v20_v30  ;;  %v22_v40 = vld [vmem:[%s6780_s0 + $0x1c] sm:$0xf] }
   0x9   :  { %4038 = vmatprep.subr.bf16.mxu1 %v4256_v5  ;;  %3970 = vmatprep.mubr.msk.bf16.mxu0 %vm756_vm0, %v3351_v23  ;;  %v220_v36 = vmax.bf16 %v4268_v11, %v3138_v32  ;;  %v221_v37 = vmax.bf16 %v4268_v11, %v3139_v33  ;;  %v3421_v38 = vcombine.low %v218_v24, %v219_v25  ;;  %v3140_v41 = vld [vmem:[%s6780_s0 + $0x118] sm:$0xf]  ;;  %v3141_v43 = vld [vmem:[%s6780_s0 + $0x11c] sm:$0xf]  ;;  %v23_v44 = vld [vmem:[%s6780_s0 + $0x20] sm:$0xf] }
   0xa   :  { %4042 = vmatprep.mubr.msk.bf16.mxu1 %vm756_vm0, %v3420_v27  ;;  %v3353_v42 = vcombine.low %v83_v31, %v84_v35  ;;  %v24_v45 = vld [vmem:[%s6780_s0 + $0x24] sm:$0xf]  ;;  %v3142_v47 = vld [vmem:[%s6780_s0 + $0x120] sm:$0xf]  ;;  %v85_v49 = vmax.bf16 %v4268_v11, %v21_v39  ;;  %v86_v50 = vmax.bf16 %v4268_v11, %v22_v40  ;;  %v222_v51 = vmax.bf16 %v4268_v11, %v3140_v41  ;;  %v25_v57 = vld [vmem:[%s6780_s0 + $0x28] sm:$0xf] }
   0xb   :  { %3967 = vmatpush3.bf16.msra.mxu0 %v4255_v4  ;;  %v3422_v46 = vcombine.low %v220_v36, %v221_v37  ;;  %v3143_v48 = vld [vmem:[%s6780_s0 + $0x124] sm:$0xf]  ;;  %v223_v52 = vmax.bf16 %v4268_v11, %v3141_v43  ;;  %v87_v53 = vmax.bf16 %v4268_v11, %v23_v44  ;;  %v88_v54 = vmax.bf16 %v4268_v11, %v24_v45  ;;  %v26_v58 = vld [vmem:[%s6780_s0 + $0x2c] sm:$0xf]  ;;  %v3144_v60 = vld [vmem:[%s6780_s0 + $0x128] sm:$0xf] }
   0xc   :  { %4039 = vmatpush3.bf16.msra.mxu1 %v4256_v5  ;;  %3968 = vmatprep.subr.bf16.mxu0 %v4257_v6  ;;  %v224_v55 = vmax.bf16 %v4268_v11, %v3142_v47  ;;  %v225_v56 = vmax.bf16 %v4268_v11, %v3143_v48  ;;  %v3354_v59 = vcombine.low %v85_v49, %v86_v50  ;;  %v3145_v61 = vld [vmem:[%s6780_s0 + $0x12c] sm:$0xf]  ;;  %v27_v62 = vld [vmem:[%s6780_s0 + $0x30] sm:$0xf]  ;;  %v28_v1 = vld [vmem:[%s6780_s0 + $0x34] sm:$0xf] }
   0xd   :  { %4040 = vmatprep.subr.bf16.mxu1 %v4258_v7  ;;  %v3423_v63 = vcombine.low %v222_v51, %v223_v52  ;;  %v3355_v0 = vcombine.low %v87_v53, %v88_v54  ;;  %v4261_v3 = vld [vmem:[%s6779_s1 + $0x48] sm:$0xff]   ;;  %v3146_v4 = vld [vmem:[%s6780_s0 + $0x130] sm:$0xf]  ;;  %v3147_v5 = vld [vmem:[%s6780_s0 + $0x134] sm:$0xf]  ;;  %v90_v8 = vmax.bf16 %v4268_v11, %v26_v58  ;;  %v226_v9 = vmax.bf16 %v4268_v11, %v3144_v60 }
   0xe   :  { %v3424_v2 = vcombine.low %v224_v55, %v225_v56  ;;  %v227_v10 = vmax.bf16 %v4268_v11, %v3145_v61  ;;  %v91_v12 = vmax.bf16 %v4268_v11, %v27_v62  ;;  %v92_v13 = vmax.bf16 %v4268_v11, %v28_v1  ;;  %v29_v19 = vld [vmem:[%s6780_s0 + $0x38] sm:$0xf]  ;;  %v30_v20 = vld [vmem:[%s6780_s0 + $0x3c] sm:$0xf]  ;;  %v31_v24 = vld [vmem:[%s6780_s0 + $0x40] sm:$0xf] }
   0xf   :  { %3969 = vmatpush3.bf16.msra.mxu0 %v4257_v6  ;;  %v4262_v6 = vld [vmem:[%s6779_s1 + $0x68] sm:$0xff]   ;;  %v228_v14 = vmax.bf16 %v4268_v11, %v3146_v4  ;;  %v229_v15 = vmax.bf16 %v4268_v11, %v3147_v5  ;;  %v3148_v21 = vld [vmem:[%s6780_s0 + $0x138] sm:$0xf]  ;;  %v3149_v23 = vld [vmem:[%s6780_s0 + $0x13c] sm:$0xf]  ;;  %v94_v29 = vmax.bf16 %v4268_v11, %v30_v20  ;;  %v95_v32 = vmax.bf16 %v4268_v11, %v31_v24 }
  0x10   :  { %4041 = vmatpush3.bf16.msra.mxu1 %v4258_v7  ;;  %4106 = vmatprep.subr.bf16.mxu0 %v4259_v26  ;;  %v89_v7 = vmax.bf16 %v4268_v11, %v25_v57  ;;  %v3425_v17 = vcombine.low %v226_v9, %v227_v10  ;;  %v3357_v18 = vcombine.low %v91_v12, %v92_v13  ;;  %v32_v25 = vld [vmem:[%s6780_s0 + $0x44] sm:$0xf]  ;;  %v4263_v36 = vld [vmem:[%s6779_s1 + $0x50] sm:$0xff]   ;;  %v33_v41 = vld [vmem:[%s6780_s0 + $0x48] sm:$0xf] }
  0x11   :  { %4178 = vmatprep.subr.bf16.mxu1 %v4260_v28  ;;  %v3426_v22 = vcombine.low %v228_v14, %v229_v15  ;;  %v3151_v27 = vld [vmem:[%s6780_s0 + $0x144] sm:$0xf]  ;;  %v230_v30 = vmax.bf16 %v4268_v11, %v3148_v21  ;;  %v231_v31 = vmax.bf16 %v4268_v11, %v3149_v23  ;;  %v96_v33 = vmax.bf16 %v4268_v11, %v32_v25  ;;  %v4264_v37 = vld [vmem:[%s6779_s1 + $0x70] sm:$0xff]   ;;  %v3152_v43 = vld [vmem:[%s6780_s0 + $0x148] sm:$0xf] }
  0x12   :  { %3971 = vmatmul.mubr.msk.bf16.vlgmr.msra.gmra.mrb[0].mxu0 %vm756_vm0, %v3352_v34  ;;  %v3356_v16 = vcombine.low %v89_v7, %v90_v8  ;;  %v233_v35 = vmax.bf16 %v4268_v11, %v3151_v27  ;;  %v3153_v45 = vld [vmem:[%s6780_s0 + $0x14c] sm:$0xf]  ;;  %v36_v47 = vld [vmem:[%s6780_s0 + $0x54] sm:$0xf]  ;;  %v3154_v48 = vld [vmem:[%s6780_s0 + $0x150] sm:$0xf]  ;;  %v97_v50 = vmax.bf16 %v4268_v11, %v33_v41  ;;  %v234_v52 = vmax.bf16 %v4268_v11, %v3152_v43 }
  0x13   :  { %4043 = vmatmul.mubr.msk.bf16.vlgmr.msra.gmra.mrb[0].mxu1 %vm756_vm0, %v3421_v38  ;;  %4107 = vmatpush3.bf16.msra.mxu0 %v4259_v26  ;;  %v3150_v26 = vld [vmem:[%s6780_s0 + $0x140] sm:$0xf]  ;;  %v3427_v39 = vcombine.low %v230_v30, %v231_v31  ;;  %v3359_v40 = vcombine.low %v95_v32, %v96_v33  ;;  %v3155_v49 = vld [vmem:[%s6780_s0 + $0x154] sm:$0xf]  ;;  %v235_v53 = vmax.bf16 %v4268_v11, %v3153_v45  ;;  %v38_v60 = vld [vmem:[%s6780_s0 + $0x5c] sm:$0xf] }
  0x14   :  { %4179 = vmatpush3.bf16.msra.mxu1 %v4260_v28  ;;  %3974 = vmatprep.mubr.msk.bf16.mxu0 %vm756_vm0, %v3353_v42  ;;  %v93_v28 = vmax.bf16 %v4268_v11, %v29_v19  ;;  %v232_v34 = vmax.bf16 %v4268_v11, %v3150_v26  ;;  %v34_v42 = vld [vmem:[%s6780_s0 + $0x4c] sm:$0xf]  ;;  %v100_v55 = vmax.bf16 %v4268_v11, %v36_v47  ;;  %v3156_v61 = vld [vmem:[%s6780_s0 + $0x158] sm:$0xf]  ;;  %v39_v1 = vld [vmem:[%s6780_s0 + $0x60] sm:$0xf] }
  0x15   :  { %4046 = vmatprep.mubr.msk.bf16.mxu1 %vm756_vm0, %v3422_v46  ;;  %4108 = vmatprep.subr.bf16.mxu0 %v4261_v3  ;;  %v35_v46 = vld [vmem:[%s6780_s0 + $0x50] sm:$0xf]  ;;  %v98_v51 = vmax.bf16 %v4268_v11, %v34_v42  ;;  %v236_v56 = vmax.bf16 %v4268_v11, %v3154_v48  ;;  %v237_v57 = vmax.bf16 %v4268_v11, %v3155_v49  ;;  %v3158_v4 = vld [vmem:[%s6780_s0 + $0x160] sm:$0xf]  ;;  %v3159_v5 = vld [vmem:[%s6780_s0 + $0x164] sm:$0xf] }
  0x16   :  { %4180 = vmatprep.subr.bf16.mxu1 %v4262_v6  ;;  %v3358_v38 = vcombine.low %v93_v28, %v94_v29  ;;  %v3428_v44 = vcombine.low %v232_v34, %v233_v35  ;;  %v99_v54 = vmax.bf16 %v4268_v11, %v35_v46  ;;  %v3429_v62 = vcombine.low %v234_v52, %v235_v53  ;;  %v4266_v10 = vld [vmem:[%s6779_s1 + $0x78] sm:$0xff]   ;;  %v41_v20 = vld [vmem:[%s6780_s0 + $0x68] sm:$0xf]  ;;  %v42_v21 = vld [vmem:[%s6780_s0 + $0x6c] sm:$0xf] }
  0x17   :  { %4109 = vmatpush3.bf16.msra.mxu0 %v4261_v3  ;;  %v3360_v58 = vcombine.low %v97_v50, %v98_v51  ;;  %v3430_v3 = vcombine.low %v236_v56, %v237_v57  ;;  %v102_v8 = vmax.bf16 %v4268_v11, %v38_v60  ;;  %v238_v9 = vmax.bf16 %v4268_v11, %v3156_v61  ;;  %v3161_v24 = vld [vmem:[%s6780_s0 + $0x16c] sm:$0xf]  ;;  %v43_v25 = vld [vmem:[%s6780_s0 + $0x70] sm:$0xf]  ;;  %v44_v26 = vld [vmem:[%s6780_s0 + $0x74] sm:$0xf] }
  0x18   :  { %4181 = vmatpush3.bf16.msra.mxu1 %v4262_v6  ;;  %4110 = vmatprep.subr.bf16.mxu0 %v4263_v36  ;;  %v4265_v6 = vld [vmem:[%s6779_s1 + $0x58] sm:$0xff]   ;;  %v103_v13 = vmax.bf16 %v4268_v11, %v39_v1  ;;  %v240_v15 = vmax.bf16 %v4268_v11, %v3158_v4  ;;  %v3162_v27 = vld [vmem:[%s6780_s0 + $0x170] sm:$0xf]  ;;  %v3163_v28 = vld [vmem:[%s6780_s0 + $0x174] sm:$0xf]  ;;  %v105_v29 = vmax.bf16 %v4268_v11, %v41_v20 }
  0x19   :  { %4182 = vmatprep.subr.bf16.mxu1 %v4264_v37  ;;  %v106_v30 = vmax.bf16 %v4268_v11, %v42_v21  ;;  %v243_v32 = vmax.bf16 %v4268_v11, %v3161_v24  ;;  %v107_v33 = vmax.bf16 %v4268_v11, %v43_v25  ;;  %v108_v34 = vmax.bf16 %v4268_v11, %v44_v26  ;;  %v46_v41 = vld [vmem:[%s6780_s0 + $0x7c] sm:$0xf]  ;;  %v3164_v42 = vld [vmem:[%s6780_s0 + $0x178] sm:$0xf]  ;;  %v47_v45 = vld [vmem:[%s6780_s0 + $0x80] sm:$0xf] }
  0x1a   :  { %3975 = vmatmul.mubr.msk.bf16.gmra.mrb[4].mxu0 %vm756_vm0, %v3354_v59  ;;  %v37_v59 = vld [vmem:[%s6780_s0 + $0x58] sm:$0xf]  ;;  %v244_v35 = vmax.bf16 %v4268_v11, %v3162_v27  ;;  %v48_v46 = vld [vmem:[%s6780_s0 + $0x84] sm:$0xf]  ;;  %v3166_v47 = vld [vmem:[%s6780_s0 + $0x180] sm:$0xf]  ;;  %v110_v50 = vmax.bf16 %v4268_v11, %v46_v41  ;;  %v246_v51 = vmax.bf16 %v4268_v11, %v3164_v42  ;;  %v111_v53 = vmax.bf16 %v4268_v11, %v47_v45 }
  0x1b   :  { %4047 = vmatmul.mubr.msk.bf16.gmra.mrb[4].mxu1 %vm756_vm0, %v3423_v63  ;;  %3978 = vmatprep.mubr.msk.bf16.mxu0 %vm756_vm0, %v3355_v0  ;;  %v3361_v63 = vcombine.low %v99_v54, %v100_v55  ;;  %v3157_v0 = vld [vmem:[%s6780_s0 + $0x15c] sm:$0xf]  ;;  %v101_v7 = vmax.bf16 %v4268_v11, %v37_v59  ;;  %v3167_v48 = vld [vmem:[%s6780_s0 + $0x184] sm:$0xf]  ;;  %v112_v54 = vmax.bf16 %v4268_v11, %v48_v46  ;;  %v49_v60 = vld [vmem:[%s6780_s0 + $0x88] sm:$0xf] }
  0x1c   :  { %4050 = vmatprep.mubr.msk.bf16.mxu1 %vm756_vm0, %v3424_v2  ;;  %4111 = vmatpush3.bf16.msra.mxu0 %v4263_v36  ;;  %v40_v2 = vld [vmem:[%s6780_s0 + $0x64] sm:$0xf]  ;;  %v239_v12 = vmax.bf16 %v4268_v11, %v3157_v0  ;;  %v245_v36 = vmax.bf16 %v4268_v11, %v3163_v28  ;;  %v248_v55 = vmax.bf16 %v4268_v11, %v3166_v47  ;;  %v50_v61 = vld [vmem:[%s6780_s0 + $0x8c] sm:$0xf]  ;;  %v51_v1 = vld [vmem:[%s6780_s0 + $0x90] sm:$0xf] }
  0x1d   :  { %4183 = vmatpush3.bf16.msra.mxu1 %v4264_v37  ;;  %v104_v14 = vmax.bf16 %v4268_v11, %v40_v2  ;;  %4112 = vmatprep.subr.bf16.mxu0 %v4265_v6  ;;  %v3364_v37 = vcombine.low %v105_v29, %v106_v30  ;;  %v249_v56 = vmax.bf16 %v4268_v11, %v3167_v48  ;;  %v3169_v0 = vld [vmem:[%s6780_s0 + $0x18c] sm:$0xf]  ;;  %v52_v2 = vld [vmem:[%s6780_s0 + $0x94] sm:$0xf]  ;;  %v3173_v21 = vld [vmem:[%s6780_s0 + $0x19c] sm:$0xf] }
  0x1e   :  { %4184 = vmatprep.subr.bf16.mxu1 %v4266_v10  ;;  %v3434_v43 = vcombine.low %v244_v35, %v245_v36  ;;  %v3367_v59 = vcombine.low %v111_v53, %v112_v54  ;;  %v3171_v4 = vld [vmem:[%s6780_s0 + $0x194] sm:$0xf]  ;;  %v3174_v24 = vld [vmem:[%s6780_s0 + $0x1a0] sm:$0xf]  ;;  %v3175_v25 = vld [vmem:[%s6780_s0 + $0x1a4] sm:$0xf]  ;;  %v255_v29 = vmax.bf16 %v4268_v11, %v3173_v21 }
  0x1f   :  { %v3363_v19 = vcombine.low %v103_v13, %v104_v14  ;;  %v253_v13 = vmax.bf16 %v4268_v11, %v3171_v4  ;;  %v3177_v41 = vld [vmem:[%s6780_s0 + $0x1ac] sm:$0xf]  ;;  %v59_v42 = vld [vmem:[%s6780_s0 + $0xb0] sm:$0xf]  ;;  %v3179_v45 = vld [vmem:[%s6780_s0 + $0x1b4] sm:$0xf] }
  0x20   :  { %4113 = vmatpush3.bf16.msra.mxu0 %v4265_v6  ;;  %v114_v6 = vmax.bf16 %v4268_v11, %v50_v61  ;;  %v261_v53 = vmax.bf16 %v4268_v11, %v3179_v45  ;;  %v3181_v61 = vld [vmem:[%s6780_s0 + $0x1bc] sm:$0xf]  ;;  %v3186_v21 = vld [vmem:[%s6780_s0 + $0x1d0] sm:$0xf] }
  0x21   :  { %4185 = vmatpush3.bf16.msra.mxu1 %v4266_v10  ;;  %v116_v10 = vmax.bf16 %v4268_v11, %v52_v2 }
  0x22   :  { %3979 = vmatmul.mubr.msk.bf16.gmra.mrb[8].mxu0 %vm756_vm0, %v3356_v16  ;;  %v241_v16 = vmax.bf16 %v4268_v11, %v3159_v5  ;;  %v113_v5 = vmax.bf16 %v4268_v11, %v49_v60 }
  0x23   :  { %4051 = vmatmul.mubr.msk.bf16.gmra.mrb[8].mxu1 %vm756_vm0, %v3425_v17  ;;  %3982 = vmatprep.mubr.msk.bf16.mxu0 %vm756_vm0, %v3357_v18  ;;  %v3362_v17 = vcombine.low %v101_v7, %v102_v8  ;;  %v3431_v18 = vcombine.low %v238_v9, %v239_v12  ;;  %v251_v8 = vmax.bf16 %v4268_v11, %v3169_v0  ;;  %v3182_v0 = vld [vmem:[%s6780_s0 + $0x1c0] sm:$0xf] }
  0x24   :  { %4054 = vmatprep.mubr.msk.bf16.mxu1 %vm756_vm0, %v3426_v22  ;;  %v3160_v22 = vld [vmem:[%s6780_s0 + $0x168] sm:$0xf]  ;;  %v3432_v23 = vcombine.low %v240_v15, %v241_v16  ;;  %v115_v9 = vmax.bf16 %v4268_v11, %v51_v1  ;;  %v3368_v14 = vcombine.low %v113_v5, %v114_v6  ;;  %v3183_v1 = vld [vmem:[%s6780_s0 + $0x1c4] sm:$0xf]  ;;  %v263_v5 = vmax.bf16 %v4268_v11, %v3181_v61  ;;  %v3194_v61 = vld [vmem:[%s6780_s0 + $0x1f0] sm:$0xf] }
  0x25   :  { %v242_v31 = vmax.bf16 %v4268_v11, %v3160_v22  ;;  %v55_v22 = vld [vmem:[%s6780_s0 + $0xa0] sm:$0xf] }
  0x26   :  { %v3369_v16 = vcombine.low %v115_v9, %v116_v10  ;;  %v119_v30 = vmax.bf16 %v4268_v11, %v55_v22  ;;  %v265_v9 = vmax.bf16 %v4268_v11, %v3183_v1  ;;  %v3187_v22 = vld [vmem:[%s6780_s0 + $0x1d4] sm:$0xf] }
  0x2a   :  { %3983 = vmatmul.mubr.msk.bf16.gmra.mrb[12].mxu0 %vm756_vm0, %v3358_v38  ;;  %v3433_v38 = vcombine.low %v242_v31, %v243_v32  ;;  %v256_v32 = vmax.bf16 %v4268_v11, %v3174_v24 }
  0x2b   :  { %4055 = vmatmul.mubr.msk.bf16.gmra.mrb[12].mxu1 %vm756_vm0, %v3427_v39  ;;  %3986 = vmatprep.mubr.msk.bf16.mxu0 %vm756_vm0, %v3359_v40  ;;  %v3365_v39 = vcombine.low %v107_v33, %v108_v34  ;;  %v45_v40 = vld [vmem:[%s6780_s0 + $0x78] sm:$0xf]  ;;  %v257_v33 = vmax.bf16 %v4268_v11, %v3175_v25 }
  0x2c   :  { %4058 = vmatprep.mubr.msk.bf16.mxu1 %vm756_vm0, %v3428_v44  ;;  %v3165_v44 = vld [vmem:[%s6780_s0 + $0x17c] sm:$0xf]  ;;  %v109_v49 = vmax.bf16 %v4268_v11, %v45_v40 }
  0x2d   :  { %v247_v52 = vmax.bf16 %v4268_v11, %v3165_v44  ;;  %v3440_v40 = vcombine.low %v256_v32, %v257_v33  ;;  %v3178_v44 = vld [vmem:[%s6780_s0 + $0x1b0] sm:$0xf] }
  0x2e   :  { %v3366_v57 = vcombine.low %v109_v49, %v110_v50  ;;  %v259_v49 = vmax.bf16 %v4268_v11, %v3177_v41  ;;  %v123_v50 = vmax.bf16 %v4268_v11, %v59_v42  ;;  %v3190_v41 = vld [vmem:[%s6780_s0 + $0x1e0] sm:$0xf]  ;;  %v3191_v42 = vld [vmem:[%s6780_s0 + $0x1e4] sm:$0xf] }
  0x32   :  { %3987 = vmatmul.mubr.msk.bf16.gmra.mrb[16].mxu0 %vm756_vm0, %v3360_v58  ;;  %v3435_v58 = vcombine.low %v246_v51, %v247_v52  ;;  %v260_v52 = vmax.bf16 %v4268_v11, %v3178_v44 }
  0x33   :  { %4059 = vmatmul.mubr.msk.bf16.gmra.mrb[16].mxu1 %vm756_vm0, %v3429_v62  ;;  %3990 = vmatprep.mubr.msk.bf16.mxu0 %vm756_vm0, %v3361_v63  ;;  %v3168_v62 = vld [vmem:[%s6780_s0 + $0x188] sm:$0xf]  ;;  %v3436_v63 = vcombine.low %v248_v55, %v249_v56 }
  0x34   :  { %4062 = vmatprep.mubr.msk.bf16.mxu1 %vm756_vm0, %v3430_v3  ;;  %v3170_v3 = vld [vmem:[%s6780_s0 + $0x190] sm:$0xf]  ;;  %v250_v7 = vmax.bf16 %v4268_v11, %v3168_v62  ;;  %v3442_v60 = vcombine.low %v260_v52, %v261_v53  ;;  %v63_v62 = vld [vmem:[%s6780_s0 + $0xc0] sm:$0xf] }
  0x35   :  { %v252_v12 = vmax.bf16 %v4268_v11, %v3170_v3  ;;  %v127_v6 = vmax.bf16 %v4268_v11, %v63_v62  ;;  %v3195_v62 = vld [vmem:[%s6780_s0 + $0x1f4] sm:$0xf] }
  0x36   :  { %v3437_v15 = vcombine.low %v250_v7, %v251_v8  ;;  %v264_v8 = vmax.bf16 %v4268_v11, %v3182_v0 }
  0x37   :  { %v3438_v20 = vcombine.low %v252_v12, %v253_v13 }
  0x3a   :  { %3991 = vmatmul.mubr.msk.bf16.gmra.mrb[20].mxu0 %vm756_vm0, %v3362_v17  ;;  %v53_v17 = vld [vmem:[%s6780_s0 + $0x98] sm:$0xf] }
  0x3b   :  { %4063 = vmatmul.mubr.msk.bf16.gmra.mrb[20].mxu1 %vm756_vm0, %v3431_v18  ;;  %3994 = vmatprep.mubr.msk.bf16.mxu0 %vm756_vm0, %v3363_v19  ;;  %v54_v18 = vld [vmem:[%s6780_s0 + $0x9c] sm:$0xf]  ;;  %v3172_v19 = vld [vmem:[%s6780_s0 + $0x198] sm:$0xf]  ;;  %v117_v26 = vmax.bf16 %v4268_v11, %v53_v17  ;;  %v3444_v17 = vcombine.low %v264_v8, %v265_v9 }
  0x3c   :  { %4066 = vmatprep.mubr.msk.bf16.mxu1 %vm756_vm0, %v3432_v23  ;;  %v56_v23 = vld [vmem:[%s6780_s0 + $0xa4] sm:$0xf]  ;;  %v118_v27 = vmax.bf16 %v4268_v11, %v54_v18  ;;  %v254_v28 = vmax.bf16 %v4268_v11, %v3172_v19  ;;  %v3185_v18 = vld [vmem:[%s6780_s0 + $0x1cc] sm:$0xf]  ;;  %v67_v19 = vld [vmem:[%s6780_s0 + $0xd0] sm:$0xf] }
  0x3d   :  { %v120_v31 = vmax.bf16 %v4268_v11, %v56_v23 }
  0x3e   :  { %v3370_v34 = vcombine.low %v117_v26, %v118_v27  ;;  %v3439_v35 = vcombine.low %v254_v28, %v255_v29  ;;  %v267_v26 = vmax.bf16 %v4268_v11, %v3185_v18  ;;  %v131_v27 = vmax.bf16 %v4268_v11, %v67_v19  ;;  %v3278_v18 = vld [vmem:[%s6780_s0 + $0x300] sm:$0xf]  ;;  %v3279_v19 = vld [vmem:[%s6780_s0 + $0x304] sm:$0xf] }
  0x3f   :  { %v3371_v36 = vcombine.low %v119_v30, %v120_v31  ;;  %v268_v29 = vmax.bf16 %v4268_v11, %v3186_v21  ;;  %v269_v30 = vmax.bf16 %v4268_v11, %v3187_v22 }
  0x42   :  { %3995 = vmatmul.mubr.msk.bf16.gmra.mrb[24].mxu0 %vm756_vm0, %v3364_v37  ;;  %v57_v37 = vld [vmem:[%s6780_s0 + $0xa8] sm:$0xf] }
  0x43   :  { %4067 = vmatmul.mubr.msk.bf16.gmra.mrb[24].mxu1 %vm756_vm0, %v3433_v38  ;;  %3998 = vmatprep.mubr.msk.bf16.mxu0 %vm756_vm0, %v3365_v39  ;;  %v58_v38 = vld [vmem:[%s6780_s0 + $0xac] sm:$0xf]  ;;  %v3176_v39 = vld [vmem:[%s6780_s0 + $0x1a8] sm:$0xf]  ;;  %v121_v46 = vmax.bf16 %v4268_v11, %v57_v37  ;;  %v3446_v37 = vcombine.low %v268_v29, %v269_v30 }
  0x44   :  { %4070 = vmatprep.mubr.msk.bf16.mxu1 %vm756_vm0, %v3434_v43  ;;  %v60_v43 = vld [vmem:[%s6780_s0 + $0xb4] sm:$0xf]  ;;  %v122_v47 = vmax.bf16 %v4268_v11, %v58_v38  ;;  %v258_v48 = vmax.bf16 %v4268_v11, %v3176_v39  ;;  %v3189_v38 = vld [vmem:[%s6780_s0 + $0x1dc] sm:$0xf]  ;;  %v71_v39 = vld [vmem:[%s6780_s0 + $0xe0] sm:$0xf] }
  0x45   :  { %v124_v51 = vmax.bf16 %v4268_v11, %v60_v43 }
  0x46   :  { %v3372_v54 = vcombine.low %v121_v46, %v122_v47  ;;  %v3441_v55 = vcombine.low %v258_v48, %v259_v49  ;;  %v271_v46 = vmax.bf16 %v4268_v11, %v3189_v38  ;;  %v135_v47 = vmax.bf16 %v4268_v11, %v71_v39  ;;  %v3282_v38 = vld [vmem:[%s6780_s0 + $0x310] sm:$0xf]  ;;  %v3283_v39 = vld [vmem:[%s6780_s0 + $0x314] sm:$0xf] }
  0x47   :  { %v3373_v56 = vcombine.low %v123_v50, %v124_v51  ;;  %v272_v49 = vmax.bf16 %v4268_v11, %v3190_v41  ;;  %v273_v50 = vmax.bf16 %v4268_v11, %v3191_v42 }
  0x4a   :  { %3999 = vmatmul.mubr.msk.bf16.gmra.mrb[28].mxu0 %vm756_vm0, %v3366_v57  ;;  %v61_v57 = vld [vmem:[%s6780_s0 + $0xb8] sm:$0xf] }
  0x4b   :  { %4071 = vmatmul.mubr.msk.bf16.gmra.mrb[28].mxu1 %vm756_vm0, %v3435_v58  ;;  %4002 = vmatprep.mubr.msk.bf16.mxu0 %vm756_vm0, %v3367_v59  ;;  %v62_v58 = vld [vmem:[%s6780_s0 + $0xbc] sm:$0xf]  ;;  %v3180_v59 = vld [vmem:[%s6780_s0 + $0x1b8] sm:$0xf]  ;;  %v125_v2 = vmax.bf16 %v4268_v11, %v61_v57  ;;  %v3448_v57 = vcombine.low %v272_v49, %v273_v50 }
  0x4c   :  { %4074 = vmatprep.mubr.msk.bf16.mxu1 %vm756_vm0, %v3436_v63  ;;  %v64_v63 = vld [vmem:[%s6780_s0 + $0xc4] sm:$0xf]  ;;  %v126_v3 = vmax.bf16 %v4268_v11, %v62_v58  ;;  %v262_v4 = vmax.bf16 %v4268_v11, %v3180_v59  ;;  %v3193_v58 = vld [vmem:[%s6780_s0 + $0x1ec] sm:$0xf]  ;;  %v75_v59 = vld [vmem:[%s6780_s0 + $0xf0] sm:$0xf] }
  0x4d   :  { %v128_v7 = vmax.bf16 %v4268_v11, %v64_v63 }
  0x4e   :  { %v3374_v10 = vcombine.low %v125_v2, %v126_v3  ;;  %v3443_v12 = vcombine.low %v262_v4, %v263_v5  ;;  %v275_v2 = vmax.bf16 %v4268_v11, %v3193_v58  ;;  %v139_v3 = vmax.bf16 %v4268_v11, %v75_v59  ;;  %v3286_v58 = vld [vmem:[%s6780_s0 + $0x320] sm:$0xf]  ;;  %v3287_v59 = vld [vmem:[%s6780_s0 + $0x324] sm:$0xf] }
  0x4f   :  { %v3375_v13 = vcombine.low %v127_v6, %v128_v7  ;;  %v276_v5 = vmax.bf16 %v4268_v11, %v3194_v61  ;;  %v277_v6 = vmax.bf16 %v4268_v11, %v3195_v62 }
  0x52   :  { %4003 = vmatmul.mubr.msk.bf16.gmra.mrb[32].mxu0 %vm756_vm0, %v3368_v14  ;;  %v65_v14 = vld [vmem:[%s6780_s0 + $0xc8] sm:$0xf] }
  0x53   :  { %4075 = vmatmul.mubr.msk.bf16.gmra.mrb[32].mxu1 %vm756_vm0, %v3437_v15  ;;  %4006 = vmatprep.mubr.msk.bf16.mxu0 %vm756_vm0, %v3369_v16  ;;  %v66_v15 = vld [vmem:[%s6780_s0 + $0xcc] sm:$0xf]  ;;  %v3184_v16 = vld [vmem:[%s6780_s0 + $0x1c8] sm:$0xf]  ;;  %v129_v23 = vmax.bf16 %v4268_v11, %v65_v14  ;;  %v3450_v14 = vcombine.low %v276_v5, %v277_v6 }
  0x54   :  { %4078 = vmatprep.mubr.msk.bf16.mxu1 %vm756_vm0, %v3438_v20  ;;  %v68_v20 = vld [vmem:[%s6780_s0 + $0xd4] sm:$0xf]  ;;  %v130_v24 = vmax.bf16 %v4268_v11, %v66_v15  ;;  %v266_v25 = vmax.bf16 %v4268_v11, %v3184_v16  ;;  %v3197_v15 = vld [vmem:[%s6780_s0 + $0x1fc] sm:$0xf]  ;;  %v3206_v16 = vld [vmem:[%s6780_s0 + $0x200] sm:$0xf] }
  0x55   :  { %v132_v28 = vmax.bf16 %v4268_v11, %v68_v20 }
  0x56   :  { %v3376_v31 = vcombine.low %v129_v23, %v130_v24  ;;  %v3445_v32 = vcombine.low %v266_v25, %v267_v26  ;;  %v279_v23 = vmax.bf16 %v4268_v11, %v3197_v15  ;;  %v354_v24 = vmax.bf16 %v4268_v11, %v3206_v16  ;;  %v3290_v15 = vld [vmem:[%s6780_s0 + $0x330] sm:$0xf]  ;;  %v3291_v16 = vld [vmem:[%s6780_s0 + $0x334] sm:$0xf] }
  0x57   :  { %v3377_v33 = vcombine.low %v131_v27, %v132_v28  ;;  %v492_v26 = vmax.bf16 %v4268_v11, %v3278_v18  ;;  %v493_v27 = vmax.bf16 %v4268_v11, %v3279_v19 }
  0x5a   :  { %4007 = vmatmul.mubr.msk.bf16.gmra.mrb[36].mxu0 %vm756_vm0, %v3370_v34  ;;  %v69_v34 = vld [vmem:[%s6780_s0 + $0xd8] sm:$0xf] }
  0x5b   :  { %4079 = vmatmul.mubr.msk.bf16.gmra.mrb[36].mxu1 %vm756_vm0, %v3439_v35  ;;  %4010 = vmatprep.mubr.msk.bf16.mxu0 %vm756_vm0, %v3371_v36  ;;  %v70_v35 = vld [vmem:[%s6780_s0 + $0xdc] sm:$0xf]  ;;  %v3188_v36 = vld [vmem:[%s6780_s0 + $0x1d8] sm:$0xf]  ;;  %v133_v43 = vmax.bf16 %v4268_v11, %v69_v34  ;;  %v3686_v34 = vcombine.low %v492_v26, %v493_v27 }
  0x5c   :  { %4082 = vmatprep.mubr.msk.bf16.mxu1 %vm756_vm0, %v3440_v40  ;;  %v72_v40 = vld [vmem:[%s6780_s0 + $0xe4] sm:$0xf]  ;;  %v134_v44 = vmax.bf16 %v4268_v11, %v70_v35  ;;  %v270_v45 = vmax.bf16 %v4268_v11, %v3188_v36  ;;  %v3281_v35 = vld [vmem:[%s6780_s0 + $0x30c] sm:$0xf]  ;;  %v3210_v36 = vld [vmem:[%s6780_s0 + $0x210] sm:$0xf] }
  0x5d   :  { %v136_v48 = vmax.bf16 %v4268_v11, %v72_v40 }
  0x5e   :  { %v3378_v51 = vcombine.low %v133_v43, %v134_v44  ;;  %v3447_v52 = vcombine.low %v270_v45, %v271_v46  ;;  %v495_v43 = vmax.bf16 %v4268_v11, %v3281_v35  ;;  %v358_v44 = vmax.bf16 %v4268_v11, %v3210_v36  ;;  %v3294_v35 = vld [vmem:[%s6780_s0 + $0x340] sm:$0xf]  ;;  %v3295_v36 = vld [vmem:[%s6780_s0 + $0x344] sm:$0xf] }
  0x5f   :  { %v3379_v53 = vcombine.low %v135_v47, %v136_v48  ;;  %v496_v46 = vmax.bf16 %v4268_v11, %v3282_v38  ;;  %v497_v47 = vmax.bf16 %v4268_v11, %v3283_v39 }
  0x62   :  { %4011 = vmatmul.mubr.msk.bf16.gmra.mrb[40].mxu0 %vm756_vm0, %v3372_v54  ;;  %v73_v54 = vld [vmem:[%s6780_s0 + $0xe8] sm:$0xf] }
  0x63   :  { %4083 = vmatmul.mubr.msk.bf16.gmra.mrb[40].mxu1 %vm756_vm0, %v3441_v55  ;;  %4014 = vmatprep.mubr.msk.bf16.mxu0 %vm756_vm0, %v3373_v56  ;;  %v74_v55 = vld [vmem:[%s6780_s0 + $0xec] sm:$0xf]  ;;  %v3192_v56 = vld [vmem:[%s6780_s0 + $0x1e8] sm:$0xf]  ;;  %v137_v63 = vmax.bf16 %v4268_v11, %v73_v54  ;;  %v3688_v54 = vcombine.low %v496_v46, %v497_v47 }
  0x64   :  { %4086 = vmatprep.mubr.msk.bf16.mxu1 %vm756_vm0, %v3442_v60  ;;  %v76_v60 = vld [vmem:[%s6780_s0 + $0xf4] sm:$0xf]  ;;  %v138_v0 = vmax.bf16 %v4268_v11, %v74_v55  ;;  %v274_v1 = vmax.bf16 %v4268_v11, %v3192_v56  ;;  %v3285_v55 = vld [vmem:[%s6780_s0 + $0x31c] sm:$0xf]  ;;  %v3214_v56 = vld [vmem:[%s6780_s0 + $0x220] sm:$0xf] }
  0x65   :  { %v140_v4 = vmax.bf16 %v4268_v11, %v76_v60 }
  0x66   :  { %v3380_v7 = vcombine.low %v137_v63, %v138_v0  ;;  %v3449_v8 = vcombine.low %v274_v1, %v275_v2  ;;  %v499_v63 = vmax.bf16 %v4268_v11, %v3285_v55  ;;  %v362_v0 = vmax.bf16 %v4268_v11, %v3214_v56  ;;  %v3298_v55 = vld [vmem:[%s6780_s0 + $0x350] sm:$0xf]  ;;  %v3299_v56 = vld [vmem:[%s6780_s0 + $0x354] sm:$0xf] }
  0x67   :  { %v3381_v9 = vcombine.low %v139_v3, %v140_v4  ;;  %v500_v2 = vmax.bf16 %v4268_v11, %v3286_v58  ;;  %v501_v3 = vmax.bf16 %v4268_v11, %v3287_v59 }
  0x6a   :  { %4015 = vmatmul.mubr.msk.bf16.gmra.mrb[44].mxu0 %vm756_vm0, %v3374_v10  ;;  %v77_v10 = vld [vmem:[%s6780_s0 + $0xf8] sm:$0xf] }
  0x6b   :  { %4087 = vmatmul.mubr.msk.bf16.gmra.mrb[44].mxu1 %vm756_vm0, %v3443_v12  ;;  %4018 = vmatprep.mubr.msk.bf16.mxu0 %vm756_vm0, %v3375_v13  ;;  %v78_v12 = vld [vmem:[%s6780_s0 + $0xfc] sm:$0xf]  ;;  %v3196_v13 = vld [vmem:[%s6780_s0 + $0x1f8] sm:$0xf]  ;;  %v141_v20 = vmax.bf16 %v4268_v11, %v77_v10  ;;  %v3690_v10 = vcombine.low %v500_v2, %v501_v3 }
  0x6c   :  { %4090 = vmatprep.mubr.msk.bf16.mxu1 %vm756_vm0, %v3444_v17  ;;  %v3207_v17 = vld [vmem:[%s6780_s0 + $0x204] sm:$0xf]  ;;  %v142_v21 = vmax.bf16 %v4268_v11, %v78_v12  ;;  %v278_v22 = vmax.bf16 %v4268_v11, %v3196_v13  ;;  %v3289_v12 = vld [vmem:[%s6780_s0 + $0x32c] sm:$0xf]  ;;  %v3218_v13 = vld [vmem:[%s6780_s0 + $0x230] sm:$0xf] }
  0x6d   :  { %v355_v25 = vmax.bf16 %v4268_v11, %v3207_v17 }
  0x6e   :  { %v3382_v28 = vcombine.low %v141_v20, %v142_v21  ;;  %v3451_v29 = vcombine.low %v278_v22, %v279_v23  ;;  %v503_v20 = vmax.bf16 %v4268_v11, %v3289_v12  ;;  %v366_v21 = vmax.bf16 %v4268_v11, %v3218_v13  ;;  %v3302_v12 = vld [vmem:[%s6780_s0 + $0x360] sm:$0xf]  ;;  %v3303_v13 = vld [vmem:[%s6780_s0 + $0x364] sm:$0xf] }
  0x6f   :  { %v3553_v30 = vcombine.low %v354_v24, %v355_v25  ;;  %v504_v23 = vmax.bf16 %v4268_v11, %v3290_v15  ;;  %v505_v24 = vmax.bf16 %v4268_v11, %v3291_v16 }
  0x72   :  { %4019 = vmatmul.mubr.msk.bf16.gmra.mrb[48].mxu0 %vm756_vm0, %v3376_v31  ;;  %v3208_v31 = vld [vmem:[%s6780_s0 + $0x208] sm:$0xf] }
  0x73   :  { %4091 = vmatmul.mubr.msk.bf16.gmra.mrb[48].mxu1 %vm756_vm0, %v3445_v32  ;;  %4022 = vmatprep.mubr.msk.bf16.mxu0 %vm756_vm0, %v3377_v33  ;;  %v3209_v32 = vld [vmem:[%s6780_s0 + $0x20c] sm:$0xf]  ;;  %v3280_v33 = vld [vmem:[%s6780_s0 + $0x308] sm:$0xf]  ;;  %v356_v40 = vmax.bf16 %v4268_v11, %v3208_v31  ;;  %v3692_v31 = vcombine.low %v504_v23, %v505_v24 }
  0x74   :  { %4094 = vmatprep.mubr.msk.bf16.mxu1 %vm756_vm0, %v3446_v37  ;;  %v3211_v37 = vld [vmem:[%s6780_s0 + $0x214] sm:$0xf]  ;;  %v357_v41 = vmax.bf16 %v4268_v11, %v3209_v32  ;;  %v494_v42 = vmax.bf16 %v4268_v11, %v3280_v33  ;;  %v3293_v32 = vld [vmem:[%s6780_s0 + $0x33c] sm:$0xf]  ;;  %v3222_v33 = vld [vmem:[%s6780_s0 + $0x240] sm:$0xf] }
  0x75   :  { %v359_v45 = vmax.bf16 %v4268_v11, %v3211_v37 }
  0x76   :  { %v3554_v48 = vcombine.low %v356_v40, %v357_v41  ;;  %v3687_v49 = vcombine.low %v494_v42, %v495_v43  ;;  %v507_v40 = vmax.bf16 %v4268_v11, %v3293_v32  ;;  %v370_v41 = vmax.bf16 %v4268_v11, %v3222_v33  ;;  %v3306_v32 = vld [vmem:[%s6780_s0 + $0x370] sm:$0xf]  ;;  %v3307_v33 = vld [vmem:[%s6780_s0 + $0x374] sm:$0xf] }
  0x77   :  { %v3555_v50 = vcombine.low %v358_v44, %v359_v45  ;;  %v508_v43 = vmax.bf16 %v4268_v11, %v3294_v35  ;;  %v509_v44 = vmax.bf16 %v4268_v11, %v3295_v36 }
  0x7a   :  { %4023 = vmatmul.mubr.msk.bf16.gmra.mrb[52].mxu0 %vm756_vm0, %v3378_v51  ;;  %v3212_v51 = vld [vmem:[%s6780_s0 + $0x218] sm:$0xf] }
  0x7b   :  { %4095 = vmatmul.mubr.msk.bf16.gmra.mrb[52].mxu1 %vm756_vm0, %v3447_v52  ;;  %4026 = vmatprep.mubr.msk.bf16.mxu0 %vm756_vm0, %v3379_v53  ;;  %v3213_v52 = vld [vmem:[%s6780_s0 + $0x21c] sm:$0xf]  ;;  %v3284_v53 = vld [vmem:[%s6780_s0 + $0x318] sm:$0xf]  ;;  %v360_v60 = vmax.bf16 %v4268_v11, %v3212_v51  ;;  %v3694_v51 = vcombine.low %v508_v43, %v509_v44 }
  0x7c   :  { %4098 = vmatprep.mubr.msk.bf16.mxu1 %vm756_vm0, %v3448_v57  ;;  %v3215_v57 = vld [vmem:[%s6780_s0 + $0x224] sm:$0xf]  ;;  %v361_v61 = vmax.bf16 %v4268_v11, %v3213_v52  ;;  %v498_v62 = vmax.bf16 %v4268_v11, %v3284_v53  ;;  %v3297_v52 = vld [vmem:[%s6780_s0 + $0x34c] sm:$0xf]  ;;  %v3226_v53 = vld [vmem:[%s6780_s0 + $0x250] sm:$0xf] }
  0x7d   :  { %v363_v1 = vmax.bf16 %v4268_v11, %v3215_v57 }
  0x7e   :  { %v3556_v4 = vcombine.low %v360_v60, %v361_v61  ;;  %v3689_v5 = vcombine.low %v498_v62, %v499_v63  ;;  %v511_v60 = vmax.bf16 %v4268_v11, %v3297_v52  ;;  %v374_v61 = vmax.bf16 %v4268_v11, %v3226_v53  ;;  %v3310_v52 = vld [vmem:[%s6780_s0 + $0x380] sm:$0xf]  ;;  %v3311_v53 = vld [vmem:[%s6780_s0 + $0x384] sm:$0xf] }
  0x7f   :  { %v3557_v6 = vcombine.low %v362_v0, %v363_v1  ;;  %v512_v63 = vmax.bf16 %v4268_v11, %v3298_v55  ;;  %v513_v0 = vmax.bf16 %v4268_v11, %v3299_v56 }
  0x82   :  { %4027 = vmatmul.mubr.msk.bf16.gmra.mrb[56].mxu0 %vm756_vm0, %v3380_v7  ;;  %v3216_v7 = vld [vmem:[%s6780_s0 + $0x228] sm:$0xf] }
  0x83   :  { %4099 = vmatmul.mubr.msk.bf16.gmra.mrb[56].mxu1 %vm756_vm0, %v3449_v8  ;;  %4030 = vmatprep.mubr.msk.bf16.mxu0 %vm756_vm0, %v3381_v9  ;;  %v3217_v8 = vld [vmem:[%s6780_s0 + $0x22c] sm:$0xf]  ;;  %v3288_v9 = vld [vmem:[%s6780_s0 + $0x328] sm:$0xf]  ;;  %v364_v17 = vmax.bf16 %v4268_v11, %v3216_v7  ;;  %v3696_v7 = vcombine.low %v512_v63, %v513_v0 }
  0x84   :  { %4102 = vmatprep.mubr.msk.bf16.mxu1 %vm756_vm0, %v3450_v14  ;;  %v3219_v14 = vld [vmem:[%s6780_s0 + $0x234] sm:$0xf]  ;;  %v365_v18 = vmax.bf16 %v4268_v11, %v3217_v8  ;;  %v502_v19 = vmax.bf16 %v4268_v11, %v3288_v9  ;;  %v3301_v8 = vld [vmem:[%s6780_s0 + $0x35c] sm:$0xf]  ;;  %v3230_v9 = vld [vmem:[%s6780_s0 + $0x260] sm:$0xf] }
  0x85   :  { %v367_v22 = vmax.bf16 %v4268_v11, %v3219_v14 }
  0x86   :  { %v3558_v25 = vcombine.low %v364_v17, %v365_v18  ;;  %v3691_v26 = vcombine.low %v502_v19, %v503_v20  ;;  %v515_v17 = vmax.bf16 %v4268_v11, %v3301_v8  ;;  %v378_v18 = vmax.bf16 %v4268_v11, %v3230_v9  ;;  %v3314_v8 = vld [vmem:[%s6780_s0 + $0x390] sm:$0xf]  ;;  %v3315_v9 = vld [vmem:[%s6780_s0 + $0x394] sm:$0xf] }
  0x87   :  { %v3559_v27 = vcombine.low %v366_v21, %v367_v22  ;;  %v516_v20 = vmax.bf16 %v4268_v11, %v3302_v12  ;;  %v517_v21 = vmax.bf16 %v4268_v11, %v3303_v13 }
  0x8a   :  { %4031 = vmatmul.mubr.msk.bf16.gmra.mrb[60].mxu0 %vm756_vm0, %v3382_v28  ;;  %v3220_v28 = vld [vmem:[%s6780_s0 + $0x238] sm:$0xf] }
  0x8b   :  { %4103 = vmatmul.mubr.msk.bf16.gmra.mrb[60].mxu1 %vm756_vm0, %v3451_v29  ;;  %4114 = vmatprep.mubr.msk.bf16.mxu0 %vm756_vm0, %v3553_v30  ;;  %v3221_v29 = vld [vmem:[%s6780_s0 + $0x23c] sm:$0xf]  ;;  %v3292_v30 = vld [vmem:[%s6780_s0 + $0x338] sm:$0xf]  ;;  %v368_v37 = vmax.bf16 %v4268_v11, %v3220_v28  ;;  %v3698_v28 = vcombine.low %v516_v20, %v517_v21 }
  0x8c   :  { %4186 = vmatprep.mubr.msk.bf16.mxu1 %vm756_vm0, %v3686_v34  ;;  %v3223_v34 = vld [vmem:[%s6780_s0 + $0x244] sm:$0xf]  ;;  %v369_v38 = vmax.bf16 %v4268_v11, %v3221_v29  ;;  %v506_v39 = vmax.bf16 %v4268_v11, %v3292_v30  ;;  %v3305_v29 = vld [vmem:[%s6780_s0 + $0x36c] sm:$0xf]  ;;  %v3234_v30 = vld [vmem:[%s6780_s0 + $0x270] sm:$0xf] }
  0x8d   :  { %v371_v42 = vmax.bf16 %v4268_v11, %v3223_v34 }
  0x8e   :  { %v3560_v45 = vcombine.low %v368_v37, %v369_v38  ;;  %v3693_v46 = vcombine.low %v506_v39, %v507_v40  ;;  %v519_v37 = vmax.bf16 %v4268_v11, %v3305_v29  ;;  %v382_v38 = vmax.bf16 %v4268_v11, %v3234_v30  ;;  %v3318_v29 = vld [vmem:[%s6780_s0 + $0x3a0] sm:$0xf]  ;;  %v3319_v30 = vld [vmem:[%s6780_s0 + $0x3a4] sm:$0xf] }
  0x8f   :  { %v3561_v47 = vcombine.low %v370_v41, %v371_v42  ;;  %v520_v40 = vmax.bf16 %v4268_v11, %v3306_v32  ;;  %v521_v41 = vmax.bf16 %v4268_v11, %v3307_v33 }
  0x92   :  { %4115 = vmatmul.mubr.msk.bf16.vlgmr.msra.gmra.mrb[64].mxu0 %vm756_vm0, %v3554_v48  ;;  %v3224_v48 = vld [vmem:[%s6780_s0 + $0x248] sm:$0xf] }
  0x93   :  { %4187 = vmatmul.mubr.msk.bf16.vlgmr.msra.gmra.mrb[64].mxu1 %vm756_vm0, %v3687_v49  ;;  %4118 = vmatprep.mubr.msk.bf16.mxu0 %vm756_vm0, %v3555_v50  ;;  %v3225_v49 = vld [vmem:[%s6780_s0 + $0x24c] sm:$0xf]  ;;  %v3296_v50 = vld [vmem:[%s6780_s0 + $0x348] sm:$0xf]  ;;  %v372_v57 = vmax.bf16 %v4268_v11, %v3224_v48  ;;  %v3700_v48 = vcombine.low %v520_v40, %v521_v41 }
  0x94   :  { %4190 = vmatprep.mubr.msk.bf16.mxu1 %vm756_vm0, %v3688_v54  ;;  %v3227_v54 = vld [vmem:[%s6780_s0 + $0x254] sm:$0xf]  ;;  %v373_v58 = vmax.bf16 %v4268_v11, %v3225_v49  ;;  %v510_v59 = vmax.bf16 %v4268_v11, %v3296_v50  ;;  %v3309_v49 = vld [vmem:[%s6780_s0 + $0x37c] sm:$0xf]  ;;  %v3238_v50 = vld [vmem:[%s6780_s0 + $0x280] sm:$0xf] }
  0x95   :  { %v375_v62 = vmax.bf16 %v4268_v11, %v3227_v54 }
  0x96   :  { %v3562_v1 = vcombine.low %v372_v57, %v373_v58  ;;  %v3695_v2 = vcombine.low %v510_v59, %v511_v60  ;;  %v523_v57 = vmax.bf16 %v4268_v11, %v3309_v49  ;;  %v386_v58 = vmax.bf16 %v4268_v11, %v3238_v50  ;;  %v3322_v49 = vld [vmem:[%s6780_s0 + $0x3b0] sm:$0xf]  ;;  %v3323_v50 = vld [vmem:[%s6780_s0 + $0x3b4] sm:$0xf] }
  0x97   :  { %v3563_v3 = vcombine.low %v374_v61, %v375_v62  ;;  %v524_v60 = vmax.bf16 %v4268_v11, %v3310_v52  ;;  %v525_v61 = vmax.bf16 %v4268_v11, %v3311_v53 }
  0x9a   :  { %4119 = vmatmul.mubr.msk.bf16.gmra.mrb[68].mxu0 %vm756_vm0, %v3556_v4  ;;  %v3228_v4 = vld [vmem:[%s6780_s0 + $0x258] sm:$0xf] }
  0x9b   :  { %4191 = vmatmul.mubr.msk.bf16.gmra.mrb[68].mxu1 %vm756_vm0, %v3689_v5  ;;  %4122 = vmatprep.mubr.msk.bf16.mxu0 %vm756_vm0, %v3557_v6  ;;  %v3229_v5 = vld [vmem:[%s6780_s0 + $0x25c] sm:$0xf]  ;;  %v3300_v6 = vld [vmem:[%s6780_s0 + $0x358] sm:$0xf]  ;;  %v376_v14 = vmax.bf16 %v4268_v11, %v3228_v4  ;;  %v3702_v4 = vcombine.low %v524_v60, %v525_v61 }
  0x9c   :  { %4194 = vmatprep.mubr.msk.bf16.mxu1 %vm756_vm0, %v3690_v10  ;;  %v3231_v10 = vld [vmem:[%s6780_s0 + $0x264] sm:$0xf]  ;;  %v377_v15 = vmax.bf16 %v4268_v11, %v3229_v5  ;;  %v514_v16 = vmax.bf16 %v4268_v11, %v3300_v6  ;;  %v3313_v5 = vld [vmem:[%s6780_s0 + $0x38c] sm:$0xf]  ;;  %v3242_v6 = vld [vmem:[%s6780_s0 + $0x290] sm:$0xf] }
  0x9d   :  { %v379_v19 = vmax.bf16 %v4268_v11, %v3231_v10 }
  0x9e   :  { %v3564_v22 = vcombine.low %v376_v14, %v377_v15  ;;  %v3697_v23 = vcombine.low %v514_v16, %v515_v17  ;;  %v527_v14 = vmax.bf16 %v4268_v11, %v3313_v5  ;;  %v390_v15 = vmax.bf16 %v4268_v11, %v3242_v6  ;;  %v3326_v5 = vld [vmem:[%s6780_s0 + $0x3c0] sm:$0xf]  ;;  %v3327_v6 = vld [vmem:[%s6780_s0 + $0x3c4] sm:$0xf] }
  0x9f   :  { %v3565_v24 = vcombine.low %v378_v18, %v379_v19  ;;  %v528_v17 = vmax.bf16 %v4268_v11, %v3314_v8  ;;  %v529_v18 = vmax.bf16 %v4268_v11, %v3315_v9 }
  0xa2   :  { %4123 = vmatmul.mubr.msk.bf16.gmra.mrb[72].mxu0 %vm756_vm0, %v3558_v25  ;;  %v3232_v25 = vld [vmem:[%s6780_s0 + $0x268] sm:$0xf] }
  0xa3   :  { %4195 = vmatmul.mubr.msk.bf16.gmra.mrb[72].mxu1 %vm756_vm0, %v3691_v26  ;;  %4126 = vmatprep.mubr.msk.bf16.mxu0 %vm756_vm0, %v3559_v27  ;;  %v3233_v26 = vld [vmem:[%s6780_s0 + $0x26c] sm:$0xf]  ;;  %v3304_v27 = vld [vmem:[%s6780_s0 + $0x368] sm:$0xf]  ;;  %v380_v34 = vmax.bf16 %v4268_v11, %v3232_v25  ;;  %v3704_v25 = vcombine.low %v528_v17, %v529_v18 }
  0xa4   :  { %4198 = vmatprep.mubr.msk.bf16.mxu1 %vm756_vm0, %v3692_v31  ;;  %v3235_v31 = vld [vmem:[%s6780_s0 + $0x274] sm:$0xf]  ;;  %v381_v35 = vmax.bf16 %v4268_v11, %v3233_v26  ;;  %v518_v36 = vmax.bf16 %v4268_v11, %v3304_v27  ;;  %v3317_v26 = vld [vmem:[%s6780_s0 + $0x39c] sm:$0xf]  ;;  %v3246_v27 = vld [vmem:[%s6780_s0 + $0x2a0] sm:$0xf] }
  0xa5   :  { %v383_v39 = vmax.bf16 %v4268_v11, %v3235_v31 }
  0xa6   :  { %v3566_v42 = vcombine.low %v380_v34, %v381_v35  ;;  %v3699_v43 = vcombine.low %v518_v36, %v519_v37  ;;  %v531_v34 = vmax.bf16 %v4268_v11, %v3317_v26  ;;  %v394_v35 = vmax.bf16 %v4268_v11, %v3246_v27 }
  0xa7   :  { %v3567_v44 = vcombine.low %v382_v38, %v383_v39  ;;  %v532_v37 = vmax.bf16 %v4268_v11, %v3318_v29  ;;  %v533_v38 = vmax.bf16 %v4268_v11, %v3319_v30  ;;  %v3328_v30 = vld [vmem:[%s6780_s0 + $0x3c8] sm:$0xf] }
  0xaa   :  { %4127 = vmatmul.mubr.msk.bf16.gmra.mrb[76].mxu0 %vm756_vm0, %v3560_v45  ;;  %v3236_v45 = vld [vmem:[%s6780_s0 + $0x278] sm:$0xf] }
  0xab   :  { %4199 = vmatmul.mubr.msk.bf16.gmra.mrb[76].mxu1 %vm756_vm0, %v3693_v46  ;;  %4130 = vmatprep.mubr.msk.bf16.mxu0 %vm756_vm0, %v3561_v47  ;;  %v3237_v46 = vld [vmem:[%s6780_s0 + $0x27c] sm:$0xf]  ;;  %v3308_v47 = vld [vmem:[%s6780_s0 + $0x378] sm:$0xf]  ;;  %v384_v54 = vmax.bf16 %v4268_v11, %v3236_v45  ;;  %v3706_v45 = vcombine.low %v532_v37, %v533_v38  ;;  %v3258_v37 = vld [vmem:[%s6780_s0 + $0x2d0] sm:$0xf] }
  0xac   :  { %4202 = vmatprep.mubr.msk.bf16.mxu1 %vm756_vm0, %v3694_v51  ;;  %v3239_v51 = vld [vmem:[%s6780_s0 + $0x284] sm:$0xf]  ;;  %v385_v55 = vmax.bf16 %v4268_v11, %v3237_v46  ;;  %v522_v56 = vmax.bf16 %v4268_v11, %v3308_v47  ;;  %v3321_v46 = vld [vmem:[%s6780_s0 + $0x3ac] sm:$0xf]  ;;  %v3250_v47 = vld [vmem:[%s6780_s0 + $0x2b0] sm:$0xf] }
  0xad   :  { %v387_v59 = vmax.bf16 %v4268_v11, %v3239_v51  ;;  %v3259_v38 = vld [vmem:[%s6780_s0 + $0x2d4] sm:$0xf] }
  0xae   :  { %v3568_v62 = vcombine.low %v384_v54, %v385_v55  ;;  %v3701_v63 = vcombine.low %v522_v56, %v523_v57  ;;  %v535_v54 = vmax.bf16 %v4268_v11, %v3321_v46  ;;  %v398_v55 = vmax.bf16 %v4268_v11, %v3250_v47 }
  0xaf   :  { %v3569_v0 = vcombine.low %v386_v58, %v387_v59  ;;  %v536_v57 = vmax.bf16 %v4268_v11, %v3322_v49  ;;  %v537_v58 = vmax.bf16 %v4268_v11, %v3323_v50  ;;  %v542_v47 = vmax.bf16 %v4268_v11, %v3328_v30 }
  0xb0   :  { %v406_v49 = vmax.bf16 %v4268_v11, %v3258_v37  ;;  %v407_v50 = vmax.bf16 %v4268_v11, %v3259_v38 }
  0xb2   :  { %4131 = vmatmul.mubr.msk.bf16.gmra.mrb[80].mxu0 %vm756_vm0, %v3562_v1  ;;  %v3240_v1 = vld [vmem:[%s6780_s0 + $0x288] sm:$0xf] }
  0xb3   :  { %4203 = vmatmul.mubr.msk.bf16.gmra.mrb[80].mxu1 %vm756_vm0, %v3695_v2  ;;  %4134 = vmatprep.mubr.msk.bf16.mxu0 %vm756_vm0, %v3563_v3  ;;  %v3241_v2 = vld [vmem:[%s6780_s0 + $0x28c] sm:$0xf]  ;;  %v3312_v3 = vld [vmem:[%s6780_s0 + $0x388] sm:$0xf]  ;;  %v388_v10 = vmax.bf16 %v4268_v11, %v3240_v1  ;;  %v3708_v1 = vcombine.low %v536_v57, %v537_v58  ;;  %v3260_v58 = vld [vmem:[%s6780_s0 + $0x2d8] sm:$0xf] }
  0xb4   :  { %4206 = vmatprep.mubr.msk.bf16.mxu1 %vm756_vm0, %v3696_v7  ;;  %v3243_v7 = vld [vmem:[%s6780_s0 + $0x294] sm:$0xf]  ;;  %v389_v12 = vmax.bf16 %v4268_v11, %v3241_v2  ;;  %v526_v13 = vmax.bf16 %v4268_v11, %v3312_v3  ;;  %v3325_v2 = vld [vmem:[%s6780_s0 + $0x3bc] sm:$0xf]  ;;  %v3254_v3 = vld [vmem:[%s6780_s0 + $0x2c0] sm:$0xf] }
  0xb5   :  { %v391_v16 = vmax.bf16 %v4268_v11, %v3243_v7 }
  0xb6   :  { %v3570_v19 = vcombine.low %v388_v10, %v389_v12  ;;  %v3703_v20 = vcombine.low %v526_v13, %v527_v14  ;;  %v5355_v10 = vld [vmem:[%s6781_s2] ss:$0 sm:$0xff]  ;;  %v539_v12 = vmax.bf16 %v4268_v11, %v3325_v2  ;;  %v402_v13 = vmax.bf16 %v4268_v11, %v3254_v3  ;;  %v3332_v2 = vld [vmem:[%s6780_s0 + $0x3d8] sm:$0xf]  ;;  %v3333_v3 = vld [vmem:[%s6780_s0 + $0x3dc] sm:$0xf] }
  0xb7   :  { %v3571_v21 = vcombine.low %v390_v15, %v391_v16  ;;  %v540_v15 = vmax.bf16 %v4268_v11, %v3326_v5  ;;  %v541_v16 = vmax.bf16 %v4268_v11, %v3327_v6 }
  0xba   :  { %4135 = vmatmul.mubr.msk.bf16.gmra.mrb[84].mxu0 %vm756_vm0, %v3564_v22  ;;  %v3244_v22 = vld [vmem:[%s6780_s0 + $0x298] sm:$0xf] }
  0xbb   :  { %4207 = vmatmul.mubr.msk.bf16.gmra.mrb[84].mxu1 %vm756_vm0, %v3697_v23  ;;  %4138 = vmatprep.mubr.msk.bf16.mxu0 %vm756_vm0, %v3565_v24  ;;  %v3245_v23 = vld [vmem:[%s6780_s0 + $0x29c] sm:$0xf]  ;;  %v3316_v24 = vld [vmem:[%s6780_s0 + $0x398] sm:$0xf]  ;;  %v392_v31 = vmax.bf16 %v4268_v11, %v3244_v22  ;;  %v3256_v22 = vld [vmem:[%s6780_s0 + $0x2c8] sm:$0xf] }
  0xbc   :  { %4210 = vmatprep.mubr.msk.bf16.mxu1 %vm756_vm0, %v3698_v28  ;;  %v3247_v28 = vld [vmem:[%s6780_s0 + $0x2a4] sm:$0xf]  ;;  %v393_v32 = vmax.bf16 %v4268_v11, %v3245_v23  ;;  %v530_v33 = vmax.bf16 %v4268_v11, %v3316_v24  ;;  %v3257_v23 = vld [vmem:[%s6780_s0 + $0x2cc] sm:$0xf] }
  0xbd   :  { %v395_v36 = vmax.bf16 %v4268_v11, %v3247_v28  ;;  %v405_v46 = vmax.bf16 %v4268_v11, %v3257_v23 }
  0xbe   :  { %v3572_v39 = vcombine.low %v392_v31, %v393_v32  ;;  %v3705_v40 = vcombine.low %v530_v33, %v531_v34  ;;  %v3329_v31 = vld [vmem:[%s6780_s0 + $0x3cc] sm:$0xf] }
  0xbf   :  { %v3573_v41 = vcombine.low %v394_v35, %v395_v36  ;;  %v3710_v36 = vcombine.low %v540_v15, %v541_v16  ;;  %v3334_v16 = vld [vmem:[%s6780_s0 + $0x3e0] sm:$0xf] }
  0xc2   :  { %4139 = vmatmul.mubr.msk.bf16.gmra.mrb[88].mxu0 %vm756_vm0, %v3566_v42  ;;  %v3248_v42 = vld [vmem:[%s6780_s0 + $0x2a8] sm:$0xf] }
  0xc3   :  { %4211 = vmatmul.mubr.msk.bf16.gmra.mrb[88].mxu1 %vm756_vm0, %v3699_v43  ;;  %4142 = vmatprep.mubr.msk.bf16.mxu0 %vm756_vm0, %v3567_v44  ;;  %v3249_v43 = vld [vmem:[%s6780_s0 + $0x2ac] sm:$0xf]  ;;  %v3320_v44 = vld [vmem:[%s6780_s0 + $0x3a8] sm:$0xf]  ;;  %v396_v51 = vmax.bf16 %v4268_v11, %v3248_v42  ;;  %v3330_v42 = vld [vmem:[%s6780_s0 + $0x3d0] sm:$0xf] }
  0xc4   :  { %4214 = vmatprep.mubr.msk.bf16.mxu1 %vm756_vm0, %v3700_v48  ;;  %v3251_v48 = vld [vmem:[%s6780_s0 + $0x2b4] sm:$0xf]  ;;  %v397_v52 = vmax.bf16 %v4268_v11, %v3249_v43  ;;  %v534_v53 = vmax.bf16 %v4268_v11, %v3320_v44 }
  0xc5   :  { %v399_v56 = vmax.bf16 %v4268_v11, %v3251_v48  ;;  %v3331_v43 = vld [vmem:[%s6780_s0 + $0x3d4] sm:$0xf]  ;;  %v543_v48 = vmax.bf16 %v4268_v11, %v3329_v31 }
  0xc6   :  { %v3574_v59 = vcombine.low %v396_v51, %v397_v52  ;;  %v3707_v60 = vcombine.low %v534_v53, %v535_v54  ;;  %v544_v51 = vmax.bf16 %v4268_v11, %v3330_v42  ;;  %v545_v52 = vmax.bf16 %v4268_v11, %v3331_v43 }
  0xc7   :  { %v3575_v61 = vcombine.low %v398_v55, %v399_v56 }
  0xca   :  { %4143 = vmatmul.mubr.msk.bf16.gmra.mrb[92].mxu0 %vm756_vm0, %v3568_v62  ;;  %v3252_v62 = vld [vmem:[%s6780_s0 + $0x2b8] sm:$0xf] }
  0xcb   :  { %4215 = vmatmul.mubr.msk.bf16.gmra.mrb[92].mxu1 %vm756_vm0, %v3701_v63  ;;  %4146 = vmatprep.mubr.msk.bf16.mxu0 %vm756_vm0, %v3569_v0  ;;  %v3253_v63 = vld [vmem:[%s6780_s0 + $0x2bc] sm:$0xf]  ;;  %v3324_v0 = vld [vmem:[%s6780_s0 + $0x3b8] sm:$0xf]  ;;  %v400_v7 = vmax.bf16 %v4268_v11, %v3252_v62 }
  0xcc   :  { %4218 = vmatprep.mubr.msk.bf16.mxu1 %vm756_vm0, %v3702_v4  ;;  %v3255_v4 = vld [vmem:[%s6780_s0 + $0x2c4] sm:$0xf]  ;;  %v401_v8 = vmax.bf16 %v4268_v11, %v3253_v63  ;;  %v538_v9 = vmax.bf16 %v4268_v11, %v3324_v0  ;;  %v3711_v0 = vcombine.low %v542_v47, %v543_v48  ;;  %v3266_v47 = vld [vmem:[%s6780_s0 + $0x2f0] sm:$0xf]  ;;  %v3267_v48 = vld [vmem:[%s6780_s0 + $0x2f4] sm:$0xf] }
  0xcd   :  { %v403_v14 = vmax.bf16 %v4268_v11, %v3255_v4 }
  0xce   :  { %v3709_v28 = vcombine.low %v538_v9, %v539_v12  ;;  %v3262_v9 = vld [vmem:[%s6780_s0 + $0x2e0] sm:$0xf]  ;;  %v3263_v12 = vld [vmem:[%s6780_s0 + $0x2e4] sm:$0xf] }
  0xcf   :  { %v3577_v29 = vcombine.low %v402_v13, %v403_v14  ;;  %v410_v23 = vmax.bf16 %v4268_v11, %v3262_v9 }
  0xd2   :  { %4147 = vmatmul.mubr.msk.bf16.gmra.mrb[96].mxu0 %vm756_vm0, %v3570_v19 }
  0xd3   :  { %4219 = vmatmul.mubr.msk.bf16.gmra.mrb[96].mxu1 %vm756_vm0, %v3703_v20  ;;  %4150 = vmatprep.mubr.msk.bf16.mxu0 %vm756_vm0, %v3571_v21  ;;  %v3576_v21 = vcombine.low %v400_v7, %v401_v8  ;;  %v3712_v8 = vcombine.low %v544_v51, %v545_v52  ;;  %v3338_v52 = vld [vmem:[%s6780_s0 + $0x3f0] sm:$0xf] }
  0xd4   :  { %4222 = vmatprep.mubr.msk.bf16.mxu1 %vm756_vm0, %v3704_v25 }
  0xda   :  { %4151 = vmatmul.mubr.msk.bf16.gmra.mrb[100].mxu0 %vm756_vm0, %v3572_v39 }
  0xdb   :  { %4223 = vmatmul.mubr.msk.bf16.gmra.mrb[100].mxu1 %vm756_vm0, %v3705_v40  ;;  %4154 = vmatprep.mubr.msk.bf16.mxu0 %vm756_vm0, %v3573_v41 }
  0xdc   :  { %4226 = vmatprep.mubr.msk.bf16.mxu1 %vm756_vm0, %v3706_v45  ;;  %v404_v45 = vmax.bf16 %v4268_v11, %v3256_v22  ;;  %v547_v22 = vmax.bf16 %v4268_v11, %v3333_v3 }
  0xde   :  { %v3578_v57 = vcombine.low %v404_v45, %v405_v46 }
  0xe2   :  { %4155 = vmatmul.mubr.msk.bf16.gmra.mrb[104].mxu0 %vm756_vm0, %v3574_v59  ;;  %v3261_v59 = vld [vmem:[%s6780_s0 + $0x2dc] sm:$0xf] }
  0xe3   :  { %4227 = vmatmul.mubr.msk.bf16.gmra.mrb[104].mxu1 %vm756_vm0, %v3707_v60  ;;  %4158 = vmatprep.mubr.msk.bf16.mxu0 %vm756_vm0, %v3575_v61 }
  0xe4   :  { %4230 = vmatprep.mubr.msk.bf16.mxu1 %vm756_vm0, %v3708_v1  ;;  %v3579_v1 = vcombine.low %v406_v49, %v407_v50 }
  0xe5   :  { %v3972_v17 = vpop.f32.mrb[0].mxu0 }
  0xe6   :  { %v896_v18 = vadd.f32 %v3972_v17, %v5355_v10  ;;  %v4044_v19 = vpop.f32.mrb[0].mxu1  ;;  %v887_v20 = vpop.f32.mrb[1].mxu0  ;;  %v3335_v17 = vld [vmem:[%s6780_s0 + $0x3e4] sm:$0xf] }
  0xe7   :  { %v1537_v24 = vadd.f32 %v4044_v19, %v5355_v10  ;;  %v888_v25 = vadd.f32 %v5355_v10, %v887_v20  ;;  %v1528_v26 = vpop.f32.mrb[1].mxu1  ;;  %v3973_v27 = vpop.f32.mrb[2].mxu0  ;;  %v408_v19 = vmax.bf16 %v4268_v11, %v3260_v58  ;;  %v409_v20 = vmax.bf16 %v4268_v11, %v3261_v59 }
  0xe8   :  { %1145 = vst.msk [vmem:[%s6782_s3 + $0x10] sm:$0xff] %vm1142_vm1, %v896_v18  ;;  %v1529_v32 = vadd.f32 %v5355_v10, %v1528_v26  ;;  %v899_v33 = vadd.f32 %v3973_v27, %v5355_v10  ;;  %v4045_v34 = vpop.f32.mrb[2].mxu1  ;;  %v890_v35 = vpop.f32.mrb[3].mxu0  ;;  %v549_v26 = vmax.bf16 %v4268_v11, %v3335_v17  ;;  %v414_v59 = vmax.bf16 %v4268_v11, %v3266_v47 }
  0xe9   :  { %3490 = vst.msk [vmem:[%s6782_s3 + $0x210] sm:$0xff] %vm1142_vm1, %v1537_v24  ;;  %1143 = vst.msk [vmem:[%s6782_s3] sm:$0xff] %vm1142_vm1, %v888_v25  ;;  %v1540_v39 = vadd.f32 %v4045_v34, %v5355_v10  ;;  %v891_v40 = vadd.f32 %v5355_v10, %v890_v35  ;;  %v1531_v41 = vpop.f32.mrb[3].mxu1  ;;  %v411_v24 = vmax.bf16 %v4268_v11, %v3263_v12  ;;  %v3268_v12 = vld [vmem:[%s6780_s0 + $0x2f8] sm:$0xf] }
  0xea   :  { %3488 = vst.msk [vmem:[%s6782_s3 + $0x200] sm:$0xff] %vm1142_vm1, %v1529_v32  ;;  %1146 = vst.msk [vmem:[%s6782_s3 + $0x18] sm:$0xff] %vm1142_vm1, %v899_v33  ;;  %v1532_v44 = vadd.f32 %v5355_v10, %v1531_v41  ;;  %4159 = vmatmul.mubr.msk.bf16.gmra.mrb[108].mxu0 %vm756_vm0, %v3576_v21  ;;  %v546_v21 = vmax.bf16 %v4268_v11, %v3332_v2  ;;  %v548_v25 = vmax.bf16 %v4268_v11, %v3334_v16  ;;  %v3264_v32 = vld [vmem:[%s6780_s0 + $0x2e8] sm:$0xf]  ;;  %v3265_v33 = vld [vmem:[%s6780_s0 + $0x2ec] sm:$0xf] }
  0xeb   :  { %3491 = vst.msk [vmem:[%s6782_s3 + $0x218] sm:$0xff] %vm1142_vm1, %v1540_v39  ;;  %1144 = vst.msk [vmem:[%s6782_s3 + $0x8] sm:$0xff] %vm1142_vm1, %v891_v40  ;;  %4231 = vmatmul.mubr.msk.bf16.gmra.mrb[108].mxu1 %vm756_vm0, %v3709_v28  ;;  %4162 = vmatprep.mubr.msk.bf16.mxu0 %vm756_vm0, %v3577_v29  ;;  %v3580_v31 = vcombine.low %v408_v19, %v409_v20  ;;  %v3581_v39 = vcombine.low %v410_v23, %v411_v24  ;;  %v3336_v40 = vld [vmem:[%s6780_s0 + $0x3e8] sm:$0xf]  ;;  %v3337_v41 = vld [vmem:[%s6780_s0 + $0x3ec] sm:$0xf] }
  0xec   :  { %3489 = vst.msk [vmem:[%s6782_s3 + $0x208] sm:$0xff] %vm1142_vm1, %v1532_v44  ;;  %4234 = vmatprep.mubr.msk.bf16.mxu1 %vm756_vm0, %v3710_v36  ;;  %v3713_v38 = vcombine.low %v546_v21, %v547_v22  ;;  %v3714_v46 = vcombine.low %v548_v25, %v549_v26  ;;  %v551_v58 = vmax.bf16 %v4268_v11, %v3337_v41  ;;  %v3340_v19 = vld [vmem:[%s6780_s0 + $0x3f8] sm:$0xf]  ;;  %v3341_v20 = vld [vmem:[%s6780_s0 + $0x3fc] sm:$0xf] }
  0xed   :  { %v3976_v53 = vpop.f32.mrb[4].mxu0  ;;  %v416_v25 = vmax.bf16 %v4268_v11, %v3268_v12 }
  0xee   :  { %v912_v54 = vadd.f32 %v3976_v53, %v5355_v10  ;;  %v4048_v55 = vpop.f32.mrb[4].mxu1  ;;  %v903_v56 = vpop.f32.mrb[5].mxu0  ;;  %v3339_v53 = vld [vmem:[%s6780_s0 + $0x3f4] sm:$0xf] }
  0xef   :  { %v1553_v60 = vadd.f32 %v4048_v55, %v5355_v10  ;;  %v904_v61 = vadd.f32 %v5355_v10, %v903_v56  ;;  %v1544_v62 = vpop.f32.mrb[5].mxu1  ;;  %v3977_v63 = vpop.f32.mrb[6].mxu0  ;;  %v412_v55 = vmax.bf16 %v4268_v11, %v3264_v32  ;;  %v413_v56 = vmax.bf16 %v4268_v11, %v3265_v33 }
  0xf0   :  { %1149 = vst.msk [vmem:[%s6782_s3 + $0x30] sm:$0xff] %vm1142_vm1, %v912_v54  ;;  %v1545_v4 = vadd.f32 %v5355_v10, %v1544_v62  ;;  %v915_v5 = vadd.f32 %v3977_v63, %v5355_v10  ;;  %v4049_v6 = vpop.f32.mrb[6].mxu1  ;;  %v906_v7 = vpop.f32.mrb[7].mxu0  ;;  %v553_v62 = vmax.bf16 %v4268_v11, %v3339_v53 }
  0xf1   :  { %3494 = vst.msk [vmem:[%s6782_s3 + $0x230] sm:$0xff] %vm1142_vm1, %v1553_v60  ;;  %1147 = vst.msk [vmem:[%s6782_s3 + $0x20] sm:$0xff] %vm1142_vm1, %v904_v61  ;;  %v1556_v13 = vadd.f32 %v4049_v6, %v5355_v10  ;;  %v907_v14 = vadd.f32 %v5355_v10, %v906_v7  ;;  %v1547_v15 = vpop.f32.mrb[7].mxu1  ;;  %v415_v60 = vmax.bf16 %v4268_v11, %v3267_v48 }
  0xf2   :  { %3492 = vst.msk [vmem:[%s6782_s3 + $0x220] sm:$0xff] %vm1142_vm1, %v1545_v4  ;;  %1150 = vst.msk [vmem:[%s6782_s3 + $0x38] sm:$0xff] %vm1142_vm1, %v915_v5  ;;  %v1548_v18 = vadd.f32 %v5355_v10, %v1547_v15  ;;  %4163 = vmatmul.mubr.msk.bf16.gmra.mrb[112].mxu0 %vm756_vm0, %v3578_v57  ;;  %v550_v57 = vmax.bf16 %v4268_v11, %v3336_v40  ;;  %v552_v61 = vmax.bf16 %v4268_v11, %v3338_v52 }
  0xf3   :  { %3495 = vst.msk [vmem:[%s6782_s3 + $0x238] sm:$0xff] %vm1142_vm1, %v1556_v13  ;;  %1148 = vst.msk [vmem:[%s6782_s3 + $0x28] sm:$0xff] %vm1142_vm1, %v907_v14  ;;  %4235 = vmatmul.mubr.msk.bf16.gmra.mrb[112].mxu1 %vm756_vm0, %v3711_v0  ;;  %4166 = vmatprep.mubr.msk.bf16.mxu0 %vm756_vm0, %v3579_v1  ;;  %v3582_v3 = vcombine.low %v412_v55, %v413_v56  ;;  %v3583_v9 = vcombine.low %v414_v59, %v415_v60  ;;  %v3269_v13 = vld [vmem:[%s6780_s0 + $0x2fc] sm:$0xf] }
  0xf4   :  { %3493 = vst.msk [vmem:[%s6782_s3 + $0x228] sm:$0xff] %vm1142_vm1, %v1548_v18  ;;  %4238 = vmatprep.mubr.msk.bf16.mxu1 %vm756_vm0, %v3712_v8  ;;  %v3715_v8 = vcombine.low %v550_v57, %v551_v58  ;;  %v3716_v18 = vcombine.low %v552_v61, %v553_v62  ;;  %v417_v26 = vmax.bf16 %v4268_v11, %v3269_v13 }
  0xf5   :  { %v3980_v27 = vpop.f32.mrb[8].mxu0 }
  0xf6   :  { %v928_v28 = vadd.f32 %v3980_v27, %v5355_v10  ;;  %v4052_v29 = vpop.f32.mrb[8].mxu1  ;;  %v919_v30 = vpop.f32.mrb[9].mxu0  ;;  %v554_v27 = vmax.bf16 %v4268_v11, %v3340_v19  ;;  %v3584_v33 = vcombine.low %v416_v25, %v417_v26 }
  0xf7   :  { %v1569_v34 = vadd.f32 %v4052_v29, %v5355_v10  ;;  %v920_v35 = vadd.f32 %v5355_v10, %v919_v30  ;;  %v1560_v36 = vpop.f32.mrb[9].mxu1  ;;  %v3981_v37 = vpop.f32.mrb[10].mxu0 }
  0xf8   :  { %1153 = vst.msk [vmem:[%s6782_s3 + $0x50] sm:$0xff] %vm1142_vm1, %v928_v28  ;;  %v1561_v42 = vadd.f32 %v5355_v10, %v1560_v36  ;;  %v931_v43 = vadd.f32 %v3981_v37, %v5355_v10  ;;  %v4053_v44 = vpop.f32.mrb[10].mxu1  ;;  %v922_v45 = vpop.f32.mrb[11].mxu0  ;;  %v555_v28 = vmax.bf16 %v4268_v11, %v3341_v20 }
  0xf9   :  { %3498 = vst.msk [vmem:[%s6782_s3 + $0x250] sm:$0xff] %vm1142_vm1, %v1569_v34  ;;  %1151 = vst.msk [vmem:[%s6782_s3 + $0x40] sm:$0xff] %vm1142_vm1, %v920_v35  ;;  %v1572_v49 = vadd.f32 %v4053_v44, %v5355_v10  ;;  %v923_v50 = vadd.f32 %v5355_v10, %v922_v45  ;;  %v1563_v51 = vpop.f32.mrb[11].mxu1 }
  0xfa   :  { %3496 = vst.msk [vmem:[%s6782_s3 + $0x240] sm:$0xff] %vm1142_vm1, %v1561_v42  ;;  %1154 = vst.msk [vmem:[%s6782_s3 + $0x58] sm:$0xff] %vm1142_vm1, %v931_v43  ;;  %v1564_v54 = vadd.f32 %v5355_v10, %v1563_v51  ;;  %4167 = vmatmul.mubr.msk.bf16.gmra.mrb[116].mxu0 %vm756_vm0, %v3580_v31  ;;  %v3717_v11 = vcombine.low %v554_v27, %v555_v28 }
  0xfb   :  { %3499 = vst.msk [vmem:[%s6782_s3 + $0x258] sm:$0xff] %vm1142_vm1, %v1572_v49  ;;  %1152 = vst.msk [vmem:[%s6782_s3 + $0x48] sm:$0xff] %vm1142_vm1, %v923_v50  ;;  %4239 = vmatmul.mubr.msk.bf16.gmra.mrb[116].mxu1 %vm756_vm0, %v3713_v38  ;;  %4170 = vmatprep.mubr.msk.bf16.mxu0 %vm756_vm0, %v3581_v39 }
  0xfc   :  { %3497 = vst.msk [vmem:[%s6782_s3 + $0x248] sm:$0xff] %vm1142_vm1, %v1564_v54  ;;  %4242 = vmatprep.mubr.msk.bf16.mxu1 %vm756_vm0, %v3714_v46 }
  0xfd   :  { %v3984_v63 = vpop.f32.mrb[12].mxu0 }
  0xfe   :  { %v944_v0 = vadd.f32 %v3984_v63, %v5355_v10  ;;  %v4056_v1 = vpop.f32.mrb[12].mxu1  ;;  %v935_v2 = vpop.f32.mrb[13].mxu0 }
  0xff   :  { %v1585_v4 = vadd.f32 %v4056_v1, %v5355_v10  ;;  %v936_v5 = vadd.f32 %v5355_v10, %v935_v2  ;;  %v1576_v6 = vpop.f32.mrb[13].mxu1  ;;  %v3985_v7 = vpop.f32.mrb[14].mxu0 }
 0x100   :  { %1157 = vst.msk [vmem:[%s6782_s3 + $0x70] sm:$0xff] %vm1142_vm1, %v944_v0  ;;  %v1577_v14 = vadd.f32 %v5355_v10, %v1576_v6  ;;  %v947_v15 = vadd.f32 %v3985_v7, %v5355_v10  ;;  %v4057_v16 = vpop.f32.mrb[14].mxu1  ;;  %v938_v17 = vpop.f32.mrb[15].mxu0 }
 0x101   :  { %3502 = vst.msk [vmem:[%s6782_s3 + $0x270] sm:$0xff] %vm1142_vm1, %v1585_v4  ;;  %1155 = vst.msk [vmem:[%s6782_s3 + $0x60] sm:$0xff] %vm1142_vm1, %v936_v5  ;;  %v1588_v21 = vadd.f32 %v4057_v16, %v5355_v10  ;;  %v939_v22 = vadd.f32 %v5355_v10, %v938_v17  ;;  %v1579_v23 = vpop.f32.mrb[15].mxu1 }
 0x102   :  { %3500 = vst.msk [vmem:[%s6782_s3 + $0x260] sm:$0xff] %vm1142_vm1, %v1577_v14  ;;  %1158 = vst.msk [vmem:[%s6782_s3 + $0x78] sm:$0xff] %vm1142_vm1, %v947_v15  ;;  %v1580_v24 = vadd.f32 %v5355_v10, %v1579_v23  ;;  %4171 = vmatmul.mubr.msk.bf16.gmra.mrb[120].mxu0 %vm756_vm0, %v3582_v3 }
 0x103   :  { %3503 = vst.msk [vmem:[%s6782_s3 + $0x278] sm:$0xff] %vm1142_vm1, %v1588_v21  ;;  %1156 = vst.msk [vmem:[%s6782_s3 + $0x68] sm:$0xff] %vm1142_vm1, %v939_v22  ;;  %4243 = vmatmul.mubr.msk.bf16.gmra.mrb[120].mxu1 %vm756_vm0, %v3715_v8  ;;  %4174 = vmatprep.mubr.msk.bf16.mxu0 %vm756_vm0, %v3583_v9 }
 0x104   :  { %3501 = vst.msk [vmem:[%s6782_s3 + $0x268] sm:$0xff] %vm1142_vm1, %v1580_v24  ;;  %4246 = vmatprep.mubr.msk.bf16.mxu1 %vm756_vm0, %v3716_v18 }
 0x105   :  { %v3988_v29 = vpop.f32.mrb[16].mxu0 }
 0x106   :  { %v960_v30 = vadd.f32 %v3988_v29, %v5355_v10  ;;  %v4060_v31 = vpop.f32.mrb[16].mxu1  ;;  %v951_v32 = vpop.f32.mrb[17].mxu0 }
 0x107   :  { %v1601_v34 = vadd.f32 %v4060_v31, %v5355_v10  ;;  %v952_v35 = vadd.f32 %v5355_v10, %v951_v32  ;;  %v1592_v36 = vpop.f32.mrb[17].mxu1  ;;  %v3989_v37 = vpop.f32.mrb[18].mxu0 }
 0x108   :  { %1161 = vst.msk [vmem:[%s6782_s3 + $0x90] sm:$0xff] %vm1142_vm1, %v960_v30  ;;  %v1593_v38 = vadd.f32 %v5355_v10, %v1592_v36  ;;  %v963_v39 = vadd.f32 %v3989_v37, %v5355_v10  ;;  %v4061_v40 = vpop.f32.mrb[18].mxu1  ;;  %v954_v41 = vpop.f32.mrb[19].mxu0 }
 0x109   :  { %3506 = vst.msk [vmem:[%s6782_s3 + $0x290] sm:$0xff] %vm1142_vm1, %v1601_v34  ;;  %1159 = vst.msk [vmem:[%s6782_s3 + $0x80] sm:$0xff] %vm1142_vm1, %v952_v35  ;;  %v1604_v42 = vadd.f32 %v4061_v40, %v5355_v10  ;;  %v955_v43 = vadd.f32 %v5355_v10, %v954_v41  ;;  %v1595_v44 = vpop.f32.mrb[19].mxu1 }
 0x10a   :  { %3504 = vst.msk [vmem:[%s6782_s3 + $0x280] sm:$0xff] %vm1142_vm1, %v1593_v38  ;;  %1162 = vst.msk [vmem:[%s6782_s3 + $0x98] sm:$0xff] %vm1142_vm1, %v963_v39  ;;  %v1596_v45 = vadd.f32 %v5355_v10, %v1595_v44  ;;  %4175 = vmatmul.mubr.msk.bf16.gmra.mrb[124].mxu0 %vm756_vm0, %v3584_v33 }
 0x10b   :  { %3507 = vst.msk [vmem:[%s6782_s3 + $0x298] sm:$0xff] %vm1142_vm1, %v1604_v42  ;;  %1160 = vst.msk [vmem:[%s6782_s3 + $0x88] sm:$0xff] %vm1142_vm1, %v955_v43  ;;  %4247 = vmatmul.mubr.msk.bf16.gmra.mrb[124].mxu1 %vm756_vm0, %v3717_v11 }
 0x10c   :  { %3505 = vst.msk [vmem:[%s6782_s3 + $0x288] sm:$0xff] %vm1142_vm1, %v1596_v45 }
 0x10d   :  { %v3992_v46 = vpop.f32.mrb[20].mxu0 }
 0x10e   :  { %v976_v47 = vadd.f32 %v3992_v46, %v5355_v10  ;;  %v4064_v48 = vpop.f32.mrb[20].mxu1  ;;  %v967_v49 = vpop.f32.mrb[21].mxu0 }
 0x10f   :  { %v1617_v50 = vadd.f32 %v4064_v48, %v5355_v10  ;;  %v968_v51 = vadd.f32 %v5355_v10, %v967_v49  ;;  %v1608_v52 = vpop.f32.mrb[21].mxu1  ;;  %v3993_v53 = vpop.f32.mrb[22].mxu0 }
 0x110   :  { %1165 = vst.msk [vmem:[%s6782_s3 + $0xb0] sm:$0xff] %vm1142_vm1, %v976_v47  ;;  %v1609_v54 = vadd.f32 %v5355_v10, %v1608_v52  ;;  %v979_v55 = vadd.f32 %v3993_v53, %v5355_v10  ;;  %v4065_v56 = vpop.f32.mrb[22].mxu1  ;;  %v970_v57 = vpop.f32.mrb[23].mxu0 }
 0x111   :  { %3510 = vst.msk [vmem:[%s6782_s3 + $0x2b0] sm:$0xff] %vm1142_vm1, %v1617_v50  ;;  %1163 = vst.msk [vmem:[%s6782_s3 + $0xa0] sm:$0xff] %vm1142_vm1, %v968_v51  ;;  %v1620_v58 = vadd.f32 %v4065_v56, %v5355_v10  ;;  %v971_v59 = vadd.f32 %v5355_v10, %v970_v57  ;;  %v1611_v60 = vpop.f32.mrb[23].mxu1 }
 0x112   :  { %3508 = vst.msk [vmem:[%s6782_s3 + $0x2a0] sm:$0xff] %vm1142_vm1, %v1609_v54  ;;  %1166 = vst.msk [vmem:[%s6782_s3 + $0xb8] sm:$0xff] %vm1142_vm1, %v979_v55  ;;  %v1612_v61 = vadd.f32 %v5355_v10, %v1611_v60 }
 0x113   :  { %3511 = vst.msk [vmem:[%s6782_s3 + $0x2b8] sm:$0xff] %vm1142_vm1, %v1620_v58  ;;  %1164 = vst.msk [vmem:[%s6782_s3 + $0xa8] sm:$0xff] %vm1142_vm1, %v971_v59 }
 0x114   :  { %3509 = vst.msk [vmem:[%s6782_s3 + $0x2a8] sm:$0xff] %vm1142_vm1, %v1612_v61 }
 0x115   :  { %v3996_v62 = vpop.f32.mrb[24].mxu0 }
 0x116   :  { %v992_v63 = vadd.f32 %v3996_v62, %v5355_v10  ;;  %v4068_v0 = vpop.f32.mrb[24].mxu1  ;;  %v983_v1 = vpop.f32.mrb[25].mxu0 }
 0x117   :  { %v1633_v2 = vadd.f32 %v4068_v0, %v5355_v10  ;;  %v984_v3 = vadd.f32 %v5355_v10, %v983_v1  ;;  %v1624_v4 = vpop.f32.mrb[25].mxu1  ;;  %v3997_v5 = vpop.f32.mrb[26].mxu0 }
 0x118   :  { %1169 = vst.msk [vmem:[%s6782_s3 + $0xd0] sm:$0xff] %vm1142_vm1, %v992_v63  ;;  %v1625_v6 = vadd.f32 %v5355_v10, %v1624_v4  ;;  %v995_v7 = vadd.f32 %v3997_v5, %v5355_v10  ;;  %v4069_v8 = vpop.f32.mrb[26].mxu1  ;;  %v986_v9 = vpop.f32.mrb[27].mxu0 }
 0x119   :  { %3514 = vst.msk [vmem:[%s6782_s3 + $0x2d0] sm:$0xff] %vm1142_vm1, %v1633_v2  ;;  %1167 = vst.msk [vmem:[%s6782_s3 + $0xc0] sm:$0xff] %vm1142_vm1, %v984_v3  ;;  %v1636_v12 = vadd.f32 %v4069_v8, %v5355_v10  ;;  %v987_v13 = vadd.f32 %v5355_v10, %v986_v9  ;;  %v1627_v14 = vpop.f32.mrb[27].mxu1 }
 0x11a   :  { %3512 = vst.msk [vmem:[%s6782_s3 + $0x2c0] sm:$0xff] %vm1142_vm1, %v1625_v6  ;;  %1170 = vst.msk [vmem:[%s6782_s3 + $0xd8] sm:$0xff] %vm1142_vm1, %v995_v7  ;;  %v1628_v15 = vadd.f32 %v5355_v10, %v1627_v14 }
 0x11b   :  { %3515 = vst.msk [vmem:[%s6782_s3 + $0x2d8] sm:$0xff] %vm1142_vm1, %v1636_v12  ;;  %1168 = vst.msk [vmem:[%s6782_s3 + $0xc8] sm:$0xff] %vm1142_vm1, %v987_v13 }
 0x11c   :  { %3513 = vst.msk [vmem:[%s6782_s3 + $0x2c8] sm:$0xff] %vm1142_vm1, %v1628_v15 }
 0x11d   :  { %v4000_v16 = vpop.f32.mrb[28].mxu0 }
 0x11e   :  { %v1008_v17 = vadd.f32 %v4000_v16, %v5355_v10  ;;  %v4072_v18 = vpop.f32.mrb[28].mxu1  ;;  %v999_v19 = vpop.f32.mrb[29].mxu0 }
 0x11f   :  { %v1649_v20 = vadd.f32 %v4072_v18, %v5355_v10  ;;  %v1000_v21 = vadd.f32 %v5355_v10, %v999_v19  ;;  %v1640_v22 = vpop.f32.mrb[29].mxu1  ;;  %v4001_v23 = vpop.f32.mrb[30].mxu0 }
 0x120   :  { %1173 = vst.msk [vmem:[%s6782_s3 + $0xf0] sm:$0xff] %vm1142_vm1, %v1008_v17  ;;  %v1641_v24 = vadd.f32 %v5355_v10, %v1640_v22  ;;  %v1011_v25 = vadd.f32 %v4001_v23, %v5355_v10  ;;  %v4073_v26 = vpop.f32.mrb[30].mxu1  ;;  %v1002_v27 = vpop.f32.mrb[31].mxu0 }
 0x121   :  { %3518 = vst.msk [vmem:[%s6782_s3 + $0x2f0] sm:$0xff] %vm1142_vm1, %v1649_v20  ;;  %1171 = vst.msk [vmem:[%s6782_s3 + $0xe0] sm:$0xff] %vm1142_vm1, %v1000_v21  ;;  %v1652_v28 = vadd.f32 %v4073_v26, %v5355_v10  ;;  %v1003_v29 = vadd.f32 %v5355_v10, %v1002_v27  ;;  %v1643_v30 = vpop.f32.mrb[31].mxu1 }
 0x122   :  { %3516 = vst.msk [vmem:[%s6782_s3 + $0x2e0] sm:$0xff] %vm1142_vm1, %v1641_v24  ;;  %1174 = vst.msk [vmem:[%s6782_s3 + $0xf8] sm:$0xff] %vm1142_vm1, %v1011_v25  ;;  %v1644_v31 = vadd.f32 %v5355_v10, %v1643_v30 }
 0x123   :  { %3519 = vst.msk [vmem:[%s6782_s3 + $0x2f8] sm:$0xff] %vm1142_vm1, %v1652_v28  ;;  %1172 = vst.msk [vmem:[%s6782_s3 + $0xe8] sm:$0xff] %vm1142_vm1, %v1003_v29 }
 0x124   :  { %3517 = vst.msk [vmem:[%s6782_s3 + $0x2e8] sm:$0xff] %vm1142_vm1, %v1644_v31 }
 0x125   :  { %v4004_v32 = vpop.f32.mrb[32].mxu0 }
 0x126   :  { %v1024_v33 = vadd.f32 %v4004_v32, %v5355_v10  ;;  %v4076_v34 = vpop.f32.mrb[32].mxu1  ;;  %v1015_v35 = vpop.f32.mrb[33].mxu0 }
 0x127   :  { %v1665_v36 = vadd.f32 %v4076_v34, %v5355_v10  ;;  %v1016_v37 = vadd.f32 %v5355_v10, %v1015_v35  ;;  %v1656_v11 = vpop.f32.mrb[33].mxu1  ;;  %v4005_v38 = vpop.f32.mrb[34].mxu0 }
 0x128   :  { %1177 = vst.msk [vmem:[%s6782_s3 + $0x110] sm:$0xff] %vm1142_vm1, %v1024_v33  ;;  %v1657_v39 = vadd.f32 %v5355_v10, %v1656_v11  ;;  %v1027_v40 = vadd.f32 %v4005_v38, %v5355_v10  ;;  %v4077_v41 = vpop.f32.mrb[34].mxu1  ;;  %v1018_v42 = vpop.f32.mrb[35].mxu0 }
 0x129   :  { %3522 = vst.msk [vmem:[%s6782_s3 + $0x310] sm:$0xff] %vm1142_vm1, %v1665_v36  ;;  %1175 = vst.msk [vmem:[%s6782_s3 + $0x100] sm:$0xff] %vm1142_vm1, %v1016_v37  ;;  %v1668_v43 = vadd.f32 %v4077_v41, %v5355_v10  ;;  %v1019_v44 = vadd.f32 %v5355_v10, %v1018_v42  ;;  %v1659_v45 = vpop.f32.mrb[35].mxu1 }
 0x12a   :  { %3520 = vst.msk [vmem:[%s6782_s3 + $0x300] sm:$0xff] %vm1142_vm1, %v1657_v39  ;;  %1178 = vst.msk [vmem:[%s6782_s3 + $0x118] sm:$0xff] %vm1142_vm1, %v1027_v40  ;;  %v1660_v46 = vadd.f32 %v5355_v10, %v1659_v45 }
 0x12b   :  { %3523 = vst.msk [vmem:[%s6782_s3 + $0x318] sm:$0xff] %vm1142_vm1, %v1668_v43  ;;  %1176 = vst.msk [vmem:[%s6782_s3 + $0x108] sm:$0xff] %vm1142_vm1, %v1019_v44 }
 0x12c   :  { %3521 = vst.msk [vmem:[%s6782_s3 + $0x308] sm:$0xff] %vm1142_vm1, %v1660_v46 }
 0x12d   :  { %v4008_v47 = vpop.f32.mrb[36].mxu0 }
 0x12e   :  { %v1040_v48 = vadd.f32 %v4008_v47, %v5355_v10  ;;  %v4080_v49 = vpop.f32.mrb[36].mxu1  ;;  %v1031_v50 = vpop.f32.mrb[37].mxu0 }
 0x12f   :  { %v1681_v51 = vadd.f32 %v4080_v49, %v5355_v10  ;;  %v1032_v52 = vadd.f32 %v5355_v10, %v1031_v50  ;;  %v1672_v53 = vpop.f32.mrb[37].mxu1  ;;  %v4009_v54 = vpop.f32.mrb[38].mxu0 }
 0x130   :  { %1181 = vst.msk [vmem:[%s6782_s3 + $0x130] sm:$0xff] %vm1142_vm1, %v1040_v48  ;;  %v1673_v55 = vadd.f32 %v5355_v10, %v1672_v53  ;;  %v1043_v56 = vadd.f32 %v4009_v54, %v5355_v10  ;;  %v4081_v57 = vpop.f32.mrb[38].mxu1  ;;  %v1034_v58 = vpop.f32.mrb[39].mxu0 }
 0x131   :  { %3526 = vst.msk [vmem:[%s6782_s3 + $0x330] sm:$0xff] %vm1142_vm1, %v1681_v51  ;;  %1179 = vst.msk [vmem:[%s6782_s3 + $0x120] sm:$0xff] %vm1142_vm1, %v1032_v52  ;;  %v1684_v59 = vadd.f32 %v4081_v57, %v5355_v10  ;;  %v1035_v60 = vadd.f32 %v5355_v10, %v1034_v58  ;;  %v1675_v61 = vpop.f32.mrb[39].mxu1 }
 0x132   :  { %3524 = vst.msk [vmem:[%s6782_s3 + $0x320] sm:$0xff] %vm1142_vm1, %v1673_v55  ;;  %1182 = vst.msk [vmem:[%s6782_s3 + $0x138] sm:$0xff] %vm1142_vm1, %v1043_v56  ;;  %v1676_v62 = vadd.f32 %v5355_v10, %v1675_v61 }
 0x133   :  { %3527 = vst.msk [vmem:[%s6782_s3 + $0x338] sm:$0xff] %vm1142_vm1, %v1684_v59  ;;  %1180 = vst.msk [vmem:[%s6782_s3 + $0x128] sm:$0xff] %vm1142_vm1, %v1035_v60 }
 0x134   :  { %3525 = vst.msk [vmem:[%s6782_s3 + $0x328] sm:$0xff] %vm1142_vm1, %v1676_v62 }
 0x135   :  { %v4012_v63 = vpop.f32.mrb[40].mxu0 }
 0x136   :  { %v1056_v0 = vadd.f32 %v4012_v63, %v5355_v10  ;;  %v4084_v1 = vpop.f32.mrb[40].mxu1  ;;  %v1047_v2 = vpop.f32.mrb[41].mxu0 }
 0x137   :  { %v1697_v3 = vadd.f32 %v4084_v1, %v5355_v10  ;;  %v1048_v4 = vadd.f32 %v5355_v10, %v1047_v2  ;;  %v1688_v5 = vpop.f32.mrb[41].mxu1  ;;  %v4013_v6 = vpop.f32.mrb[42].mxu0 }
 0x138   :  { %1185 = vst.msk [vmem:[%s6782_s3 + $0x150] sm:$0xff] %vm1142_vm1, %v1056_v0  ;;  %v1689_v7 = vadd.f32 %v5355_v10, %v1688_v5  ;;  %v1059_v8 = vadd.f32 %v4013_v6, %v5355_v10  ;;  %v4085_v9 = vpop.f32.mrb[42].mxu1  ;;  %v1050_v12 = vpop.f32.mrb[43].mxu0 }
 0x139   :  { %3530 = vst.msk [vmem:[%s6782_s3 + $0x350] sm:$0xff] %vm1142_vm1, %v1697_v3  ;;  %1183 = vst.msk [vmem:[%s6782_s3 + $0x140] sm:$0xff] %vm1142_vm1, %v1048_v4  ;;  %v1700_v13 = vadd.f32 %v4085_v9, %v5355_v10  ;;  %v1051_v14 = vadd.f32 %v5355_v10, %v1050_v12  ;;  %v1691_v15 = vpop.f32.mrb[43].mxu1 }
 0x13a   :  { %3528 = vst.msk [vmem:[%s6782_s3 + $0x340] sm:$0xff] %vm1142_vm1, %v1689_v7  ;;  %1186 = vst.msk [vmem:[%s6782_s3 + $0x158] sm:$0xff] %vm1142_vm1, %v1059_v8  ;;  %v1692_v16 = vadd.f32 %v5355_v10, %v1691_v15 }
 0x13b   :  { %3531 = vst.msk [vmem:[%s6782_s3 + $0x358] sm:$0xff] %vm1142_vm1, %v1700_v13  ;;  %1184 = vst.msk [vmem:[%s6782_s3 + $0x148] sm:$0xff] %vm1142_vm1, %v1051_v14 }
 0x13c   :  { %3529 = vst.msk [vmem:[%s6782_s3 + $0x348] sm:$0xff] %vm1142_vm1, %v1692_v16 }
 0x13d   :  { %v4016_v17 = vpop.f32.mrb[44].mxu0 }
 0x13e   :  { %v1072_v18 = vadd.f32 %v4016_v17, %v5355_v10  ;;  %v4088_v19 = vpop.f32.mrb[44].mxu1  ;;  %v1063_v20 = vpop.f32.mrb[45].mxu0 }
 0x13f   :  { %v1713_v21 = vadd.f32 %v4088_v19, %v5355_v10  ;;  %v1064_v22 = vadd.f32 %v5355_v10, %v1063_v20  ;;  %v1704_v23 = vpop.f32.mrb[45].mxu1  ;;  %v4017_v24 = vpop.f32.mrb[46].mxu0 }
 0x140   :  { %1189 = vst.msk [vmem:[%s6782_s3 + $0x170] sm:$0xff] %vm1142_vm1, %v1072_v18  ;;  %v1705_v25 = vadd.f32 %v5355_v10, %v1704_v23  ;;  %v1075_v26 = vadd.f32 %v4017_v24, %v5355_v10  ;;  %v4089_v27 = vpop.f32.mrb[46].mxu1  ;;  %v1066_v28 = vpop.f32.mrb[47].mxu0 }
 0x141   :  { %3534 = vst.msk [vmem:[%s6782_s3 + $0x370] sm:$0xff] %vm1142_vm1, %v1713_v21  ;;  %1187 = vst.msk [vmem:[%s6782_s3 + $0x160] sm:$0xff] %vm1142_vm1, %v1064_v22  ;;  %v1716_v29 = vadd.f32 %v4089_v27, %v5355_v10  ;;  %v1067_v30 = vadd.f32 %v5355_v10, %v1066_v28  ;;  %v1707_v31 = vpop.f32.mrb[47].mxu1 }
 0x142   :  { %3532 = vst.msk [vmem:[%s6782_s3 + $0x360] sm:$0xff] %vm1142_vm1, %v1705_v25  ;;  %1190 = vst.msk [vmem:[%s6782_s3 + $0x178] sm:$0xff] %vm1142_vm1, %v1075_v26  ;;  %v1708_v32 = vadd.f32 %v5355_v10, %v1707_v31 }
 0x143   :  { %3535 = vst.msk [vmem:[%s6782_s3 + $0x378] sm:$0xff] %vm1142_vm1, %v1716_v29  ;;  %1188 = vst.msk [vmem:[%s6782_s3 + $0x168] sm:$0xff] %vm1142_vm1, %v1067_v30 }
 0x144   :  { %3533 = vst.msk [vmem:[%s6782_s3 + $0x368] sm:$0xff] %vm1142_vm1, %v1708_v32 }
 0x145   :  { %v4020_v33 = vpop.f32.mrb[48].mxu0 }
 0x146   :  { %v1088_v34 = vadd.f32 %v4020_v33, %v5355_v10  ;;  %v4092_v35 = vpop.f32.mrb[48].mxu1  ;;  %v1079_v36 = vpop.f32.mrb[49].mxu0 }
 0x147   :  { %v1729_v37 = vadd.f32 %v4092_v35, %v5355_v10  ;;  %v1080_v11 = vadd.f32 %v5355_v10, %v1079_v36  ;;  %v1720_v38 = vpop.f32.mrb[49].mxu1  ;;  %v4021_v39 = vpop.f32.mrb[50].mxu0 }
 0x148   :  { %1193 = vst.msk [vmem:[%s6782_s3 + $0x190] sm:$0xff] %vm1142_vm1, %v1088_v34  ;;  %v1721_v40 = vadd.f32 %v5355_v10, %v1720_v38  ;;  %v1091_v41 = vadd.f32 %v4021_v39, %v5355_v10  ;;  %v4093_v42 = vpop.f32.mrb[50].mxu1  ;;  %v1082_v43 = vpop.f32.mrb[51].mxu0 }
 0x149   :  { %3538 = vst.msk [vmem:[%s6782_s3 + $0x390] sm:$0xff] %vm1142_vm1, %v1729_v37  ;;  %1191 = vst.msk [vmem:[%s6782_s3 + $0x180] sm:$0xff] %vm1142_vm1, %v1080_v11  ;;  %v1732_v44 = vadd.f32 %v4093_v42, %v5355_v10  ;;  %v1083_v45 = vadd.f32 %v5355_v10, %v1082_v43  ;;  %v1723_v46 = vpop.f32.mrb[51].mxu1 }
 0x14a   :  { %3536 = vst.msk [vmem:[%s6782_s3 + $0x380] sm:$0xff] %vm1142_vm1, %v1721_v40  ;;  %1194 = vst.msk [vmem:[%s6782_s3 + $0x198] sm:$0xff] %vm1142_vm1, %v1091_v41  ;;  %v1724_v47 = vadd.f32 %v5355_v10, %v1723_v46 }
 0x14b   :  { %3539 = vst.msk [vmem:[%s6782_s3 + $0x398] sm:$0xff] %vm1142_vm1, %v1732_v44  ;;  %1192 = vst.msk [vmem:[%s6782_s3 + $0x188] sm:$0xff] %vm1142_vm1, %v1083_v45 }
 0x14c   :  { %3537 = vst.msk [vmem:[%s6782_s3 + $0x388] sm:$0xff] %vm1142_vm1, %v1724_v47 }
 0x14d   :  { %v4024_v48 = vpop.f32.mrb[52].mxu0 }
 0x14e   :  { %v1104_v49 = vadd.f32 %v4024_v48, %v5355_v10  ;;  %v4096_v50 = vpop.f32.mrb[52].mxu1  ;;  %v1095_v51 = vpop.f32.mrb[53].mxu0 }
 0x14f   :  { %v1745_v52 = vadd.f32 %v4096_v50, %v5355_v10  ;;  %v1096_v53 = vadd.f32 %v5355_v10, %v1095_v51  ;;  %v1736_v54 = vpop.f32.mrb[53].mxu1  ;;  %v4025_v55 = vpop.f32.mrb[54].mxu0 }
 0x150   :  { %1197 = vst.msk [vmem:[%s6782_s3 + $0x1b0] sm:$0xff] %vm1142_vm1, %v1104_v49  ;;  %v1737_v56 = vadd.f32 %v5355_v10, %v1736_v54  ;;  %v1107_v57 = vadd.f32 %v4025_v55, %v5355_v10  ;;  %v4097_v58 = vpop.f32.mrb[54].mxu1  ;;  %v1098_v59 = vpop.f32.mrb[55].mxu0 }
 0x151   :  { %3542 = vst.msk [vmem:[%s6782_s3 + $0x3b0] sm:$0xff] %vm1142_vm1, %v1745_v52  ;;  %1195 = vst.msk [vmem:[%s6782_s3 + $0x1a0] sm:$0xff] %vm1142_vm1, %v1096_v53  ;;  %v1748_v60 = vadd.f32 %v4097_v58, %v5355_v10  ;;  %v1099_v61 = vadd.f32 %v5355_v10, %v1098_v59  ;;  %v1739_v62 = vpop.f32.mrb[55].mxu1  ;;  %v6178_v53 = vld [vmem:[%s6781_s2] ss:$0 sm:$0xff] }
 0x152   :  { %3540 = vst.msk [vmem:[%s6782_s3 + $0x3a0] sm:$0xff] %vm1142_vm1, %v1737_v56  ;;  %1198 = vst.msk [vmem:[%s6782_s3 + $0x1b8] sm:$0xff] %vm1142_vm1, %v1107_v57  ;;  %v1740_v63 = vadd.f32 %v5355_v10, %v1739_v62 }
 0x153   :  { %3543 = vst.msk [vmem:[%s6782_s3 + $0x3b8] sm:$0xff] %vm1142_vm1, %v1748_v60  ;;  %1196 = vst.msk [vmem:[%s6782_s3 + $0x1a8] sm:$0xff] %vm1142_vm1, %v1099_v61 }
 0x154   :  { %3541 = vst.msk [vmem:[%s6782_s3 + $0x3a8] sm:$0xff] %vm1142_vm1, %v1740_v63 }
 0x155   :  { %v4028_v0 = vpop.f32.mrb[56].mxu0 }
 0x156   :  { %v1120_v1 = vadd.f32 %v4028_v0, %v5355_v10  ;;  %v4100_v2 = vpop.f32.mrb[56].mxu1  ;;  %v1111_v3 = vpop.f32.mrb[57].mxu0 }
 0x157   :  { %v1761_v4 = vadd.f32 %v4100_v2, %v5355_v10  ;;  %v1112_v5 = vadd.f32 %v5355_v10, %v1111_v3  ;;  %v1752_v6 = vpop.f32.mrb[57].mxu1  ;;  %v4029_v7 = vpop.f32.mrb[58].mxu0 }
 0x158   :  { %1201 = vst.msk [vmem:[%s6782_s3 + $0x1d0] sm:$0xff] %vm1142_vm1, %v1120_v1  ;;  %v1753_v8 = vadd.f32 %v5355_v10, %v1752_v6  ;;  %v1123_v9 = vadd.f32 %v4029_v7, %v5355_v10  ;;  %v4101_v12 = vpop.f32.mrb[58].mxu1  ;;  %v1114_v13 = vpop.f32.mrb[59].mxu0 }
 0x159   :  { %3546 = vst.msk [vmem:[%s6782_s3 + $0x3d0] sm:$0xff] %vm1142_vm1, %v1761_v4  ;;  %1199 = vst.msk [vmem:[%s6782_s3 + $0x1c0] sm:$0xff] %vm1142_vm1, %v1112_v5  ;;  %v1764_v14 = vadd.f32 %v4101_v12, %v5355_v10  ;;  %v1115_v15 = vadd.f32 %v5355_v10, %v1114_v13  ;;  %v1755_v16 = vpop.f32.mrb[59].mxu1 }
 0x15a   :  { %3544 = vst.msk [vmem:[%s6782_s3 + $0x3c0] sm:$0xff] %vm1142_vm1, %v1753_v8  ;;  %1202 = vst.msk [vmem:[%s6782_s3 + $0x1d8] sm:$0xff] %vm1142_vm1, %v1123_v9  ;;  %v1756_v17 = vadd.f32 %v5355_v10, %v1755_v16 }
 0x15b   :  { %3547 = vst.msk [vmem:[%s6782_s3 + $0x3d8] sm:$0xff] %vm1142_vm1, %v1764_v14  ;;  %1200 = vst.msk [vmem:[%s6782_s3 + $0x1c8] sm:$0xff] %vm1142_vm1, %v1115_v15 }
 0x15c   :  { %3545 = vst.msk [vmem:[%s6782_s3 + $0x3c8] sm:$0xff] %vm1142_vm1, %v1756_v17 }
 0x15d   :  { %v4032_v18 = vpop.f32.mrb[60].mxu0 }
 0x15e   :  { %v1136_v19 = vadd.f32 %v4032_v18, %v5355_v10  ;;  %v4104_v20 = vpop.f32.mrb[60].mxu1  ;;  %v1127_v21 = vpop.f32.mrb[61].mxu0 }
 0x15f   :  { %v1777_v22 = vadd.f32 %v4104_v20, %v5355_v10  ;;  %v1128_v23 = vadd.f32 %v5355_v10, %v1127_v21  ;;  %v1768_v24 = vpop.f32.mrb[61].mxu1  ;;  %v4033_v25 = vpop.f32.mrb[62].mxu0 }
 0x160   :  { %1205 = vst.msk [vmem:[%s6782_s3 + $0x1f0] sm:$0xff] %vm1142_vm1, %v1136_v19  ;;  %v1769_v26 = vadd.f32 %v5355_v10, %v1768_v24  ;;  %v1139_v27 = vadd.f32 %v4033_v25, %v5355_v10  ;;  %v4105_v28 = vpop.f32.mrb[62].mxu1  ;;  %v1130_v29 = vpop.f32.mrb[63].mxu0 }
 0x161   :  { %3550 = vst.msk [vmem:[%s6782_s3 + $0x3f0] sm:$0xff] %vm1142_vm1, %v1777_v22  ;;  %1203 = vst.msk [vmem:[%s6782_s3 + $0x1e0] sm:$0xff] %vm1142_vm1, %v1128_v23  ;;  %v1780_v30 = vadd.f32 %v4105_v28, %v5355_v10  ;;  %v1131_v31 = vadd.f32 %v5355_v10, %v1130_v29  ;;  %v1771_v32 = vpop.f32.mrb[63].mxu1 }
 0x162   :  { %3548 = vst.msk [vmem:[%s6782_s3 + $0x3e0] sm:$0xff] %vm1142_vm1, %v1769_v26  ;;  %1206 = vst.msk [vmem:[%s6782_s3 + $0x1f8] sm:$0xff] %vm1142_vm1, %v1139_v27  ;;  %v1772_v33 = vadd.f32 %v5355_v10, %v1771_v32 }
 0x163   :  { %3551 = vst.msk [vmem:[%s6782_s3 + $0x3f8] sm:$0xff] %vm1142_vm1, %v1780_v30  ;;  %1204 = vst.msk [vmem:[%s6782_s3 + $0x1e8] sm:$0xff] %vm1142_vm1, %v1131_v31 }
 0x164   :  { %3549 = vst.msk [vmem:[%s6782_s3 + $0x3e8] sm:$0xff] %vm1142_vm1, %v1772_v33 }
 0x165   :  { %v4116_v34 = vpop.f32.mrb[64].mxu0 }
 0x166   :  { %v2178_v35 = vadd.f32 %v4116_v34, %v5355_v10  ;;  %v4188_v36 = vpop.f32.mrb[64].mxu1  ;;  %v2169_v37 = vpop.f32.mrb[65].mxu0 }
 0x167   :  { %v2819_v11 = vadd.f32 %v4188_v36, %v5355_v10  ;;  %v2170_v38 = vadd.f32 %v5355_v10, %v2169_v37  ;;  %v2810_v39 = vpop.f32.mrb[65].mxu1  ;;  %v4117_v40 = vpop.f32.mrb[66].mxu0 }
 0x168   :  { %3623 = vst.msk [vmem:[%s6782_s3 + $0x410] sm:$0xff] %vm1142_vm1, %v2178_v35  ;;  %v2811_v41 = vadd.f32 %v5355_v10, %v2810_v39  ;;  %v2181_v42 = vadd.f32 %v4117_v40, %v5355_v10  ;;  %v4189_v43 = vpop.f32.mrb[66].mxu1  ;;  %v2172_v44 = vpop.f32.mrb[67].mxu0 }
 0x169   :  { %3756 = vst.msk [vmem:[%s6782_s3 + $0x610] sm:$0xff] %vm1142_vm1, %v2819_v11  ;;  %3621 = vst.msk [vmem:[%s6782_s3 + $0x400] sm:$0xff] %vm1142_vm1, %v2170_v38  ;;  %v2822_v45 = vadd.f32 %v4189_v43, %v5355_v10  ;;  %v2173_v46 = vadd.f32 %v5355_v10, %v2172_v44  ;;  %v2813_v47 = vpop.f32.mrb[67].mxu1 }
 0x16a   :  { %3754 = vst.msk [vmem:[%s6782_s3 + $0x600] sm:$0xff] %vm1142_vm1, %v2811_v41  ;;  %3624 = vst.msk [vmem:[%s6782_s3 + $0x418] sm:$0xff] %vm1142_vm1, %v2181_v42  ;;  %v2814_v48 = vadd.f32 %v5355_v10, %v2813_v47 }
 0x16b   :  { %3757 = vst.msk [vmem:[%s6782_s3 + $0x618] sm:$0xff] %vm1142_vm1, %v2822_v45  ;;  %3622 = vst.msk [vmem:[%s6782_s3 + $0x408] sm:$0xff] %vm1142_vm1, %v2173_v46 }
 0x16c   :  { %3755 = vst.msk [vmem:[%s6782_s3 + $0x608] sm:$0xff] %vm1142_vm1, %v2814_v48 }
 0x16d   :  { %v4120_v49 = vpop.f32.mrb[68].mxu0 }
 0x16e   :  { %v2194_v50 = vadd.f32 %v4120_v49, %v5355_v10  ;;  %v4192_v51 = vpop.f32.mrb[68].mxu1  ;;  %v2185_v52 = vpop.f32.mrb[69].mxu0 }
 0x16f   :  { %v2835_v54 = vadd.f32 %v6178_v53, %v4192_v51  ;;  %v2186_v55 = vadd.f32 %v6178_v53, %v2185_v52  ;;  %v2826_v56 = vpop.f32.mrb[69].mxu1  ;;  %v4121_v57 = vpop.f32.mrb[70].mxu0 }
 0x170   :  { %3627 = vst.msk [vmem:[%s6782_s3 + $0x430] sm:$0xff] %vm1142_vm1, %v2194_v50  ;;  %v2827_v10 = vadd.f32 %v6178_v53, %v2826_v56  ;;  %v2197_v58 = vadd.f32 %v6178_v53, %v4121_v57  ;;  %v4193_v59 = vpop.f32.mrb[70].mxu1  ;;  %v2188_v60 = vpop.f32.mrb[71].mxu0 }
 0x171   :  { %3760 = vst.msk [vmem:[%s6782_s3 + $0x630] sm:$0xff] %vm1142_vm1, %v2835_v54  ;;  %3625 = vst.msk [vmem:[%s6782_s3 + $0x420] sm:$0xff] %vm1142_vm1, %v2186_v55  ;;  %v2838_v61 = vadd.f32 %v6178_v53, %v4193_v59  ;;  %v2189_v62 = vadd.f32 %v6178_v53, %v2188_v60  ;;  %v2829_v63 = vpop.f32.mrb[71].mxu1 }
 0x172   :  { %3758 = vst.msk [vmem:[%s6782_s3 + $0x620] sm:$0xff] %vm1142_vm1, %v2827_v10  ;;  %3628 = vst.msk [vmem:[%s6782_s3 + $0x438] sm:$0xff] %vm1142_vm1, %v2197_v58  ;;  %v2830_v0 = vadd.f32 %v6178_v53, %v2829_v63 }
 0x173   :  { %3761 = vst.msk [vmem:[%s6782_s3 + $0x638] sm:$0xff] %vm1142_vm1, %v2838_v61  ;;  %3626 = vst.msk [vmem:[%s6782_s3 + $0x428] sm:$0xff] %vm1142_vm1, %v2189_v62 }
 0x174   :  { %3759 = vst.msk [vmem:[%s6782_s3 + $0x628] sm:$0xff] %vm1142_vm1, %v2830_v0 }
 0x175   :  { %v4124_v1 = vpop.f32.mrb[72].mxu0 }
 0x176   :  { %v2210_v2 = vadd.f32 %v6178_v53, %v4124_v1  ;;  %v4196_v3 = vpop.f32.mrb[72].mxu1  ;;  %v2201_v4 = vpop.f32.mrb[73].mxu0 }
 0x177   :  { %v2851_v5 = vadd.f32 %v6178_v53, %v4196_v3  ;;  %v2202_v6 = vadd.f32 %v6178_v53, %v2201_v4  ;;  %v2842_v7 = vpop.f32.mrb[73].mxu1  ;;  %v4125_v8 = vpop.f32.mrb[74].mxu0 }
 0x178   :  { %3631 = vst.msk [vmem:[%s6782_s3 + $0x450] sm:$0xff] %vm1142_vm1, %v2210_v2  ;;  %v2843_v9 = vadd.f32 %v6178_v53, %v2842_v7  ;;  %v2213_v12 = vadd.f32 %v6178_v53, %v4125_v8  ;;  %v4197_v13 = vpop.f32.mrb[74].mxu1  ;;  %v2204_v14 = vpop.f32.mrb[75].mxu0 }
 0x179   :  { %3764 = vst.msk [vmem:[%s6782_s3 + $0x650] sm:$0xff] %vm1142_vm1, %v2851_v5  ;;  %3629 = vst.msk [vmem:[%s6782_s3 + $0x440] sm:$0xff] %vm1142_vm1, %v2202_v6  ;;  %v2854_v15 = vadd.f32 %v6178_v53, %v4197_v13  ;;  %v2205_v16 = vadd.f32 %v6178_v53, %v2204_v14  ;;  %v2845_v17 = vpop.f32.mrb[75].mxu1 }
 0x17a   :  { %3762 = vst.msk [vmem:[%s6782_s3 + $0x640] sm:$0xff] %vm1142_vm1, %v2843_v9  ;;  %3632 = vst.msk [vmem:[%s6782_s3 + $0x458] sm:$0xff] %vm1142_vm1, %v2213_v12  ;;  %v2846_v18 = vadd.f32 %v6178_v53, %v2845_v17 }
 0x17b   :  { %3765 = vst.msk [vmem:[%s6782_s3 + $0x658] sm:$0xff] %vm1142_vm1, %v2854_v15  ;;  %3630 = vst.msk [vmem:[%s6782_s3 + $0x448] sm:$0xff] %vm1142_vm1, %v2205_v16 }
 0x17c   :  { %3763 = vst.msk [vmem:[%s6782_s3 + $0x648] sm:$0xff] %vm1142_vm1, %v2846_v18 }
 0x17d   :  { %v4128_v19 = vpop.f32.mrb[76].mxu0 }
 0x17e   :  { %v2226_v20 = vadd.f32 %v6178_v53, %v4128_v19  ;;  %v4200_v21 = vpop.f32.mrb[76].mxu1  ;;  %v2217_v22 = vpop.f32.mrb[77].mxu0 }
 0x17f   :  { %v2867_v23 = vadd.f32 %v6178_v53, %v4200_v21  ;;  %v2218_v24 = vadd.f32 %v6178_v53, %v2217_v22  ;;  %v2858_v25 = vpop.f32.mrb[77].mxu1  ;;  %v4129_v26 = vpop.f32.mrb[78].mxu0 }
 0x180   :  { %3635 = vst.msk [vmem:[%s6782_s3 + $0x470] sm:$0xff] %vm1142_vm1, %v2226_v20  ;;  %v2859_v27 = vadd.f32 %v6178_v53, %v2858_v25  ;;  %v2229_v28 = vadd.f32 %v6178_v53, %v4129_v26  ;;  %v4201_v29 = vpop.f32.mrb[78].mxu1  ;;  %v2220_v30 = vpop.f32.mrb[79].mxu0 }
 0x181   :  { %3768 = vst.msk [vmem:[%s6782_s3 + $0x670] sm:$0xff] %vm1142_vm1, %v2867_v23  ;;  %3633 = vst.msk [vmem:[%s6782_s3 + $0x460] sm:$0xff] %vm1142_vm1, %v2218_v24  ;;  %v2870_v31 = vadd.f32 %v6178_v53, %v4201_v29  ;;  %v2221_v32 = vadd.f32 %v6178_v53, %v2220_v30  ;;  %v2861_v33 = vpop.f32.mrb[79].mxu1 }
 0x182   :  { %3766 = vst.msk [vmem:[%s6782_s3 + $0x660] sm:$0xff] %vm1142_vm1, %v2859_v27  ;;  %3636 = vst.msk [vmem:[%s6782_s3 + $0x478] sm:$0xff] %vm1142_vm1, %v2229_v28  ;;  %v2862_v34 = vadd.f32 %v6178_v53, %v2861_v33 }
 0x183   :  { %3769 = vst.msk [vmem:[%s6782_s3 + $0x678] sm:$0xff] %vm1142_vm1, %v2870_v31  ;;  %3634 = vst.msk [vmem:[%s6782_s3 + $0x468] sm:$0xff] %vm1142_vm1, %v2221_v32 }
 0x184   :  { %3767 = vst.msk [vmem:[%s6782_s3 + $0x668] sm:$0xff] %vm1142_vm1, %v2862_v34 }
 0x185   :  { %v4132_v35 = vpop.f32.mrb[80].mxu0 }
 0x186   :  { %v2242_v36 = vadd.f32 %v6178_v53, %v4132_v35  ;;  %v4204_v37 = vpop.f32.mrb[80].mxu1  ;;  %v2233_v11 = vpop.f32.mrb[81].mxu0 }
 0x187   :  { %v2883_v38 = vadd.f32 %v6178_v53, %v4204_v37  ;;  %v2234_v39 = vadd.f32 %v6178_v53, %v2233_v11  ;;  %v2874_v40 = vpop.f32.mrb[81].mxu1  ;;  %v4133_v41 = vpop.f32.mrb[82].mxu0 }
 0x188   :  { %3639 = vst.msk [vmem:[%s6782_s3 + $0x490] sm:$0xff] %vm1142_vm1, %v2242_v36  ;;  %v2875_v42 = vadd.f32 %v6178_v53, %v2874_v40  ;;  %v2245_v43 = vadd.f32 %v6178_v53, %v4133_v41  ;;  %v4205_v44 = vpop.f32.mrb[82].mxu1  ;;  %v2236_v45 = vpop.f32.mrb[83].mxu0 }
 0x189   :  { %3772 = vst.msk [vmem:[%s6782_s3 + $0x690] sm:$0xff] %vm1142_vm1, %v2883_v38  ;;  %3637 = vst.msk [vmem:[%s6782_s3 + $0x480] sm:$0xff] %vm1142_vm1, %v2234_v39  ;;  %v2886_v46 = vadd.f32 %v6178_v53, %v4205_v44  ;;  %v2237_v47 = vadd.f32 %v6178_v53, %v2236_v45  ;;  %v2877_v48 = vpop.f32.mrb[83].mxu1 }
 0x18a   :  { %3770 = vst.msk [vmem:[%s6782_s3 + $0x680] sm:$0xff] %vm1142_vm1, %v2875_v42  ;;  %3640 = vst.msk [vmem:[%s6782_s3 + $0x498] sm:$0xff] %vm1142_vm1, %v2245_v43  ;;  %v2878_v49 = vadd.f32 %v6178_v53, %v2877_v48 }
 0x18b   :  { %3773 = vst.msk [vmem:[%s6782_s3 + $0x698] sm:$0xff] %vm1142_vm1, %v2886_v46  ;;  %3638 = vst.msk [vmem:[%s6782_s3 + $0x488] sm:$0xff] %vm1142_vm1, %v2237_v47 }
 0x18c   :  { %3771 = vst.msk [vmem:[%s6782_s3 + $0x688] sm:$0xff] %vm1142_vm1, %v2878_v49 }
 0x18d   :  { %v4136_v50 = vpop.f32.mrb[84].mxu0 }
 0x18e   :  { %v2258_v51 = vadd.f32 %v6178_v53, %v4136_v50  ;;  %v4208_v52 = vpop.f32.mrb[84].mxu1  ;;  %v2249_v54 = vpop.f32.mrb[85].mxu0 }
 0x18f   :  { %v2899_v55 = vadd.f32 %v6178_v53, %v4208_v52  ;;  %v2250_v56 = vadd.f32 %v6178_v53, %v2249_v54  ;;  %v2890_v57 = vpop.f32.mrb[85].mxu1  ;;  %v4137_v10 = vpop.f32.mrb[86].mxu0 }
 0x190   :  { %3643 = vst.msk [vmem:[%s6782_s3 + $0x4b0] sm:$0xff] %vm1142_vm1, %v2258_v51  ;;  %v2891_v58 = vadd.f32 %v6178_v53, %v2890_v57  ;;  %v2261_v59 = vadd.f32 %v6178_v53, %v4137_v10  ;;  %v4209_v60 = vpop.f32.mrb[86].mxu1  ;;  %v2252_v61 = vpop.f32.mrb[87].mxu0 }
 0x191   :  { %3776 = vst.msk [vmem:[%s6782_s3 + $0x6b0] sm:$0xff] %vm1142_vm1, %v2899_v55  ;;  %3641 = vst.msk [vmem:[%s6782_s3 + $0x4a0] sm:$0xff] %vm1142_vm1, %v2250_v56  ;;  %v2902_v62 = vadd.f32 %v6178_v53, %v4209_v60  ;;  %v2253_v63 = vadd.f32 %v6178_v53, %v2252_v61  ;;  %v2893_v0 = vpop.f32.mrb[87].mxu1 }
 0x192   :  { %3774 = vst.msk [vmem:[%s6782_s3 + $0x6a0] sm:$0xff] %vm1142_vm1, %v2891_v58  ;;  %3644 = vst.msk [vmem:[%s6782_s3 + $0x4b8] sm:$0xff] %vm1142_vm1, %v2261_v59  ;;  %v2894_v1 = vadd.f32 %v6178_v53, %v2893_v0 }
 0x193   :  { %3777 = vst.msk [vmem:[%s6782_s3 + $0x6b8] sm:$0xff] %vm1142_vm1, %v2902_v62  ;;  %3642 = vst.msk [vmem:[%s6782_s3 + $0x4a8] sm:$0xff] %vm1142_vm1, %v2253_v63 }
 0x194   :  { %3775 = vst.msk [vmem:[%s6782_s3 + $0x6a8] sm:$0xff] %vm1142_vm1, %v2894_v1 }
 0x195   :  { %v4140_v2 = vpop.f32.mrb[88].mxu0 }
 0x196   :  { %v2274_v3 = vadd.f32 %v6178_v53, %v4140_v2  ;;  %v4212_v4 = vpop.f32.mrb[88].mxu1  ;;  %v2265_v5 = vpop.f32.mrb[89].mxu0 }
 0x197   :  { %v2915_v6 = vadd.f32 %v6178_v53, %v4212_v4  ;;  %v2266_v7 = vadd.f32 %v6178_v53, %v2265_v5  ;;  %v2906_v8 = vpop.f32.mrb[89].mxu1  ;;  %v4141_v9 = vpop.f32.mrb[90].mxu0 }
 0x198   :  { %3647 = vst.msk [vmem:[%s6782_s3 + $0x4d0] sm:$0xff] %vm1142_vm1, %v2274_v3  ;;  %v2907_v12 = vadd.f32 %v6178_v53, %v2906_v8  ;;  %v2277_v13 = vadd.f32 %v6178_v53, %v4141_v9  ;;  %v4213_v14 = vpop.f32.mrb[90].mxu1  ;;  %v2268_v15 = vpop.f32.mrb[91].mxu0 }
 0x199   :  { %3780 = vst.msk [vmem:[%s6782_s3 + $0x6d0] sm:$0xff] %vm1142_vm1, %v2915_v6  ;;  %3645 = vst.msk [vmem:[%s6782_s3 + $0x4c0] sm:$0xff] %vm1142_vm1, %v2266_v7  ;;  %v2918_v16 = vadd.f32 %v6178_v53, %v4213_v14  ;;  %v2269_v17 = vadd.f32 %v6178_v53, %v2268_v15  ;;  %v2909_v18 = vpop.f32.mrb[91].mxu1 }
 0x19a   :  { %3778 = vst.msk [vmem:[%s6782_s3 + $0x6c0] sm:$0xff] %vm1142_vm1, %v2907_v12  ;;  %3648 = vst.msk [vmem:[%s6782_s3 + $0x4d8] sm:$0xff] %vm1142_vm1, %v2277_v13  ;;  %v2910_v19 = vadd.f32 %v6178_v53, %v2909_v18 }
 0x19b   :  { %3781 = vst.msk [vmem:[%s6782_s3 + $0x6d8] sm:$0xff] %vm1142_vm1, %v2918_v16  ;;  %3646 = vst.msk [vmem:[%s6782_s3 + $0x4c8] sm:$0xff] %vm1142_vm1, %v2269_v17 }
 0x19c   :  { %3779 = vst.msk [vmem:[%s6782_s3 + $0x6c8] sm:$0xff] %vm1142_vm1, %v2910_v19 }
 0x19d   :  { %v4144_v20 = vpop.f32.mrb[92].mxu0 }
 0x19e   :  { %v2290_v21 = vadd.f32 %v6178_v53, %v4144_v20  ;;  %v4216_v22 = vpop.f32.mrb[92].mxu1  ;;  %v2281_v23 = vpop.f32.mrb[93].mxu0 }
 0x19f   :  { %v2931_v24 = vadd.f32 %v6178_v53, %v4216_v22  ;;  %v2282_v25 = vadd.f32 %v6178_v53, %v2281_v23  ;;  %v2922_v26 = vpop.f32.mrb[93].mxu1  ;;  %v4145_v27 = vpop.f32.mrb[94].mxu0 }
 0x1a0   :  { %3651 = vst.msk [vmem:[%s6782_s3 + $0x4f0] sm:$0xff] %vm1142_vm1, %v2290_v21  ;;  %v2923_v28 = vadd.f32 %v6178_v53, %v2922_v26  ;;  %v2293_v29 = vadd.f32 %v6178_v53, %v4145_v27  ;;  %v4217_v30 = vpop.f32.mrb[94].mxu1  ;;  %v2284_v31 = vpop.f32.mrb[95].mxu0 }
 0x1a1   :  { %3784 = vst.msk [vmem:[%s6782_s3 + $0x6f0] sm:$0xff] %vm1142_vm1, %v2931_v24  ;;  %3649 = vst.msk [vmem:[%s6782_s3 + $0x4e0] sm:$0xff] %vm1142_vm1, %v2282_v25  ;;  %v2934_v32 = vadd.f32 %v6178_v53, %v4217_v30  ;;  %v2285_v33 = vadd.f32 %v6178_v53, %v2284_v31  ;;  %v2925_v34 = vpop.f32.mrb[95].mxu1 }
 0x1a2   :  { %3782 = vst.msk [vmem:[%s6782_s3 + $0x6e0] sm:$0xff] %vm1142_vm1, %v2923_v28  ;;  %3652 = vst.msk [vmem:[%s6782_s3 + $0x4f8] sm:$0xff] %vm1142_vm1, %v2293_v29  ;;  %v2926_v35 = vadd.f32 %v6178_v53, %v2925_v34 }
 0x1a3   :  { %3785 = vst.msk [vmem:[%s6782_s3 + $0x6f8] sm:$0xff] %vm1142_vm1, %v2934_v32  ;;  %3650 = vst.msk [vmem:[%s6782_s3 + $0x4e8] sm:$0xff] %vm1142_vm1, %v2285_v33 }
 0x1a4   :  { %3783 = vst.msk [vmem:[%s6782_s3 + $0x6e8] sm:$0xff] %vm1142_vm1, %v2926_v35 }
 0x1a5   :  { %v4148_v36 = vpop.f32.mrb[96].mxu0 }
 0x1a6   :  { %v2306_v37 = vadd.f32 %v6178_v53, %v4148_v36  ;;  %v4220_v11 = vpop.f32.mrb[96].mxu1  ;;  %v2297_v38 = vpop.f32.mrb[97].mxu0 }
 0x1a7   :  { %v2947_v39 = vadd.f32 %v6178_v53, %v4220_v11  ;;  %v2298_v40 = vadd.f32 %v6178_v53, %v2297_v38  ;;  %v2938_v41 = vpop.f32.mrb[97].mxu1  ;;  %v4149_v42 = vpop.f32.mrb[98].mxu0 }
 0x1a8   :  { %3655 = vst.msk [vmem:[%s6782_s3 + $0x510] sm:$0xff] %vm1142_vm1, %v2306_v37  ;;  %v2939_v43 = vadd.f32 %v6178_v53, %v2938_v41  ;;  %v2309_v44 = vadd.f32 %v6178_v53, %v4149_v42  ;;  %v4221_v45 = vpop.f32.mrb[98].mxu1  ;;  %v2300_v46 = vpop.f32.mrb[99].mxu0 }
 0x1a9   :  { %3788 = vst.msk [vmem:[%s6782_s3 + $0x710] sm:$0xff] %vm1142_vm1, %v2947_v39  ;;  %3653 = vst.msk [vmem:[%s6782_s3 + $0x500] sm:$0xff] %vm1142_vm1, %v2298_v40  ;;  %v2950_v47 = vadd.f32 %v6178_v53, %v4221_v45  ;;  %v2301_v48 = vadd.f32 %v6178_v53, %v2300_v46  ;;  %v2941_v49 = vpop.f32.mrb[99].mxu1 }
 0x1aa   :  { %3786 = vst.msk [vmem:[%s6782_s3 + $0x700] sm:$0xff] %vm1142_vm1, %v2939_v43  ;;  %3656 = vst.msk [vmem:[%s6782_s3 + $0x518] sm:$0xff] %vm1142_vm1, %v2309_v44  ;;  %v2942_v50 = vadd.f32 %v6178_v53, %v2941_v49 }
 0x1ab   :  { %3789 = vst.msk [vmem:[%s6782_s3 + $0x718] sm:$0xff] %vm1142_vm1, %v2950_v47  ;;  %3654 = vst.msk [vmem:[%s6782_s3 + $0x508] sm:$0xff] %vm1142_vm1, %v2301_v48 }
 0x1ac   :  { %3787 = vst.msk [vmem:[%s6782_s3 + $0x708] sm:$0xff] %vm1142_vm1, %v2942_v50 }
 0x1ad   :  { %v4152_v51 = vpop.f32.mrb[100].mxu0 }
 0x1ae   :  { %v2322_v52 = vadd.f32 %v6178_v53, %v4152_v51  ;;  %v4224_v54 = vpop.f32.mrb[100].mxu1  ;;  %v2313_v55 = vpop.f32.mrb[101].mxu0 }
 0x1af   :  { %v2963_v56 = vadd.f32 %v6178_v53, %v4224_v54  ;;  %v2314_v57 = vadd.f32 %v6178_v53, %v2313_v55  ;;  %v2954_v10 = vpop.f32.mrb[101].mxu1  ;;  %v4153_v58 = vpop.f32.mrb[102].mxu0 }
 0x1b0   :  { %3659 = vst.msk [vmem:[%s6782_s3 + $0x530] sm:$0xff] %vm1142_vm1, %v2322_v52  ;;  %v2955_v59 = vadd.f32 %v6178_v53, %v2954_v10  ;;  %v2325_v60 = vadd.f32 %v6178_v53, %v4153_v58  ;;  %v4225_v61 = vpop.f32.mrb[102].mxu1  ;;  %v2316_v62 = vpop.f32.mrb[103].mxu0 }
 0x1b1   :  { %3792 = vst.msk [vmem:[%s6782_s3 + $0x730] sm:$0xff] %vm1142_vm1, %v2963_v56  ;;  %3657 = vst.msk [vmem:[%s6782_s3 + $0x520] sm:$0xff] %vm1142_vm1, %v2314_v57  ;;  %v2966_v63 = vadd.f32 %v6178_v53, %v4225_v61  ;;  %v2317_v0 = vadd.f32 %v6178_v53, %v2316_v62  ;;  %v2957_v1 = vpop.f32.mrb[103].mxu1 }
 0x1b2   :  { %3790 = vst.msk [vmem:[%s6782_s3 + $0x720] sm:$0xff] %vm1142_vm1, %v2955_v59  ;;  %3660 = vst.msk [vmem:[%s6782_s3 + $0x538] sm:$0xff] %vm1142_vm1, %v2325_v60  ;;  %v2958_v2 = vadd.f32 %v6178_v53, %v2957_v1 }
 0x1b3   :  { %3793 = vst.msk [vmem:[%s6782_s3 + $0x738] sm:$0xff] %vm1142_vm1, %v2966_v63  ;;  %3658 = vst.msk [vmem:[%s6782_s3 + $0x528] sm:$0xff] %vm1142_vm1, %v2317_v0 }
 0x1b4   :  { %3791 = vst.msk [vmem:[%s6782_s3 + $0x728] sm:$0xff] %vm1142_vm1, %v2958_v2 }
 0x1b5   :  { %v4156_v3 = vpop.f32.mrb[104].mxu0 }
 0x1b6   :  { %v2338_v4 = vadd.f32 %v6178_v53, %v4156_v3  ;;  %v4228_v5 = vpop.f32.mrb[104].mxu1  ;;  %v2329_v6 = vpop.f32.mrb[105].mxu0 }
 0x1b7   :  { %v2979_v7 = vadd.f32 %v6178_v53, %v4228_v5  ;;  %v2330_v8 = vadd.f32 %v6178_v53, %v2329_v6  ;;  %v2970_v9 = vpop.f32.mrb[105].mxu1  ;;  %v4157_v12 = vpop.f32.mrb[106].mxu0 }
 0x1b8   :  { %3663 = vst.msk [vmem:[%s6782_s3 + $0x550] sm:$0xff] %vm1142_vm1, %v2338_v4  ;;  %v2971_v13 = vadd.f32 %v6178_v53, %v2970_v9  ;;  %v2341_v14 = vadd.f32 %v6178_v53, %v4157_v12  ;;  %v4229_v15 = vpop.f32.mrb[106].mxu1  ;;  %v2332_v16 = vpop.f32.mrb[107].mxu0 }
 0x1b9   :  { %3796 = vst.msk [vmem:[%s6782_s3 + $0x750] sm:$0xff] %vm1142_vm1, %v2979_v7  ;;  %3661 = vst.msk [vmem:[%s6782_s3 + $0x540] sm:$0xff] %vm1142_vm1, %v2330_v8  ;;  %v2982_v17 = vadd.f32 %v6178_v53, %v4229_v15  ;;  %v2333_v18 = vadd.f32 %v6178_v53, %v2332_v16  ;;  %v2973_v19 = vpop.f32.mrb[107].mxu1 }
 0x1ba   :  { %3794 = vst.msk [vmem:[%s6782_s3 + $0x740] sm:$0xff] %vm1142_vm1, %v2971_v13  ;;  %3664 = vst.msk [vmem:[%s6782_s3 + $0x558] sm:$0xff] %vm1142_vm1, %v2341_v14  ;;  %v2974_v20 = vadd.f32 %v6178_v53, %v2973_v19 }
 0x1bb   :  { %3797 = vst.msk [vmem:[%s6782_s3 + $0x758] sm:$0xff] %vm1142_vm1, %v2982_v17  ;;  %3662 = vst.msk [vmem:[%s6782_s3 + $0x548] sm:$0xff] %vm1142_vm1, %v2333_v18 }
 0x1bc   :  { %3795 = vst.msk [vmem:[%s6782_s3 + $0x748] sm:$0xff] %vm1142_vm1, %v2974_v20 }
 0x1bd   :  { %v4160_v21 = vpop.f32.mrb[108].mxu0 }
 0x1be   :  { %v2354_v22 = vadd.f32 %v6178_v53, %v4160_v21  ;;  %v4232_v23 = vpop.f32.mrb[108].mxu1  ;;  %v2345_v24 = vpop.f32.mrb[109].mxu0 }
 0x1bf   :  { %v2995_v25 = vadd.f32 %v6178_v53, %v4232_v23  ;;  %v2346_v26 = vadd.f32 %v6178_v53, %v2345_v24  ;;  %v2986_v27 = vpop.f32.mrb[109].mxu1  ;;  %v4161_v28 = vpop.f32.mrb[110].mxu0 }
 0x1c0   :  { %3667 = vst.msk [vmem:[%s6782_s3 + $0x570] sm:$0xff] %vm1142_vm1, %v2354_v22  ;;  %v2987_v29 = vadd.f32 %v6178_v53, %v2986_v27  ;;  %v2357_v30 = vadd.f32 %v6178_v53, %v4161_v28  ;;  %v4233_v31 = vpop.f32.mrb[110].mxu1  ;;  %v2348_v32 = vpop.f32.mrb[111].mxu0 }
 0x1c1   :  { %3800 = vst.msk [vmem:[%s6782_s3 + $0x770] sm:$0xff] %vm1142_vm1, %v2995_v25  ;;  %3665 = vst.msk [vmem:[%s6782_s3 + $0x560] sm:$0xff] %vm1142_vm1, %v2346_v26  ;;  %v2998_v33 = vadd.f32 %v6178_v53, %v4233_v31  ;;  %v2349_v34 = vadd.f32 %v6178_v53, %v2348_v32  ;;  %v2989_v35 = vpop.f32.mrb[111].mxu1 }
 0x1c2   :  { %3798 = vst.msk [vmem:[%s6782_s3 + $0x760] sm:$0xff] %vm1142_vm1, %v2987_v29  ;;  %3668 = vst.msk [vmem:[%s6782_s3 + $0x578] sm:$0xff] %vm1142_vm1, %v2357_v30  ;;  %v2990_v36 = vadd.f32 %v6178_v53, %v2989_v35 }
 0x1c3   :  { %3801 = vst.msk [vmem:[%s6782_s3 + $0x778] sm:$0xff] %vm1142_vm1, %v2998_v33  ;;  %3666 = vst.msk [vmem:[%s6782_s3 + $0x568] sm:$0xff] %vm1142_vm1, %v2349_v34 }
 0x1c4   :  { %3799 = vst.msk [vmem:[%s6782_s3 + $0x768] sm:$0xff] %vm1142_vm1, %v2990_v36 }
 0x1c5   :  { %v4164_v37 = vpop.f32.mrb[112].mxu0 }
 0x1c6   :  { %v2370_v11 = vadd.f32 %v6178_v53, %v4164_v37  ;;  %v4236_v38 = vpop.f32.mrb[112].mxu1  ;;  %v2361_v39 = vpop.f32.mrb[113].mxu0 }
 0x1c7   :  { %v3011_v40 = vadd.f32 %v6178_v53, %v4236_v38  ;;  %v2362_v41 = vadd.f32 %v6178_v53, %v2361_v39  ;;  %v3002_v42 = vpop.f32.mrb[113].mxu1  ;;  %v4165_v43 = vpop.f32.mrb[114].mxu0 }
 0x1c8   :  { %3671 = vst.msk [vmem:[%s6782_s3 + $0x590] sm:$0xff] %vm1142_vm1, %v2370_v11  ;;  %v3003_v44 = vadd.f32 %v6178_v53, %v3002_v42  ;;  %v2373_v45 = vadd.f32 %v6178_v53, %v4165_v43  ;;  %v4237_v46 = vpop.f32.mrb[114].mxu1  ;;  %v2364_v47 = vpop.f32.mrb[115].mxu0 }
 0x1c9   :  { %3804 = vst.msk [vmem:[%s6782_s3 + $0x790] sm:$0xff] %vm1142_vm1, %v3011_v40  ;;  %3669 = vst.msk [vmem:[%s6782_s3 + $0x580] sm:$0xff] %vm1142_vm1, %v2362_v41  ;;  %v3014_v48 = vadd.f32 %v6178_v53, %v4237_v46  ;;  %v2365_v49 = vadd.f32 %v6178_v53, %v2364_v47  ;;  %v3005_v50 = vpop.f32.mrb[115].mxu1 }
 0x1ca   :  { %3802 = vst.msk [vmem:[%s6782_s3 + $0x780] sm:$0xff] %vm1142_vm1, %v3003_v44  ;;  %3672 = vst.msk [vmem:[%s6782_s3 + $0x598] sm:$0xff] %vm1142_vm1, %v2373_v45  ;;  %v3006_v51 = vadd.f32 %v6178_v53, %v3005_v50 }
 0x1cb   :  { %3805 = vst.msk [vmem:[%s6782_s3 + $0x798] sm:$0xff] %vm1142_vm1, %v3014_v48  ;;  %3670 = vst.msk [vmem:[%s6782_s3 + $0x588] sm:$0xff] %vm1142_vm1, %v2365_v49 }
 0x1cc   :  { %3803 = vst.msk [vmem:[%s6782_s3 + $0x788] sm:$0xff] %vm1142_vm1, %v3006_v51 }
 0x1cd   :  { %v4168_v52 = vpop.f32.mrb[116].mxu0 }
 0x1ce   :  { %v2386_v54 = vadd.f32 %v6178_v53, %v4168_v52  ;;  %v4240_v55 = vpop.f32.mrb[116].mxu1  ;;  %v2377_v56 = vpop.f32.mrb[117].mxu0 }
 0x1cf   :  { %v3027_v57 = vadd.f32 %v6178_v53, %v4240_v55  ;;  %v2378_v10 = vadd.f32 %v6178_v53, %v2377_v56  ;;  %v3018_v58 = vpop.f32.mrb[117].mxu1  ;;  %v4169_v59 = vpop.f32.mrb[118].mxu0 }
 0x1d0   :  { %3675 = vst.msk [vmem:[%s6782_s3 + $0x5b0] sm:$0xff] %vm1142_vm1, %v2386_v54  ;;  %v3019_v60 = vadd.f32 %v6178_v53, %v3018_v58  ;;  %v2389_v61 = vadd.f32 %v6178_v53, %v4169_v59  ;;  %v4241_v62 = vpop.f32.mrb[118].mxu1  ;;  %v2380_v63 = vpop.f32.mrb[119].mxu0 }
 0x1d1   :  { %3808 = vst.msk [vmem:[%s6782_s3 + $0x7b0] sm:$0xff] %vm1142_vm1, %v3027_v57  ;;  %3673 = vst.msk [vmem:[%s6782_s3 + $0x5a0] sm:$0xff] %vm1142_vm1, %v2378_v10  ;;  %v3030_v0 = vadd.f32 %v6178_v53, %v4241_v62  ;;  %v2381_v1 = vadd.f32 %v6178_v53, %v2380_v63  ;;  %v3021_v2 = vpop.f32.mrb[119].mxu1 }
 0x1d2   :  { %3806 = vst.msk [vmem:[%s6782_s3 + $0x7a0] sm:$0xff] %vm1142_vm1, %v3019_v60  ;;  %3676 = vst.msk [vmem:[%s6782_s3 + $0x5b8] sm:$0xff] %vm1142_vm1, %v2389_v61  ;;  %v3022_v3 = vadd.f32 %v6178_v53, %v3021_v2 }
 0x1d3   :  { %3809 = vst.msk [vmem:[%s6782_s3 + $0x7b8] sm:$0xff] %vm1142_vm1, %v3030_v0  ;;  %3674 = vst.msk [vmem:[%s6782_s3 + $0x5a8] sm:$0xff] %vm1142_vm1, %v2381_v1 }
 0x1d4   :  { %3807 = vst.msk [vmem:[%s6782_s3 + $0x7a8] sm:$0xff] %vm1142_vm1, %v3022_v3 }
 0x1d5   :  { %v4172_v4 = vpop.f32.mrb[120].mxu0 }
 0x1d6   :  { %v2402_v5 = vadd.f32 %v6178_v53, %v4172_v4  ;;  %v4244_v6 = vpop.f32.mrb[120].mxu1  ;;  %v2393_v7 = vpop.f32.mrb[121].mxu0 }
 0x1d7   :  { %v3043_v8 = vadd.f32 %v6178_v53, %v4244_v6  ;;  %v2394_v9 = vadd.f32 %v6178_v53, %v2393_v7  ;;  %v3034_v12 = vpop.f32.mrb[121].mxu1  ;;  %v4173_v13 = vpop.f32.mrb[122].mxu0 }
 0x1d8   :  { %3679 = vst.msk [vmem:[%s6782_s3 + $0x5d0] sm:$0xff] %vm1142_vm1, %v2402_v5  ;;  %v3035_v14 = vadd.f32 %v6178_v53, %v3034_v12  ;;  %v2405_v15 = vadd.f32 %v6178_v53, %v4173_v13  ;;  %v4245_v16 = vpop.f32.mrb[122].mxu1  ;;  %v2396_v17 = vpop.f32.mrb[123].mxu0 }
 0x1d9   :  { %3812 = vst.msk [vmem:[%s6782_s3 + $0x7d0] sm:$0xff] %vm1142_vm1, %v3043_v8  ;;  %3677 = vst.msk [vmem:[%s6782_s3 + $0x5c0] sm:$0xff] %vm1142_vm1, %v2394_v9  ;;  %v3046_v18 = vadd.f32 %v6178_v53, %v4245_v16  ;;  %v2397_v19 = vadd.f32 %v6178_v53, %v2396_v17  ;;  %v3037_v20 = vpop.f32.mrb[123].mxu1 }
 0x1da   :  { %3810 = vst.msk [vmem:[%s6782_s3 + $0x7c0] sm:$0xff] %vm1142_vm1, %v3035_v14  ;;  %3680 = vst.msk [vmem:[%s6782_s3 + $0x5d8] sm:$0xff] %vm1142_vm1, %v2405_v15  ;;  %v3038_v21 = vadd.f32 %v6178_v53, %v3037_v20 }
 0x1db   :  { %3813 = vst.msk [vmem:[%s6782_s3 + $0x7d8] sm:$0xff] %vm1142_vm1, %v3046_v18  ;;  %3678 = vst.msk [vmem:[%s6782_s3 + $0x5c8] sm:$0xff] %vm1142_vm1, %v2397_v19 }
 0x1dc   :  { %3811 = vst.msk [vmem:[%s6782_s3 + $0x7c8] sm:$0xff] %vm1142_vm1, %v3038_v21 }
 0x1dd   :  { %v4176_v22 = vpop.f32.mrb[124].mxu0 }
 0x1de   :  { %v2418_v23 = vadd.f32 %v6178_v53, %v4176_v22  ;;  %v4248_v24 = vpop.f32.mrb[124].mxu1  ;;  %v2409_v25 = vpop.f32.mrb[125].mxu0 }
 0x1df   :  { %v3059_v26 = vadd.f32 %v6178_v53, %v4248_v24  ;;  %v2410_v27 = vadd.f32 %v6178_v53, %v2409_v25  ;;  %v3050_v28 = vpop.f32.mrb[125].mxu1  ;;  %v4177_v29 = vpop.f32.mrb[126].mxu0 }
 0x1e0   :  { %3683 = vst.msk [vmem:[%s6782_s3 + $0x5f0] sm:$0xff] %vm1142_vm1, %v2418_v23  ;;  %v3051_v30 = vadd.f32 %v6178_v53, %v3050_v28  ;;  %v2421_v31 = vadd.f32 %v6178_v53, %v4177_v29  ;;  %v4249_v32 = vpop.f32.mrb[126].mxu1  ;;  %v2412_v33 = vpop.f32.mrb[127].mxu0 }
 0x1e1   :  { %3816 = vst.msk [vmem:[%s6782_s3 + $0x7f0] sm:$0xff] %vm1142_vm1, %v3059_v26  ;;  %3681 = vst.msk [vmem:[%s6782_s3 + $0x5e0] sm:$0xff] %vm1142_vm1, %v2410_v27  ;;  %v3062_v34 = vadd.f32 %v6178_v53, %v4249_v32  ;;  %v2413_v35 = vadd.f32 %v6178_v53, %v2412_v33  ;;  %v3053_v36 = vpop.f32.mrb[127].mxu1 }
 0x1e2   :  { %3814 = vst.msk [vmem:[%s6782_s3 + $0x7e0] sm:$0xff] %vm1142_vm1, %v3051_v30  ;;  %3684 = vst.msk [vmem:[%s6782_s3 + $0x5f8] sm:$0xff] %vm1142_vm1, %v2421_v31  ;;  %v3054_v37 = vadd.f32 %v6178_v53, %v3053_v36 }
 0x1e3   :  { %3817 = vst.msk [vmem:[%s6782_s3 + $0x7f8] sm:$0xff] %vm1142_vm1, %v3062_v34  ;;  %3682 = vst.msk [vmem:[%s6782_s3 + $0x5e8] sm:$0xff] %vm1142_vm1, %v2413_v35 }
 0x1e4   :  { %3815 = vst.msk [vmem:[%s6782_s3 + $0x7e8] sm:$0xff] %vm1142_vm1, %v3054_v37 }

</bundles_post_ra>
